<compile_context>
chip_gen: v6e
topology: v6e:2x2x1
jax: 0.10.0
libtpu: 0.0.40
codegen_flags: <defaults>
</compile_context>

<pallas_src>
import functools

import numpy as np
import jax
import jax.numpy as jnp
from jax.experimental import pallas as pl
from jax.experimental.pallas import tpu as pltpu


# ---------------------------------------------------------------------------
# Architecture / AttEncoderModule constants (static, not traced)
# ---------------------------------------------------------------------------
IMG_FM, ENC_DIM, N_ATTRS, N_CLASSES = 3, 16, 1, 2
CLS_CONV_DIM = 8
ATTACK_INDICES = (0,)          # BDD attrib_flags -> ['Daytime'] -> index 0
THRES_INT = 0.5
EPS = 1.0

H0 = W0 = 16                   # toy input resolution

F_IN = H0 * W0 * IMG_FM        # 768  (multiple of 128 -> lane aligned)
F_DEC2 = H0 * W0 * IMG_FM      # 768  (dec2 / recon flat width, NCHW order)
F_LOGIT = 128                  # N_CLASSES padded to one lane tile

_VMEM_LIMIT = 32 * 1024 * 1024  # ~12.6 MiB actually needed; < v7x 64 MiB phys.


def _round_up(x, m):
    return (x + m - 1) // m * m


# ---------------------------------------------------------------------------
# One-time (numpy, outside jit) dense spatial unrolling of conv / deconv
# ---------------------------------------------------------------------------
def _feat_idx(order, h, w, c, H, W, C):
    """Flat feature indices for spatial position (h, w) and channel array c."""
    if order == "nhwc":
        return (h * W + w) * C + c
    return c * (H * W) + (h * W + w)          # "nchw"


def _expand_bias(bias, OH, OW, out_order):
    b = np.asarray(bias, np.float32)
    return np.tile(b, OH * OW) if out_order == "nhwc" else np.repeat(b, OH * OW)


def _conv_dense(w_flat, bias, cin, cout, H, W, k, s, p, in_order, out_order):
    """Unroll Conv2d(k,s,p) over a fixed HxW grid: out_flat = in_flat @ D + b.

    w_flat is tap-major im2col layout ((i*k + j)*cin + ci, co)."""
    OH = (H + 2 * p - k) // s + 1
    OW = (W + 2 * p - k) // s + 1
    w = np.asarray(w_flat, np.float32).reshape(k, k, cin, cout)
    D = np.zeros((H * W * cin, OH * OW * cout), np.float32)
    ci, co = np.arange(cin), np.arange(cout)
    for oh in range(OH):
        for ow in range(OW):
            oc = _feat_idx(out_order, oh, ow, co, OH, OW, cout)
            for i in range(k):
                for j in range(k):
                    h, ww = s * oh + i - p, s * ow + j - p
                    if 0 <= h < H and 0 <= ww < W:
                        ic = _feat_idx(in_order, h, ww, ci, H, W, cin)
                        D[np.ix_(ic, oc)] += w[i, j]
    return D, _expand_bias(bias, OH, OW, out_order)


def _deconv_dense(w_flat, bias, cin, cout, H, W, k, s, p, in_order, out_order):
    """Unroll ConvTranspose2d(k,s,p) (adjoint of conv: oh = s*ih + i - p)."""
    OH, OW = s * H, s * W                     # (H-1)*s - 2p + k == 2H for k=4,s=2,p=1
    w = np.asarray(w_flat, np.float32).reshape(k, k, cin, cout)
    D = np.zeros((H * W * cin, OH * OW * cout), np.float32)
    ci, co = np.arange(cin), np.arange(cout)
    for ih in range(H):
        for iw in range(W):
            ic = _feat_idx(in_order, ih, iw, ci, H, W, cin)
            for i in range(k):
                for j in range(k):
                    oh, ow = s * ih + i - p, s * iw + j - p
                    if 0 <= oh < OH and 0 <= ow < OW:
                        oc = _feat_idx(out_order, oh, ow, co, OH, OW, cout)
                        D[np.ix_(ic, oc)] += w[i, j]
    return D, _expand_bias(bias, OH, OW, out_order)


def _as_layer(D, b):
    """Pad out-features to a multiple of 128 and cast the weight to bf16 ONCE."""
    K, N = D.shape
    assert K % 128 == 0, "flattened in-features must stay lane aligned"
    Np = _round_up(N, 128)
    Dp = np.zeros((K, Np), np.float32)
    Dp[:, :N] = D
    bp = np.zeros((1, Np), np.float32)
    bp[0, :N] = b
    return {"w": jnp.asarray(Dp, jnp.bfloat16), "b": jnp.asarray(bp, jnp.float32)}


# ---------------------------------------------------------------------------
# Fused Pallas kernel: the whole attacker forward, VMEM resident
# ---------------------------------------------------------------------------
def _fused_attacker_kernel(x_ref, attr_ref,
                           we1_ref, be1_ref, we2_ref, be2_ref,
                           wd1_ref, u_ref, bd1_ref, wd2_ref, bd2_ref,
                           wc_ref, bc_ref, wf_ref, bf_ref,
                           recon_ref, logits_ref, *, n_valid_rows):
    """Rows = padded batch; every intermediate stays in VMEM / vregs.

    Matmuls: bf16 x bf16 -> f32 accumulate on the MXU. Activations on the VPU,
    tanh on the EUP, one global min/max reduction fused into the dec2 epilogue.
    """
    bf16, f32 = jnp.bfloat16, jnp.float32

    def dense(h, w_ref, b_ref):
        return jnp.dot(h.astype(bf16), w_ref[...],
                       preferred_element_type=f32) + b_ref[...]

    def lrelu(v):                              # LeakyReLU(0.2) == max(v, 0.2*v)
        return jnp.maximum(v, 0.2 * v)

    # --- adv_generator.encode(x): two stride-2 convs + LeakyReLU(0.2) ---
    h = lrelu(dense(x_ref[...], we1_ref, be1_ref))
    h = lrelu(dense(h, we2_ref, be2_ref))

    # --- adv_generator.decode(z, attr): attr channel folded in as attr * u ---
    d = dense(h, wd1_ref, bd1_ref)
    for a in range(N_ATTRS):                   # static unroll (N_ATTRS == 1)
        d = d + attr_ref[a] * u_ref[pl.ds(a, 1), :]
    d = jnp.maximum(d, 0.0)                    # ReLU

    # --- dec2 + tanh + fused global (recon - min) / (max - min) ---
    r = jnp.tanh(dense(d, wd2_ref, bd2_ref))
    row = jax.lax.broadcasted_iota(jnp.int32, r.shape, 0)
    valid = row < n_valid_rows                 # exclude zero-padded batch rows
    mn = jnp.min(jnp.where(valid, r, jnp.inf), axis=1, keepdims=True)
    mn = jnp.min(mn, axis=0, keepdims=True)                        # (1, 1)
    mx = jnp.max(jnp.where(valid, r, -jnp.inf), axis=1, keepdims=True)
    mx = jnp.max(mx, axis=0, keepdims=True)                        # (1, 1)
    rng = mx - mn
    denom = jnp.where(rng > 0.0, rng, 1.0)     # constant recon -> zeros
    r = (r - mn) / denom
    recon_ref[...] = r

    # --- target_model(recon): 'simple' classifier conv + linear ---
    c = lrelu(dense(r, wc_ref, bc_ref))
    logits_ref[...] = dense(c, wf_ref, bf_ref)


def _full2d(shape):
    return pl.BlockSpec(shape, lambda i: (0, 0))


# ---------------------------------------------------------------------------
# AttEncoderModule equivalent (tiny scalar setup, plain JAX)
# ---------------------------------------------------------------------------
def attrib_encoder(input_logits, alphas):
    attr_b = input_logits
    for idx in ATTACK_INDICES:                 # from __init__: flip attacked attrs
        attr_b = attr_b.at[idx].set(1.0 - attr_b[idx])
    attr_b = (attr_b * 2.0 - 1.0) * THRES_INT
    for pos, idx in enumerate(ATTACK_INDICES):  # learnable alpha (init 1.0)
        attr_b = attr_b.at[idx].set((alphas[pos] * 2.0 - 1.0) * THRES_INT)
    attr_b = jnp.minimum(attr_b, EPS)
    attr_b = jnp.maximum(attr_b, 0.0)
    return attr_b[None, :]                     # (1, n_attrs)


# ---------------------------------------------------------------------------
# Attacker forward: one fused pallas_call
# ---------------------------------------------------------------------------
def attacker_forward(params, x_nchw, attrib_vector=None):
    if attrib_vector is None:
        attrib_vector = attrib_encoder(params["input_logits"], params["alphas"])
    attr_vec = attrib_vector.reshape(N_ATTRS).astype(jnp.float32)

    B = x_nchw.shape[0]
    MP = max(16, _round_up(B, 16))             # pad batch rows once (bf16 tile)
    x_flat = x_nchw.reshape(B, F_IN).astype(jnp.bfloat16)
    x_pad = jnp.pad(x_flat, ((0, MP - B), (0, 0)))

    enc1, enc2 = params["enc1"], params["enc2"]
    dec1, dec2 = params["dec1"], params["dec2"]
    clsc, clsf = params["cls_conv"], params["cls_fc"]

    operands = (x_pad, attr_vec,
                enc1["w"], enc1["b"], enc2["w"], enc2["b"],
                dec1["w"], dec1["u"], dec1["b"], dec2["w"], dec2["b"],
                clsc["w"], clsc["b"], clsf["w"], clsf["b"])

    in_specs = [_full2d(x_pad.shape),
                pl.BlockSpec(memory_space=pltpu.MemorySpace.SMEM)]
    in_specs += [_full2d(op.shape) for op in operands[2:]]

    recon_p, logits_p = pl.pallas_call(
        functools.partial(_fused_attacker_kernel, n_valid_rows=B),
        out_shape=(jax.ShapeDtypeStruct((MP, F_DEC2), jnp.float32),
                   jax.ShapeDtypeStruct((MP, F_LOGIT), jnp.float32)),
        grid=(1,),
        in_specs=in_specs,
        out_specs=(_full2d((MP, F_DEC2)), _full2d((MP, F_LOGIT))),
        compiler_params=pltpu.CompilerParams(
            dimension_semantics=("arbitrary",),
            vmem_limit_bytes=_VMEM_LIMIT),
    )(*operands)

    recon = recon_p[:B].reshape(B, IMG_FM, H0, W0)   # dec2 emits NCHW-flat order
    cl_label = logits_p[:B, :N_CLASSES]
    return recon, cl_label


# ---------------------------------------------------------------------------
# Pure-JAX reference with identical bf16/f32 numerics (correctness check)
# ---------------------------------------------------------------------------
def reference_forward(params, x_nchw, attrib_vector):
    bf16, f32 = jnp.bfloat16, jnp.float32
    B = x_nchw.shape[0]

    def dense(h, layer):
        return jnp.dot(h.astype(bf16), layer["w"],
                       preferred_element_type=f32) + layer["b"]

    def lrelu(v):
        return jnp.maximum(v, 0.2 * v)

    h = lrelu(dense(x_nchw.reshape(B, F_IN), params["enc1"]))
    h = lrelu(dense(h, params["enc2"]))
    d = dense(h, params["dec1"])
    for a in range(N_ATTRS):
        d = d + attrib_vector[0, a] * params["dec1"]["u"][a:a + 1, :]
    d = jnp.maximum(d, 0.0)
    r = jnp.tanh(dense(d, params["dec2"]))
    mn, mx = r.min(), r.max()
    denom = jnp.where(mx - mn > 0.0, mx - mn, 1.0)
    r = (r - mn) / denom
    c = lrelu(dense(r, params["cls_conv"]))
    logits = dense(c, params["cls_fc"])
    return r.reshape(B, IMG_FM, H0, W0), logits[:, :N_CLASSES]


# ---------------------------------------------------------------------------
# Deterministic parameter construction + one-time prep
# ---------------------------------------------------------------------------
def make_params(key):
    ks = jax.random.split(key, 12)

    def w(k, shape, scale=0.05):
        return scale * jax.random.normal(k, shape, jnp.float32)

    return {
        "input_logits": jnp.array([1.0], jnp.float32),
        "alphas": jnp.ones((len(ATTACK_INDICES),), jnp.float32),
        "enc1_w": w(ks[0], (4 * 4 * IMG_FM, ENC_DIM)),
        "enc1_b": w(ks[1], (ENC_DIM,)),
        "enc2_w": w(ks[2], (4 * 4 * ENC_DIM, 2 * ENC_DIM)),
        "enc2_b": w(ks[3], (2 * ENC_DIM,)),
        "dec1_w": w(ks[4], (4 * 4 * (2 * ENC_DIM + N_ATTRS), ENC_DIM)),
        "dec1_b": w(ks[5], (ENC_DIM,)),
        "dec2_w": w(ks[6], (4 * 4 * ENC_DIM, IMG_FM)),
        "dec2_b": w(ks[7], (IMG_FM,)),
        "cls_conv_w": w(ks[8], (4 * 4 * IMG_FM, CLS_CONV_DIM)),
        "cls_conv_b": w(ks[9], (CLS_CONV_DIM,)),
        "cls_fc_w": w(ks[10], (8 * 8 * CLS_CONV_DIM, N_CLASSES)),
        "cls_fc_b": w(ks[11], (N_CLASSES,)),
    }


def prepare_params(raw):
    """One-time prep (outside jit): unroll every conv / deconv over the fixed
    16x16 grid into dense lane-aligned bf16 matrices, folding the NCHW<->NHWC
    permutations into them, and expand biases per output feature."""
    # encoder stride-2 convs; enc1 reads the input directly in NCHW-flat order
    e1 = _conv_dense(raw["enc1_w"], raw["enc1_b"], IMG_FM, ENC_DIM,
                     H0, W0, 4, 2, 1, "nchw", "nhwc")
    e2 = _conv_dense(raw["enc2_w"], raw["enc2_b"], ENC_DIM, 2 * ENC_DIM,
                     H0 // 2, W0 // 2, 4, 2, 1, "nhwc", "nhwc")
    # decoder ConvTranspose2d(4,2,1); dec1 input = latent (32ch) + attr (1ch)
    cin1 = 2 * ENC_DIM + N_ATTRS
    d1_full, d1_b = _deconv_dense(raw["dec1_w"], raw["dec1_b"], cin1, ENC_DIM,
                                  H0 // 4, W0 // 4, 4, 2, 1, "nhwc", "nhwc")
    rows = np.arange((H0 // 4) * (W0 // 4) * cin1).reshape(-1, cin1)
    d1_z = d1_full[rows[:, :2 * ENC_DIM].reshape(-1)]            # (512, 1024)
    # attr is constant over the 4x4 latent grid -> contribution is attr * u
    d1_u = np.stack([d1_full[rows[:, 2 * ENC_DIM + a]].sum(0)
                     for a in range(N_ATTRS)], axis=0)           # (N_ATTRS, 1024)
    d2 = _deconv_dense(raw["dec2_w"], raw["dec2_b"], ENC_DIM, IMG_FM,
                       H0 // 2, W0 // 2, 4, 2, 1, "nhwc", "nchw")
    # 'simple' classifier: conv (reads the NCHW-flat recon) + linear
    cc = _conv_dense(raw["cls_conv_w"], raw["cls_conv_b"], IMG_FM, CLS_CONV_DIM,
                     H0, W0, 4, 2, 1, "nchw", "nhwc")
    cf = (np.asarray(raw["cls_fc_w"], np.float32),
          np.asarray(raw["cls_fc_b"], np.float32))

    dec1 = _as_layer(d1_z, d1_b)
    Np = dec1["w"].shape[1]
    u_p = np.zeros((N_ATTRS, Np), np.float32)
    u_p[:, :d1_u.shape[1]] = d1_u
    dec1["u"] = jnp.asarray(u_p, jnp.float32)

    return {
        "input_logits": raw["input_logits"],
        "alphas": raw["alphas"],
        "enc1": _as_layer(*e1),
        "enc2": _as_layer(*e2),
        "dec1": dec1,
        "dec2": _as_layer(*d2),
        "cls_conv": _as_layer(*cc),
        "cls_fc": _as_layer(*cf),
    }


if __name__ == "__main__":
    key = jax.random.PRNGKey(0)
    kp, kx = jax.random.split(key)
    params = prepare_params(make_params(kp))   # unroll / pad / cast ONCE, outside jit

    B = 2
    x = jax.random.normal(kx, (B, IMG_FM, H0, W0), jnp.float32)  # NCHW like PyTorch

    fwd = jax.jit(attacker_forward)
    recon, cl_label = fwd(params, x)
    jax.block_until_ready((recon, cl_label))

    assert recon.shape == (B, IMG_FM, H0, W0)
    assert cl_label.shape == (B, N_CLASSES)
    assert bool(jnp.isfinite(recon).all()) and bool(jnp.isfinite(cl_label).all())
    # normalized reconstruction must span exactly [0, 1]
    assert abs(float(recon.min())) < 1e-6 and abs(float(recon.max()) - 1.0) < 1e-6

    # pure-JAX reference with identical numerics
    attrib = attrib_encoder(params["input_logits"], params["alphas"])
    r_ref, l_ref = jax.jit(reference_forward)(params, x, attrib)
    np.testing.assert_allclose(np.asarray(recon), np.asarray(r_ref),
                               atol=2e-2, rtol=0)
    np.testing.assert_allclose(np.asarray(cl_label), np.asarray(l_ref),
                               atol=2e-2, rtol=0)
    print("KERNEL_OK")
</pallas_src>

<mosaic_0001>
module attributes {stable_mosaic.version = 11 : i64} {
  func.func @_fused_attacker_kernel(%arg0: i32, %arg1: memref<16x768xbf16, #tpu.memory_space<vmem>>, %arg2: memref<1xf32, #tpu.memory_space<smem>>, %arg3: memref<768x1024xbf16, #tpu.memory_space<vmem>>, %arg4: memref<1x1024xf32, #tpu.memory_space<vmem>>, %arg5: memref<1024x512xbf16, #tpu.memory_space<vmem>>, %arg6: memref<1x512xf32, #tpu.memory_space<vmem>>, %arg7: memref<512x1024xbf16, #tpu.memory_space<vmem>>, %arg8: memref<1x1024xf32, #tpu.memory_space<vmem>>, %arg9: memref<1x1024xf32, #tpu.memory_space<vmem>>, %arg10: memref<1024x768xbf16, #tpu.memory_space<vmem>>, %arg11: memref<1x768xf32, #tpu.memory_space<vmem>>, %arg12: memref<768x512xbf16, #tpu.memory_space<vmem>>, %arg13: memref<1x512xf32, #tpu.memory_space<vmem>>, %arg14: memref<512x128xbf16, #tpu.memory_space<vmem>>, %arg15: memref<1x128xf32, #tpu.memory_space<vmem>>, %arg16: memref<16x768xf32, #tpu.memory_space<vmem>>, %arg17: memref<16x128xf32, #tpu.memory_space<vmem>>) attributes {dimension_semantics = [#tpu.dimension_semantics<arbitrary>], iteration_bounds = array<i64: 1>, scalar_prefetch = 0 : i64, scratch_operands = 0 : i64, tpu.core_type = #tpu.core_type<tc>, window_params = [{pipeline_mode = #tpu.pipeline_mode<synchronous>, transform_indices = @transform_0, window_bounds = array<i64: 16, 768>}, {transform_indices = @transform_1, window_bounds = array<i64: 1>}, {pipeline_mode = #tpu.pipeline_mode<synchronous>, transform_indices = @transform_2, window_bounds = array<i64: 768, 1024>}, {pipeline_mode = #tpu.pipeline_mode<synchronous>, transform_indices = @transform_3, window_bounds = array<i64: 1, 1024>}, {pipeline_mode = #tpu.pipeline_mode<synchronous>, transform_indices = @transform_4, window_bounds = array<i64: 1024, 512>}, {pipeline_mode = #tpu.pipeline_mode<synchronous>, transform_indices = @transform_5, window_bounds = array<i64: 1, 512>}, {pipeline_mode = #tpu.pipeline_mode<synchronous>, transform_indices = @transform_6, window_bounds = array<i64: 512, 1024>}, {pipeline_mode = #tpu.pipeline_mode<synchronous>, transform_indices = @transform_7, window_bounds = array<i64: 1, 1024>}, {pipeline_mode = #tpu.pipeline_mode<synchronous>, transform_indices = @transform_8, window_bounds = array<i64: 1, 1024>}, {pipeline_mode = #tpu.pipeline_mode<synchronous>, transform_indices = @transform_9, window_bounds = array<i64: 1024, 768>}, {pipeline_mode = #tpu.pipeline_mode<synchronous>, transform_indices = @transform_10, window_bounds = array<i64: 1, 768>}, {pipeline_mode = #tpu.pipeline_mode<synchronous>, transform_indices = @transform_11, window_bounds = array<i64: 768, 512>}, {pipeline_mode = #tpu.pipeline_mode<synchronous>, transform_indices = @transform_12, window_bounds = array<i64: 1, 512>}, {pipeline_mode = #tpu.pipeline_mode<synchronous>, transform_indices = @transform_13, window_bounds = array<i64: 512, 128>}, {pipeline_mode = #tpu.pipeline_mode<synchronous>, transform_indices = @transform_14, window_bounds = array<i64: 1, 128>}, {pipeline_mode = #tpu.pipeline_mode<synchronous>, transform_indices = @transform_15, window_bounds = array<i64: 16, 768>}, {pipeline_mode = #tpu.pipeline_mode<synchronous>, transform_indices = @transform_16, window_bounds = array<i64: 16, 128>}]} {
    %c0 = arith.constant 0 : index
    %c0_0 = arith.constant 0 : index
    %0 = vector.load %arg1[%c0, %c0_0] : memref<16x768xbf16, #tpu.memory_space<vmem>>, vector<16x768xbf16>
    %c0_1 = arith.constant 0 : index
    %c0_2 = arith.constant 0 : index
    %1 = vector.load %arg3[%c0_1, %c0_2] : memref<768x1024xbf16, #tpu.memory_space<vmem>>, vector<768x1024xbf16>
    %cst = arith.constant dense<0.000000e+00> : vector<16x1024xf32>
    %2 = tpu.matmul %0, %1, %cst {dimension_numbers = #tpu.dot_dimension_numbers<[1], [0], [0], [1], [0, 0, 1, 1], [], []>} : vector<16x768xbf16>, vector<768x1024xbf16>, vector<16x1024xf32> -> vector<16x1024xf32>
    %c0_3 = arith.constant 0 : index
    %c0_4 = arith.constant 0 : index
    %3 = vector.load %arg4[%c0_3, %c0_4] : memref<1x1024xf32, #tpu.memory_space<vmem>>, vector<1x1024xf32>
    %4 = vector.broadcast %3 : vector<1x1024xf32> to vector<16x1024xf32>
    %5 = arith.addf %2, %4 : vector<16x1024xf32>
    %cst_5 = arith.constant 2.000000e-01 : f32
    %6 = vector.broadcast %cst_5 : f32 to vector<16x1024xf32>
    %7 = arith.mulf %6, %5 : vector<16x1024xf32>
    %8 = arith.maximumf %5, %7 : vector<16x1024xf32>
    %9 = arith.truncf %8 : vector<16x1024xf32> to vector<16x1024xbf16>
    %c0_6 = arith.constant 0 : index
    %c0_7 = arith.constant 0 : index
    %10 = vector.load %arg5[%c0_6, %c0_7] : memref<1024x512xbf16, #tpu.memory_space<vmem>>, vector<1024x512xbf16>
    %cst_8 = arith.constant dense<0.000000e+00> : vector<16x512xf32>
    %11 = tpu.matmul %9, %10, %cst_8 {dimension_numbers = #tpu.dot_dimension_numbers<[1], [0], [0], [1], [0, 0, 1, 1], [], []>} : vector<16x1024xbf16>, vector<1024x512xbf16>, vector<16x512xf32> -> vector<16x512xf32>
    %c0_9 = arith.constant 0 : index
    %c0_10 = arith.constant 0 : index
    %12 = vector.load %arg6[%c0_9, %c0_10] : memref<1x512xf32, #tpu.memory_space<vmem>>, vector<1x512xf32>
    %13 = vector.broadcast %12 : vector<1x512xf32> to vector<16x512xf32>
    %14 = arith.addf %11, %13 : vector<16x512xf32>
    %cst_11 = arith.constant 2.000000e-01 : f32
    %15 = vector.broadcast %cst_11 : f32 to vector<16x512xf32>
    %16 = arith.mulf %15, %14 : vector<16x512xf32>
    %17 = arith.maximumf %14, %16 : vector<16x512xf32>
    %18 = arith.truncf %17 : vector<16x512xf32> to vector<16x512xbf16>
    %c0_12 = arith.constant 0 : index
    %c0_13 = arith.constant 0 : index
    %19 = vector.load %arg7[%c0_12, %c0_13] : memref<512x1024xbf16, #tpu.memory_space<vmem>>, vector<512x1024xbf16>
    %cst_14 = arith.constant dense<0.000000e+00> : vector<16x1024xf32>
    %20 = tpu.matmul %18, %19, %cst_14 {dimension_numbers = #tpu.dot_dimension_numbers<[1], [0], [0], [1], [0, 0, 1, 1], [], []>} : vector<16x512xbf16>, vector<512x1024xbf16>, vector<16x1024xf32> -> vector<16x1024xf32>
    %c0_15 = arith.constant 0 : index
    %c0_16 = arith.constant 0 : index
    %21 = vector.load %arg9[%c0_15, %c0_16] : memref<1x1024xf32, #tpu.memory_space<vmem>>, vector<1x1024xf32>
    %22 = vector.broadcast %21 : vector<1x1024xf32> to vector<16x1024xf32>
    %23 = arith.addf %20, %22 : vector<16x1024xf32>
    %c0_17 = arith.constant 0 : index
    %24 = memref.load %arg2[%c0_17] : memref<1xf32, #tpu.memory_space<smem>>
    %c0_18 = arith.constant 0 : index
    %c0_19 = arith.constant 0 : index
    %25 = vector.load %arg8[%c0_18, %c0_19] : memref<1x1024xf32, #tpu.memory_space<vmem>>, vector<1x1024xf32>
    %26 = vector.broadcast %24 : f32 to vector<1x1024xf32>
    %27 = arith.mulf %26, %25 : vector<1x1024xf32>
    %28 = vector.broadcast %27 : vector<1x1024xf32> to vector<16x1024xf32>
    %29 = arith.addf %23, %28 : vector<16x1024xf32>
    %cst_20 = arith.constant 0.000000e+00 : f32
    %30 = vector.broadcast %cst_20 : f32 to vector<16x1024xf32>
    %31 = arith.maximumf %29, %30 : vector<16x1024xf32>
    %32 = arith.truncf %31 : vector<16x1024xf32> to vector<16x1024xbf16>
    %c0_21 = arith.constant 0 : index
    %c0_22 = arith.constant 0 : index
    %33 = vector.load %arg10[%c0_21, %c0_22] : memref<1024x768xbf16, #tpu.memory_space<vmem>>, vector<1024x768xbf16>
    %cst_23 = arith.constant dense<0.000000e+00> : vector<16x768xf32>
    %34 = tpu.matmul %32, %33, %cst_23 {dimension_numbers = #tpu.dot_dimension_numbers<[1], [0], [0], [1], [0, 0, 1, 1], [], []>} : vector<16x1024xbf16>, vector<1024x768xbf16>, vector<16x768xf32> -> vector<16x768xf32>
    %c0_24 = arith.constant 0 : index
    %c0_25 = arith.constant 0 : index
    %35 = vector.load %arg11[%c0_24, %c0_25] : memref<1x768xf32, #tpu.memory_space<vmem>>, vector<1x768xf32>
    %36 = vector.broadcast %35 : vector<1x768xf32> to vector<16x768xf32>
    %37 = arith.addf %34, %36 : vector<16x768xf32>
    %38 = math.tanh %37 : vector<16x768xf32>
    %39 = tpu.iota {dimensions = array<i32: 0>} : vector<16x768xi32>
    %c2_i32 = arith.constant 2 : i32
    %40 = vector.broadcast %c2_i32 : i32 to vector<16x768xi32>
    %41 = arith.cmpi slt, %39, %40 : vector<16x768xi32>
    %cst_26 = arith.constant 0x7F800000 : f32
    %42 = vector.broadcast %cst_26 : f32 to vector<16x768xf32>
    %43 = arith.select %41, %38, %42 : vector<16x768xi1>, vector<16x768xf32>
    %cst_27 = arith.constant dense<0x7F800000> : vector<16xf32>
    %44 = vector.multi_reduction <minimumf>, %43, %cst_27 [1] : vector<16x768xf32> to vector<16xf32>
    %45 = vector.shape_cast %44 : vector<16xf32> to vector<16x1xf32>
    %cst_28 = arith.constant dense<0x7F800000> : vector<1xf32>
    %46 = vector.multi_reduction <minimumf>, %45, %cst_28 [0] : vector<16x1xf32> to vector<1xf32>
    %47 = vector.shape_cast %46 : vector<1xf32> to vector<1x1xf32>
    %cst_29 = arith.constant 0xFF800000 : f32
    %48 = vector.broadcast %cst_29 : f32 to vector<16x768xf32>
    %49 = arith.select %41, %38, %48 : vector<16x768xi1>, vector<16x768xf32>
    %cst_30 = arith.constant dense<0xFF800000> : vector<16xf32>
    %50 = vector.multi_reduction <maximumf>, %49, %cst_30 [1] : vector<16x768xf32> to vector<16xf32>
    %51 = vector.shape_cast %50 : vector<16xf32> to vector<16x1xf32>
    %cst_31 = arith.constant dense<0xFF800000> : vector<1xf32>
    %52 = vector.multi_reduction <maximumf>, %51, %cst_31 [0] : vector<16x1xf32> to vector<1xf32>
    %53 = vector.shape_cast %52 : vector<1xf32> to vector<1x1xf32>
    %54 = arith.subf %53, %47 : vector<1x1xf32>
    %cst_32 = arith.constant 0.000000e+00 : f32
    %55 = vector.broadcast %cst_32 : f32 to vector<1x1xf32>
    %56 = arith.cmpf ogt, %54, %55 : vector<1x1xf32>
    %cst_33 = arith.constant 1.000000e+00 : f32
    %57 = vector.broadcast %cst_33 : f32 to vector<1x1xf32>
    %58 = arith.select %56, %54, %57 : vector<1x1xi1>, vector<1x1xf32>
    %59 = vector.broadcast %47 : vector<1x1xf32> to vector<16x768xf32>
    %60 = arith.subf %38, %59 : vector<16x768xf32>
    %61 = vector.broadcast %58 : vector<1x1xf32> to vector<16x768xf32>
    %62 = arith.divf %60, %61 : vector<16x768xf32>
    %c0_34 = arith.constant 0 : index
    %c0_35 = arith.constant 0 : index
    %63 = vector.load %arg16[%c0_34, %c0_35] : memref<16x768xf32, #tpu.memory_space<vmem>>, vector<16x768xf32>
    tpu.vector_store %arg16[%c0_34, %c0_35], %62 {strides = array<i32>} : memref<16x768xf32, #tpu.memory_space<vmem>>, vector<16x768xf32>,
    %64 = arith.truncf %62 : vector<16x768xf32> to vector<16x768xbf16>
    %c0_36 = arith.constant 0 : index
    %c0_37 = arith.constant 0 : index
    %65 = vector.load %arg12[%c0_36, %c0_37] : memref<768x512xbf16, #tpu.memory_space<vmem>>, vector<768x512xbf16>
    %cst_38 = arith.constant dense<0.000000e+00> : vector<16x512xf32>
    %66 = tpu.matmul %64, %65, %cst_38 {dimension_numbers = #tpu.dot_dimension_numbers<[1], [0], [0], [1], [0, 0, 1, 1], [], []>} : vector<16x768xbf16>, vector<768x512xbf16>, vector<16x512xf32> -> vector<16x512xf32>
    %c0_39 = arith.constant 0 : index
    %c0_40 = arith.constant 0 : index
    %67 = vector.load %arg13[%c0_39, %c0_40] : memref<1x512xf32, #tpu.memory_space<vmem>>, vector<1x512xf32>
    %68 = vector.broadcast %67 : vector<1x512xf32> to vector<16x512xf32>
    %69 = arith.addf %66, %68 : vector<16x512xf32>
    %cst_41 = arith.constant 2.000000e-01 : f32
    %70 = vector.broadcast %cst_41 : f32 to vector<16x512xf32>
    %71 = arith.mulf %70, %69 : vector<16x512xf32>
    %72 = arith.maximumf %69, %71 : vector<16x512xf32>
    %73 = arith.truncf %72 : vector<16x512xf32> to vector<16x512xbf16>
    %c0_42 = arith.constant 0 : index
    %c0_43 = arith.constant 0 : index
    %74 = vector.load %arg14[%c0_42, %c0_43] : memref<512x128xbf16, #tpu.memory_space<vmem>>, vector<512x128xbf16>
    %cst_44 = arith.constant dense<0.000000e+00> : vector<16x128xf32>
    %75 = tpu.matmul %73, %74, %cst_44 {dimension_numbers = #tpu.dot_dimension_numbers<[1], [0], [0], [1], [0, 0, 1, 1], [], []>} : vector<16x512xbf16>, vector<512x128xbf16>, vector<16x128xf32> -> vector<16x128xf32>
    %c0_45 = arith.constant 0 : index
    %c0_46 = arith.constant 0 : index
    %76 = vector.load %arg15[%c0_45, %c0_46] : memref<1x128xf32, #tpu.memory_space<vmem>>, vector<1x128xf32>
    %77 = vector.broadcast %76 : vector<1x128xf32> to vector<16x128xf32>
    %78 = arith.addf %75, %77 : vector<16x128xf32>
    %c0_47 = arith.constant 0 : index
    %c0_48 = arith.constant 0 : index
    %79 = vector.load %arg17[%c0_47, %c0_48] : memref<16x128xf32, #tpu.memory_space<vmem>>, vector<16x128xf32>
    tpu.vector_store %arg17[%c0_47, %c0_48], %78 {strides = array<i32>} : memref<16x128xf32, #tpu.memory_space<vmem>>, vector<16x128xf32>,
    return
  }
  func.func @transform_0(%arg0: i32) -> (i32, i32) {
    %c0_i32 = arith.constant 0 : i32
    %c0_i32_0 = arith.constant 0 : i32
    %c0_i32_1 = arith.constant 0 : i32
    return %c0_i32, %c0_i32_0 : i32, i32
  }
  func.func @transform_1(%arg0: i32) -> i32 {
    %c0_i32 = arith.constant 0 : i32
    %c0_i32_0 = arith.constant 0 : i32
    return %c0_i32 : i32
  }
  func.func @transform_2(%arg0: i32) -> (i32, i32) {
    %c0_i32 = arith.constant 0 : i32
    %c0_i32_0 = arith.constant 0 : i32
    %c0_i32_1 = arith.constant 0 : i32
    return %c0_i32, %c0_i32_0 : i32, i32
  }
  func.func @transform_3(%arg0: i32) -> (i32, i32) {
    %c0_i32 = arith.constant 0 : i32
    %c0_i32_0 = arith.constant 0 : i32
    %c0_i32_1 = arith.constant 0 : i32
    return %c0_i32, %c0_i32_0 : i32, i32
  }
  func.func @transform_4(%arg0: i32) -> (i32, i32) {
    %c0_i32 = arith.constant 0 : i32
    %c0_i32_0 = arith.constant 0 : i32
    %c0_i32_1 = arith.constant 0 : i32
    return %c0_i32, %c0_i32_0 : i32, i32
  }
  func.func @transform_5(%arg0: i32) -> (i32, i32) {
    %c0_i32 = arith.constant 0 : i32
    %c0_i32_0 = arith.constant 0 : i32
    %c0_i32_1 = arith.constant 0 : i32
    return %c0_i32, %c0_i32_0 : i32, i32
  }
  func.func @transform_6(%arg0: i32) -> (i32, i32) {
    %c0_i32 = arith.constant 0 : i32
    %c0_i32_0 = arith.constant 0 : i32
    %c0_i32_1 = arith.constant 0 : i32
    return %c0_i32, %c0_i32_0 : i32, i32
  }
  func.func @transform_7(%arg0: i32) -> (i32, i32) {
    %c0_i32 = arith.constant 0 : i32
    %c0_i32_0 = arith.constant 0 : i32
    %c0_i32_1 = arith.constant 0 : i32
    return %c0_i32, %c0_i32_0 : i32, i32
  }
  func.func @transform_8(%arg0: i32) -> (i32, i32) {
    %c0_i32 = arith.constant 0 : i32
    %c0_i32_0 = arith.constant 0 : i32
    %c0_i32_1 = arith.constant 0 : i32
    return %c0_i32, %c0_i32_0 : i32, i32
  }
  func.func @transform_9(%arg0: i32) -> (i32, i32) {
    %c0_i32 = arith.constant 0 : i32
    %c0_i32_0 = arith.constant 0 : i32
    %c0_i32_1 = arith.constant 0 : i32
    return %c0_i32, %c0_i32_0 : i32, i32
  }
  func.func @transform_10(%arg0: i32) -> (i32, i32) {
    %c0_i32 = arith.constant 0 : i32
    %c0_i32_0 = arith.constant 0 : i32
    %c0_i32_1 = arith.constant 0 : i32
    return %c0_i32, %c0_i32_0 : i32, i32
  }
  func.func @transform_11(%arg0: i32) -> (i32, i32) {
    %c0_i32 = arith.constant 0 : i32
    %c0_i32_0 = arith.constant 0 : i32
    %c0_i32_1 = arith.constant 0 : i32
    return %c0_i32, %c0_i32_0 : i32, i32
  }
  func.func @transform_12(%arg0: i32) -> (i32, i32) {
    %c0_i32 = arith.constant 0 : i32
    %c0_i32_0 = arith.constant 0 : i32
    %c0_i32_1 = arith.constant 0 : i32
    return %c0_i32, %c0_i32_0 : i32, i32
  }
  func.func @transform_13(%arg0: i32) -> (i32, i32) {
    %c0_i32 = arith.constant 0 : i32
    %c0_i32_0 = arith.constant 0 : i32
    %c0_i32_1 = arith.constant 0 : i32
    return %c0_i32, %c0_i32_0 : i32, i32
  }
  func.func @transform_14(%arg0: i32) -> (i32, i32) {
    %c0_i32 = arith.constant 0 : i32
    %c0_i32_0 = arith.constant 0 : i32
    %c0_i32_1 = arith.constant 0 : i32
    return %c0_i32, %c0_i32_0 : i32, i32
  }
  func.func @transform_15(%arg0: i32) -> (i32, i32) {
    %c0_i32 = arith.constant 0 : i32
    %c0_i32_0 = arith.constant 0 : i32
    %c0_i32_1 = arith.constant 0 : i32
    return %c0_i32, %c0_i32_0 : i32, i32
  }
  func.func @transform_16(%arg0: i32) -> (i32, i32) {
    %c0_i32 = arith.constant 0 : i32
    %c0_i32_0 = arith.constant 0 : i32
    %c0_i32_1 = arith.constant 0 : i32
    return %c0_i32, %c0_i32_0 : i32, i32
  }
}

</mosaic_0001>

<bundles_post_ra>
// kernel: attacker_forward.1
= control target key start
LH: loop header
LB: loop body
LE: loop exit
PB: predicated region body
PF: predicated region fallthrough
CT: control target
= control target key end

     0   :  { %s15795_s0 = inlined_call_operand.vmem [shape: bf16[16,768], index: 0, kind: input, shape index: {}]   ;;  %s15796_s1 = inlined_call_operand.<no memory space> [shape: f32[1], index: 1, kind: input, shape index: {}]   ;;  %s15797_s2 = inlined_call_operand.hbm [shape: bf16[768,1024], index: 2, kind: input, shape index: {}]   ;;  %s15798_s3 = inlined_call_operand.hbm [shape: f32[1,1024], index: 3, kind: input, shape index: {}]   ;;  %s15799_s4 = inlined_call_operand.hbm [shape: bf16[1024,512], index: 4, kind: input, shape index: {}]   ;;  %s15800_s5 = inlined_call_operand.hbm [shape: f32[1,512], index: 5, kind: input, shape index: {}]   ;;  %s15801_s6 = inlined_call_operand.hbm [shape: bf16[512,1024], index: 6, kind: input, shape index: {}]   ;;  %s15802_s7 = inlined_call_operand.hbm [shape: f32[1,1024], index: 7, kind: input, shape index: {}]   ;;  %s15803_s8 = inlined_call_operand.hbm [shape: f32[1,1024], index: 8, kind: input, shape index: {}]   ;;  %s15804_s9 = inlined_call_operand.hbm [shape: bf16[1024,768], index: 9, kind: input, shape index: {}]   ;;  %s15805_s10 = inlined_call_operand.hbm [shape: f32[1,768], index: 10, kind: input, shape index: {}]   ;;  %s15806_s11 = inlined_call_operand.hbm [shape: bf16[768,512], index: 11, kind: input, shape index: {}]   ;;  %s15807_s12 = inlined_call_operand.hbm [shape: f32[1,512], index: 12, kind: input, shape index: {}]   ;;  %s15808_s13 = inlined_call_operand.hbm [shape: bf16[512,128], index: 13, kind: input, shape index: {}]   ;;  %s15809_s14 = inlined_call_operand.hbm [shape: f32[1,128], index: 14, kind: input, shape index: {}]   ;;  %s15810_s15 = inlined_call_operand.vmem [shape: f32[16,768], index: 15, kind: output, shape index: {0}]   ;;  %s15811_s16 = inlined_call_operand.vmem [shape: f32[16,128], index: 16, kind: output, shape index: {1}]  }
   0x1   :  { %15813 = sst [smem:[#allocation30_spill]] %s15795_s0 }
   0x2   :  { %23 = vsyncpa [#allocation4], 0 }
   0x3   :  { %24 = vsyncpa [#allocation6], 0 }
   0x4   :  { %25 = vsyncpa [#allocation9], 0 }
   0x5   :  { %26 = vsyncpa [#allocation12], 0 }
   0x6   :  { %27 = vsyncpa [#allocation15], 0 }
   0x7   :  { %28 = vsyncpa [#allocation18], 0 }
   0x8   :  { %29 = vsyncpa [#allocation21], 0  ;;  %s15055_s21 = smov [#allocation5]   ;;  %s15056_s23 = smov [#allocation8]  }
   0x9   :  { %s52_s22 = sshll.u32 %s15055_s21, 4  ;;  %s74_s24 = sshll.u32 %s15056_s23, 4  ;;  %s53_s22 = int_to_ptr.vmem [resolvable:$true] %s52_s22  ;;  %s75_s24 = int_to_ptr.vmem [resolvable:$true] %s74_s24 }
   0xa   :  { %s14789_s25 = scalar_lea.vmem %s53_s22, 128  ;;  %p14794_p1 = scmp.lt.s32.totalorder %s53_s22, %s53_s22 }
   0xb   :  { %p14790_p0 = scmp.ne.s32.totalorder %s53_s22, %s14789_s25  ;;  %p14795_p2 = scmp.lt.s32.totalorder %s14789_s25, %s14789_s25 }
   0xd   :  { %p14796_p3 = por %p14795_p2, %p14794_p1 }
   0xf   :  { %p14797_p4 = pnand %p14796_p3, %p14790_p0 }
  0x11   :  { %14800 = shalt.err (!%p14797_p4)
}
  0x12   :  { %55 = dma.hbm_to_vmem [thread:$0]  %s15798_s3, 128, %s53_s22, [#allocation6]  }
  0x13   :  { %s14809_s28 = scalar_lea.vmem %s75_s24, 64  ;;  %p14814_p6 = scmp.lt.s32.totalorder %s75_s24, %s75_s24 }
  0x14   :  { %p14810_p5 = scmp.ne.s32.totalorder %s75_s24, %s14809_s28  ;;  %p14815_p7 = scmp.lt.s32.totalorder %s14809_s28, %s14809_s28 }
  0x16   :  { %p14816_p8 = por %p14815_p7, %p14814_p6 }
  0x18   :  { %p14817_p9 = pnand %p14816_p8, %p14810_p5 }
  0x1a   :  { %14820 = shalt.err (!%p14817_p9)
}
  0x1b   :  { %77 = dma.hbm_to_vmem [thread:$0]  %s15800_s5, 64, %s75_s24, [#allocation9]  }
  0x1c   :  { %s15057_s0 = smov [#allocation11]   ;;  %s15058_s18 = smov [#allocation14]  }
  0x1d   :  { %s96_s17 = sshll.u32 %s15057_s0, 4  ;;  %s115_s19 = sshll.u32 %s15058_s18, 4  ;;  %s97_s17 = int_to_ptr.vmem [resolvable:$true] %s96_s17  ;;  %s116_s19 = int_to_ptr.vmem [resolvable:$true] %s115_s19 }
  0x1e   :  { %s14829_s20 = scalar_lea.vmem %s97_s17, 128  ;;  %p14834_p11 = scmp.lt.s32.totalorder %s97_s17, %s97_s17 }
  0x1f   :  { %p14830_p10 = scmp.ne.s32.totalorder %s97_s17, %s14829_s20  ;;  %p14835_p12 = scmp.lt.s32.totalorder %s14829_s20, %s14829_s20 }
  0x21   :  { %p14836_p13 = por %p14835_p12, %p14834_p11 }
  0x23   :  { %p14837_p0 = pnand %p14836_p13, %p14830_p10 }
  0x25   :  { %14840 = shalt.err (!%p14837_p0)
}
  0x26   :  { %99 = dma.hbm_to_vmem [thread:$0]  %s15802_s7, 128, %s97_s17, [#allocation12]  }
  0x27   :  { %s14849_s22 = scalar_lea.vmem %s116_s19, 49152  ;;  %p14854_p2 = scmp.lt.s32.totalorder %s116_s19, %s116_s19 }
  0x28   :  { %p14850_p1 = scmp.ne.s32.totalorder %s116_s19, %s14849_s22  ;;  %p14855_p3 = scmp.lt.s32.totalorder %s14849_s22, %s14849_s22 }
  0x2a   :  { %p14856_p4 = por %p14855_p3, %p14854_p2 }
  0x2c   :  { %p14857_p5 = pnand %p14856_p4, %p14850_p1 }
  0x2e   :  { %14860 = shalt.err (!%p14857_p5)
}
  0x2f   :  { %s15059_s5 = smov 384   ;;  %s15060_s23 = smov 24  }
  0x30   :  { %121 = dma.hbm_to_vmem [thread:$0]  %s15804_s9, 49152, %s116_s19, [#allocation15], %s15059_s5, %s15059_s5, %s15060_s23  }
  0x31   :  { %s15061_s26 = smov [#allocation17]   ;;  %s15062_s28 = smov [#allocation20]  }
  0x32   :  { %s137_s27 = sshll.u32 %s15061_s26, 4  ;;  %s159_s29 = sshll.u32 %s15062_s28, 4  ;;  %s138_s27 = int_to_ptr.vmem [resolvable:$true] %s137_s27  ;;  %s160_s29 = int_to_ptr.vmem [resolvable:$true] %s159_s29 }
  0x33   :  { %s14869_s7 = scalar_lea.vmem %s138_s27, 24576  ;;  %p14874_p7 = scmp.lt.s32.totalorder %s138_s27, %s138_s27 }
  0x34   :  { %p14870_p6 = scmp.ne.s32.totalorder %s138_s27, %s14869_s7  ;;  %p14875_p8 = scmp.lt.s32.totalorder %s14869_s7, %s14869_s7 }
  0x36   :  { %p14876_p9 = por %p14875_p8, %p14874_p7 }
  0x38   :  { %p14877_p10 = pnand %p14876_p9, %p14870_p6 }
  0x3a   :  { %14880 = shalt.err (!%p14877_p10)
}
  0x3b   :  { %s15063_s30 = smov 256   ;;  %s15064_s0 = smov 16  }
  0x3c   :  { %143 = dma.hbm_to_vmem [thread:$0]  %s15806_s11, 24576, %s138_s27, [#allocation18], %s15063_s30, %s15063_s30, %s15064_s0  }
  0x3d   :  { %s14889_s18 = scalar_lea.vmem %s160_s29, 4096  ;;  %p14894_p12 = scmp.lt.s32.totalorder %s160_s29, %s160_s29 }
  0x3e   :  { %p14890_p11 = scmp.ne.s32.totalorder %s160_s29, %s14889_s18  ;;  %p14895_p13 = scmp.lt.s32.totalorder %s14889_s18, %s14889_s18 }
  0x40   :  { %p14896_p0 = por %p14895_p13, %p14894_p12 }
  0x42   :  { %p14897_p1 = pnand %p14896_p0, %p14890_p11 }
  0x44   :  { %14900 = shalt.err (!%p14897_p1)
}
  0x45   :  { %s15065_s19 = smov 64   ;;  %s15066_s20 = smov 4  }
  0x46   :  { %165 = dma.hbm_to_vmem [thread:$0]  %s15808_s13, 4096, %s160_s29, [#allocation21], %s15065_s19, %s15065_s19, %s15066_s20  }
  0x47   :  { %s15067_s22 = smov [#allocation3]  }
  0x48   :  { %s39_s5 = sshll.u32 %s15067_s22, 4  ;;  %s40_s5 = int_to_ptr.vmem [resolvable:$true] %s39_s5 }
  0x49   :  { %s14909_s23 = scalar_lea.vmem %s40_s5, 49152  ;;  %p14914_p3 = scmp.lt.s32.totalorder %s40_s5, %s40_s5 }
  0x4a   :  { %p14910_p2 = scmp.ne.s32.totalorder %s40_s5, %s14909_s23  ;;  %p14915_p4 = scmp.lt.s32.totalorder %s14909_s23, %s14909_s23 }
  0x4c   :  { %p14916_p5 = por %p14915_p4, %p14914_p3 }
  0x4e   :  { %p14917_p6 = pnand %p14916_p5, %p14910_p2 }
  0x50   :  { %14920 = shalt.err (!%p14917_p6)
}
  0x51   :  { %s15068_s11 = smov 512   ;;  %s15069_s24 = smov 32  }
  0x52   :  { %45 = dma.hbm_to_vmem [thread:$0]  %s15797_s2, 49152, %s40_s5, [#allocation4], %s15068_s11, %s15068_s11, %s15069_s24  }
  0x53   :  { %s15070_s27 = smov [#allocation7]   ;;  %s15071_s13 = smov [#allocation10]  }
  0x54   :  { %s61_s28 = sshll.u32 %s15070_s27, 4  ;;  %s83_s29 = sshll.u32 %s15071_s13, 4  ;;  %s62_s28 = int_to_ptr.vmem [resolvable:$true] %s61_s28  ;;  %s84_s29 = int_to_ptr.vmem [resolvable:$true] %s83_s29 }
  0x55   :  { %s14929_s7 = scalar_lea.vmem %s62_s28, 32768  ;;  %p14934_p8 = scmp.lt.s32.totalorder %s62_s28, %s62_s28 }
  0x56   :  { %p14930_p7 = scmp.ne.s32.totalorder %s62_s28, %s14929_s7  ;;  %p14935_p9 = scmp.lt.s32.totalorder %s14929_s7, %s14929_s7 }
  0x58   :  { %p14936_p10 = por %p14935_p9, %p14934_p8 }
  0x5a   :  { %p14937_p11 = pnand %p14936_p10, %p14930_p7 }
  0x5c   :  { %14940 = shalt.err (!%p14937_p11)
}
  0x5d   :  { %67 = dma.hbm_to_vmem [thread:$0]  %s15799_s4, 32768, %s62_s28, [#allocation6], %s15063_s30, %s15063_s30, %s15064_s0  }
  0x5e   :  { %s14949_s2 = scalar_lea.vmem %s84_s29, 32768  ;;  %p14954_p13 = scmp.lt.s32.totalorder %s84_s29, %s84_s29 }
  0x5f   :  { %p14950_p12 = scmp.ne.s32.totalorder %s84_s29, %s14949_s2  ;;  %p14955_p0 = scmp.lt.s32.totalorder %s14949_s2, %s14949_s2 }
  0x61   :  { %p14956_p1 = por %p14955_p0, %p14954_p13 }
  0x63   :  { %p14957_p2 = pnand %p14956_p1, %p14950_p12 }
  0x65   :  { %14960 = shalt.err (!%p14957_p2)
}
  0x66   :  { %89 = dma.hbm_to_vmem [thread:$0]  %s15801_s6, 32768, %s84_s29, [#allocation9], %s15068_s11, %s15068_s11, %s15069_s24  }
  0x67   :  { %s15072_s20 = smov [#allocation13]   ;;  %s15073_s21 = smov [#allocation16]  }
  0x68   :  { %s106_s3 = sshll.u32 %s15072_s20, 4  ;;  %s128_s22 = sshll.u32 %s15073_s21, 4  ;;  %s107_s3 = int_to_ptr.vmem [resolvable:$true] %s106_s3  ;;  %s129_s22 = int_to_ptr.vmem [resolvable:$true] %s128_s22 }
  0x69   :  { %s14969_s5 = scalar_lea.vmem %s107_s3, 128  ;;  %p14974_p4 = scmp.lt.s32.totalorder %s107_s3, %s107_s3 }
  0x6a   :  { %p14970_p3 = scmp.ne.s32.totalorder %s107_s3, %s14969_s5  ;;  %p14975_p5 = scmp.lt.s32.totalorder %s14969_s5, %s14969_s5 }
  0x6c   :  { %p14976_p6 = por %p14975_p5, %p14974_p4 }
  0x6e   :  { %p14977_p7 = pnand %p14976_p6, %p14970_p3 }
  0x70   :  { %14980 = shalt.err (!%p14977_p7)
}
  0x71   :  { %109 = dma.hbm_to_vmem [thread:$0]  %s15803_s8, 128, %s107_s3, [#allocation12]  }
  0x72   :  { %s14989_s0 = scalar_lea.vmem %s129_s22, 96  ;;  %p14994_p9 = scmp.lt.s32.totalorder %s129_s22, %s129_s22 }
  0x73   :  { %p14990_p8 = scmp.ne.s32.totalorder %s129_s22, %s14989_s0  ;;  %p14995_p10 = scmp.lt.s32.totalorder %s14989_s0, %s14989_s0 }
  0x75   :  { %p14996_p11 = por %p14995_p10, %p14994_p9 }
  0x77   :  { %p14997_p12 = pnand %p14996_p11, %p14990_p8 }
  0x79   :  { %15000 = shalt.err (!%p14997_p12)
}
  0x7a   :  { %131 = dma.hbm_to_vmem [thread:$0]  %s15805_s10, 96, %s129_s22, [#allocation15]  }
  0x7b   :  { %s15074_s11 = smov [#allocation19]   ;;  %s15075_s25 = smov [#allocation22]  }
  0x7c   :  { %s150_s24 = sshll.u32 %s15074_s11, 4  ;;  %s172_s26 = sshll.u32 %s15075_s25, 4  ;;  %s151_s24 = int_to_ptr.vmem [resolvable:$true] %s150_s24  ;;  %s173_s26 = int_to_ptr.vmem [resolvable:$true] %s172_s26 }
  0x7d   :  { %s15009_s27 = scalar_lea.vmem %s151_s24, 64  ;;  %p15014_p0 = scmp.lt.s32.totalorder %s151_s24, %s151_s24 }
  0x7e   :  { %p15010_p13 = scmp.ne.s32.totalorder %s151_s24, %s15009_s27  ;;  %p15015_p1 = scmp.lt.s32.totalorder %s15009_s27, %s15009_s27 }
  0x80   :  { %p15016_p2 = por %p15015_p1, %p15014_p0 }
  0x82   :  { %p15017_p3 = pnand %p15016_p2, %p15010_p13 }
  0x84   :  { %15020 = shalt.err (!%p15017_p3)
}
  0x85   :  { %153 = dma.hbm_to_vmem [thread:$0]  %s15807_s12, 64, %s151_s24, [#allocation18]  }
  0x86   :  { %s15029_s13 = scalar_lea.vmem %s173_s26, 16  ;;  %s15033_s10 = scalar_lea.vmem %s173_s26, 32 }
  0x87   :  { %p15030_p4 = scmp.ne.s32.totalorder %s173_s26, %s15029_s13  ;;  %p15034_p5 = scmp.lt.s32.totalorder %s173_s26, %s173_s26 }
  0x88   :  { %p15035_p6 = scmp.lt.s32.totalorder %s15033_s10, %s15029_s13 }
  0x8a   :  { %p15036_p7 = por %p15035_p6, %p15034_p5 }
  0x8c   :  { %p15037_p8 = pnand %p15036_p7, %p15030_p4 }
  0x8e   :  { %15040 = shalt.err (!%p15037_p8)
}
  0x8f   :  { %175 = dma.hbm_to_vmem [thread:$0]  %s15809_s14, 16, %s173_s26, [#allocation21]  }
  0x90   :  { %15041 = dma.done.wait [#allocation4], 49152  }
  0x91   :  { %15042 = vsyncadd [#allocation4], 4294918144 }
  0x92   :  { %15043 = dma.done.wait [#allocation6], 32896  }
  0x93   :  { %15044 = vsyncadd [#allocation6], 4294934400 }
  0x94   :  { %15045 = dma.done.wait [#allocation9], 32832  }
  0x95   :  { %15046 = vsyncadd [#allocation9], 4294934464 }
  0x96   :  { %15047 = dma.done.wait [#allocation12], 256  }
  0x97   :  { %15048 = vsyncadd [#allocation12], 4294967040 }
  0x98   :  { %15049 = dma.done.wait [#allocation15], 49248  }
  0x99   :  { %15050 = vsyncadd [#allocation15], 4294918048 }
  0x9a   :  { %15051 = dma.done.wait [#allocation18], 24640  }
  0x9b   :  { %15052 = vsyncadd [#allocation18], 4294942656 }
  0x9c   :  { %15053 = dma.done.wait [#allocation21], 4112  }
  0x9d   :  { %15054 = vsyncadd [#allocation21], 4294963184  ;;  %v278_v0 = vld [vmem:[#allocation3 + $0x1c0] sm:$0xff]  ;;  %s15814_s17 = sld [smem:[#allocation30_spill]] }
  0x9e   :  { %v282_v1 = vld [vmem:[#allocation3 + $0x1e0] sm:$0xff] }
  0x9f   :  { %v406_v2 = vld [vmem:[#allocation3 + $0x5c0] sm:$0xff]  ;;  %v11941_v3 = vcombine.high %v278_v0, %v282_v1  ;;  %v11940_v5 = vcombine.low %v278_v0, %v282_v1 }
  0xa0   :  { %v410_v4 = vld [vmem:[#allocation3 + $0x5e0] sm:$0xff] }
  0xa1   :  { %v270_v6 = vld [vmem:[#allocation3 + $0x180] sm:$0xff]  ;;  %v12069_v8 = vcombine.high %v406_v2, %v410_v4  ;;  %v12068_v9 = vcombine.low %v406_v2, %v410_v4  ;;  %2598 = vmatprep.subr.bf16.mxu0 %v11941_v3 }
  0xa2   :  { %v274_v7 = vld [vmem:[#allocation3 + $0x1a0] sm:$0xff]  ;;  %2599 = vmatpush1.bf16.msra.mxu0 %v11940_v5 }
  0xa3   :  { %v11933_v10 = vcombine.high %v270_v6, %v274_v7  ;;  %v398_v11 = vld [vmem:[#allocation3 + $0x580] sm:$0xff]  ;;  %2641 = vmatprep.subr.bf16.mxu1 %v12069_v8  ;;  %v11932_v18 = vcombine.low %v270_v6, %v274_v7 }
  0xa4   :  { %v402_v12 = vld [vmem:[#allocation3 + $0x5a0] sm:$0xff]  ;;  %2642 = vmatpush1.bf16.msra.mxu1 %v12068_v9 }
  0xa5   :  { %v262_v13 = vld [vmem:[#allocation3 + $0x140] sm:$0xff]  ;;  %v12061_v14 = vcombine.high %v398_v11, %v402_v12  ;;  %2600 = vmatprep.subr.bf16.mxu0 %v11933_v10  ;;  %v12060_v19 = vcombine.low %v398_v11, %v402_v12 }
  0xa6   :  { %v266_v15 = vld [vmem:[#allocation3 + $0x160] sm:$0xff]  ;;  %2601 = vmatpush1.bf16.msra.mxu0 %v11932_v18 }
  0xa7   :  { %v390_v16 = vld [vmem:[#allocation3 + $0x540] sm:$0xff]  ;;  %v11925_v20 = vcombine.high %v262_v13, %v266_v15  ;;  %2643 = vmatprep.subr.bf16.mxu1 %v12061_v14  ;;  %v11924_v26 = vcombine.low %v262_v13, %v266_v15 }
  0xa8   :  { %v394_v17 = vld [vmem:[#allocation3 + $0x560] sm:$0xff]  ;;  %2644 = vmatpush1.bf16.msra.mxu1 %v12060_v19 }
  0xa9   :  { %v12053_v21 = vcombine.high %v390_v16, %v394_v17  ;;  %v254_v22 = vld [vmem:[#allocation3 + $0x100] sm:$0xff]  ;;  %2602 = vmatprep.subr.bf16.mxu0 %v11925_v20  ;;  %v12052_v27 = vcombine.low %v390_v16, %v394_v17 }
  0xaa   :  { %v258_v23 = vld [vmem:[#allocation3 + $0x120] sm:$0xff]  ;;  %2603 = vmatpush1.bf16.msra.mxu0 %v11924_v26 }
  0xab   :  { %v382_v24 = vld [vmem:[#allocation3 + $0x500] sm:$0xff]  ;;  %v11917_v28 = vcombine.high %v254_v22, %v258_v23  ;;  %2645 = vmatprep.subr.bf16.mxu1 %v12053_v21  ;;  %v11916_v34 = vcombine.low %v254_v22, %v258_v23 }
  0xac   :  { %v386_v25 = vld [vmem:[#allocation3 + $0x520] sm:$0xff]  ;;  %2646 = vmatpush1.bf16.msra.mxu1 %v12052_v27 }
  0xad   :  { %v12045_v29 = vcombine.high %v382_v24, %v386_v25  ;;  %v246_v30 = vld [vmem:[#allocation3 + $0xc0] sm:$0xff]  ;;  %2604 = vmatprep.subr.bf16.mxu0 %v11917_v28  ;;  %v12044_v35 = vcombine.low %v382_v24, %v386_v25 }
  0xae   :  { %v250_v31 = vld [vmem:[#allocation3 + $0xe0] sm:$0xff]  ;;  %2605 = vmatpush1.bf16.msra.mxu0 %v11916_v34 }
  0xaf   :  { %v374_v32 = vld [vmem:[#allocation3 + $0x4c0] sm:$0xff]  ;;  %v11909_v36 = vcombine.high %v246_v30, %v250_v31  ;;  %2647 = vmatprep.subr.bf16.mxu1 %v12045_v29  ;;  %v11908_v42 = vcombine.low %v246_v30, %v250_v31 }
  0xb0   :  { %v378_v33 = vld [vmem:[#allocation3 + $0x4e0] sm:$0xff]  ;;  %2648 = vmatpush1.bf16.msra.mxu1 %v12044_v35 }
  0xb1   :  { %v12037_v37 = vcombine.high %v374_v32, %v378_v33  ;;  %v238_v38 = vld [vmem:[#allocation3 + $0x80] sm:$0xff]  ;;  %2606 = vmatprep.subr.bf16.mxu0 %v11909_v36  ;;  %v12036_v43 = vcombine.low %v374_v32, %v378_v33 }
  0xb2   :  { %v242_v39 = vld [vmem:[#allocation3 + $0xa0] sm:$0xff]  ;;  %2607 = vmatpush1.bf16.msra.mxu0 %v11908_v42 }
  0xb3   :  { %v366_v40 = vld [vmem:[#allocation3 + $0x480] sm:$0xff]  ;;  %v11901_v44 = vcombine.high %v238_v38, %v242_v39  ;;  %2649 = vmatprep.subr.bf16.mxu1 %v12037_v37  ;;  %v11900_v50 = vcombine.low %v238_v38, %v242_v39 }
  0xb4   :  { %v370_v41 = vld [vmem:[#allocation3 + $0x4a0] sm:$0xff]  ;;  %2650 = vmatpush1.bf16.msra.mxu1 %v12036_v43 }
  0xb5   :  { %v12029_v45 = vcombine.high %v366_v40, %v370_v41  ;;  %v230_v46 = vld [vmem:[#allocation3 + $0x40] sm:$0xff]  ;;  %2608 = vmatprep.subr.bf16.mxu0 %v11901_v44  ;;  %v12028_v52 = vcombine.low %v366_v40, %v370_v41 }
  0xb6   :  { %v234_v47 = vld [vmem:[#allocation3 + $0x60] sm:$0xff]  ;;  %2609 = vmatpush1.bf16.msra.mxu0 %v11900_v50 }
  0xb7   :  { %v358_v48 = vld [vmem:[#allocation3 + $0x440] sm:$0xff]  ;;  %v11893_v53 = vcombine.high %v230_v46, %v234_v47  ;;  %2651 = vmatprep.subr.bf16.mxu1 %v12029_v45  ;;  %v11892_v60 = vcombine.low %v230_v46, %v234_v47 }
  0xb8   :  { %v362_v49 = vld [vmem:[#allocation3 + $0x460] sm:$0xff]  ;;  %2652 = vmatpush1.bf16.msra.mxu1 %v12028_v52 }
  0xb9   :  { %v222_v51 = vld [vmem:[#allocation3] sm:$0xff]  ;;  %v12021_v55 = vcombine.high %v358_v48, %v362_v49  ;;  %2610 = vmatprep.subr.bf16.mxu0 %v11893_v53  ;;  %v12020_v61 = vcombine.low %v358_v48, %v362_v49 }
  0xba   :  { %v226_v54 = vld [vmem:[#allocation3 + $0x20] sm:$0xff]  ;;  %2611 = vmatpush1.bf16.msra.mxu0 %v11892_v60 }
  0xbb   :  { %v15211_v56 = vld [vmem:[%s15814_s17 + $0x4] ss:$24 sps:$4 sm:$0xff]   ;;  %v11885_v62 = vcombine.high %v222_v51, %v226_v54  ;;  %2653 = vmatprep.subr.bf16.mxu1 %v12021_v55  ;;  %v11884_v4 = vcombine.low %v222_v51, %v226_v54 }
  0xbc   :  { %v350_v57 = vld [vmem:[#allocation3 + $0x400] sm:$0xff]  ;;  %2630 = vmatprep.mubr.bf16.mxu0 %v15211_v56  ;;  %2654 = vmatpush1.bf16.msra.mxu1 %v12020_v61 }
  0xbd   :  { %v354_v58 = vld [vmem:[#allocation3 + $0x420] sm:$0xff]  ;;  %2612 = vmatprep.subr.bf16.mxu0 %v11885_v62 }
  0xbe   :  { %v15216_v59 = vld [vmem:[%s15814_s17 + $0xc] ss:$24 sps:$4 sm:$0xff]   ;;  %v12013_v63 = vcombine.high %v350_v57, %v354_v58  ;;  %v12012_v5 = vcombine.low %v350_v57, %v354_v58  ;;  %2613 = vmatpush1.bf16.msra.mxu0 %v11884_v4 }
  0xbf   :  { %v342_v0 = vld [vmem:[#allocation3 + $0x3c0] sm:$0xff]  ;;  %2673 = vmatprep.mubr.bf16.mxu1 %v15216_v59  ;;  %v279_v4 = vld [vmem:[#allocation3 + $0x1c8] sm:$0xff] }
  0xc0   :  { %v346_v1 = vld [vmem:[#allocation3 + $0x3e0] sm:$0xff]  ;;  %2655 = vmatprep.subr.bf16.mxu1 %v12013_v63 }
  0xc1   :  { %v470_v2 = vld [vmem:[#allocation3 + $0x7c0] sm:$0xff]  ;;  %v12005_v6 = vcombine.high %v342_v0, %v346_v1  ;;  %v12004_v12 = vcombine.low %v342_v0, %v346_v1  ;;  %2656 = vmatpush1.bf16.msra.mxu1 %v12012_v5  ;;  %v283_v5 = vld [vmem:[#allocation3 + $0x1e8] sm:$0xff] }
  0xc2   :  { %v474_v3 = vld [vmem:[#allocation3 + $0x7e0] sm:$0xff] }
  0xc3   :  { %v12133_v7 = vcombine.high %v470_v2, %v474_v3  ;;  %v334_v8 = vld [vmem:[#allocation3 + $0x380] sm:$0xff]  ;;  %2614 = vmatprep.subr.bf16.mxu0 %v12005_v6  ;;  %v12132_v13 = vcombine.low %v470_v2, %v474_v3 }
  0xc4   :  { %v338_v9 = vld [vmem:[#allocation3 + $0x3a0] sm:$0xff]  ;;  %2615 = vmatpush2.bf16.msra.mxu0 %v12004_v12 }
  0xc5   :  { %v462_v10 = vld [vmem:[#allocation3 + $0x780] sm:$0xff]  ;;  %v11997_v14 = vcombine.high %v334_v8, %v338_v9  ;;  %2657 = vmatprep.subr.bf16.mxu1 %v12133_v7  ;;  %v11996_v20 = vcombine.low %v334_v8, %v338_v9  ;;  %v11943_v9 = vcombine.high %v279_v4, %v283_v5 }
  0xc6   :  { %v466_v11 = vld [vmem:[#allocation3 + $0x7a0] sm:$0xff]  ;;  %2658 = vmatpush2.bf16.msra.mxu1 %v12132_v13  ;;  %v271_v13 = vld [vmem:[#allocation3 + $0x188] sm:$0xff] }
  0xc7   :  { %v12125_v15 = vcombine.high %v462_v10, %v466_v11  ;;  %v326_v16 = vld [vmem:[#allocation3 + $0x340] sm:$0xff]  ;;  %2616 = vmatprep.subr.bf16.mxu0 %v11997_v14  ;;  %v12124_v21 = vcombine.low %v462_v10, %v466_v11  ;;  %v275_v14 = vld [vmem:[#allocation3 + $0x1a8] sm:$0xff] }
  0xc8   :  { %v330_v17 = vld [vmem:[#allocation3 + $0x360] sm:$0xff]  ;;  %2617 = vmatpush2.bf16.msra.mxu0 %v11996_v20 }
  0xc9   :  { %v454_v18 = vld [vmem:[#allocation3 + $0x740] sm:$0xff]  ;;  %v11989_v22 = vcombine.high %v326_v16, %v330_v17  ;;  %2659 = vmatprep.subr.bf16.mxu1 %v12125_v15  ;;  %v11988_v28 = vcombine.low %v326_v16, %v330_v17  ;;  %v11942_v17 = vcombine.low %v279_v4, %v283_v5 }
  0xca   :  { %v458_v19 = vld [vmem:[#allocation3 + $0x760] sm:$0xff]  ;;  %2660 = vmatpush2.bf16.msra.mxu1 %v12124_v21 }
  0xcb   :  { %v12117_v23 = vcombine.high %v454_v18, %v458_v19  ;;  %v318_v24 = vld [vmem:[#allocation3 + $0x300] sm:$0xff]  ;;  %2618 = vmatprep.subr.bf16.mxu0 %v11989_v22  ;;  %v12116_v29 = vcombine.low %v454_v18, %v458_v19  ;;  %v11935_v19 = vcombine.high %v271_v13, %v275_v14  ;;  %v15231_v22 = vld [vmem:[%s15814_s17 + $0x14] ss:$24 sps:$4 sm:$0xff]  }
  0xcc   :  { %v322_v25 = vld [vmem:[#allocation3 + $0x320] sm:$0xff]  ;;  %2619 = vmatpush2.bf16.msra.mxu0 %v11988_v28 }
  0xcd   :  { %v446_v26 = vld [vmem:[#allocation3 + $0x700] sm:$0xff]  ;;  %v11981_v30 = vcombine.high %v318_v24, %v322_v25  ;;  %2661 = vmatprep.subr.bf16.mxu1 %v12117_v23  ;;  %v11980_v36 = vcombine.low %v318_v24, %v322_v25  ;;  %v263_v23 = vld [vmem:[#allocation3 + $0x148] sm:$0xff] }
  0xce   :  { %v450_v27 = vld [vmem:[#allocation3 + $0x720] sm:$0xff]  ;;  %2662 = vmatpush2.bf16.msra.mxu1 %v12116_v29  ;;  %v267_v24 = vld [vmem:[#allocation3 + $0x168] sm:$0xff] }
  0xcf   :  { %v12109_v31 = vcombine.high %v446_v26, %v450_v27  ;;  %v310_v32 = vld [vmem:[#allocation3 + $0x2c0] sm:$0xff]  ;;  %2620 = vmatprep.subr.bf16.mxu0 %v11981_v30  ;;  %v12108_v37 = vcombine.low %v446_v26, %v450_v27  ;;  %v11934_v26 = vcombine.low %v271_v13, %v275_v14  ;;  %v11927_v30 = vcombine.high %v263_v23, %v267_v24 }
  0xd0   :  { %v314_v33 = vld [vmem:[#allocation3 + $0x2e0] sm:$0xff]  ;;  %2621 = vmatpush2.bf16.msra.mxu0 %v11980_v36 }
  0xd1   :  { %v438_v34 = vld [vmem:[#allocation3 + $0x6c0] sm:$0xff]  ;;  %v11973_v38 = vcombine.high %v310_v32, %v314_v33  ;;  %2663 = vmatprep.subr.bf16.mxu1 %v12109_v31  ;;  %v11972_v44 = vcombine.low %v310_v32, %v314_v33  ;;  %v255_v31 = vld [vmem:[#allocation3 + $0x108] sm:$0xff] }
  0xd2   :  { %v442_v35 = vld [vmem:[#allocation3 + $0x6e0] sm:$0xff]  ;;  %2664 = vmatpush2.bf16.msra.mxu1 %v12108_v37  ;;  %v259_v32 = vld [vmem:[#allocation3 + $0x128] sm:$0xff] }
  0xd3   :  { %v12101_v39 = vcombine.high %v438_v34, %v442_v35  ;;  %v302_v40 = vld [vmem:[#allocation3 + $0x280] sm:$0xff]  ;;  %2622 = vmatprep.subr.bf16.mxu0 %v11973_v38  ;;  %v12100_v45 = vcombine.low %v438_v34, %v442_v35  ;;  %v11926_v34 = vcombine.low %v263_v23, %v267_v24  ;;  %v247_v38 = vld [vmem:[#allocation3 + $0xc8] sm:$0xff] }
  0xd4   :  { %v306_v41 = vld [vmem:[#allocation3 + $0x2a0] sm:$0xff]  ;;  %2623 = vmatpush2.bf16.msra.mxu0 %v11972_v44 }
  0xd5   :  { %v430_v42 = vld [vmem:[#allocation3 + $0x680] sm:$0xff]  ;;  %v11965_v46 = vcombine.high %v302_v40, %v306_v41  ;;  %2665 = vmatprep.subr.bf16.mxu1 %v12101_v39  ;;  %v11964_v52 = vcombine.low %v302_v40, %v306_v41  ;;  %v11919_v39 = vcombine.high %v255_v31, %v259_v32  ;;  %v251_v40 = vld [vmem:[#allocation3 + $0xe8] sm:$0xff] }
  0xd6   :  { %v434_v43 = vld [vmem:[#allocation3 + $0x6a0] sm:$0xff]  ;;  %2666 = vmatpush2.bf16.msra.mxu1 %v12100_v45  ;;  %v239_v45 = vld [vmem:[#allocation3 + $0x88] sm:$0xff] }
  0xd7   :  { %v12093_v47 = vcombine.high %v430_v42, %v434_v43  ;;  %v294_v48 = vld [vmem:[#allocation3 + $0x240] sm:$0xff]  ;;  %2624 = vmatprep.subr.bf16.mxu0 %v11965_v46  ;;  %v12092_v53 = vcombine.low %v430_v42, %v434_v43  ;;  %v11918_v42 = vcombine.low %v255_v31, %v259_v32  ;;  %v11911_v46 = vcombine.high %v247_v38, %v251_v40 }
  0xd8   :  { %v298_v49 = vld [vmem:[#allocation3 + $0x260] sm:$0xff]  ;;  %2625 = vmatpush2.bf16.msra.mxu0 %v11964_v52 }
  0xd9   :  { %v422_v50 = vld [vmem:[#allocation3 + $0x640] sm:$0xff]  ;;  %v11957_v54 = vcombine.high %v294_v48, %v298_v49  ;;  %2667 = vmatprep.subr.bf16.mxu1 %v12093_v47  ;;  %v11956_v62 = vcombine.low %v294_v48, %v298_v49  ;;  %v243_v47 = vld [vmem:[#allocation3 + $0xa8] sm:$0xff]  ;;  %v11910_v49 = vcombine.low %v247_v38, %v251_v40 }
  0xda   :  { %v426_v51 = vld [vmem:[#allocation3 + $0x660] sm:$0xff]  ;;  %2668 = vmatpush2.bf16.msra.mxu1 %v12092_v53  ;;  %v231_v53 = vld [vmem:[#allocation3 + $0x48] sm:$0xff] }
  0xdb   :  { %v12085_v55 = vcombine.high %v422_v50, %v426_v51  ;;  %v286_v57 = vld [vmem:[#allocation3 + $0x200] sm:$0xff]  ;;  %2626 = vmatprep.subr.bf16.mxu0 %v11957_v54  ;;  %v12084_v63 = vcombine.low %v422_v50, %v426_v51  ;;  %v11903_v54 = vcombine.high %v239_v45, %v243_v47 }
  0xdc   :  { %v290_v58 = vld [vmem:[#allocation3 + $0x220] sm:$0xff]  ;;  %2627 = vmatpush2.bf16.msra.mxu0 %v11956_v62 }
  0xdd   :  { %v414_v60 = vld [vmem:[#allocation3 + $0x600] sm:$0xff]  ;;  %v11949_v0 = vcombine.high %v286_v57, %v290_v58  ;;  %2669 = vmatprep.subr.bf16.mxu1 %v12085_v55  ;;  %v11948_v6 = vcombine.low %v286_v57, %v290_v58  ;;  %v235_v55 = vld [vmem:[#allocation3 + $0x68] sm:$0xff]  ;;  %v11902_v58 = vcombine.low %v239_v45, %v243_v47 }
  0xde   :  { %v418_v61 = vld [vmem:[#allocation3 + $0x620] sm:$0xff]  ;;  %2670 = vmatpush2.bf16.msra.mxu1 %v12084_v63  ;;  %v223_v63 = vld [vmem:[#allocation3 + $0x8] sm:$0xff] }
  0xdf   :  { %v12077_v1 = vcombine.high %v414_v60, %v418_v61  ;;  %v534_v2 = vld [vmem:[#allocation3 + $0x9c0] sm:$0xff]  ;;  %2628 = vmatprep.subr.bf16.mxu0 %v11949_v0  ;;  %v12076_v7 = vcombine.low %v414_v60, %v418_v61  ;;  %v11895_v0 = vcombine.high %v231_v53, %v235_v55 }
  0xe0   :  { %v538_v3 = vld [vmem:[#allocation3 + $0x9e0] sm:$0xff]  ;;  %2629 = vmatpush2.bf16.msra.mxu0 %v11948_v6 }
  0xe1   :  { %v12197_v8 = vcombine.high %v534_v2, %v538_v3  ;;  %2671 = vmatprep.subr.bf16.mxu1 %v12077_v1  ;;  %v526_v10 = vld [vmem:[#allocation3 + $0x980] sm:$0xff]  ;;  %v12196_v16 = vcombine.low %v534_v2, %v538_v3  ;;  %v227_v1 = vld [vmem:[#allocation3 + $0x28] sm:$0xff]  ;;  %v11894_v3 = vcombine.low %v231_v53, %v235_v55 }
  0xe2   :  { %v530_v11 = vld [vmem:[#allocation3 + $0x9a0] sm:$0xff]  ;;  %2672 = vmatpush2.bf16.msra.mxu1 %v12076_v7  ;;  %v343_v7 = vld [vmem:[#allocation3 + $0x3c8] sm:$0xff] }
  0xe3   :  { %v15223_v12 = vld [vmem:[%s15814_s17] ss:$24 sps:$4 sm:$0xff]   ;;  %2684 = vmatprep.subr.bf16.mxu0 %v12197_v8  ;;  %v12189_v18 = vcombine.high %v526_v10, %v530_v11  ;;  %2727 = vmatprep.subr.bf16.mxu1 %v11943_v9  ;;  %v12188_v25 = vcombine.low %v526_v10, %v530_v11  ;;  %v11887_v8 = vcombine.high %v223_v63, %v227_v1  ;;  %v347_v9 = vld [vmem:[#allocation3 + $0x3e8] sm:$0xff] }
  0xe4   :  { %v13461_v15 = vld [vmem:[%s15814_s17 + $0x8] ss:$24 sps:$4 sm:$0xff]   ;;  %2631 = vmatmul.mubr.bf16.vlgmr.msra.gmra.mxu0 %v15223_v12  ;;  %v11886_v11 = vcombine.low %v223_v63, %v227_v1 }
  0xe5   :  { %v518_v20 = vld [vmem:[#allocation3 + $0x940] sm:$0xff]  ;;  %2674 = vmatmul.mubr.bf16.vlgmr.msra.gmra.mxu1 %v13461_v15  ;;  %2685 = vmatpush1.bf16.msra.mxu0 %v12196_v16  ;;  %v335_v16 = vld [vmem:[#allocation3 + $0x388] sm:$0xff] }
  0xe6   :  { %v522_v21 = vld [vmem:[#allocation3 + $0x960] sm:$0xff]  ;;  %2728 = vmatpush1.bf16.msra.mxu1 %v11942_v17  ;;  %2686 = vmatprep.subr.bf16.mxu0 %v12189_v18  ;;  %v12007_v17 = vcombine.high %v343_v7, %v347_v9  ;;  %v339_v18 = vld [vmem:[#allocation3 + $0x3a8] sm:$0xff] }
  0xe7   :  { %v12181_v27 = vcombine.high %v518_v20, %v522_v21  ;;  %v510_v28 = vld [vmem:[#allocation3 + $0x900] sm:$0xff]  ;;  %2729 = vmatprep.subr.bf16.mxu1 %v11935_v19  ;;  %2716 = vmatprep.mubr.bf16.mxu0 %v15231_v22  ;;  %v12180_v33 = vcombine.low %v518_v20, %v522_v21  ;;  %v12006_v20 = vcombine.low %v343_v7, %v347_v9  ;;  %v411_v9 = vld [vmem:[#allocation3 + $0x5e8] sm:$0xff] }
  0xe8   :  { %v514_v29 = vld [vmem:[#allocation3 + $0x920] sm:$0xff]  ;;  %2759 = vmatprep.mubr.bf16.mxu1 %v15211_v56 }
  0xe9   :  { %2687 = vmatpush1.bf16.msra.mxu0 %v12188_v25  ;;  %v12173_v35 = vcombine.high %v510_v28, %v514_v29  ;;  %v502_v36 = vld [vmem:[#allocation3 + $0x8c0] sm:$0xff]  ;;  %v12172_v41 = vcombine.low %v510_v28, %v514_v29  ;;  %v327_v25 = vld [vmem:[#allocation3 + $0x348] sm:$0xff]  ;;  %v11998_v29 = vcombine.low %v335_v16, %v339_v18 }
  0xea   :  { %2730 = vmatpush1.bf16.msra.mxu1 %v11934_v26  ;;  %2688 = vmatprep.subr.bf16.mxu0 %v12181_v27  ;;  %v506_v37 = vld [vmem:[#allocation3 + $0x8e0] sm:$0xff]  ;;  %v11999_v26 = vcombine.high %v335_v16, %v339_v18  ;;  %v331_v27 = vld [vmem:[#allocation3 + $0x368] sm:$0xff] }
  0xeb   :  { %2731 = vmatprep.subr.bf16.mxu1 %v11927_v30  ;;  %v12165_v43 = vcombine.high %v502_v36, %v506_v37  ;;  %v494_v44 = vld [vmem:[#allocation3 + $0x880] sm:$0xff]  ;;  %v12164_v48 = vcombine.low %v502_v36, %v506_v37  ;;  %v11990_v37 = vcombine.low %v327_v25, %v331_v27  ;;  %v15239_v16 = vld [vmem:[%s15814_s17 + $0x10] ss:$24 sps:$4 sm:$0xff]  }
  0xec   :  { %v498_v56 = vld [vmem:[#allocation3 + $0x8a0] sm:$0xff]  ;;  %v399_v18 = vld [vmem:[#allocation3 + $0x588] sm:$0xff] }
  0xed   :  { %2689 = vmatpush1.bf16.msra.mxu0 %v12180_v33  ;;  %v12157_v50 = vcombine.high %v494_v44, %v498_v56  ;;  %v486_v51 = vld [vmem:[#allocation3 + $0x840] sm:$0xff]  ;;  %v12156_v57 = vcombine.low %v494_v44, %v498_v56  ;;  %v319_v33 = vld [vmem:[#allocation3 + $0x308] sm:$0xff] }
  0xee   :  { %2732 = vmatpush1.bf16.msra.mxu1 %v11926_v34  ;;  %2690 = vmatprep.subr.bf16.mxu0 %v12173_v35  ;;  %v490_v52 = vld [vmem:[#allocation3 + $0x860] sm:$0xff]  ;;  %v11991_v34 = vcombine.high %v327_v25, %v331_v27  ;;  %v323_v35 = vld [vmem:[#allocation3 + $0x328] sm:$0xff] }
  0xef   :  { %2733 = vmatprep.subr.bf16.mxu1 %v11919_v39  ;;  %v12149_v60 = vcombine.high %v486_v51, %v490_v52  ;;  %v478_v61 = vld [vmem:[#allocation3 + $0x800] sm:$0xff]  ;;  %v12148_v2 = vcombine.low %v486_v51, %v490_v52  ;;  %v11982_v56 = vcombine.low %v319_v33, %v323_v35  ;;  %v391_v27 = vld [vmem:[#allocation3 + $0x548] sm:$0xff] }
  0xf0   :  { %v482_v62 = vld [vmem:[#allocation3 + $0x820] sm:$0xff] }
  0xf1   :  { %2691 = vmatpush1.bf16.msra.mxu0 %v12172_v41  ;;  %v12141_v4 = vcombine.high %v478_v61, %v482_v62  ;;  %v598_v5 = vld [vmem:[#allocation3 + $0xbc0] sm:$0xff]  ;;  %v12140_v10 = vcombine.low %v478_v61, %v482_v62  ;;  %v311_v41 = vld [vmem:[#allocation3 + $0x2c8] sm:$0xff] }
  0xf2   :  { %2734 = vmatpush1.bf16.msra.mxu1 %v11918_v42  ;;  %2692 = vmatprep.subr.bf16.mxu0 %v12165_v43  ;;  %v602_v6 = vld [vmem:[#allocation3 + $0xbe0] sm:$0xff]  ;;  %v11983_v42 = vcombine.high %v319_v33, %v323_v35  ;;  %v315_v43 = vld [vmem:[#allocation3 + $0x2e8] sm:$0xff] }
  0xf3   :  { %2735 = vmatprep.subr.bf16.mxu1 %v11911_v46  ;;  %v12261_v13 = vcombine.high %v598_v5, %v602_v6  ;;  %v590_v14 = vld [vmem:[#allocation3 + $0xb80] sm:$0xff]  ;;  %v12260_v19 = vcombine.low %v598_v5, %v602_v6  ;;  %v11974_v52 = vcombine.low %v311_v41, %v315_v43  ;;  %v383_v35 = vld [vmem:[#allocation3 + $0x508] sm:$0xff] }
  0xf4   :  { %v594_v15 = vld [vmem:[#allocation3 + $0xba0] sm:$0xff] }
  0xf5   :  { %2693 = vmatpush1.bf16.msra.mxu0 %v12164_v48  ;;  %v12253_v21 = vcombine.high %v590_v14, %v594_v15  ;;  %v582_v23 = vld [vmem:[#allocation3 + $0xb40] sm:$0xff]  ;;  %v12252_v28 = vcombine.low %v590_v14, %v594_v15  ;;  %v303_v48 = vld [vmem:[#allocation3 + $0x288] sm:$0xff] }
  0xf6   :  { %2736 = vmatpush1.bf16.msra.mxu1 %v11910_v49  ;;  %2694 = vmatprep.subr.bf16.mxu0 %v12157_v50  ;;  %v586_v24 = vld [vmem:[#allocation3 + $0xb60] sm:$0xff]  ;;  %v11975_v49 = vcombine.high %v311_v41, %v315_v43  ;;  %v307_v50 = vld [vmem:[#allocation3 + $0x2a8] sm:$0xff] }
  0xf7   :  { %2737 = vmatprep.subr.bf16.mxu1 %v11903_v54  ;;  %v12245_v30 = vcombine.high %v582_v23, %v586_v24  ;;  %v574_v31 = vld [vmem:[#allocation3 + $0xb00] sm:$0xff]  ;;  %v12244_v36 = vcombine.low %v582_v23, %v586_v24  ;;  %v11966_v62 = vcombine.low %v303_v48, %v307_v50  ;;  %v531_v23 = vld [vmem:[#allocation3 + $0x9a8] sm:$0xff] }
  0xf8   :  { %v578_v32 = vld [vmem:[#allocation3 + $0xb20] sm:$0xff]  ;;  %v379_v43 = vld [vmem:[#allocation3 + $0x4e8] sm:$0xff] }
  0xf9   :  { %2695 = vmatpush1.bf16.msra.mxu0 %v12156_v57  ;;  %v12237_v38 = vcombine.high %v574_v31, %v578_v32  ;;  %v566_v39 = vld [vmem:[#allocation3 + $0xac0] sm:$0xff]  ;;  %v12236_v44 = vcombine.low %v574_v31, %v578_v32  ;;  %v295_v57 = vld [vmem:[#allocation3 + $0x248] sm:$0xff] }
  0xfa   :  { %2738 = vmatpush1.bf16.msra.mxu1 %v11902_v58  ;;  %2696 = vmatprep.subr.bf16.mxu0 %v12149_v60  ;;  %v570_v40 = vld [vmem:[#allocation3 + $0xae0] sm:$0xff]  ;;  %v11967_v58 = vcombine.high %v303_v48, %v307_v50  ;;  %v299_v60 = vld [vmem:[#allocation3 + $0x268] sm:$0xff] }
  0xfb   :  { %2739 = vmatprep.subr.bf16.mxu1 %v11895_v0  ;;  %v12229_v45 = vcombine.high %v566_v39, %v570_v40  ;;  %v558_v46 = vld [vmem:[#allocation3 + $0xa80] sm:$0xff]  ;;  %v12228_v51 = vcombine.low %v566_v39, %v570_v40  ;;  %v11958_v6 = vcombine.low %v295_v57, %v299_v60  ;;  %v523_v31 = vld [vmem:[#allocation3 + $0x968] sm:$0xff] }
  0xfc   :  { %v562_v47 = vld [vmem:[#allocation3 + $0xaa0] sm:$0xff]  ;;  %v515_v39 = vld [vmem:[#allocation3 + $0x928] sm:$0xff] }
  0xfd   :  { %2697 = vmatpush1.bf16.msra.mxu0 %v12148_v2  ;;  %v12221_v53 = vcombine.high %v558_v46, %v562_v47  ;;  %v550_v54 = vld [vmem:[#allocation3 + $0xa40] sm:$0xff]  ;;  %v12220_v61 = vcombine.low %v558_v46, %v562_v47  ;;  %v287_v2 = vld [vmem:[#allocation3 + $0x208] sm:$0xff] }
  0xfe   :  { %2740 = vmatpush1.bf16.msra.mxu1 %v11894_v3  ;;  %2698 = vmatprep.subr.bf16.mxu0 %v12141_v4  ;;  %v554_v55 = vld [vmem:[#allocation3 + $0xa60] sm:$0xff]  ;;  %v11959_v3 = vcombine.high %v295_v57, %v299_v60  ;;  %v291_v4 = vld [vmem:[#allocation3 + $0x228] sm:$0xff] }
  0xff   :  { %2741 = vmatprep.subr.bf16.mxu1 %v11887_v8  ;;  %v12213_v63 = vcombine.high %v550_v54, %v554_v55  ;;  %v542_v0 = vld [vmem:[#allocation3 + $0xa00] sm:$0xff]  ;;  %v12212_v5 = vcombine.low %v550_v54, %v554_v55  ;;  %v407_v8 = vld [vmem:[#allocation3 + $0x5c8] sm:$0xff]  ;;  %v11950_v15 = vcombine.low %v287_v2, %v291_v4 }
 0x100   :  { %v546_v1 = vld [vmem:[#allocation3 + $0xa20] sm:$0xff]  ;;  %v12070_v24 = vcombine.low %v407_v8, %v411_v9  ;;  %v367_v48 = vld [vmem:[#allocation3 + $0x488] sm:$0xff] }
 0x101   :  { %2699 = vmatpush1.bf16.msra.mxu0 %v12140_v10  ;;  %v12205_v7 = vcombine.high %v542_v0, %v546_v1  ;;  %v535_v10 = vld [vmem:[#allocation3 + $0x9c8] sm:$0xff]  ;;  %v12204_v14 = vcombine.low %v542_v0, %v546_v1 }
 0x102   :  { %2742 = vmatpush1.bf16.msra.mxu1 %v11886_v11  ;;  %2700 = vmatprep.subr.bf16.mxu0 %v12261_v13  ;;  %v11951_v11 = vcombine.high %v287_v2, %v291_v4  ;;  %v539_v13 = vld [vmem:[#allocation3 + $0x9e8] sm:$0xff] }
 0x103   :  { %2743 = vmatprep.subr.bf16.mxu1 %v12007_v17  ;;  %v12071_v17 = vcombine.high %v407_v8, %v411_v9  ;;  %v12198_v25 = vcombine.low %v535_v10, %v539_v13  ;;  %v359_v55 = vld [vmem:[#allocation3 + $0x448] sm:$0xff] }
 0x104   :  { %v363_v57 = vld [vmem:[#allocation3 + $0x468] sm:$0xff] }
 0x105   :  { %2701 = vmatpush2.bf16.msra.mxu0 %v12260_v19  ;;  %v403_v19 = vld [vmem:[#allocation3 + $0x5a8] sm:$0xff]  ;;  %v12023_v0 = vcombine.high %v359_v55, %v363_v57 }
 0x106   :  { %2744 = vmatpush2.bf16.msra.mxu1 %v12006_v20  ;;  %2702 = vmatprep.subr.bf16.mxu0 %v12253_v21  ;;  %v527_v20 = vld [vmem:[#allocation3 + $0x988] sm:$0xff]  ;;  %v12199_v21 = vcombine.high %v535_v10, %v539_v13  ;;  %v12062_v32 = vcombine.low %v399_v18, %v403_v19 }
 0x107   :  { %2745 = vmatprep.subr.bf16.mxu1 %v11999_v26  ;;  %v12063_v26 = vcombine.high %v399_v18, %v403_v19  ;;  %v12190_v33 = vcombine.low %v527_v20, %v531_v23  ;;  %v351_v1 = vld [vmem:[#allocation3 + $0x408] sm:$0xff] }
 0x108   :  { %v355_v2 = vld [vmem:[#allocation3 + $0x428] sm:$0xff] }
 0x109   :  { %2703 = vmatpush2.bf16.msra.mxu0 %v12252_v28  ;;  %v395_v28 = vld [vmem:[#allocation3 + $0x568] sm:$0xff]  ;;  %v12015_v8 = vcombine.high %v351_v1, %v355_v2 }
 0x10a   :  { %2746 = vmatpush2.bf16.msra.mxu1 %v11998_v29  ;;  %2704 = vmatprep.subr.bf16.mxu0 %v12245_v30  ;;  %v12191_v29 = vcombine.high %v527_v20, %v531_v23  ;;  %v519_v30 = vld [vmem:[#allocation3 + $0x948] sm:$0xff]  ;;  %v12054_v40 = vcombine.low %v391_v27, %v395_v28 }
 0x10b   :  { %2747 = vmatprep.subr.bf16.mxu1 %v11991_v34  ;;  %v12055_v34 = vcombine.high %v391_v27, %v395_v28  ;;  %v471_v9 = vld [vmem:[#allocation3 + $0x7c8] sm:$0xff] }
 0x10c   :  { %v475_v10 = vld [vmem:[#allocation3 + $0x7e8] sm:$0xff] }
 0x10d   :  { %2705 = vmatpush2.bf16.msra.mxu0 %v12244_v36  ;;  %v387_v36 = vld [vmem:[#allocation3 + $0x528] sm:$0xff]  ;;  %v12135_v18 = vcombine.high %v471_v9, %v475_v10 }
 0x10e   :  { %2748 = vmatpush2.bf16.msra.mxu1 %v11990_v37  ;;  %2706 = vmatprep.subr.bf16.mxu0 %v12237_v38  ;;  %v511_v37 = vld [vmem:[#allocation3 + $0x908] sm:$0xff]  ;;  %v12183_v38 = vcombine.high %v519_v30, %v523_v31  ;;  %v12047_v41 = vcombine.high %v383_v35, %v387_v36  ;;  %v12046_v46 = vcombine.low %v383_v35, %v387_v36 }
 0x10f   :  { %2749 = vmatprep.subr.bf16.mxu1 %v11983_v42  ;;  %v375_v42 = vld [vmem:[#allocation3 + $0x4c8] sm:$0xff]  ;;  %v12174_v47 = vcombine.low %v511_v37, %v515_v39 }
 0x110   :  { %v463_v19 = vld [vmem:[#allocation3 + $0x788] sm:$0xff] }
 0x111   :  { %2707 = vmatpush2.bf16.msra.mxu0 %v12236_v44  ;;  %v503_v44 = vld [vmem:[#allocation3 + $0x8c8] sm:$0xff] }
 0x112   :  { %2750 = vmatpush2.bf16.msra.mxu1 %v11982_v56  ;;  %2708 = vmatprep.subr.bf16.mxu0 %v12229_v45  ;;  %v12175_v56 = vcombine.high %v511_v37, %v515_v39  ;;  %v507_v45 = vld [vmem:[#allocation3 + $0x8e8] sm:$0xff] }
 0x113   :  { %2751 = vmatprep.subr.bf16.mxu1 %v11975_v49  ;;  %v495_v49 = vld [vmem:[#allocation3 + $0x888] sm:$0xff]  ;;  %v12167_v50 = vcombine.high %v503_v44, %v507_v45 }
 0x114   :  { %v467_v20 = vld [vmem:[#allocation3 + $0x7a8] sm:$0xff] }
 0x115   :  { %2709 = vmatpush2.bf16.msra.mxu0 %v12228_v51  ;;  %v499_v51 = vld [vmem:[#allocation3 + $0x8a8] sm:$0xff]  ;;  %v12127_v27 = vcombine.high %v463_v19, %v467_v20 }
 0x116   :  { %2752 = vmatpush2.bf16.msra.mxu1 %v11974_v52  ;;  %2710 = vmatprep.subr.bf16.mxu0 %v12221_v53  ;;  %v12038_v52 = vcombine.low %v375_v42, %v379_v43  ;;  %v12166_v53 = vcombine.low %v503_v44, %v507_v45  ;;  %v12159_v60 = vcombine.high %v495_v49, %v499_v51  ;;  %v455_v28 = vld [vmem:[#allocation3 + $0x748] sm:$0xff] }
 0x117   :  { %2753 = vmatprep.subr.bf16.mxu1 %v11967_v58  ;;  %v487_v58 = vld [vmem:[#allocation3 + $0x848] sm:$0xff] }
 0x118   :  { %v447_v36 = vld [vmem:[#allocation3 + $0x708] sm:$0xff] }
 0x119   :  { %2711 = vmatpush2.bf16.msra.mxu0 %v12220_v61  ;;  %v491_v61 = vld [vmem:[#allocation3 + $0x868] sm:$0xff] }
 0x11a   :  { %2754 = vmatpush2.bf16.msra.mxu1 %v11966_v62  ;;  %2712 = vmatprep.subr.bf16.mxu0 %v12213_v63  ;;  %v12158_v63 = vcombine.low %v495_v49, %v499_v51  ;;  %v12151_v4 = vcombine.high %v487_v58, %v491_v61  ;;  %v451_v37 = vld [vmem:[#allocation3 + $0x728] sm:$0xff] }
 0x11b   :  { %2755 = vmatprep.subr.bf16.mxu1 %v11959_v3  ;;  %v479_v3 = vld [vmem:[#allocation3 + $0x808] sm:$0xff] }
 0x11c   :  { %v443_v44 = vld [vmem:[#allocation3 + $0x6e8] sm:$0xff] }
 0x11d   :  { %2713 = vmatpush2.bf16.msra.mxu0 %v12212_v5  ;;  %v483_v5 = vld [vmem:[#allocation3 + $0x828] sm:$0xff] }
 0x11e   :  { %2756 = vmatpush2.bf16.msra.mxu1 %v11958_v6  ;;  %2714 = vmatprep.subr.bf16.mxu0 %v12205_v7  ;;  %v12022_v6 = vcombine.low %v359_v55, %v363_v57  ;;  %v12150_v7 = vcombine.low %v487_v58, %v491_v61  ;;  %v12143_v13 = vcombine.high %v479_v3, %v483_v5  ;;  %v435_v49 = vld [vmem:[#allocation3 + $0x6a8] sm:$0xff] }
 0x11f   :  { %2757 = vmatprep.subr.bf16.mxu1 %v11951_v11  ;;  %v599_v11 = vld [vmem:[#allocation3 + $0xbc8] sm:$0xff] }
 0x120   :  { %v423_v57 = vld [vmem:[#allocation3 + $0x648] sm:$0xff] }
 0x121   :  { %2715 = vmatpush2.bf16.msra.mxu0 %v12204_v14  ;;  %v603_v14 = vld [vmem:[#allocation3 + $0xbe8] sm:$0xff] }
 0x122   :  { %2758 = vmatpush2.bf16.msra.mxu1 %v11950_v15  ;;  %2770 = vmatprep.subr.bf16.mxu0 %v12071_v17  ;;  %v12014_v15 = vcombine.low %v351_v1, %v355_v2  ;;  %v12142_v17 = vcombine.low %v479_v3, %v483_v5  ;;  %v12263_v23 = vcombine.high %v599_v11, %v603_v14  ;;  %v427_v58 = vld [vmem:[#allocation3 + $0x668] sm:$0xff] }
 0x123   :  { %2813 = vmatprep.subr.bf16.mxu1 %v12199_v21  ;;  %v591_v21 = vld [vmem:[#allocation3 + $0xb88] sm:$0xff]  ;;  %v12087_v1 = vcombine.high %v423_v57, %v427_v58 }
 0x124   :  { %2717 = vmatmul.mubr.bf16.vlgmr.msra.gmra.mxu0 %v15239_v16  ;;  %v415_v2 = vld [vmem:[#allocation3 + $0x608] sm:$0xff] }
 0x125   :  { %2760 = vmatmul.mubr.bf16.vlgmr.msra.gmra.mxu1 %v15223_v12  ;;  %2771 = vmatpush1.bf16.msra.mxu0 %v12070_v24  ;;  %v12182_v12 = vcombine.low %v519_v30, %v523_v31  ;;  %v595_v24 = vld [vmem:[#allocation3 + $0xba8] sm:$0xff] }
 0x126   :  { %2814 = vmatpush1.bf16.msra.mxu1 %v12198_v25  ;;  %2772 = vmatprep.subr.bf16.mxu0 %v12063_v26  ;;  %v12134_v25 = vcombine.low %v471_v9, %v475_v10  ;;  %v12262_v26 = vcombine.low %v599_v11, %v603_v14  ;;  %v583_v30 = vld [vmem:[#allocation3 + $0xb48] sm:$0xff]  ;;  %v12255_v31 = vcombine.high %v591_v21, %v595_v24  ;;  %v280_v10 = vld [vmem:[#allocation3 + $0x1d0] sm:$0xff] }
 0x127   :  { %2815 = vmatprep.subr.bf16.mxu1 %v12191_v29  ;;  %2802 = vmatprep.mubr.bf16.mxu0 %v15216_v59  ;;  %v12039_v59 = vcombine.high %v375_v42, %v379_v43  ;;  %v459_v29 = vld [vmem:[#allocation3 + $0x768] sm:$0xff]  ;;  %v12111_v42 = vcombine.high %v447_v36, %v451_v37  ;;  %v284_v11 = vld [vmem:[#allocation3 + $0x1f0] sm:$0xff] }
 0x128   :  { %2845 = vmatprep.mubr.bf16.mxu1 %v15231_v22  ;;  %v371_v22 = vld [vmem:[#allocation3 + $0x4a8] sm:$0xff]  ;;  %v12119_v35 = vcombine.high %v455_v28, %v459_v29 }
 0x129   :  { %2773 = vmatpush1.bf16.msra.mxu0 %v12062_v32  ;;  %v12031_v54 = vcombine.high %v367_v48, %v371_v22  ;;  %v12030_v62 = vcombine.low %v367_v48, %v371_v22  ;;  %v587_v32 = vld [vmem:[#allocation3 + $0xb68] sm:$0xff] }
 0x12a   :  { %2816 = vmatpush1.bf16.msra.mxu1 %v12190_v33  ;;  %2774 = vmatprep.subr.bf16.mxu0 %v12055_v34  ;;  %v12126_v33 = vcombine.low %v463_v19, %v467_v20  ;;  %v12254_v34 = vcombine.low %v591_v21, %v595_v24  ;;  %v12247_v39 = vcombine.high %v583_v30, %v587_v32  ;;  %v439_v43 = vld [vmem:[#allocation3 + $0x6c8] sm:$0xff]  ;;  %v272_v20 = vld [vmem:[#allocation3 + $0x190] sm:$0xff] }
 0x12b   :  { %2817 = vmatprep.subr.bf16.mxu1 %v12183_v38  ;;  %v575_v38 = vld [vmem:[#allocation3 + $0xb08] sm:$0xff]  ;;  %v12103_v48 = vcombine.high %v439_v43, %v443_v44  ;;  %v11945_v19 = vcombine.high %v280_v10, %v284_v11  ;;  %v276_v21 = vld [vmem:[#allocation3 + $0x1b0] sm:$0xff] }
 0x12c   :  { %v431_v22 = vld [vmem:[#allocation3 + $0x688] sm:$0xff] }
 0x12d   :  { %2775 = vmatpush1.bf16.msra.mxu0 %v12054_v40  ;;  %v579_v40 = vld [vmem:[#allocation3 + $0xb28] sm:$0xff]  ;;  %v12095_v55 = vcombine.high %v431_v22, %v435_v49 }
 0x12e   :  { %2818 = vmatpush1.bf16.msra.mxu1 %v12182_v12  ;;  %2776 = vmatprep.subr.bf16.mxu0 %v12047_v41  ;;  %v12118_v12 = vcombine.low %v455_v28, %v459_v29  ;;  %v12246_v41 = vcombine.low %v583_v30, %v587_v32  ;;  %v12239_v45 = vcombine.high %v575_v38, %v579_v40  ;;  %v419_v3 = vld [vmem:[#allocation3 + $0x628] sm:$0xff]  ;;  %v264_v29 = vld [vmem:[#allocation3 + $0x150] sm:$0xff] }
 0x12f   :  { %2819 = vmatprep.subr.bf16.mxu1 %v12175_v56  ;;  %v567_v56 = vld [vmem:[#allocation3 + $0xac8] sm:$0xff]  ;;  %v12079_v9 = vcombine.high %v415_v2, %v419_v3  ;;  %v11937_v28 = vcombine.high %v272_v20, %v276_v21  ;;  %v268_v30 = vld [vmem:[#allocation3 + $0x170] sm:$0xff] }
 0x131   :  { %2777 = vmatpush1.bf16.msra.mxu0 %v12046_v46  ;;  %v571_v46 = vld [vmem:[#allocation3 + $0xae8] sm:$0xff] }
 0x132   :  { %2820 = vmatpush1.bf16.msra.mxu1 %v12174_v47  ;;  %2778 = vmatprep.subr.bf16.mxu0 %v12039_v59  ;;  %v12110_v47 = vcombine.low %v447_v36, %v451_v37  ;;  %v12238_v59 = vcombine.low %v575_v38, %v579_v40  ;;  %v12231_v51 = vcombine.high %v567_v56, %v571_v46  ;;  %v256_v38 = vld [vmem:[#allocation3 + $0x110] sm:$0xff] }
 0x133   :  { %2821 = vmatprep.subr.bf16.mxu1 %v12167_v50  ;;  %v559_v50 = vld [vmem:[#allocation3 + $0xa88] sm:$0xff]  ;;  %v11929_v37 = vcombine.high %v264_v29, %v268_v30  ;;  %v384_v40 = vld [vmem:[#allocation3 + $0x510] sm:$0xff] }
 0x135   :  { %2779 = vmatpush1.bf16.msra.mxu0 %v12038_v52  ;;  %v563_v52 = vld [vmem:[#allocation3 + $0xaa8] sm:$0xff] }
 0x136   :  { %2822 = vmatpush1.bf16.msra.mxu1 %v12166_v53  ;;  %2780 = vmatprep.subr.bf16.mxu0 %v12031_v54  ;;  %v12102_v53 = vcombine.low %v439_v43, %v443_v44  ;;  %v12230_v54 = vcombine.low %v567_v56, %v571_v46  ;;  %v12223_v61 = vcombine.high %v559_v50, %v563_v52  ;;  %v252_v46 = vld [vmem:[#allocation3 + $0xf0] sm:$0xff] }
 0x137   :  { %2823 = vmatprep.subr.bf16.mxu1 %v12159_v60  ;;  %v551_v60 = vld [vmem:[#allocation3 + $0xa48] sm:$0xff]  ;;  %v11928_v43 = vcombine.low %v264_v29, %v268_v30 }
 0x139   :  { %2781 = vmatpush1.bf16.msra.mxu0 %v12030_v62  ;;  %v555_v62 = vld [vmem:[#allocation3 + $0xa68] sm:$0xff] }
 0x13a   :  { %2824 = vmatpush1.bf16.msra.mxu1 %v12158_v63  ;;  %2782 = vmatprep.subr.bf16.mxu0 %v12023_v0  ;;  %v12094_v63 = vcombine.low %v431_v22, %v435_v49  ;;  %v12222_v0 = vcombine.low %v559_v50, %v563_v52  ;;  %v12215_v5 = vcombine.high %v551_v60, %v555_v62  ;;  %v244_v52 = vld [vmem:[#allocation3 + $0xb0] sm:$0xff] }
 0x13b   :  { %2825 = vmatprep.subr.bf16.mxu1 %v12151_v4  ;;  %v543_v4 = vld [vmem:[#allocation3 + $0xa08] sm:$0xff] }
 0x13d   :  { %2783 = vmatpush1.bf16.msra.mxu0 %v12022_v6  ;;  %v547_v6 = vld [vmem:[#allocation3 + $0xa28] sm:$0xff] }
 0x13e   :  { %2826 = vmatpush1.bf16.msra.mxu1 %v12150_v7  ;;  %2784 = vmatprep.subr.bf16.mxu0 %v12015_v8  ;;  %v12086_v7 = vcombine.low %v423_v57, %v427_v58  ;;  %v12214_v8 = vcombine.low %v551_v60, %v555_v62  ;;  %v12207_v14 = vcombine.high %v543_v4, %v547_v6  ;;  %v236_v62 = vld [vmem:[#allocation3 + $0x70] sm:$0xff] }
 0x13f   :  { %2827 = vmatprep.subr.bf16.mxu1 %v12143_v13  ;;  %v408_v13 = vld [vmem:[#allocation3 + $0x5d0] sm:$0xff] }
 0x141   :  { %2785 = vmatpush1.bf16.msra.mxu0 %v12014_v15  ;;  %v412_v15 = vld [vmem:[#allocation3 + $0x5f0] sm:$0xff] }
 0x142   :  { %2828 = vmatpush1.bf16.msra.mxu1 %v12142_v17  ;;  %2786 = vmatprep.subr.bf16.mxu0 %v12135_v18  ;;  %v12078_v17 = vcombine.low %v415_v2, %v419_v3  ;;  %v12206_v18 = vcombine.low %v543_v4, %v547_v6  ;;  %v12073_v24 = vcombine.high %v408_v13, %v412_v15  ;;  %v228_v6 = vld [vmem:[#allocation3 + $0x30] sm:$0xff] }
 0x143   :  { %2829 = vmatprep.subr.bf16.mxu1 %v12263_v23  ;;  %v400_v23 = vld [vmem:[#allocation3 + $0x590] sm:$0xff] }
 0x145   :  { %2787 = vmatpush2.bf16.msra.mxu0 %v12134_v25  ;;  %v404_v25 = vld [vmem:[#allocation3 + $0x5b0] sm:$0xff] }
 0x146   :  { %2830 = vmatpush2.bf16.msra.mxu1 %v12262_v26  ;;  %2788 = vmatprep.subr.bf16.mxu0 %v12127_v27  ;;  %v11944_v26 = vcombine.low %v280_v10, %v284_v11  ;;  %v12072_v27 = vcombine.low %v408_v13, %v412_v15  ;;  %v12065_v32 = vcombine.high %v400_v23, %v404_v25  ;;  %v348_v15 = vld [vmem:[#allocation3 + $0x3f0] sm:$0xff] }
 0x147   :  { %2831 = vmatprep.subr.bf16.mxu1 %v12255_v31  ;;  %v392_v31 = vld [vmem:[#allocation3 + $0x550] sm:$0xff]  ;;  %v12064_v36 = vcombine.low %v400_v23, %v404_v25 }
 0x148   :  { %v340_v25 = vld [vmem:[#allocation3 + $0x3b0] sm:$0xff] }
 0x149   :  { %2789 = vmatpush2.bf16.msra.mxu0 %v12126_v33  ;;  %v396_v33 = vld [vmem:[#allocation3 + $0x570] sm:$0xff] }
 0x14a   :  { %2832 = vmatpush2.bf16.msra.mxu1 %v12254_v34  ;;  %2790 = vmatprep.subr.bf16.mxu0 %v12119_v35  ;;  %v15248_v34 = vld [vmem:[%s15814_s17 + $0x8] ss:$24 sps:$4 sm:$0xff]   ;;  %v11936_v35 = vcombine.low %v272_v20, %v276_v21  ;;  %v12056_v44 = vcombine.low %v392_v31, %v396_v33 }
 0x14b   :  { %2833 = vmatprep.subr.bf16.mxu1 %v12247_v39  ;;  %v260_v39 = vld [vmem:[#allocation3 + $0x130] sm:$0xff] }
 0x14c   :  { %v11921_v56 = vcombine.high %v256_v38, %v260_v39  ;;  %v11920_v22 = vcombine.low %v256_v38, %v260_v39 }
 0x14d   :  { %2791 = vmatpush2.bf16.msra.mxu0 %v12118_v12  ;;  %v12057_v12 = vcombine.high %v392_v31, %v396_v33  ;;  %v332_v33 = vld [vmem:[#allocation3 + $0x370] sm:$0xff] }
 0x14e   :  { %2834 = vmatpush2.bf16.msra.mxu1 %v12246_v41  ;;  %2792 = vmatprep.subr.bf16.mxu0 %v12111_v42  ;;  %v388_v41 = vld [vmem:[#allocation3 + $0x530] sm:$0xff]  ;;  %v15255_v42 = vld [vmem:[%s15814_s17 + $0x4] ss:$24 sps:$4 sm:$0xff]  }
 0x14f   :  { %2835 = vmatprep.subr.bf16.mxu1 %v12239_v45  ;;  %v248_v45 = vld [vmem:[#allocation3 + $0xd0] sm:$0xff]  ;;  %v12048_v49 = vcombine.low %v384_v40, %v388_v41 }
 0x150   :  { %v11913_v50 = vcombine.high %v248_v45, %v252_v46  ;;  %v11912_v57 = vcombine.low %v248_v45, %v252_v46 }
 0x151   :  { %2793 = vmatpush2.bf16.msra.mxu0 %v12110_v47  ;;  %v376_v47 = vld [vmem:[#allocation3 + $0x4d0] sm:$0xff] }
 0x152   :  { %2836 = vmatpush2.bf16.msra.mxu1 %v12238_v59  ;;  %2794 = vmatprep.subr.bf16.mxu0 %v12103_v48  ;;  %v12049_v59 = vcombine.high %v384_v40, %v388_v41  ;;  %v380_v48 = vld [vmem:[#allocation3 + $0x4f0] sm:$0xff] }
 0x153   :  { %2837 = vmatprep.subr.bf16.mxu1 %v12231_v51  ;;  %v240_v51 = vld [vmem:[#allocation3 + $0x90] sm:$0xff]  ;;  %v12040_v58 = vcombine.low %v376_v47, %v380_v48 }
 0x154   :  { %v11905_v60 = vcombine.high %v240_v51, %v244_v52  ;;  %v11904_v2 = vcombine.low %v240_v51, %v244_v52  ;;  %v324_v41 = vld [vmem:[#allocation3 + $0x330] sm:$0xff] }
 0x155   :  { %2795 = vmatpush2.bf16.msra.mxu0 %v12102_v53  ;;  %v368_v53 = vld [vmem:[#allocation3 + $0x490] sm:$0xff] }
 0x156   :  { %2838 = vmatpush2.bf16.msra.mxu1 %v12230_v54  ;;  %2796 = vmatprep.subr.bf16.mxu0 %v12095_v55  ;;  %v12041_v54 = vcombine.high %v376_v47, %v380_v48  ;;  %v372_v55 = vld [vmem:[#allocation3 + $0x4b0] sm:$0xff] }
 0x157   :  { %2839 = vmatprep.subr.bf16.mxu1 %v12223_v61  ;;  %v232_v61 = vld [vmem:[#allocation3 + $0x50] sm:$0xff]  ;;  %v12032_v3 = vcombine.low %v368_v53, %v372_v55 }
 0x158   :  { %v11897_v4 = vcombine.high %v232_v61, %v236_v62  ;;  %v11896_v10 = vcombine.low %v232_v61, %v236_v62  ;;  %v312_v47 = vld [vmem:[#allocation3 + $0x2d0] sm:$0xff] }
 0x159   :  { %2797 = vmatpush2.bf16.msra.mxu0 %v12094_v63  ;;  %v360_v63 = vld [vmem:[#allocation3 + $0x450] sm:$0xff] }
 0x15a   :  { %2840 = vmatpush2.bf16.msra.mxu1 %v12222_v0  ;;  %2798 = vmatprep.subr.bf16.mxu0 %v12087_v1  ;;  %v12033_v0 = vcombine.high %v368_v53, %v372_v55  ;;  %v364_v1 = vld [vmem:[#allocation3 + $0x470] sm:$0xff] }
 0x15b   :  { %2841 = vmatprep.subr.bf16.mxu1 %v12215_v5  ;;  %v224_v5 = vld [vmem:[#allocation3 + $0x10] sm:$0xff]  ;;  %v12024_v11 = vcombine.low %v360_v63, %v364_v1 }
 0x15c   :  { %v11889_v13 = vcombine.high %v224_v5, %v228_v6  ;;  %v11888_v20 = vcombine.low %v224_v5, %v228_v6  ;;  %v440_v48 = vld [vmem:[#allocation3 + $0x6d0] sm:$0xff]  ;;  %v608_v5 = vlaneseq }
 0x15d   :  { %2799 = vmatpush2.bf16.msra.mxu0 %v12086_v7  ;;  %v352_v7 = vld [vmem:[#allocation3 + $0x410] sm:$0xff] }
 0x15e   :  { %2842 = vmatpush2.bf16.msra.mxu1 %v12214_v8  ;;  %2800 = vmatprep.subr.bf16.mxu0 %v12079_v9  ;;  %v12025_v8 = vcombine.high %v360_v63, %v364_v1  ;;  %v356_v9 = vld [vmem:[#allocation3 + $0x430] sm:$0xff] }
 0x15f   :  { %2843 = vmatprep.subr.bf16.mxu1 %v12207_v14  ;;  %v344_v14 = vld [vmem:[#allocation3 + $0x3d0] sm:$0xff]  ;;  %v12016_v21 = vcombine.low %v352_v7, %v356_v9 }
 0x160   :  { %v12009_v23 = vcombine.high %v344_v14, %v348_v15  ;;  %v12008_v29 = vcombine.low %v344_v14, %v348_v15  ;;  %v304_v53 = vld [vmem:[#allocation3 + $0x290] sm:$0xff]  ;;  %v15261_v15 = vshrl.u32 %v608_v5, 7  ;;  %v253_v5 = vld [vmem:[#allocation3 + $0xf8] sm:$0xff] }
 0x161   :  { %2801 = vmatpush2.bf16.msra.mxu0 %v12078_v17  ;;  %v472_v17 = vld [vmem:[#allocation3 + $0x7d0] sm:$0xff] }
 0x162   :  { %2844 = vmatpush2.bf16.msra.mxu1 %v12206_v18  ;;  %2856 = vmatprep.subr.bf16.mxu0 %v11945_v19  ;;  %v12017_v18 = vcombine.high %v352_v7, %v356_v9  ;;  %v476_v19 = vld [vmem:[#allocation3 + $0x7f0] sm:$0xff]  ;;  %vm9950_vm0 = vcmp.lt.s32.totalorder %v15261_v15, 2 }
 0x163   :  { %2899 = vmatprep.subr.bf16.mxu1 %v12073_v24  ;;  %v336_v24 = vld [vmem:[#allocation3 + $0x390] sm:$0xff]  ;;  %v12136_v30 = vcombine.low %v472_v17, %v476_v19 }
 0x164   :  { %2803 = vmatmul.mubr.bf16.vlgmr.msra.gmra.mxu0 %v15248_v34  ;;  %v12001_v31 = vcombine.high %v336_v24, %v340_v25  ;;  %v12000_v38 = vcombine.low %v336_v24, %v340_v25  ;;  %v432_v55 = vld [vmem:[#allocation3 + $0x690] sm:$0xff]  ;;  %v285_v24 = vld [vmem:[#allocation3 + $0x1f8] sm:$0xff]  ;;  %v606_v25 = vld [vmem:[#allocation5] sm:$0xff] }
 0x165   :  { %2846 = vmatmul.mubr.bf16.vlgmr.msra.gmra.mxu1 %v15239_v16  ;;  %2857 = vmatpush1.bf16.msra.mxu0 %v11944_v26  ;;  %v14773_v16 = vld [vmem:[%s15814_s17 + $0xc] ss:$24 sps:$4 sm:$0xff]   ;;  %v464_v26 = vld [vmem:[#allocation3 + $0x790] sm:$0xff] }
 0x166   :  { %2900 = vmatpush1.bf16.msra.mxu1 %v12072_v27  ;;  %2858 = vmatprep.subr.bf16.mxu0 %v11937_v28  ;;  %v12137_v27 = vcombine.high %v472_v17, %v476_v19  ;;  %v468_v28 = vld [vmem:[#allocation3 + $0x7b0] sm:$0xff] }
 0x167   :  { %2901 = vmatprep.subr.bf16.mxu1 %v12065_v32  ;;  %2888 = vmatprep.mubr.bf16.mxu0 %v15255_v42  ;;  %v328_v32 = vld [vmem:[#allocation3 + $0x350] sm:$0xff]  ;;  %v12128_v39 = vcombine.low %v464_v26, %v468_v28 }
 0x168   :  { %2931 = vmatprep.mubr.bf16.mxu1 %v14773_v16  ;;  %v11993_v40 = vcombine.high %v328_v32, %v332_v33  ;;  %v448_v16 = vld [vmem:[#allocation3 + $0x710] sm:$0xff] }
 0x169   :  { %2859 = vmatpush1.bf16.msra.mxu0 %v11936_v35  ;;  %v456_v35 = vld [vmem:[#allocation3 + $0x750] sm:$0xff] }
 0x16a   :  { %2902 = vmatpush1.bf16.msra.mxu1 %v12064_v36  ;;  %2860 = vmatprep.subr.bf16.mxu0 %v11929_v37  ;;  %v12129_v36 = vcombine.high %v464_v26, %v468_v28  ;;  %v460_v37 = vld [vmem:[#allocation3 + $0x770] sm:$0xff] }
 0x16b   :  { %2903 = vmatprep.subr.bf16.mxu1 %v12057_v12  ;;  %v320_v12 = vld [vmem:[#allocation3 + $0x310] sm:$0xff]  ;;  %v12120_v45 = vcombine.low %v456_v35, %v460_v37 }
 0x16c   :  { %v11985_v46 = vcombine.high %v320_v12, %v324_v41  ;;  %v296_v63 = vld [vmem:[#allocation3 + $0x250] sm:$0xff] }
 0x16d   :  { %2861 = vmatpush1.bf16.msra.mxu0 %v11928_v43  ;;  %v12121_v43 = vcombine.high %v456_v35, %v460_v37  ;;  %v424_v1 = vld [vmem:[#allocation3 + $0x650] sm:$0xff]  ;;  %v277_v35 = vld [vmem:[#allocation3 + $0x1b8] sm:$0xff] }
 0x16e   :  { %2904 = vmatpush1.bf16.msra.mxu1 %v12056_v44  ;;  %2862 = vmatprep.subr.bf16.mxu0 %v11921_v56  ;;  %v452_v44 = vld [vmem:[#allocation3 + $0x730] sm:$0xff]  ;;  %v11992_v56 = vcombine.low %v328_v32, %v332_v33  ;;  %v273_v32 = vld [vmem:[#allocation3 + $0x198] sm:$0xff] }
 0x16f   :  { %2905 = vmatprep.subr.bf16.mxu1 %v12049_v59  ;;  %v316_v59 = vld [vmem:[#allocation3 + $0x2f0] sm:$0xff]  ;;  %v12112_v51 = vcombine.low %v448_v16, %v452_v44 }
 0x170   :  { %v11977_v52 = vcombine.high %v312_v47, %v316_v59  ;;  %v292_v9 = vld [vmem:[#allocation3 + $0x230] sm:$0xff] }
 0x171   :  { %2863 = vmatpush1.bf16.msra.mxu0 %v11920_v22  ;;  %v12113_v22 = vcombine.high %v448_v16, %v452_v44  ;;  %v536_v19 = vld [vmem:[#allocation3 + $0x9d0] sm:$0xff]  ;;  %v265_v44 = vld [vmem:[#allocation3 + $0x158] sm:$0xff] }
 0x172   :  { %2906 = vmatpush1.bf16.msra.mxu1 %v12048_v49  ;;  %2864 = vmatprep.subr.bf16.mxu0 %v11913_v50  ;;  %v444_v49 = vld [vmem:[#allocation3 + $0x6f0] sm:$0xff]  ;;  %v11984_v50 = vcombine.low %v320_v12, %v324_v41 }
 0x173   :  { %2907 = vmatprep.subr.bf16.mxu1 %v12041_v54  ;;  %v308_v54 = vld [vmem:[#allocation3 + $0x2b0] sm:$0xff]  ;;  %v12104_v61 = vcombine.low %v440_v48, %v444_v49 }
 0x174   :  { %v11969_v62 = vcombine.high %v304_v53, %v308_v54  ;;  %v520_v12 = vld [vmem:[#allocation3 + $0x950] sm:$0xff] }
 0x175   :  { %2865 = vmatpush1.bf16.msra.mxu0 %v11912_v57  ;;  %v12105_v57 = vcombine.high %v440_v48, %v444_v49  ;;  %v524_v41 = vld [vmem:[#allocation3 + $0x970] sm:$0xff]  ;;  %v11938_v48 = vcombine.low %v273_v32, %v277_v35 }
 0x176   :  { %2908 = vmatpush1.bf16.msra.mxu1 %v12040_v58  ;;  %2866 = vmatprep.subr.bf16.mxu0 %v11905_v60  ;;  %v436_v58 = vld [vmem:[#allocation3 + $0x6b0] sm:$0xff]  ;;  %v11976_v60 = vcombine.low %v312_v47, %v316_v59 }
 0x177   :  { %2909 = vmatprep.subr.bf16.mxu1 %v12033_v0  ;;  %v300_v0 = vld [vmem:[#allocation3 + $0x270] sm:$0xff]  ;;  %v12096_v6 = vcombine.low %v432_v55, %v436_v58 }
 0x178   :  { %v11961_v7 = vcombine.high %v296_v63, %v300_v0  ;;  %v11960_v14 = vcombine.low %v296_v63, %v300_v0 }
 0x179   :  { %2867 = vmatpush1.bf16.msra.mxu0 %v11904_v2  ;;  %v12097_v2 = vcombine.high %v432_v55, %v436_v58  ;;  %v257_v55 = vld [vmem:[#allocation3 + $0x118] sm:$0xff] }
 0x17a   :  { %2910 = vmatpush1.bf16.msra.mxu1 %v12032_v3  ;;  %2868 = vmatprep.subr.bf16.mxu0 %v11897_v4  ;;  %v428_v3 = vld [vmem:[#allocation3 + $0x670] sm:$0xff]  ;;  %v11968_v4 = vcombine.low %v304_v53, %v308_v54 }
 0x17b   :  { %2911 = vmatprep.subr.bf16.mxu1 %v12025_v8  ;;  %v288_v8 = vld [vmem:[#allocation3 + $0x210] sm:$0xff]  ;;  %v12088_v17 = vcombine.low %v424_v1, %v428_v3 }
 0x17c   :  { %v11952_v26 = vcombine.low %v288_v8, %v292_v9  ;;  %v516_v53 = vld [vmem:[#allocation3 + $0x930] sm:$0xff] }
 0x17d   :  { %2869 = vmatpush1.bf16.msra.mxu0 %v11896_v10  ;;  %v416_v10 = vld [vmem:[#allocation3 + $0x610] sm:$0xff] }
 0x17e   :  { %2912 = vmatpush1.bf16.msra.mxu1 %v12024_v11  ;;  %2870 = vmatprep.subr.bf16.mxu0 %v11889_v13  ;;  %v12089_v11 = vcombine.high %v424_v1, %v428_v3  ;;  %v420_v13 = vld [vmem:[#allocation3 + $0x630] sm:$0xff] }
 0x17f   :  { %2913 = vmatprep.subr.bf16.mxu1 %v12017_v18  ;;  %v11953_v18 = vcombine.high %v288_v8, %v292_v9  ;;  %v12080_v28 = vcombine.low %v416_v10, %v420_v13  ;;  %v508_v3 = vld [vmem:[#allocation3 + $0x8f0] sm:$0xff] }
 0x180   :  { %v496_v9 = vld [vmem:[#allocation3 + $0x890] sm:$0xff] }
 0x181   :  { %2871 = vmatpush1.bf16.msra.mxu0 %v11888_v20  ;;  %v540_v20 = vld [vmem:[#allocation3 + $0x9f0] sm:$0xff] }
 0x182   :  { %2914 = vmatpush1.bf16.msra.mxu1 %v12016_v21  ;;  %2872 = vmatprep.subr.bf16.mxu0 %v12009_v23  ;;  %v281_v21 = vld [vmem:[#allocation3 + $0x1d8] sm:$0xff]  ;;  %v12081_v23 = vcombine.high %v416_v10, %v420_v13  ;;  %v12200_v37 = vcombine.low %v536_v19, %v540_v20  ;;  %v500_v10 = vld [vmem:[#allocation3 + $0x8b0] sm:$0xff] }
 0x183   :  { %2915 = vmatprep.subr.bf16.mxu1 %v12137_v27  ;;  %v15264_v27 = vsub.s32 0, %v15261_v15  ;;  %v11947_v33 = vcombine.high %v281_v21, %v285_v24  ;;  %v245_v13 = vld [vmem:[#allocation3 + $0xb8] sm:$0xff] }
 0x185   :  { %2873 = vmatpush2.bf16.msra.mxu0 %v12008_v29  ;;  %v12201_v29 = vcombine.high %v536_v19, %v540_v20  ;;  %v488_v19 = vld [vmem:[#allocation3 + $0x850] sm:$0xff] }
 0x186   :  { %2916 = vmatpush2.bf16.msra.mxu1 %v12136_v30  ;;  %2874 = vmatprep.subr.bf16.mxu0 %v12001_v31  ;;  %v528_v30 = vld [vmem:[#allocation3 + $0x990] sm:$0xff] }
 0x187   :  { %2917 = vmatprep.subr.bf16.mxu1 %v12129_v36  ;;  %v532_v31 = vld [vmem:[#allocation3 + $0x9b0] sm:$0xff]  ;;  %v611_v36 = vrot.slane %v606_v25, %v15264_v27  ;;  %v12160_v25 = vcombine.low %v496_v9, %v500_v10 }
 0x188   :  { %v12192_v47 = vcombine.low %v528_v30, %v532_v31  ;;  %v492_v20 = vld [vmem:[#allocation3 + $0x870] sm:$0xff] }
 0x189   :  { %2875 = vmatpush2.bf16.msra.mxu0 %v12000_v38  ;;  %v11946_v38 = vcombine.low %v281_v21, %v285_v24  ;;  %v233_v21 = vld [vmem:[#allocation3 + $0x58] sm:$0xff] }
 0x18a   :  { %2918 = vmatpush2.bf16.msra.mxu1 %v12128_v39  ;;  %2876 = vmatprep.subr.bf16.mxu0 %v11993_v40  ;;  %v12193_v39 = vcombine.high %v528_v30, %v532_v31  ;;  %v11939_v40 = vcombine.high %v273_v32, %v277_v35  ;;  %v237_v24 = vld [vmem:[#allocation3 + $0x78] sm:$0xff]  ;;  %v484_v30 = vld [vmem:[#allocation3 + $0x830] sm:$0xff]  ;;  %v12152_v35 = vcombine.low %v488_v19, %v492_v20 }
 0x18b   :  { %2919 = vmatprep.subr.bf16.mxu1 %v12121_v43  ;;  %v15270_v43 = vld [vmem:[%s15814_s17] ss:$24 sps:$4 sm:$0xff]   ;;  %v11899_v32 = vcombine.high %v233_v21, %v237_v24 }
 0x18c   :  { %v225_v31 = vld [vmem:[#allocation3 + $0x18] sm:$0xff] }
 0x18d   :  { %2877 = vmatpush2.bf16.msra.mxu0 %v11992_v56  ;;  %v269_v56 = vld [vmem:[#allocation3 + $0x178] sm:$0xff] }
 0x18e   :  { %2920 = vmatpush2.bf16.msra.mxu1 %v12120_v45  ;;  %2878 = vmatprep.subr.bf16.mxu0 %v11985_v46 }
 0x18f   :  { %2921 = vmatprep.subr.bf16.mxu1 %v12113_v22  ;;  %v12185_v22 = vcombine.high %v520_v12, %v524_v41 }
 0x191   :  { %2879 = vmatpush2.bf16.msra.mxu0 %v11984_v50 }
 0x192   :  { %2922 = vmatpush2.bf16.msra.mxu1 %v12112_v51  ;;  %2880 = vmatprep.subr.bf16.mxu0 %v11977_v52  ;;  %v11931_v51 = vcombine.high %v265_v44, %v269_v56  ;;  %v512_v52 = vld [vmem:[#allocation3 + $0x910] sm:$0xff] }
 0x193   :  { %2923 = vmatprep.subr.bf16.mxu1 %v12105_v57  ;;  %v261_v57 = vld [vmem:[#allocation3 + $0x138] sm:$0xff]  ;;  %v12177_v63 = vcombine.high %v512_v52, %v516_v53 }
 0x194   :  { %v11923_v1 = vcombine.high %v257_v55, %v261_v57 }
 0x195   :  { %2881 = vmatpush2.bf16.msra.mxu0 %v11976_v60  ;;  %v12184_v60 = vcombine.low %v520_v12, %v524_v41  ;;  %v349_v41 = vld [vmem:[#allocation3 + $0x3f8] sm:$0xff] }
 0x196   :  { %2924 = vmatpush2.bf16.msra.mxu1 %v12104_v61  ;;  %2882 = vmatprep.subr.bf16.mxu0 %v11969_v62  ;;  %v11930_v62 = vcombine.low %v265_v44, %v269_v56 }
 0x197   :  { %2925 = vmatprep.subr.bf16.mxu1 %v12097_v2  ;;  %v504_v2 = vld [vmem:[#allocation3 + $0x8d0] sm:$0xff] }
 0x199   :  { %2883 = vmatpush2.bf16.msra.mxu0 %v11968_v4  ;;  %v249_v4 = vld [vmem:[#allocation3 + $0xd8] sm:$0xff] }
 0x19a   :  { %2926 = vmatpush2.bf16.msra.mxu1 %v12096_v6  ;;  %2884 = vmatprep.subr.bf16.mxu0 %v11961_v7  ;;  %v12176_v6 = vcombine.low %v512_v52, %v516_v53  ;;  %v12169_v7 = vcombine.high %v504_v2, %v508_v3  ;;  %v11915_v8 = vcombine.high %v249_v4, %v253_v5 }
 0x19b   :  { %2927 = vmatprep.subr.bf16.mxu1 %v12089_v11  ;;  %v241_v11 = vld [vmem:[#allocation3 + $0x98] sm:$0xff] }
 0x19d   :  { %2885 = vmatpush2.bf16.msra.mxu0 %v11960_v14  ;;  %v12168_v14 = vcombine.low %v504_v2, %v508_v3  ;;  %v580_v2 = vld [vmem:[#allocation3 + $0xb30] sm:$0xff]  ;;  %v321_v3 = vld [vmem:[#allocation3 + $0x318] sm:$0xff] }
 0x19e   :  { %2928 = vmatpush2.bf16.msra.mxu1 %v12088_v17  ;;  %2886 = vmatprep.subr.bf16.mxu0 %v11953_v18  ;;  %v11914_v17 = vcombine.low %v249_v4, %v253_v5  ;;  %v12161_v18 = vcombine.high %v496_v9, %v500_v10  ;;  %v325_v5 = vld [vmem:[#allocation3 + $0x338] sm:$0xff]  ;;  %v572_v9 = vld [vmem:[#allocation3 + $0xaf0] sm:$0xff] }
 0x19f   :  { %2929 = vmatprep.subr.bf16.mxu1 %v12081_v23  ;;  %v11907_v23 = vcombine.high %v241_v11, %v245_v13  ;;  %v313_v10 = vld [vmem:[#allocation3 + $0x2d8] sm:$0xff] }
 0x1a1   :  { %2887 = vmatpush2.bf16.msra.mxu0 %v11952_v26  ;;  %v11906_v26 = vcombine.low %v241_v11, %v245_v13  ;;  %v11987_v11 = vcombine.high %v321_v3, %v325_v5  ;;  %v317_v13 = vld [vmem:[#allocation3 + $0x2f8] sm:$0xff] }
 0x1a2   :  { %2930 = vmatpush2.bf16.msra.mxu1 %v12080_v28  ;;  %2942 = vmatprep.subr.bf16.mxu0 %v12201_v29  ;;  %v12153_v28 = vcombine.high %v488_v19, %v492_v20  ;;  %v480_v29 = vld [vmem:[#allocation3 + $0x810] sm:$0xff] }
 0x1a3   :  { %2985 = vmatprep.subr.bf16.mxu1 %v11947_v33  ;;  %v229_v33 = vld [vmem:[#allocation3 + $0x38] sm:$0xff]  ;;  %v560_v19 = vld [vmem:[#allocation3 + $0xa90] sm:$0xff] }
 0x1a4   :  { %v2632_v16 = vpop.f32.mrf.mxu0  ;;  %2889 = vmatmul.mubr.bf16.vlgmr.msra.gmra.mxu0 %v15270_v43  ;;  %v11891_v12 = vcombine.high %v225_v31, %v229_v33  ;;  %v11890_v44 = vcombine.low %v225_v31, %v229_v33  ;;  %v564_v20 = vld [vmem:[#allocation3 + $0xab0] sm:$0xff]  ;;  %v297_v31 = vld [vmem:[#allocation3 + $0x258] sm:$0xff] }
 0x1a5   :  { %v2633_v45 = vadd.f32 %v2632_v16, %v611_v36  ;;  %v2675_v46 = vpop.f32.mrf.mxu1  ;;  %2932 = vmatmul.mubr.bf16.vlgmr.msra.gmra.mxu1 %v15248_v34  ;;  %2943 = vmatpush1.bf16.msra.mxu0 %v12200_v37  ;;  %v15283_v34 = vld [vmem:[%s15814_s17 + $0x14] ss:$24 sps:$4 sm:$0xff]   ;;  %v12145_v37 = vcombine.high %v480_v29, %v484_v30  ;;  %v12144_v16 = vcombine.low %v480_v29, %v484_v30  ;;  %v301_v33 = vld [vmem:[#allocation3 + $0x278] sm:$0xff] }
 0x1a6   :  { %2986 = vmatpush1.bf16.msra.mxu1 %v11946_v38  ;;  %v15274_v59 = vpop.f32.mrf.mxu0  ;;  %2944 = vmatprep.subr.bf16.mxu0 %v12193_v39  ;;  %v600_v38 = vld [vmem:[#allocation3 + $0xbd0] sm:$0xff] }
 0x1a7   :  { %v15276_v49 = vadd.f32 %v2675_v46, %v2633_v45  ;;  %v15278_v50 = vpop.f32.mrf.mxu1  ;;  %2987 = vmatprep.subr.bf16.mxu1 %v11939_v40  ;;  %2974 = vmatprep.mubr.bf16.mxu0 %v15283_v34  ;;  %v604_v39 = vld [vmem:[#allocation3 + $0xbf0] sm:$0xff]  ;;  %v345_v40 = vld [vmem:[#allocation3 + $0x3d8] sm:$0xff] }
 0x1a8   :  { %v2636_v54 = vpop.f32.mrf.mxu0  ;;  %3017 = vmatprep.mubr.bf16.mxu1 %v15255_v42  ;;  %v11922_v42 = vcombine.low %v257_v55, %v261_v57  ;;  %v12265_v56 = vcombine.high %v600_v38, %v604_v39  ;;  %v592_v45 = vld [vmem:[#allocation3 + $0xb90] sm:$0xff]  ;;  %v12010_v52 = vcombine.low %v345_v40, %v349_v41  ;;  %v329_v57 = vld [vmem:[#allocation3 + $0x358] sm:$0xff] }
 0x1a9   :  { %v2637_v58 = vadd.f32 %v2636_v54, %v611_v36  ;;  %2945 = vmatpush1.bf16.msra.mxu0 %v12192_v47  ;;  %v2679_v61 = vpop.f32.mrf.mxu1  ;;  %v11898_v36 = vcombine.low %v233_v21, %v237_v24  ;;  %v596_v46 = vld [vmem:[#allocation3 + $0xbb0] sm:$0xff]  ;;  %v337_v47 = vld [vmem:[#allocation3 + $0x398] sm:$0xff] }
 0x1aa   :  { %2988 = vmatpush1.bf16.msra.mxu1 %v11938_v48  ;;  %2946 = vmatprep.subr.bf16.mxu0 %v12185_v22  ;;  %v12011_v48 = vcombine.high %v345_v40, %v349_v41  ;;  %v341_v22 = vld [vmem:[#allocation3 + $0x3b8] sm:$0xff]  ;;  %v12257_v53 = vcombine.high %v592_v45, %v596_v46  ;;  %v584_v54 = vld [vmem:[#allocation3 + $0xb50] sm:$0xff] }
 0x1ab   :  { %v15287_v0 = vadd.f32 %v2679_v61, %v2637_v58  ;;  %2989 = vmatprep.subr.bf16.mxu1 %v11931_v51  ;;  %v12264_v51 = vcombine.low %v600_v38, %v604_v39  ;;  %v588_v55 = vld [vmem:[#allocation3 + $0xb70] sm:$0xff]  ;;  %v12003_v58 = vcombine.high %v337_v47, %v341_v22  ;;  %v12256_v61 = vcombine.low %v592_v45, %v596_v46  ;;  %v305_v21 = vld [vmem:[#allocation3 + $0x298] sm:$0xff] }
 0x1ac   :  { %v309_v24 = vld [vmem:[#allocation3 + $0x2b8] sm:$0xff]  ;;  %v552_v29 = vld [vmem:[#allocation3 + $0xa50] sm:$0xff] }
 0x1ad   :  { %2947 = vmatpush1.bf16.msra.mxu0 %v12184_v60  ;;  %v333_v60 = vld [vmem:[#allocation3 + $0x378] sm:$0xff]  ;;  %v556_v30 = vld [vmem:[#allocation3 + $0xa70] sm:$0xff] }
 0x1ae   :  { %2990 = vmatpush1.bf16.msra.mxu1 %v11930_v62  ;;  %2948 = vmatprep.subr.bf16.mxu0 %v12177_v63  ;;  %v12002_v62 = vcombine.low %v337_v47, %v341_v22  ;;  %v12249_v63 = vcombine.high %v584_v54, %v588_v55  ;;  %v11995_v4 = vcombine.high %v329_v57, %v333_v60  ;;  %v544_v38 = vld [vmem:[#allocation3 + $0xa10] sm:$0xff]  ;;  %v289_v40 = vld [vmem:[#allocation3 + $0x218] sm:$0xff] }
 0x1af   :  { %2991 = vmatprep.subr.bf16.mxu1 %v11923_v1  ;;  %v576_v1 = vld [vmem:[#allocation3 + $0xb10] sm:$0xff]  ;;  %v293_v41 = vld [vmem:[#allocation3 + $0x238] sm:$0xff] }
 0x1b0   :  { %v548_v39 = vld [vmem:[#allocation3 + $0xa30] sm:$0xff]  ;;  %v409_v45 = vld [vmem:[#allocation3 + $0x5d8] sm:$0xff] }
 0x1b1   :  { %2949 = vmatpush1.bf16.msra.mxu0 %v12176_v6  ;;  %v12248_v6 = vcombine.low %v584_v54, %v588_v55  ;;  %v413_v46 = vld [vmem:[#allocation3 + $0x5f8] sm:$0xff] }
 0x1b2   :  { %2992 = vmatpush1.bf16.msra.mxu1 %v11922_v42  ;;  %2950 = vmatprep.subr.bf16.mxu0 %v12169_v7  ;;  %v11994_v42 = vcombine.low %v329_v57, %v333_v60  ;;  %v12241_v7 = vcombine.high %v576_v1, %v580_v2  ;;  %v537_v47 = vld [vmem:[#allocation3 + $0x9d8] sm:$0xff] }
 0x1b3   :  { %2993 = vmatprep.subr.bf16.mxu1 %v11915_v8  ;;  %v568_v8 = vld [vmem:[#allocation3 + $0xad0] sm:$0xff]  ;;  %v541_v22 = vld [vmem:[#allocation3 + $0x9f8] sm:$0xff] }
 0x1b4   :  { %v401_v54 = vld [vmem:[#allocation3 + $0x598] sm:$0xff] }
 0x1b5   :  { %2951 = vmatpush1.bf16.msra.mxu0 %v12168_v14  ;;  %v12240_v14 = vcombine.low %v576_v1, %v580_v2  ;;  %v405_v55 = vld [vmem:[#allocation3 + $0x5b8] sm:$0xff]  ;;  %v15289_v1 = vpop.f32.mrf.mxu0  ;;  %v12202_v2 = vcombine.low %v537_v47, %v541_v22 }
 0x1b6   :  { %2994 = vmatpush1.bf16.msra.mxu1 %v11914_v17  ;;  %2952 = vmatprep.subr.bf16.mxu0 %v12161_v18  ;;  %v11986_v17 = vcombine.low %v321_v3, %v325_v5  ;;  %v12233_v18 = vcombine.high %v568_v8, %v572_v9  ;;  %v529_v57 = vld [vmem:[#allocation3 + $0x998] sm:$0xff]  ;;  %v12067_v3 = vcombine.high %v401_v54, %v405_v55 }
 0x1b7   :  { %2995 = vmatprep.subr.bf16.mxu1 %v11907_v23  ;;  %v11979_v23 = vcombine.high %v313_v10, %v317_v13  ;;  %v533_v60 = vld [vmem:[#allocation3 + $0x9b8] sm:$0xff] }
 0x1b8   :  { %v525_v5 = vld [vmem:[#allocation3 + $0x978] sm:$0xff] }
 0x1b9   :  { %2953 = vmatpush1.bf16.msra.mxu0 %v12160_v25  ;;  %v12232_v25 = vcombine.low %v568_v8, %v572_v9  ;;  %v12066_v9 = vcombine.low %v401_v54, %v405_v55  ;;  %v357_v54 = vld [vmem:[#allocation3 + $0x438] sm:$0xff] }
 0x1ba   :  { %2996 = vmatpush1.bf16.msra.mxu1 %v11906_v26  ;;  %2954 = vmatprep.subr.bf16.mxu0 %v12153_v28  ;;  %v11978_v26 = vcombine.low %v313_v10, %v317_v13  ;;  %v12225_v28 = vcombine.high %v560_v19, %v564_v20  ;;  %v385_v10 = vld [vmem:[#allocation3 + $0x518] sm:$0xff] }
 0x1bb   :  { %2997 = vmatprep.subr.bf16.mxu1 %v11899_v32  ;;  %v11971_v32 = vcombine.high %v305_v21, %v309_v24 }
 0x1bd   :  { %2955 = vmatpush1.bf16.msra.mxu0 %v12152_v35  ;;  %v12224_v35 = vcombine.low %v560_v19, %v564_v20  ;;  %v517_v19 = vld [vmem:[#allocation3 + $0x938] sm:$0xff] }
 0x1be   :  { %2998 = vmatpush1.bf16.msra.mxu1 %v11898_v36  ;;  %2956 = vmatprep.subr.bf16.mxu0 %v12145_v37  ;;  %v11970_v36 = vcombine.low %v305_v21, %v309_v24  ;;  %v12217_v37 = vcombine.high %v552_v29, %v556_v30 }
 0x1bf   :  { %2999 = vmatprep.subr.bf16.mxu1 %v11891_v12  ;;  %v11963_v12 = vcombine.high %v297_v31, %v301_v33 }
 0x1c1   :  { %2957 = vmatpush1.bf16.msra.mxu0 %v12144_v16  ;;  %v12216_v16 = vcombine.low %v552_v29, %v556_v30  ;;  %v505_v30 = vld [vmem:[#allocation3 + $0x8d8] sm:$0xff] }
 0x1c2   :  { %3000 = vmatpush1.bf16.msra.mxu1 %v11890_v44  ;;  %2958 = vmatprep.subr.bf16.mxu0 %v12265_v56  ;;  %v11962_v44 = vcombine.low %v297_v31, %v301_v33  ;;  %v12209_v56 = vcombine.high %v544_v38, %v548_v39  ;;  %v509_v31 = vld [vmem:[#allocation3 + $0x8f8] sm:$0xff] }
 0x1c3   :  { %3001 = vmatprep.subr.bf16.mxu1 %v12011_v48  ;;  %v11955_v48 = vcombine.high %v289_v40, %v293_v41 }
 0x1c5   :  { %2959 = vmatpush2.bf16.msra.mxu0 %v12264_v51  ;;  %v12208_v51 = vcombine.low %v544_v38, %v548_v39  ;;  %v369_v38 = vld [vmem:[#allocation3 + $0x498] sm:$0xff] }
 0x1c6   :  { %3002 = vmatpush2.bf16.msra.mxu1 %v12010_v52  ;;  %2960 = vmatprep.subr.bf16.mxu0 %v12257_v53  ;;  %v11954_v52 = vcombine.low %v289_v40, %v293_v41  ;;  %v12075_v53 = vcombine.high %v409_v45, %v413_v46  ;;  %v12171_v40 = vcombine.high %v505_v30, %v509_v31  ;;  %v497_v41 = vld [vmem:[#allocation3 + $0x898] sm:$0xff] }
 0x1c7   :  { %3003 = vmatprep.subr.bf16.mxu1 %v12003_v58  ;;  %v12203_v58 = vcombine.high %v537_v47, %v541_v22  ;;  %v493_v22 = vld [vmem:[#allocation3 + $0x878] sm:$0xff] }
 0x1c9   :  { %2961 = vmatpush2.bf16.msra.mxu0 %v12256_v61  ;;  %v12074_v61 = vcombine.low %v409_v45, %v413_v46  ;;  %v365_v45 = vld [vmem:[#allocation3 + $0x478] sm:$0xff]  ;;  %v12170_v46 = vcombine.low %v505_v30, %v509_v31 }
 0x1ca   :  { %3004 = vmatpush2.bf16.msra.mxu1 %v12002_v62  ;;  %2962 = vmatprep.subr.bf16.mxu0 %v12249_v63  ;;  %v393_v62 = vld [vmem:[#allocation3 + $0x558] sm:$0xff] }
 0x1cb   :  { %3005 = vmatprep.subr.bf16.mxu1 %v11995_v4  ;;  %v397_v63 = vld [vmem:[#allocation3 + $0x578] sm:$0xff] }
 0x1cc   :  { %v521_v4 = vld [vmem:[#allocation3 + $0x958] sm:$0xff]  ;;  %v12058_v24 = vcombine.low %v393_v62, %v397_v63 }
 0x1cd   :  { %2963 = vmatpush2.bf16.msra.mxu0 %v12248_v6  ;;  %v12195_v6 = vcombine.high %v529_v57, %v533_v60  ;;  %v12187_v20 = vcombine.high %v521_v4, %v525_v5  ;;  %v453_v30 = vld [vmem:[#allocation3 + $0x738] sm:$0xff] }
 0x1ce   :  { %3006 = vmatpush2.bf16.msra.mxu1 %v11994_v42  ;;  %2964 = vmatprep.subr.bf16.mxu0 %v12241_v7  ;;  %v15294_v7 = vld [vmem:[%s15814_s17 + $0x10] ss:$24 sps:$4 sm:$0xff]  }
 0x1cf   :  { %3007 = vmatprep.subr.bf16.mxu1 %v11987_v11  ;;  %v389_v11 = vld [vmem:[#allocation3 + $0x538] sm:$0xff] }
 0x1d0   :  { %v12051_v29 = vcombine.high %v385_v10, %v389_v11 }
 0x1d1   :  { %2965 = vmatpush2.bf16.msra.mxu0 %v12240_v14  ;;  %v12194_v14 = vcombine.low %v529_v57, %v533_v60  ;;  %v485_v60 = vld [vmem:[#allocation3 + $0x838] sm:$0xff] }
 0x1d2   :  { %3008 = vmatpush2.bf16.msra.mxu1 %v11986_v17  ;;  %2966 = vmatprep.subr.bf16.mxu0 %v12233_v18  ;;  %v12059_v17 = vcombine.high %v393_v62, %v397_v63  ;;  %v513_v18 = vld [vmem:[#allocation3 + $0x918] sm:$0xff] }
 0x1d3   :  { %3009 = vmatprep.subr.bf16.mxu1 %v11979_v23  ;;  %v12179_v33 = vcombine.high %v513_v18, %v517_v19  ;;  %v473_v63 = vld [vmem:[#allocation3 + $0x7d8] sm:$0xff] }
 0x1d5   :  { %2967 = vmatpush2.bf16.msra.mxu0 %v12232_v25  ;;  %v377_v25 = vld [vmem:[#allocation3 + $0x4d8] sm:$0xff] }
 0x1d6   :  { %3010 = vmatpush2.bf16.msra.mxu1 %v11978_v26  ;;  %2968 = vmatprep.subr.bf16.mxu0 %v12225_v28  ;;  %v381_v26 = vld [vmem:[#allocation3 + $0x4f8] sm:$0xff]  ;;  %v12186_v28 = vcombine.low %v521_v4, %v525_v5 }
 0x1d7   :  { %3011 = vmatprep.subr.bf16.mxu1 %v11971_v32  ;;  %v601_v5 = vld [vmem:[#allocation3 + $0xbd8] sm:$0xff] }
 0x1d9   :  { %2969 = vmatpush2.bf16.msra.mxu0 %v12224_v35 }
 0x1da   :  { %3012 = vmatpush2.bf16.msra.mxu1 %v11970_v36  ;;  %2970 = vmatprep.subr.bf16.mxu0 %v12217_v37  ;;  %v12043_v37 = vcombine.high %v377_v25, %v381_v26 }
 0x1db   :  { %3013 = vmatprep.subr.bf16.mxu1 %v11963_v12  ;;  %v373_v12 = vld [vmem:[#allocation3 + $0x4b8] sm:$0xff] }
 0x1dc   :  { %v12035_v47 = vcombine.high %v369_v38, %v373_v12 }
 0x1dd   :  { %2971 = vmatpush2.bf16.msra.mxu0 %v12216_v16  ;;  %v501_v16 = vld [vmem:[#allocation3 + $0x8b8] sm:$0xff] }
 0x1de   :  { %3014 = vmatpush2.bf16.msra.mxu1 %v11962_v44  ;;  %2972 = vmatprep.subr.bf16.mxu0 %v12209_v56  ;;  %v12042_v44 = vcombine.low %v377_v25, %v381_v26  ;;  %v361_v56 = vld [vmem:[#allocation3 + $0x458] sm:$0xff]  ;;  %v12162_v55 = vcombine.low %v497_v41, %v501_v16 }
 0x1df   :  { %3015 = vmatprep.subr.bf16.mxu1 %v11955_v48  ;;  %v489_v48 = vld [vmem:[#allocation3 + $0x858] sm:$0xff]  ;;  %v12027_v57 = vcombine.high %v361_v56, %v365_v45  ;;  %v12026_v62 = vcombine.low %v361_v56, %v365_v45 }
 0x1e0   :  { %v589_v25 = vld [vmem:[#allocation3 + $0xb78] sm:$0xff] }
 0x1e1   :  { %2973 = vmatpush2.bf16.msra.mxu0 %v12208_v51  ;;  %v12163_v51 = vcombine.high %v497_v41, %v501_v16  ;;  %v573_v41 = vld [vmem:[#allocation3 + $0xaf8] sm:$0xff] }
 0x1e2   :  { %3016 = vmatpush2.bf16.msra.mxu1 %v11954_v52  ;;  %3028 = vmatprep.subr.bf16.mxu0 %v12075_v53  ;;  %v12034_v52 = vcombine.low %v369_v38, %v373_v12  ;;  %v353_v53 = vld [vmem:[#allocation3 + $0x418] sm:$0xff] }
 0x1e3   :  { %3071 = vmatprep.subr.bf16.mxu1 %v12203_v58  ;;  %v481_v58 = vld [vmem:[#allocation3 + $0x818] sm:$0xff]  ;;  %v12019_v4 = vcombine.high %v353_v53, %v357_v54 }
 0x1e4   :  { %v2718_v42 = vpop.f32.mrf.mxu0  ;;  %2975 = vmatmul.mubr.bf16.vlgmr.msra.gmra.mxu0 %v15294_v7  ;;  %v569_v12 = vld [vmem:[#allocation3 + $0xad8] sm:$0xff] }
 0x1e5   :  { %v2719_v8 = vadd.f32 %v2718_v42, %v15276_v49  ;;  %3018 = vmatmul.mubr.bf16.vlgmr.msra.gmra.mxu1 %v15270_v43  ;;  %3029 = vmatpush1.bf16.msra.mxu0 %v12074_v61  ;;  %v14777_v49 = vld [vmem:[%s15814_s17 + $0xc] ss:$24 sps:$4 sm:$0xff]   ;;  %v12155_v61 = vcombine.high %v489_v48, %v493_v22  ;;  %v12147_v42 = vcombine.high %v481_v58, %v485_v60  ;;  %v433_v45 = vld [vmem:[#allocation3 + $0x698] sm:$0xff] }
 0x1e6   :  { %3072 = vmatpush1.bf16.msra.mxu1 %v12202_v2  ;;  %v15299_v13 = vpop.f32.mrf.mxu0  ;;  %3030 = vmatprep.subr.bf16.mxu0 %v12067_v3  ;;  %v477_v2 = vld [vmem:[#allocation3 + $0x7f8] sm:$0xff]  ;;  %v12154_v3 = vcombine.low %v489_v48, %v493_v22 }
 0x1e7   :  { %3073 = vmatprep.subr.bf16.mxu1 %v12195_v6  ;;  %3060 = vmatprep.mubr.bf16.mxu0 %v14777_v49  ;;  %v3114_v21 = vmul.f32 0.2, %v2719_v8  ;;  %v605_v6 = vld [vmem:[#allocation3 + $0xbf8] sm:$0xff] }
 0x1e8   :  { %v2722_v43 = vpop.f32.mrf.mxu0  ;;  %3103 = vmatprep.mubr.bf16.mxu1 %v15283_v34  ;;  %v12050_v34 = vcombine.low %v385_v10, %v389_v11  ;;  %v469_v10 = vld [vmem:[#allocation3 + $0x7b8] sm:$0xff]  ;;  %v12146_v11 = vcombine.low %v481_v58, %v485_v60 }
 0x1e9   :  { %v2723_v23 = vadd.f32 %v2722_v43, %v15287_v0  ;;  %3031 = vmatpush1.bf16.msra.mxu0 %v12066_v9  ;;  %v3130_v35 = vmax.f32 %v2719_v8, %v3114_v21  ;;  %v12178_v0 = vcombine.low %v513_v18, %v517_v19  ;;  %v12018_v8 = vcombine.low %v353_v53, %v357_v54  ;;  %v465_v9 = vld [vmem:[#allocation3 + $0x798] sm:$0xff]  ;;  %v15311_v53 = vld [vmem:[#allocation5] sm:$0xff] }
 0x1ea   :  { %3074 = vmatpush1.bf16.msra.mxu1 %v12194_v14  ;;  %3032 = vmatprep.subr.bf16.mxu0 %v12059_v17  ;;  %v12139_v14 = vcombine.high %v473_v63, %v477_v2  ;;  %v593_v17 = vld [vmem:[#allocation3 + $0xb98] sm:$0xff]  ;;  %v12267_v19 = vcombine.high %v601_v5, %v605_v6  ;;  %v12266_v21 = vcombine.low %v601_v5, %v605_v6  ;;  %v2681_v5 = vpop.f32.mrf.mxu1  ;;  %v2724_v6 = vpop.f32.mrf.mxu0 }
 0x1eb   :  { %v3122_v32 = vmul.f32 0.2, %v2723_v23  ;;  %3075 = vmatprep.subr.bf16.mxu1 %v12187_v20  ;;  %v597_v18 = vld [vmem:[#allocation3 + $0xbb8] sm:$0xff]  ;;  %v12138_v20 = vcombine.low %v473_v63, %v477_v2 }
 0x1ec   :  { %v457_v49 = vld [vmem:[#allocation3 + $0x758] sm:$0xff]  ;;  %v12259_v26 = vcombine.high %v593_v17, %v597_v18  ;;  %v12258_v31 = vcombine.low %v593_v17, %v597_v18  ;;  %v15317_v18 = vpop.f32.mrf.mxu1 }
 0x1ed   :  { %v3138_v36 = vmax.f32 %v2723_v23, %v3122_v32  ;;  %3033 = vmatpush1.bf16.msra.mxu0 %v12058_v24  ;;  %v461_v43 = vld [vmem:[#allocation3 + $0x778] sm:$0xff]  ;;  %v12131_v23 = vcombine.high %v465_v9, %v469_v10 }
 0x1ee   :  { %3076 = vmatpush1.bf16.msra.mxu1 %v12186_v28  ;;  %3034 = vmatprep.subr.bf16.mxu0 %v12051_v29  ;;  %v585_v24 = vld [vmem:[#allocation3 + $0xb58] sm:$0xff]  ;;  %v12130_v28 = vcombine.low %v465_v9, %v469_v10  ;;  %v12123_v32 = vcombine.high %v457_v49, %v461_v43 }
 0x1ef   :  { %v15306_v39 = vpack.c.bf16 %v3138_v36, %v3130_v35  ;;  %3077 = vmatprep.subr.bf16.mxu1 %v12179_v33  ;;  %v449_v29 = vld [vmem:[#allocation3 + $0x718] sm:$0xff]  ;;  %v12251_v36 = vcombine.high %v585_v24, %v589_v25  ;;  %v12250_v38 = vcombine.low %v585_v24, %v589_v25  ;;  %v2763_v24 = vpop.f32.mrf.mxu1 }
 0x1f0   :  { %v577_v33 = vld [vmem:[#allocation3 + $0xb18] sm:$0xff]  ;;  %v12114_v56 = vcombine.low %v449_v29, %v453_v30 }
 0x1f1   :  { %3035 = vmatpush1.bf16.msra.mxu0 %v12050_v34  ;;  %v581_v35 = vld [vmem:[#allocation3 + $0xb38] sm:$0xff]  ;;  %v12122_v34 = vcombine.low %v457_v49, %v461_v43 }
 0x1f2   :  { %3078 = vmatpush1.bf16.msra.mxu1 %v12178_v0  ;;  %3036 = vmatprep.subr.bf16.mxu0 %v12043_v37  ;;  %v441_v0 = vld [vmem:[#allocation3 + $0x6d8] sm:$0xff]  ;;  %v12243_v16 = vcombine.high %v577_v33, %v581_v35 }
 0x1f3   :  { %3079 = vmatprep.subr.bf16.mxu1 %v12171_v40  ;;  %v445_v37 = vld [vmem:[#allocation3 + $0x6f8] sm:$0xff]  ;;  %v12115_v40 = vcombine.high %v449_v29, %v453_v30  ;;  %v15322_v29 = vsub.s32 3, %v15261_v15 }
 0x1f4   :  { %v12107_v48 = vcombine.high %v441_v0, %v445_v37  ;;  %v561_v22 = vld [vmem:[#allocation3 + $0xa98] sm:$0xff] }
 0x1f5   :  { %3037 = vmatpush1.bf16.msra.mxu0 %v12042_v44  ;;  %v15309_v44 = vsub.s32 1, %v15261_v15  ;;  %v429_v58 = vld [vmem:[#allocation3 + $0x678] sm:$0xff] }
 0x1f6   :  { %3080 = vmatpush1.bf16.msra.mxu1 %v12170_v46  ;;  %3038 = vmatprep.subr.bf16.mxu0 %v12035_v47  ;;  %v437_v46 = vld [vmem:[#allocation3 + $0x6b8] sm:$0xff]  ;;  %v12242_v47 = vcombine.low %v577_v33, %v581_v35 }
 0x1f7   :  { %3081 = vmatprep.subr.bf16.mxu1 %v12163_v51  ;;  %v565_v51 = vld [vmem:[#allocation3 + $0xab8] sm:$0xff]  ;;  %v615_v54 = vrot.slane %v15311_v53, %v15309_v44 }
 0x1f8   :  { %v553_v63 = vld [vmem:[#allocation3 + $0xa58] sm:$0xff] }
 0x1f9   :  { %3039 = vmatpush1.bf16.msra.mxu0 %v12034_v52  ;;  %v12235_v52 = vcombine.high %v569_v12, %v573_v41  ;;  %v2639_v60 = vadd.f32 %v15289_v1, %v615_v54  ;;  %v557_v2 = vld [vmem:[#allocation3 + $0xa78] sm:$0xff]  ;;  %v12226_v1 = vcombine.low %v561_v22, %v565_v51 }
 0x1fa   :  { %3082 = vmatpush1.bf16.msra.mxu1 %v12162_v55  ;;  %3040 = vmatprep.subr.bf16.mxu0 %v12027_v57  ;;  %v12106_v55 = vcombine.low %v441_v0, %v445_v37  ;;  %v425_v57 = vld [vmem:[#allocation3 + $0x658] sm:$0xff] }
 0x1fb   :  { %3083 = vmatprep.subr.bf16.mxu1 %v12155_v61  ;;  %v12234_v61 = vcombine.low %v569_v12, %v573_v41  ;;  %v421_v9 = vld [vmem:[#allocation3 + $0x638] sm:$0xff]  ;;  %v2682_v10 = vadd.f32 %v2681_v5, %v2639_v60  ;;  %v12090_v49 = vcombine.low %v425_v57, %v429_v58 }
 0x1fc   :  { %v549_v17 = vld [vmem:[#allocation3 + $0xa38] sm:$0xff] }
 0x1fd   :  { %3041 = vmatpush1.bf16.msra.mxu0 %v12026_v62  ;;  %v12099_v62 = vcombine.high %v433_v45, %v437_v46  ;;  %v13465_v33 = vld [vmem:[#allocation7 + $0xe0] ss:$16 sps:$4 sm:$0xff]   ;;  %v13473_v0 = vld [vmem:[#allocation7 + $0xc4] ss:$16 sps:$4 sm:$0xff]  }
 0x1fe   :  { %3084 = vmatpush1.bf16.msra.mxu1 %v12154_v3  ;;  %3042 = vmatprep.subr.bf16.mxu0 %v12019_v4  ;;  %v12227_v3 = vcombine.high %v561_v22, %v565_v51  ;;  %v2635_v4 = vadd.f32 %v15274_v59, %v615_v54  ;;  %v2725_v59 = vadd.f32 %v2724_v6, %v2682_v10  ;;  %v13476_v37 = vld [vmem:[#allocation7 + $0x2c4] ss:$16 sps:$4 sm:$0xff]   ;;  %v13471_v12 = vld [vmem:[#allocation7 + $0xc0] ss:$16 sps:$4 sm:$0xff]  }
 0x1ff   :  { %3085 = vmatprep.subr.bf16.mxu1 %v12147_v42  ;;  %v12098_v42 = vcombine.low %v433_v45, %v437_v46  ;;  %v13474_v45 = vld [vmem:[#allocation7 + $0x2c0] ss:$16 sps:$4 sm:$0xff]   ;;  %v13479_v46 = vld [vmem:[#allocation7 + $0xa4] ss:$16 sps:$4 sm:$0xff]  }
 0x200   :  { %v13482_v51 = vld [vmem:[#allocation7 + $0x2a4] ss:$16 sps:$4 sm:$0xff]   ;;  %v13486_v6 = vld [vmem:[#allocation7 + $0x280] ss:$16 sps:$4 sm:$0xff]  }
 0x201   :  { %3043 = vmatpush1.bf16.msra.mxu0 %v12018_v8  ;;  %v417_v8 = vld [vmem:[#allocation3 + $0x618] sm:$0xff] }
 0x202   :  { %3086 = vmatpush1.bf16.msra.mxu1 %v12146_v11  ;;  %3044 = vmatprep.subr.bf16.mxu0 %v12139_v14  ;;  %v12091_v11 = vcombine.high %v425_v57, %v429_v58  ;;  %v545_v14 = vld [vmem:[#allocation3 + $0xa18] sm:$0xff]  ;;  %v12082_v30 = vcombine.low %v417_v8, %v421_v9 }
 0x203   :  { %3087 = vmatprep.subr.bf16.mxu1 %v12267_v19  ;;  %v12219_v19 = vcombine.high %v553_v63, %v557_v2  ;;  %v12211_v25 = vcombine.high %v545_v14, %v549_v17  ;;  %v13480_v58 = vld [vmem:[#allocation7 + $0x2a0] ss:$16 sps:$4 sm:$0xff]   ;;  %v13485_v60 = vld [vmem:[#allocation7 + $0x84] ss:$16 sps:$4 sm:$0xff]  }
 0x205   :  { %3045 = vmatpush2.bf16.msra.mxu0 %v12138_v20  ;;  %v2678_v20 = vadd.f32 %v15278_v50, %v2635_v4  ;;  %v13470_v50 = vld [vmem:[#allocation7 + $0x2e4] ss:$16 sps:$4 sm:$0xff]   ;;  %v13483_v4 = vld [vmem:[#allocation7 + $0x80] ss:$16 sps:$4 sm:$0xff]  }
 0x206   :  { %3088 = vmatpush2.bf16.msra.mxu1 %v12266_v21  ;;  %3046 = vmatprep.subr.bf16.mxu0 %v12131_v23  ;;  %v12218_v21 = vcombine.low %v553_v63, %v557_v2  ;;  %v12083_v23 = vcombine.high %v417_v8, %v421_v9  ;;  %v13488_v2 = vld [vmem:[#allocation7 + $0x284] ss:$16 sps:$4 sm:$0xff]  }
 0x207   :  { %3089 = vmatprep.subr.bf16.mxu1 %v12259_v26  ;;  %v2721_v43 = vadd.f32 %v15299_v13, %v2678_v20  ;;  %v3123_v26 = vmul.f32 0.2, %v2725_v59  ;;  %v15324_v13 = vpop.f32.mrf.mxu1  ;;  %v13491_v9 = vld [vmem:[#allocation7 + $0x64] ss:$16 sps:$4 sm:$0xff]  }
 0x208   :  { %v13497_v20 = vld [vmem:[#allocation7 + $0x44] ss:$16 sps:$4 sm:$0xff]  }
 0x209   :  { %3047 = vmatpush2.bf16.msra.mxu0 %v12130_v28  ;;  %v13467_v28 = vld [vmem:[#allocation7 + $0xe4] ss:$16 sps:$4 sm:$0xff]   ;;  %v3139_v35 = vmax.f32 %v2725_v59, %v3123_v26  ;;  %v13504_v26 = vld [vmem:[#allocation7 + $0x220] ss:$16 sps:$4 sm:$0xff]  }
 0x20a   :  { %3090 = vmatpush2.bf16.msra.mxu1 %v12258_v31  ;;  %3048 = vmatprep.subr.bf16.mxu0 %v12123_v32  ;;  %v3115_v31 = vmul.f32 0.2, %v2721_v43  ;;  %v12210_v32 = vcombine.low %v545_v14, %v549_v17  ;;  %v13492_v14 = vld [vmem:[#allocation7 + $0x260] ss:$16 sps:$4 sm:$0xff]  }
 0x20b   :  { %3091 = vmatprep.subr.bf16.mxu1 %v12251_v36  ;;  %v13468_v36 = vld [vmem:[#allocation7 + $0x2e0] ss:$16 sps:$4 sm:$0xff]  }
 0x20d   :  { %3049 = vmatpush2.bf16.msra.mxu0 %v12122_v34  ;;  %v623_v34 = vrot.slane %v15311_v53, %v15322_v29 }
 0x20e   :  { %3092 = vmatpush2.bf16.msra.mxu1 %v12250_v38  ;;  %3050 = vmatprep.subr.bf16.mxu0 %v12115_v40  ;;  %v3131_v38 = vmax.f32 %v2721_v43, %v3115_v31  ;;  %v2767_v40 = vpop.f32.mrf.mxu1  ;;  %v13495_v43 = vld [vmem:[#allocation7 + $0x40] ss:$16 sps:$4 sm:$0xff]  }
 0x20f   :  { %3093 = vmatprep.subr.bf16.mxu1 %v12243_v16  ;;  %v14779_v16 = vld [vmem:[%s15814_s17 + $0x8] ss:$24 sps:$4 sm:$0xff]  }
 0x210   :  { %v13510_v31 = vld [vmem:[#allocation7 + $0x200] ss:$16 sps:$4 sm:$0xff]  }
 0x211   :  { %3051 = vmatpush2.bf16.msra.mxu0 %v12114_v56  ;;  %v15333_v56 = vpack.c.bf16 %v3139_v35, %v3131_v38  ;;  %v13513_v35 = vld [vmem:[#allocation7 + $0x1e0] ss:$16 sps:$4 sm:$0xff]  }
 0x212   :  { %3094 = vmatpush2.bf16.msra.mxu1 %v12242_v47  ;;  %3052 = vmatprep.subr.bf16.mxu0 %v12107_v48  ;;  %v2764_v47 = vadd.f32 %v2763_v24, %v623_v34  ;;  %v13506_v24 = vld [vmem:[#allocation7 + $0x224] ss:$16 sps:$4 sm:$0xff]   ;;  %v13522_v38 = vld [vmem:[#allocation7 + $0x3c0] ss:$16 sps:$4 sm:$0xff]  }
 0x213   :  { %3095 = vmatprep.subr.bf16.mxu1 %v12235_v52 }
 0x215   :  { %3053 = vmatpush2.bf16.msra.mxu0 %v12106_v55  ;;  %v13477_v55 = vld [vmem:[#allocation7 + $0xa0] ss:$16 sps:$4 sm:$0xff]  }
 0x216   :  { %3096 = vmatpush2.bf16.msra.mxu1 %v12234_v61  ;;  %3054 = vmatprep.subr.bf16.mxu0 %v12099_v62  ;;  %v2768_v61 = vadd.f32 %v2767_v40, %v623_v34  ;;  %v13521_v34 = vld [vmem:[#allocation7 + $0x1c4] ss:$16 sps:$4 sm:$0xff]  }
 0x217   :  { %3097 = vmatprep.subr.bf16.mxu1 %v12227_v3  ;;  %v13527_v40 = vld [vmem:[#allocation7 + $0x1a4] ss:$16 sps:$4 sm:$0xff]  }
 0x219   :  { %3055 = vmatpush2.bf16.msra.mxu0 %v12098_v42 }
 0x21a   :  { %3098 = vmatpush2.bf16.msra.mxu1 %v12226_v1  ;;  %3056 = vmatprep.subr.bf16.mxu0 %v12091_v11  ;;  %v13489_v1 = vld [vmem:[#allocation7 + $0x60] ss:$16 sps:$4 sm:$0xff]   ;;  %v13494_v11 = vld [vmem:[#allocation7 + $0x264] ss:$16 sps:$4 sm:$0xff]  }
 0x21b   :  { %3099 = vmatprep.subr.bf16.mxu1 %v12219_v19 }
 0x21d   :  { %3057 = vmatpush2.bf16.msra.mxu0 %v12090_v49  ;;  %v13500_v49 = vld [vmem:[#allocation7 + $0x244] ss:$16 sps:$4 sm:$0xff]  }
 0x21e   :  { %3100 = vmatpush2.bf16.msra.mxu1 %v12218_v21  ;;  %3058 = vmatprep.subr.bf16.mxu0 %v12083_v23  ;;  %v13498_v21 = vld [vmem:[#allocation7 + $0x240] ss:$16 sps:$4 sm:$0xff]   ;;  %v13503_v23 = vld [vmem:[#allocation7 + $0x24] ss:$16 sps:$4 sm:$0xff]  }
 0x21f   :  { %3101 = vmatprep.subr.bf16.mxu1 %v12211_v25  ;;  %v13501_v25 = vld [vmem:[#allocation7 + $0x20] ss:$16 sps:$4 sm:$0xff]  }
 0x221   :  { %3059 = vmatpush2.bf16.msra.mxu0 %v12082_v30  ;;  %v13512_v30 = vld [vmem:[#allocation7 + $0x204] ss:$16 sps:$4 sm:$0xff]  }
 0x222   :  { %3102 = vmatpush2.bf16.msra.mxu1 %v12210_v32  ;;  %4712 = vmatprep.subr.bf16.mxu0 %v13467_v28  ;;  %v13509_v28 = vld [vmem:[#allocation7 + $0x4] ss:$16 sps:$4 sm:$0xff]  }
 0x223   :  { %4755 = vmatprep.subr.bf16.mxu1 %v13470_v50  ;;  %v13507_v50 = vld [vmem:[#allocation7] ss:$16 sps:$4 sm:$0xff]   ;;  %v13515_v32 = vld [vmem:[#allocation7 + $0x1e4] ss:$16 sps:$4 sm:$0xff]  }
 0x224   :  { %v15328_v41 = vpop.f32.mrf.mxu0  ;;  %3061 = vmatmul.mubr.bf16.vlgmr.msra.gmra.mxu0 %v14779_v16  ;;  %v15347_v16 = vsub.s32 2, %v15261_v15 }
 0x225   :  { %v15335_v48 = vpop.f32.mrf.mxu1  ;;  %3104 = vmatmul.mubr.bf16.vlgmr.msra.gmra.mxu1 %v15294_v7  ;;  %4713 = vmatpush1.bf16.msra.mxu0 %v13465_v33  ;;  %v13518_v33 = vld [vmem:[#allocation7 + $0x3e4] ss:$16 sps:$4 sm:$0xff]  }
 0x226   :  { %4744 = vmatprep.mubr.bf16.mxu0 %v15333_v56  ;;  %4756 = vmatpush1.bf16.msra.mxu1 %v13468_v36  ;;  %v2806_v22 = vpop.f32.mrf.mxu0  ;;  %v13516_v36 = vld [vmem:[#allocation7 + $0x3e0] ss:$16 sps:$4 sm:$0xff]  }
 0x227   :  { %v2807_v52 = vadd.f32 %v2806_v22, %v2764_v47  ;;  %v2849_v54 = vpop.f32.mrf.mxu1  ;;  %4714 = vmatprep.subr.bf16.mxu0 %v13473_v0  ;;  %4757 = vmatprep.subr.bf16.mxu1 %v13476_v37  ;;  %v13524_v0 = vld [vmem:[#allocation7 + $0x3c4] ss:$16 sps:$4 sm:$0xff]   ;;  %v13519_v37 = vld [vmem:[#allocation7 + $0x1c0] ss:$16 sps:$4 sm:$0xff]  }
 0x228   :  { %v15339_v57 = vpop.f32.mrf.mxu0  ;;  %v13533_v47 = vld [vmem:[#allocation7 + $0x184] ss:$16 sps:$4 sm:$0xff]  }
 0x229   :  { %v2850_v62 = vadd.f32 %v2849_v54, %v2807_v52  ;;  %v15341_v63 = vpop.f32.mrf.mxu1  ;;  %4715 = vmatpush1.bf16.msra.mxu0 %v13471_v12  ;;  %v13530_v12 = vld [vmem:[#allocation7 + $0x3a4] ss:$16 sps:$4 sm:$0xff]   ;;  %v619_v52 = vrot.slane %v15311_v53, %v15347_v16  ;;  %v13534_v54 = vld [vmem:[#allocation7 + $0x380] ss:$16 sps:$4 sm:$0xff]  }
 0x22a   :  { %4758 = vmatpush1.bf16.msra.mxu1 %v13474_v45  ;;  %v2810_v7 = vpop.f32.mrf.mxu0  ;;  %4716 = vmatprep.subr.bf16.mxu0 %v13479_v46  ;;  %v13525_v45 = vld [vmem:[#allocation7 + $0x1a0] ss:$16 sps:$4 sm:$0xff]   ;;  %v13536_v22 = vld [vmem:[#allocation7 + $0x384] ss:$16 sps:$4 sm:$0xff]  }
 0x22b   :  { %v2811_v3 = vadd.f32 %v2810_v7, %v2768_v61  ;;  %4759 = vmatprep.subr.bf16.mxu1 %v13482_v51  ;;  %v2853_v5 = vpop.f32.mrf.mxu1  ;;  %v3117_v42 = vmul.f32 0.2, %v2850_v62  ;;  %v13528_v46 = vld [vmem:[#allocation7 + $0x3a0] ss:$16 sps:$4 sm:$0xff]   ;;  %v2766_v61 = vadd.f32 %v15324_v13, %v619_v52  ;;  %v13545_v7 = vld [vmem:[#allocation7 + $0x144] ss:$16 sps:$4 sm:$0xff]  }
 0x22c   :  { %v13531_v51 = vld [vmem:[#allocation7 + $0x180] ss:$16 sps:$4 sm:$0xff]  }
 0x22d   :  { %v2854_v8 = vadd.f32 %v2853_v5, %v2811_v3  ;;  %4717 = vmatpush1.bf16.msra.mxu0 %v13477_v55  ;;  %v3133_v17 = vmax.f32 %v2850_v62, %v3117_v42  ;;  %v13539_v55 = vld [vmem:[#allocation7 + $0x164] ss:$16 sps:$4 sm:$0xff]   ;;  %v13540_v62 = vld [vmem:[#allocation7 + $0x360] ss:$16 sps:$4 sm:$0xff]   ;;  %v2762_v3 = vadd.f32 %v15317_v18, %v619_v52  ;;  %v2809_v53 = vadd.f32 %v15339_v57, %v2766_v61 }
 0x22e   :  { %4760 = vmatpush1.bf16.msra.mxu1 %v13480_v58  ;;  %4718 = vmatprep.subr.bf16.mxu0 %v13485_v60  ;;  %v13542_v58 = vld [vmem:[#allocation7 + $0x364] ss:$16 sps:$4 sm:$0xff]   ;;  %v13537_v60 = vld [vmem:[#allocation7 + $0x160] ss:$16 sps:$4 sm:$0xff]  }
 0x22f   :  { %v3125_v10 = vmul.f32 0.2, %v2854_v8  ;;  %4761 = vmatprep.subr.bf16.mxu1 %v13488_v2  ;;  %v13548_v2 = vld [vmem:[#allocation7 + $0x344] ss:$16 sps:$4 sm:$0xff]   ;;  %v2805_v5 = vadd.f32 %v15328_v41, %v2762_v3  ;;  %v2852_v13 = vadd.f32 %v15341_v63, %v2809_v53  ;;  %v13552_v18 = vld [vmem:[#allocation7 + $0x320] ss:$16 sps:$4 sm:$0xff]  }
 0x230   :  { %v13551_v42 = vld [vmem:[#allocation7 + $0x124] ss:$16 sps:$4 sm:$0xff]   ;;  %v13555_v41 = vld [vmem:[#allocation7 + $0x100] ss:$16 sps:$4 sm:$0xff]  }
 0x231   :  { %v3141_v19 = vmax.f32 %v2854_v8, %v3125_v10  ;;  %4719 = vmatpush1.bf16.msra.mxu0 %v13483_v4  ;;  %v13543_v4 = vld [vmem:[#allocation7 + $0x140] ss:$16 sps:$4 sm:$0xff]   ;;  %v13554_v8 = vld [vmem:[#allocation7 + $0x324] ss:$16 sps:$4 sm:$0xff]   ;;  %v2848_v10 = vadd.f32 %v15335_v48, %v2805_v5 }
 0x232   :  { %4762 = vmatpush1.bf16.msra.mxu1 %v13486_v6  ;;  %4720 = vmatprep.subr.bf16.mxu0 %v13491_v9  ;;  %v13546_v6 = vld [vmem:[#allocation7 + $0x340] ss:$16 sps:$4 sm:$0xff]   ;;  %v13560_v57 = vld [vmem:[#allocation7 + $0x304] ss:$16 sps:$4 sm:$0xff]  }
 0x233   :  { %4763 = vmatprep.subr.bf16.mxu1 %v13494_v11  ;;  %v15343_v59 = vpack.c.bf16 %v3141_v19, %v3133_v17  ;;  %v13549_v9 = vld [vmem:[#allocation7 + $0x120] ss:$16 sps:$4 sm:$0xff]   ;;  %v3124_v11 = vmul.f32 0.2, %v2852_v13  ;;  %v3116_v17 = vmul.f32 0.2, %v2848_v10 }
 0x234   :  { %v13563_v19 = vld [vmem:[#allocation7 + $0x4e4] ss:$16 sps:$4 sm:$0xff]   ;;  %v13654_v61 = vld [vmem:[#allocation7 + $0x600] ss:$16 sps:$4 sm:$0xff]  }
 0x235   :  { %4721 = vmatpush1.bf16.msra.mxu0 %v13489_v1  ;;  %4787 = vmatprep.mubr.bf16.mxu1 %v15343_v59  ;;  %v13557_v1 = vld [vmem:[#allocation7 + $0x104] ss:$16 sps:$4 sm:$0xff]   ;;  %v3140_v63 = vmax.f32 %v2852_v13, %v3124_v11  ;;  %v3132_v48 = vmax.f32 %v2848_v10, %v3116_v17  ;;  %v13660_v3 = vld [vmem:[#allocation7 + $0x7e0] ss:$16 sps:$4 sm:$0xff]  }
 0x236   :  { %4764 = vmatpush1.bf16.msra.mxu1 %v13492_v14  ;;  %4722 = vmatprep.subr.bf16.mxu0 %v13497_v20  ;;  %v13558_v14 = vld [vmem:[#allocation7 + $0x300] ss:$16 sps:$4 sm:$0xff]   ;;  %v13614_v20 = vld [vmem:[#allocation7 + $0x6e4] ss:$16 sps:$4 sm:$0xff]  }
 0x237   :  { %4765 = vmatprep.subr.bf16.mxu1 %v13500_v49  ;;  %v13561_v49 = vld [vmem:[#allocation7 + $0x4e0] ss:$16 sps:$4 sm:$0xff]   ;;  %v13584_v52 = vld [vmem:[#allocation7 + $0x404] ss:$16 sps:$4 sm:$0xff]  }
 0x238   :  { %v13668_v53 = vld [vmem:[#allocation7 + $0x7c4] ss:$16 sps:$4 sm:$0xff]   ;;  %v13684_v17 = vld [vmem:[#allocation7 + $0x760] ss:$16 sps:$4 sm:$0xff]  }
 0x239   :  { %4723 = vmatpush1.bf16.msra.mxu0 %v13495_v43  ;;  %v13566_v43 = vld [vmem:[#allocation7 + $0x4c4] ss:$16 sps:$4 sm:$0xff]  }
 0x23a   :  { %4766 = vmatpush1.bf16.msra.mxu1 %v13498_v21  ;;  %4724 = vmatprep.subr.bf16.mxu0 %v13503_v23  ;;  %v13612_v21 = vld [vmem:[#allocation7 + $0x6e0] ss:$16 sps:$4 sm:$0xff]   ;;  %v13620_v23 = vld [vmem:[#allocation7 + $0x6c4] ss:$16 sps:$4 sm:$0xff]  }
 0x23b   :  { %4767 = vmatprep.subr.bf16.mxu1 %v13506_v24  ;;  %v15357_v24 = vpack.c.bf16 %v3140_v63, %v3132_v48  ;;  %v13593_v5 = vld [vmem:[#allocation7 + $0x5a4] ss:$16 sps:$4 sm:$0xff]   ;;  %v13690_v48 = vld [vmem:[#allocation7 + $0x740] ss:$16 sps:$4 sm:$0xff]  }
 0x23c   :  { %v13596_v13 = vld [vmem:[#allocation7 + $0x584] ss:$16 sps:$4 sm:$0xff]  }
 0x23d   :  { %4725 = vmatpush1.bf16.msra.mxu0 %v13501_v25  ;;  %v13564_v25 = vld [vmem:[#allocation7 + $0x4c0] ss:$16 sps:$4 sm:$0xff]   ;;  %v13680_v10 = vld [vmem:[#allocation7 + $0x784] ss:$16 sps:$4 sm:$0xff]  }
 0x23e   :  { %4768 = vmatpush1.bf16.msra.mxu1 %v13504_v26  ;;  %4726 = vmatprep.subr.bf16.mxu0 %v13509_v28  ;;  %v13569_v26 = vld [vmem:[#allocation7 + $0x4a4] ss:$16 sps:$4 sm:$0xff]   ;;  %v13618_v28 = vld [vmem:[#allocation7 + $0x6c0] ss:$16 sps:$4 sm:$0xff]  }
 0x23f   :  { %4769 = vmatprep.subr.bf16.mxu1 %v13512_v30  ;;  %v13626_v30 = vld [vmem:[#allocation7 + $0x6a4] ss:$16 sps:$4 sm:$0xff]  }
 0x240   :  { %v13686_v11 = vld [vmem:[#allocation7 + $0x764] ss:$16 sps:$4 sm:$0xff]  }
 0x241   :  { %4727 = vmatpush1.bf16.msra.mxu0 %v13507_v50  ;;  %v13567_v50 = vld [vmem:[#allocation7 + $0x4a0] ss:$16 sps:$4 sm:$0xff]  }
 0x242   :  { %4770 = vmatpush1.bf16.msra.mxu1 %v13510_v31  ;;  %4728 = vmatprep.subr.bf16.mxu0 %v13515_v32  ;;  %v13572_v31 = vld [vmem:[#allocation7 + $0x484] ss:$16 sps:$4 sm:$0xff]   ;;  %v13624_v32 = vld [vmem:[#allocation7 + $0x6a0] ss:$16 sps:$4 sm:$0xff]  }
 0x243   :  { %4771 = vmatprep.subr.bf16.mxu1 %v13518_v33  ;;  %v13632_v33 = vld [vmem:[#allocation7 + $0x684] ss:$16 sps:$4 sm:$0xff]  }
 0x245   :  { %4729 = vmatpush2.bf16.msra.mxu0 %v13513_v35  ;;  %v13570_v35 = vld [vmem:[#allocation7 + $0x480] ss:$16 sps:$4 sm:$0xff]  }
 0x246   :  { %4772 = vmatpush2.bf16.msra.mxu1 %v13516_v36  ;;  %4730 = vmatprep.subr.bf16.mxu0 %v13521_v34  ;;  %v13575_v36 = vld [vmem:[#allocation7 + $0x464] ss:$16 sps:$4 sm:$0xff]   ;;  %v13630_v34 = vld [vmem:[#allocation7 + $0x680] ss:$16 sps:$4 sm:$0xff]  }
 0x247   :  { %4773 = vmatprep.subr.bf16.mxu1 %v13524_v0  ;;  %v13638_v0 = vld [vmem:[#allocation7 + $0x664] ss:$16 sps:$4 sm:$0xff]  }
 0x249   :  { %4731 = vmatpush2.bf16.msra.mxu0 %v13519_v37  ;;  %v13573_v37 = vld [vmem:[#allocation7 + $0x460] ss:$16 sps:$4 sm:$0xff]  }
 0x24a   :  { %4774 = vmatpush2.bf16.msra.mxu1 %v13522_v38  ;;  %4732 = vmatprep.subr.bf16.mxu0 %v13527_v40  ;;  %v13578_v38 = vld [vmem:[#allocation7 + $0x444] ss:$16 sps:$4 sm:$0xff]   ;;  %v13636_v40 = vld [vmem:[#allocation7 + $0x660] ss:$16 sps:$4 sm:$0xff]  }
 0x24b   :  { %4775 = vmatprep.subr.bf16.mxu1 %v13530_v12  ;;  %v13576_v12 = vld [vmem:[#allocation7 + $0x440] ss:$16 sps:$4 sm:$0xff]  }
 0x24d   :  { %4733 = vmatpush2.bf16.msra.mxu0 %v13525_v45  ;;  %v13644_v45 = vld [vmem:[#allocation7 + $0x644] ss:$16 sps:$4 sm:$0xff]  }
 0x24e   :  { %4776 = vmatpush2.bf16.msra.mxu1 %v13528_v46  ;;  %4734 = vmatprep.subr.bf16.mxu0 %v13533_v47  ;;  %v13581_v46 = vld [vmem:[#allocation7 + $0x424] ss:$16 sps:$4 sm:$0xff]   ;;  %v13642_v47 = vld [vmem:[#allocation7 + $0x640] ss:$16 sps:$4 sm:$0xff]  }
 0x24f   :  { %4777 = vmatprep.subr.bf16.mxu1 %v13536_v22  ;;  %v13650_v22 = vld [vmem:[#allocation7 + $0x624] ss:$16 sps:$4 sm:$0xff]  }
 0x251   :  { %4735 = vmatpush2.bf16.msra.mxu0 %v13531_v51  ;;  %v13579_v51 = vld [vmem:[#allocation7 + $0x420] ss:$16 sps:$4 sm:$0xff]  }
 0x252   :  { %4778 = vmatpush2.bf16.msra.mxu1 %v13534_v54  ;;  %4736 = vmatprep.subr.bf16.mxu0 %v13539_v55  ;;  %v13648_v54 = vld [vmem:[#allocation7 + $0x620] ss:$16 sps:$4 sm:$0xff]   ;;  %v13656_v55 = vld [vmem:[#allocation7 + $0x604] ss:$16 sps:$4 sm:$0xff]  }
 0x253   :  { %4779 = vmatprep.subr.bf16.mxu1 %v13542_v58  ;;  %v13582_v58 = vld [vmem:[#allocation7 + $0x400] ss:$16 sps:$4 sm:$0xff]  }
 0x255   :  { %4737 = vmatpush2.bf16.msra.mxu0 %v13537_v60  ;;  %v13587_v60 = vld [vmem:[#allocation7 + $0x5e4] ss:$16 sps:$4 sm:$0xff]  }
 0x256   :  { %4780 = vmatpush2.bf16.msra.mxu1 %v13540_v62  ;;  %4738 = vmatprep.subr.bf16.mxu0 %v13545_v7  ;;  %v13662_v62 = vld [vmem:[#allocation7 + $0x7e4] ss:$16 sps:$4 sm:$0xff]   ;;  %v13585_v7 = vld [vmem:[#allocation7 + $0x5e0] ss:$16 sps:$4 sm:$0xff]  }
 0x257   :  { %4781 = vmatprep.subr.bf16.mxu1 %v13548_v2  ;;  %v13590_v2 = vld [vmem:[#allocation7 + $0x5c4] ss:$16 sps:$4 sm:$0xff]  }
 0x259   :  { %4739 = vmatpush2.bf16.msra.mxu0 %v13543_v4  ;;  %v13588_v4 = vld [vmem:[#allocation7 + $0x5c0] ss:$16 sps:$4 sm:$0xff]  }
 0x25a   :  { %4782 = vmatpush2.bf16.msra.mxu1 %v13546_v6  ;;  %4740 = vmatprep.subr.bf16.mxu0 %v13551_v42  ;;  %v13666_v6 = vld [vmem:[#allocation7 + $0x7c0] ss:$16 sps:$4 sm:$0xff]   ;;  %v13674_v42 = vld [vmem:[#allocation7 + $0x7a4] ss:$16 sps:$4 sm:$0xff]  }
 0x25b   :  { %4783 = vmatprep.subr.bf16.mxu1 %v13554_v8  ;;  %v13591_v8 = vld [vmem:[#allocation7 + $0x5a0] ss:$16 sps:$4 sm:$0xff]  }
 0x25d   :  { %4741 = vmatpush2.bf16.msra.mxu0 %v13549_v9  ;;  %v13672_v9 = vld [vmem:[#allocation7 + $0x7a0] ss:$16 sps:$4 sm:$0xff]  }
 0x25e   :  { %4784 = vmatpush2.bf16.msra.mxu1 %v13552_v18  ;;  %4742 = vmatprep.subr.bf16.mxu0 %v13557_v1  ;;  %v13594_v18 = vld [vmem:[#allocation7 + $0x580] ss:$16 sps:$4 sm:$0xff]   ;;  %v13599_v1 = vld [vmem:[#allocation7 + $0x564] ss:$16 sps:$4 sm:$0xff]  }
 0x25f   :  { %4785 = vmatprep.subr.bf16.mxu1 %v13560_v57  ;;  %v13678_v57 = vld [vmem:[#allocation7 + $0x780] ss:$16 sps:$4 sm:$0xff]  }
 0x261   :  { %4743 = vmatpush2.bf16.msra.mxu0 %v13555_v41  ;;  %v13597_v41 = vld [vmem:[#allocation7 + $0x560] ss:$16 sps:$4 sm:$0xff]  }
 0x262   :  { %4786 = vmatpush2.bf16.msra.mxu1 %v13558_v14  ;;  %4798 = vmatprep.subr.bf16.mxu0 %v13563_v19  ;;  %v13602_v14 = vld [vmem:[#allocation7 + $0x544] ss:$16 sps:$4 sm:$0xff]  }
 0x263   :  { %4841 = vmatprep.subr.bf16.mxu1 %v13614_v20  ;;  %v13692_v19 = vld [vmem:[#allocation7 + $0x744] ss:$16 sps:$4 sm:$0xff]   ;;  %v13600_v20 = vld [vmem:[#allocation7 + $0x540] ss:$16 sps:$4 sm:$0xff]  }
 0x264   :  { %4745 = vmatmul.mubr.bf16.vlgmr.msra.gmra.mxu0 %v15306_v39  ;;  %v2890_v63 = vpop.f32.mrf.mxu0 }
 0x265   :  { %4788 = vmatmul.mubr.bf16.vlgmr.msra.gmra.mxu1 %v15357_v24  ;;  %4799 = vmatpush1.bf16.msra.mxu0 %v13561_v49  ;;  %v13605_v49 = vld [vmem:[#allocation7 + $0x524] ss:$16 sps:$4 sm:$0xff]  }
 0x266   :  { %4800 = vmatprep.subr.bf16.mxu0 %v13566_v43  ;;  %4842 = vmatpush1.bf16.msra.mxu1 %v13612_v21  ;;  %v13698_v43 = vld [vmem:[#allocation7 + $0x724] ss:$16 sps:$4 sm:$0xff]   ;;  %v15362_v21 = vsub.s32 5, %v15261_v15 }
 0x267   :  { %4843 = vmatprep.subr.bf16.mxu1 %v13620_v23  ;;  %v13603_v23 = vld [vmem:[#allocation7 + $0x520] ss:$16 sps:$4 sm:$0xff]  }
 0x269   :  { %4801 = vmatpush1.bf16.msra.mxu0 %v13564_v25  ;;  %v15365_v25 = vsub.s32 4, %v15261_v15 }
 0x26a   :  { %4802 = vmatprep.subr.bf16.mxu0 %v13569_v26  ;;  %4844 = vmatpush1.bf16.msra.mxu1 %v13618_v28  ;;  %v2892_v26 = vpop.f32.mrf.mxu0  ;;  %v13608_v28 = vld [vmem:[#allocation7 + $0x504] ss:$16 sps:$4 sm:$0xff]  }
 0x26b   :  { %4845 = vmatprep.subr.bf16.mxu1 %v13626_v30  ;;  %v13696_v30 = vld [vmem:[#allocation7 + $0x720] ss:$16 sps:$4 sm:$0xff]  }
 0x26d   :  { %4803 = vmatpush1.bf16.msra.mxu0 %v13567_v50  ;;  %v13704_v50 = vld [vmem:[#allocation7 + $0x704] ss:$16 sps:$4 sm:$0xff]  }
 0x26e   :  { %4804 = vmatprep.subr.bf16.mxu0 %v13572_v31  ;;  %4846 = vmatpush1.bf16.msra.mxu1 %v13624_v32  ;;  %v2933_v31 = vpop.f32.mrf.mxu1  ;;  %v15367_v32 = vld [vmem:[#allocation5] sm:$0xff] }
 0x26f   :  { %4847 = vmatprep.subr.bf16.mxu1 %v13632_v33  ;;  %v631_v33 = vrot.slane %v15367_v32, %v15362_v21 }
 0x271   :  { %4805 = vmatpush1.bf16.msra.mxu0 %v13570_v35  ;;  %v13606_v35 = vld [vmem:[#allocation7 + $0x500] ss:$16 sps:$4 sm:$0xff]  }
 0x272   :  { %4806 = vmatprep.subr.bf16.mxu0 %v13575_v36  ;;  %4848 = vmatpush1.bf16.msra.mxu1 %v13630_v34  ;;  %v627_v36 = vrot.slane %v15367_v32, %v15365_v25  ;;  %v2894_v34 = vpop.f32.mrf.mxu0 }
 0x273   :  { %4849 = vmatprep.subr.bf16.mxu1 %v13638_v0  ;;  %v13611_v0 = vld [vmem:[#allocation7 + $0xec] ss:$16 sps:$4 sm:$0xff]  }
 0x275   :  { %4807 = vmatpush1.bf16.msra.mxu0 %v13573_v37  ;;  %v13702_v37 = vld [vmem:[#allocation7 + $0x700] ss:$16 sps:$4 sm:$0xff]  }
 0x276   :  { %4808 = vmatprep.subr.bf16.mxu0 %v13578_v38  ;;  %4850 = vmatpush1.bf16.msra.mxu1 %v13636_v40  ;;  %v13710_v38 = vld [vmem:[#allocation7 + $0x2ec] ss:$16 sps:$4 sm:$0xff]   ;;  %v2935_v40 = vpop.f32.mrf.mxu1 }
 0x277   :  { %4851 = vmatprep.subr.bf16.mxu1 %v13644_v45  ;;  %v2891_v45 = vadd.f32 %v2890_v63, %v627_v36  ;;  %v13629_v63 = vld [vmem:[#allocation7 + $0x8c] ss:$16 sps:$4 sm:$0xff]  }
 0x279   :  { %4809 = vmatpush1.bf16.msra.mxu0 %v13576_v12  ;;  %v2893_v12 = vadd.f32 %v2892_v26, %v631_v33  ;;  %v13639_v26 = vld [vmem:[#allocation7 + $0x48] ss:$16 sps:$4 sm:$0xff]  }
 0x27a   :  { %4810 = vmatprep.subr.bf16.mxu0 %v13581_v46  ;;  %4852 = vmatpush1.bf16.msra.mxu1 %v13642_v47  ;;  %v2896_v46 = vpop.f32.mrf.mxu0  ;;  %v2895_v47 = vadd.f32 %v2894_v34, %v627_v36  ;;  %v13663_v36 = vld [vmem:[#allocation7 + $0x1c8] ss:$16 sps:$4 sm:$0xff]   ;;  %v13671_v34 = vld [vmem:[#allocation7 + $0x1ac] ss:$16 sps:$4 sm:$0xff]  }
 0x27b   :  { %4853 = vmatprep.subr.bf16.mxu1 %v13650_v22  ;;  %v2937_v22 = vpop.f32.mrf.mxu1 }
 0x27d   :  { %4811 = vmatpush1.bf16.msra.mxu0 %v13579_v51 }
 0x27e   :  { %4812 = vmatprep.subr.bf16.mxu0 %v13584_v52  ;;  %4854 = vmatpush1.bf16.msra.mxu1 %v13648_v54  ;;  %v2936_v52 = vadd.f32 %v2935_v40, %v2893_v12  ;;  %v2897_v54 = vadd.f32 %v2896_v46, %v631_v33  ;;  %v13657_v33 = vld [vmem:[#allocation7 + $0x1e8] ss:$16 sps:$4 sm:$0xff]   ;;  %v15381_v12 = vsub.s32 6, %v15261_v15 }
 0x27f   :  { %4855 = vmatprep.subr.bf16.mxu1 %v13656_v55  ;;  %v2934_v55 = vadd.f32 %v2933_v31, %v2891_v45  ;;  %v13659_v31 = vld [vmem:[#allocation7 + $0x1ec] ss:$16 sps:$4 sm:$0xff]   ;;  %v15384_v45 = vsub.s32 7, %v15261_v15  ;;  %v13675_v46 = vld [vmem:[#allocation7 + $0x188] ss:$16 sps:$4 sm:$0xff]  }
 0x280   :  { %v14469_v15 = vld [vmem:[#allocation17 + $0x4] ss:$16 sps:$4 sm:$0xff]  }
 0x281   :  { %4813 = vmatpush1.bf16.msra.mxu0 %v13582_v58 }
 0x282   :  { %4814 = vmatprep.subr.bf16.mxu0 %v13587_v60  ;;  %4856 = vmatpush1.bf16.msra.mxu1 %v13654_v61  ;;  %v2938_v60 = vadd.f32 %v2937_v22, %v2895_v47  ;;  %v13683_v47 = vld [vmem:[#allocation7 + $0x16c] ss:$16 sps:$4 sm:$0xff]  }
 0x283   :  { %4857 = vmatprep.subr.bf16.mxu1 %v13662_v62  ;;  %v2939_v62 = vpop.f32.mrf.mxu1 }
 0x285   :  { %4815 = vmatpush2.bf16.msra.mxu0 %v13585_v7 }
 0x286   :  { %4816 = vmatprep.subr.bf16.mxu0 %v13590_v2  ;;  %4858 = vmatpush2.bf16.msra.mxu1 %v13660_v3  ;;  %v2940_v3 = vadd.f32 %v2939_v62, %v2897_v54  ;;  %v13681_v54 = vld [vmem:[#allocation7 + $0x168] ss:$16 sps:$4 sm:$0xff]  }
 0x287   :  { %4859 = vmatprep.subr.bf16.mxu1 %v13668_v53 }
 0x289   :  { %4817 = vmatpush2.bf16.msra.mxu0 %v13588_v4 }
 0x28a   :  { %4818 = vmatprep.subr.bf16.mxu0 %v13593_v5  ;;  %4860 = vmatpush2.bf16.msra.mxu1 %v13666_v6 }
 0x28b   :  { %4861 = vmatprep.subr.bf16.mxu1 %v13674_v42 }
 0x28d   :  { %4819 = vmatpush2.bf16.msra.mxu0 %v13591_v8 }
 0x28e   :  { %4820 = vmatprep.subr.bf16.mxu0 %v13596_v13  ;;  %4862 = vmatpush2.bf16.msra.mxu1 %v13672_v9 }
 0x28f   :  { %4863 = vmatprep.subr.bf16.mxu1 %v13680_v10 }
 0x291   :  { %4821 = vmatpush2.bf16.msra.mxu0 %v13594_v18 }
 0x292   :  { %4822 = vmatprep.subr.bf16.mxu0 %v13599_v1  ;;  %4864 = vmatpush2.bf16.msra.mxu1 %v13678_v57 }
 0x293   :  { %4865 = vmatprep.subr.bf16.mxu1 %v13686_v11  ;;  %v13609_v11 = vld [vmem:[#allocation7 + $0xe8] ss:$16 sps:$4 sm:$0xff]  }
 0x295   :  { %4823 = vmatpush2.bf16.msra.mxu0 %v13597_v41 }
 0x296   :  { %4824 = vmatprep.subr.bf16.mxu0 %v13602_v14  ;;  %4866 = vmatpush2.bf16.msra.mxu1 %v13684_v17  ;;  %v13617_v14 = vld [vmem:[#allocation7 + $0xcc] ss:$16 sps:$4 sm:$0xff]   ;;  %v13615_v17 = vld [vmem:[#allocation7 + $0xc8] ss:$16 sps:$4 sm:$0xff]  }
 0x297   :  { %4867 = vmatprep.subr.bf16.mxu1 %v13692_v19  ;;  %v13623_v19 = vld [vmem:[#allocation7 + $0xac] ss:$16 sps:$4 sm:$0xff]  }
 0x299   :  { %4825 = vmatpush2.bf16.msra.mxu0 %v13600_v20  ;;  %v13621_v20 = vld [vmem:[#allocation7 + $0xa8] ss:$16 sps:$4 sm:$0xff]  }
 0x29a   :  { %4826 = vmatprep.subr.bf16.mxu0 %v13605_v49  ;;  %4868 = vmatpush2.bf16.msra.mxu1 %v13690_v48  ;;  %v13627_v49 = vld [vmem:[#allocation7 + $0x88] ss:$16 sps:$4 sm:$0xff]   ;;  %v13635_v48 = vld [vmem:[#allocation7 + $0x6c] ss:$16 sps:$4 sm:$0xff]  }
 0x29b   :  { %4869 = vmatprep.subr.bf16.mxu1 %v13698_v43  ;;  %v13633_v43 = vld [vmem:[#allocation7 + $0x68] ss:$16 sps:$4 sm:$0xff]  }
 0x29d   :  { %4827 = vmatpush2.bf16.msra.mxu0 %v13603_v23  ;;  %v13641_v23 = vld [vmem:[#allocation7 + $0x4c] ss:$16 sps:$4 sm:$0xff]  }
 0x29e   :  { %4828 = vmatprep.subr.bf16.mxu0 %v13608_v28  ;;  %4870 = vmatpush2.bf16.msra.mxu1 %v13696_v30  ;;  %v13647_v28 = vld [vmem:[#allocation7 + $0x2c] ss:$16 sps:$4 sm:$0xff]  }
 0x29f   :  { %4871 = vmatprep.subr.bf16.mxu1 %v13704_v50  ;;  %v13653_v30 = vld [vmem:[#allocation7 + $0xc] ss:$16 sps:$4 sm:$0xff]   ;;  %v13651_v50 = vld [vmem:[#allocation7 + $0x8] ss:$16 sps:$4 sm:$0xff]  }
 0x2a1   :  { %4829 = vmatpush2.bf16.msra.mxu0 %v13606_v35  ;;  %v13665_v35 = vld [vmem:[#allocation7 + $0x1cc] ss:$16 sps:$4 sm:$0xff]  }
 0x2a2   :  { %4884 = vmatprep.subr.bf16.mxu0 %v13611_v0  ;;  %4872 = vmatpush2.bf16.msra.mxu1 %v13702_v37  ;;  %v13669_v37 = vld [vmem:[#allocation7 + $0x1a8] ss:$16 sps:$4 sm:$0xff]  }
 0x2a3   :  { %4927 = vmatprep.subr.bf16.mxu1 %v13710_v38  ;;  %v13677_v38 = vld [vmem:[#allocation7 + $0x18c] ss:$16 sps:$4 sm:$0xff]  }
 0x2a4   :  { %v2976_v51 = vpop.f32.mrf.mxu0 }
 0x2a5   :  { %v2977_v7 = vadd.f32 %v2976_v51, %v2934_v55  ;;  %v3019_v0 = vpop.f32.mrf.mxu1  ;;  %v635_v51 = vrot.slane %v15367_v32, %v15381_v12  ;;  %v13689_v55 = vld [vmem:[#allocation7 + $0x14c] ss:$16 sps:$4 sm:$0xff]  }
 0x2a6   :  { %v2978_v58 = vpop.f32.mrf.mxu0 }
 0x2a7   :  { %v2979_v61 = vadd.f32 %v2978_v58, %v2936_v52  ;;  %v3118_v8 = vmul.f32 0.2, %v2977_v7  ;;  %v3021_v40 = vpop.f32.mrf.mxu1  ;;  %v639_v52 = vrot.slane %v15367_v32, %v15384_v45 }
 0x2a8   :  { %v2980_v2 = vpop.f32.mrf.mxu0 }
 0x2a9   :  { %v2981_v53 = vadd.f32 %v2980_v2, %v2938_v60  ;;  %v3119_v5 = vmul.f32 0.2, %v2979_v61  ;;  %v3134_v1 = vmax.f32 %v2977_v7, %v3118_v8  ;;  %v3023_v22 = vpop.f32.mrf.mxu1  ;;  %v3022_v62 = vadd.f32 %v3021_v40, %v639_v52  ;;  %v13687_v2 = vld [vmem:[#allocation7 + $0x148] ss:$16 sps:$4 sm:$0xff]   ;;  %v13719_v40 = vld [vmem:[#allocation7 + $0x4ac] ss:$16 sps:$4 sm:$0xff]  }
 0x2aa   :  { %v2982_v4 = vpop.f32.mrf.mxu0 }
 0x2ab   :  { %v3126_v6 = vmul.f32 0.2, %v2981_v53  ;;  %v2983_v42 = vadd.f32 %v2982_v4, %v2940_v3  ;;  %v3135_v10 = vmax.f32 %v2979_v61, %v3119_v5  ;;  %v3025_v58 = vpop.f32.mrf.mxu1  ;;  %v3020_v61 = vadd.f32 %v3019_v0, %v635_v51 }
 0x2ac   :  { %v3024_v4 = vadd.f32 %v3023_v22, %v635_v51  ;;  %v3026_v32 = vadd.f32 %v3025_v58, %v639_v52  ;;  %v13725_v22 = vld [vmem:[#allocation7 + $0x48c] ss:$16 sps:$4 sm:$0xff]   ;;  %v13723_v51 = vld [vmem:[#allocation7 + $0x488] ss:$16 sps:$4 sm:$0xff]  }
 0x2ad   :  { %v3127_v13 = vmul.f32 0.2, %v2983_v42  ;;  %v3142_v9 = vmax.f32 %v2981_v53, %v3126_v6  ;;  %v13695_v53 = vld [vmem:[#allocation7 + $0x12c] ss:$16 sps:$4 sm:$0xff]  }
 0x2ae   :  { %v13728_v52 = vld [vmem:[#allocation7 + $0x28c] ss:$16 sps:$4 sm:$0xff]  }
 0x2af   :  { %v3143_v18 = vmax.f32 %v2983_v42, %v3127_v13  ;;  %v15375_v41 = vpack.c.bf16 %v3142_v9, %v3134_v1  ;;  %v13734_v58 = vld [vmem:[#allocation7 + $0x26c] ss:$16 sps:$4 sm:$0xff]  }
 0x2b1   :  { %v15373_v57 = vpack.c.bf16 %v3143_v18, %v3135_v10  ;;  %v13693_v18 = vld [vmem:[#allocation7 + $0x128] ss:$16 sps:$4 sm:$0xff]  }
 0x2b3   :  { %4830 = vmatprep.mubr.bf16.mxu0 %v15373_v57 }
 0x2b4   :  { %4831 = vmatmul.mubr.bf16.vlgmr.msra.gmra.mxu0 %v15375_v41 }
 0x2b5   :  { %4885 = vmatpush1.bf16.msra.mxu0 %v13609_v11  ;;  %4916 = vmatprep.mubr.bf16.mxu0 %v15333_v56  ;;  %v13645_v56 = vld [vmem:[#allocation7 + $0x28] ss:$16 sps:$4 sm:$0xff]   ;;  %v13701_v11 = vld [vmem:[#allocation7 + $0x10c] ss:$16 sps:$4 sm:$0xff]  }
 0x2b6   :  { %4886 = vmatprep.subr.bf16.mxu0 %v13617_v14 }
 0x2b9   :  { %4887 = vmatpush1.bf16.msra.mxu0 %v13615_v17 }
 0x2ba   :  { %4888 = vmatprep.subr.bf16.mxu0 %v13623_v19 }
 0x2bd   :  { %4889 = vmatpush1.bf16.msra.mxu0 %v13621_v20 }
 0x2be   :  { %4890 = vmatprep.subr.bf16.mxu0 %v13629_v63 }
 0x2c1   :  { %4891 = vmatpush1.bf16.msra.mxu0 %v13627_v49 }
 0x2c2   :  { %4892 = vmatprep.subr.bf16.mxu0 %v13635_v48 }
 0x2c5   :  { %4893 = vmatpush1.bf16.msra.mxu0 %v13633_v43  ;;  %v13699_v43 = vld [vmem:[#allocation7 + $0x108] ss:$16 sps:$4 sm:$0xff]  }
 0x2c6   :  { %4894 = vmatprep.subr.bf16.mxu0 %v13641_v23  ;;  %v13707_v23 = vld [vmem:[#allocation7 + $0x4ec] ss:$16 sps:$4 sm:$0xff]  }
 0x2c9   :  { %4895 = vmatpush1.bf16.msra.mxu0 %v13639_v26 }
 0x2ca   :  { %4896 = vmatprep.subr.bf16.mxu0 %v13647_v28 }
 0x2cd   :  { %4897 = vmatpush1.bf16.msra.mxu0 %v13645_v56 }
 0x2ce   :  { %4898 = vmatprep.subr.bf16.mxu0 %v13653_v30 }
 0x2d1   :  { %4899 = vmatpush1.bf16.msra.mxu0 %v13651_v50 }
 0x2d2   :  { %4900 = vmatprep.subr.bf16.mxu0 %v13659_v31  ;;  %v13705_v31 = vld [vmem:[#allocation7 + $0x4e8] ss:$16 sps:$4 sm:$0xff]  }
 0x2d5   :  { %4901 = vmatpush2.bf16.msra.mxu0 %v13657_v33  ;;  %v13713_v33 = vld [vmem:[#allocation7 + $0x4cc] ss:$16 sps:$4 sm:$0xff]  }
 0x2d6   :  { %4902 = vmatprep.subr.bf16.mxu0 %v13665_v35 }
 0x2d9   :  { %4903 = vmatpush2.bf16.msra.mxu0 %v13663_v36 }
 0x2da   :  { %4904 = vmatprep.subr.bf16.mxu0 %v13671_v34  ;;  %v13708_v34 = vld [vmem:[#allocation7 + $0x2e8] ss:$16 sps:$4 sm:$0xff]  }
 0x2dd   :  { %4905 = vmatpush2.bf16.msra.mxu0 %v13669_v37  ;;  %v13711_v37 = vld [vmem:[#allocation7 + $0x4c8] ss:$16 sps:$4 sm:$0xff]  }
 0x2de   :  { %4906 = vmatprep.subr.bf16.mxu0 %v13677_v38  ;;  %v13716_v38 = vld [vmem:[#allocation7 + $0x2cc] ss:$16 sps:$4 sm:$0xff]  }
 0x2e1   :  { %4907 = vmatpush2.bf16.msra.mxu0 %v13675_v46  ;;  %v13714_v46 = vld [vmem:[#allocation7 + $0x2c8] ss:$16 sps:$4 sm:$0xff]  }
 0x2e2   :  { %4908 = vmatprep.subr.bf16.mxu0 %v13683_v47  ;;  %v13722_v47 = vld [vmem:[#allocation7 + $0x2ac] ss:$16 sps:$4 sm:$0xff]  }
 0x2e4   :  { %v3062_v60 = vpop.f32.mrf.mxu0 }
 0x2e5   :  { %v3105_v7 = vpop.f32.mrf.mxu1  ;;  %4909 = vmatpush2.bf16.msra.mxu0 %v13681_v54  ;;  %v3063_v5 = vadd.f32 %v3062_v60, %v3020_v61  ;;  %v13731_v54 = vld [vmem:[#allocation7 + $0x46c] ss:$16 sps:$4 sm:$0xff]   ;;  %v13732_v61 = vld [vmem:[#allocation7 + $0x268] ss:$16 sps:$4 sm:$0xff]  }
 0x2e6   :  { %v3064_v3 = vpop.f32.mrf.mxu0  ;;  %4910 = vmatprep.subr.bf16.mxu0 %v13689_v55  ;;  %v13726_v55 = vld [vmem:[#allocation7 + $0x288] ss:$16 sps:$4 sm:$0xff]   ;;  %v13737_v60 = vld [vmem:[#allocation7 + $0x44c] ss:$16 sps:$4 sm:$0xff]  }
 0x2e7   :  { %v3065_v6 = vadd.f32 %v3064_v3, %v3022_v62  ;;  %v3107_v42 = vpop.f32.mrf.mxu1  ;;  %v3106_v14 = vadd.f32 %v3105_v7, %v3063_v5  ;;  %v13735_v62 = vld [vmem:[#allocation7 + $0x448] ss:$16 sps:$4 sm:$0xff]   ;;  %v13740_v7 = vld [vmem:[#allocation7 + $0x24c] ss:$16 sps:$4 sm:$0xff]  }
 0x2e8   :  { %v3066_v8 = vpop.f32.mrf.mxu0  ;;  %v13738_v3 = vld [vmem:[#allocation7 + $0x248] ss:$16 sps:$4 sm:$0xff]   ;;  %v13749_v5 = vld [vmem:[#allocation7 + $0x40c] ss:$16 sps:$4 sm:$0xff]  }
 0x2e9   :  { %v3108_v13 = vadd.f32 %v3107_v42, %v3065_v6  ;;  %v3067_v9 = vadd.f32 %v3066_v8, %v3024_v4  ;;  %v3109_v10 = vpop.f32.mrf.mxu1  ;;  %4911 = vmatpush2.bf16.msra.mxu0 %v13687_v2  ;;  %v3120_v26 = vmul.f32 0.2, %v3106_v14  ;;  %v13743_v2 = vld [vmem:[#allocation7 + $0x42c] ss:$16 sps:$4 sm:$0xff]   ;;  %v13744_v6 = vld [vmem:[#allocation7 + $0x228] ss:$16 sps:$4 sm:$0xff]  }
 0x2ea   :  { %v3068_v1 = vpop.f32.mrf.mxu0  ;;  %4912 = vmatprep.subr.bf16.mxu0 %v13695_v53  ;;  %v13741_v53 = vld [vmem:[#allocation7 + $0x428] ss:$16 sps:$4 sm:$0xff]   ;;  %v13746_v4 = vld [vmem:[#allocation7 + $0x22c] ss:$16 sps:$4 sm:$0xff]  }
 0x2eb   :  { %v3110_v17 = vadd.f32 %v3109_v10, %v3067_v9  ;;  %v3069_v19 = vadd.f32 %v3068_v1, %v3026_v32  ;;  %v3111_v20 = vpop.f32.mrf.mxu1  ;;  %v3121_v63 = vmul.f32 0.2, %v3108_v13  ;;  %v3136_v35 = vmax.f32 %v3106_v14, %v3120_v26  ;;  %v13747_v42 = vld [vmem:[#allocation7 + $0x408] ss:$16 sps:$4 sm:$0xff]   ;;  %v13752_v8 = vld [vmem:[#allocation7 + $0x20c] ss:$16 sps:$4 sm:$0xff]  }
 0x2ec   :  { %v13755_v32 = vld [vmem:[#allocation7 + $0x5ec] ss:$16 sps:$4 sm:$0xff]   ;;  %v13753_v9 = vld [vmem:[#allocation7 + $0x5e8] ss:$16 sps:$4 sm:$0xff]  }
 0x2ed   :  { %v3128_v49 = vmul.f32 0.2, %v3110_v17  ;;  %v3112_v48 = vadd.f32 %v3111_v20, %v3069_v19  ;;  %4913 = vmatpush2.bf16.msra.mxu0 %v13693_v18  ;;  %v3137_v56 = vmax.f32 %v3108_v13, %v3121_v63  ;;  %v13750_v13 = vld [vmem:[#allocation7 + $0x208] ss:$16 sps:$4 sm:$0xff]   ;;  %v13758_v10 = vld [vmem:[#allocation7 + $0x3ec] ss:$16 sps:$4 sm:$0xff]  }
 0x2ee   :  { %4914 = vmatprep.subr.bf16.mxu0 %v13701_v11  ;;  %v13761_v18 = vld [vmem:[#allocation7 + $0x5cc] ss:$16 sps:$4 sm:$0xff]   ;;  %v13756_v1 = vld [vmem:[#allocation7 + $0x3e8] ss:$16 sps:$4 sm:$0xff]  }
 0x2ef   :  { %v3129_v28 = vmul.f32 0.2, %v3112_v48  ;;  %v3144_v30 = vmax.f32 %v3110_v17, %v3128_v49  ;;  %v13759_v11 = vld [vmem:[#allocation7 + $0x5c8] ss:$16 sps:$4 sm:$0xff]   ;;  %v13764_v14 = vld [vmem:[#allocation7 + $0x3cc] ss:$16 sps:$4 sm:$0xff]  }
 0x2f0   :  { %v13767_v17 = vld [vmem:[#allocation7 + $0x5ac] ss:$16 sps:$4 sm:$0xff]   ;;  %v13762_v19 = vld [vmem:[#allocation7 + $0x3c8] ss:$16 sps:$4 sm:$0xff]  }
 0x2f1   :  { %v3145_v50 = vmax.f32 %v3112_v48, %v3129_v28  ;;  %4915 = vmatpush2.bf16.msra.mxu0 %v13699_v43  ;;  %v15393_v0 = vpack.c.bf16 %v3144_v30, %v3136_v35  ;;  %v13765_v20 = vld [vmem:[#allocation7 + $0x5a8] ss:$16 sps:$4 sm:$0xff]   ;;  %v13770_v63 = vld [vmem:[#allocation7 + $0x3ac] ss:$16 sps:$4 sm:$0xff]  }
 0x2f2   :  { %4970 = vmatprep.subr.bf16.mxu0 %v13707_v23  ;;  %v13773_v49 = vld [vmem:[#allocation7 + $0x58c] ss:$16 sps:$4 sm:$0xff]   ;;  %v13768_v48 = vld [vmem:[#allocation7 + $0x3a8] ss:$16 sps:$4 sm:$0xff]  }
 0x2f3   :  { %v15390_v36 = vpack.c.bf16 %v3145_v50, %v3137_v56  ;;  %v13771_v43 = vld [vmem:[#allocation7 + $0x588] ss:$16 sps:$4 sm:$0xff]   ;;  %v13776_v23 = vld [vmem:[#allocation7 + $0x38c] ss:$16 sps:$4 sm:$0xff]  }
 0x2f4   :  { %4917 = vmatmul.mubr.bf16.vlgmr.msra.gmra.mxu0 %v15306_v39  ;;  %v13717_v39 = vld [vmem:[#allocation7 + $0x4a8] ss:$16 sps:$4 sm:$0xff]   ;;  %v13779_v26 = vld [vmem:[#allocation7 + $0x56c] ss:$16 sps:$4 sm:$0xff]  }
 0x2f5   :  { %4971 = vmatpush1.bf16.msra.mxu0 %v13705_v31  ;;  %5002 = vmatprep.mubr.bf16.mxu0 %v15373_v57  ;;  %v13720_v57 = vld [vmem:[#allocation7 + $0x2a8] ss:$16 sps:$4 sm:$0xff]   ;;  %v13782_v30 = vld [vmem:[#allocation7 + $0x36c] ss:$16 sps:$4 sm:$0xff]  }
 0x2f6   :  { %4873 = vmatprep.mubr.bf16.mxu1 %v15390_v36  ;;  %4972 = vmatprep.subr.bf16.mxu0 %v13713_v33  ;;  %v13774_v28 = vld [vmem:[#allocation7 + $0x388] ss:$16 sps:$4 sm:$0xff]   ;;  %v13785_v50 = vld [vmem:[#allocation7 + $0x54c] ss:$16 sps:$4 sm:$0xff]  }
 0x2f7   :  { %4874 = vmatmul.mubr.bf16.vlgmr.msra.gmra.mxu1 %v15393_v0  ;;  %v13777_v56 = vld [vmem:[#allocation7 + $0x568] ss:$16 sps:$4 sm:$0xff]   ;;  %v13788_v35 = vld [vmem:[#allocation7 + $0x34c] ss:$16 sps:$4 sm:$0xff]  }
 0x2f8   :  { %4928 = vmatpush1.bf16.msra.mxu1 %v13708_v34  ;;  %4959 = vmatprep.mubr.bf16.mxu1 %v15343_v59  ;;  %v13729_v59 = vld [vmem:[#allocation7 + $0x468] ss:$16 sps:$4 sm:$0xff]   ;;  %v13791_v34 = vld [vmem:[#allocation7 + $0x52c] ss:$16 sps:$4 sm:$0xff]  }
 0x2f9   :  { %4973 = vmatpush1.bf16.msra.mxu0 %v13711_v37  ;;  %4929 = vmatprep.subr.bf16.mxu1 %v13716_v38  ;;  %v13780_v31 = vld [vmem:[#allocation7 + $0x368] ss:$16 sps:$4 sm:$0xff]  }
 0x2fa   :  { %4974 = vmatprep.subr.bf16.mxu0 %v13719_v40  ;;  %v13783_v33 = vld [vmem:[#allocation7 + $0x548] ss:$16 sps:$4 sm:$0xff]   ;;  %v13794_v40 = vld [vmem:[#allocation7 + $0x32c] ss:$16 sps:$4 sm:$0xff]  }
 0x2fb   :  { %v13786_v37 = vld [vmem:[#allocation7 + $0x348] ss:$16 sps:$4 sm:$0xff]  }
 0x2fc   :  { %4930 = vmatpush1.bf16.msra.mxu1 %v13714_v46  ;;  %v13789_v38 = vld [vmem:[#allocation7 + $0x528] ss:$16 sps:$4 sm:$0xff]   ;;  %v13797_v46 = vld [vmem:[#allocation7 + $0x50c] ss:$16 sps:$4 sm:$0xff]  }
 0x2fd   :  { %4975 = vmatpush1.bf16.msra.mxu0 %v13717_v39  ;;  %4931 = vmatprep.subr.bf16.mxu1 %v13722_v47  ;;  %v5132_v39 = vld [vmem:[#allocation10 + $0x1c0] sm:$0xff] }
 0x2fe   :  { %4976 = vmatprep.subr.bf16.mxu0 %v13725_v22  ;;  %v5136_v47 = vld [vmem:[#allocation10 + $0x1e0] sm:$0xff] }
 0x2ff   :  { %v13792_v22 = vld [vmem:[#allocation7 + $0x328] ss:$16 sps:$4 sm:$0xff]  }
 0x300   :  { %4932 = vmatpush1.bf16.msra.mxu1 %v13720_v57  ;;  %v13795_v57 = vld [vmem:[#allocation7 + $0x508] ss:$16 sps:$4 sm:$0xff]  }
 0x301   :  { %4977 = vmatpush1.bf16.msra.mxu0 %v13723_v51  ;;  %4933 = vmatprep.subr.bf16.mxu1 %v13728_v52  ;;  %v13800_v51 = vld [vmem:[#allocation7 + $0x30c] ss:$16 sps:$4 sm:$0xff]   ;;  %v12581_v52 = vcombine.high %v5132_v39, %v5136_v47 }
 0x302   :  { %4978 = vmatprep.subr.bf16.mxu0 %v13731_v54  ;;  %v5124_v54 = vld [vmem:[#allocation10 + $0x180] sm:$0xff] }
 0x304   :  { %4934 = vmatpush1.bf16.msra.mxu1 %v13726_v55  ;;  %v5128_v55 = vld [vmem:[#allocation10 + $0x1a0] sm:$0xff] }
 0x305   :  { %4979 = vmatpush1.bf16.msra.mxu0 %v13729_v59  ;;  %4935 = vmatprep.subr.bf16.mxu1 %v13734_v58  ;;  %v13798_v59 = vld [vmem:[#allocation7 + $0x308] ss:$16 sps:$4 sm:$0xff]   ;;  %v13803_v58 = vld [vmem:[#allocation7 + $0x6ec] ss:$16 sps:$4 sm:$0xff]  }
 0x306   :  { %4980 = vmatprep.subr.bf16.mxu0 %v13737_v60  ;;  %v12580_v60 = vcombine.low %v5132_v39, %v5136_v47  ;;  %v13824_v39 = vld [vmem:[#allocation7 + $0x60c] ss:$16 sps:$4 sm:$0xff]  }
 0x308   :  { %4936 = vmatpush1.bf16.msra.mxu1 %v13732_v61  ;;  %v12573_v61 = vcombine.high %v5124_v54, %v5128_v55 }
 0x309   :  { %4981 = vmatpush1.bf16.msra.mxu0 %v13735_v62  ;;  %4937 = vmatprep.subr.bf16.mxu1 %v13740_v7  ;;  %v5116_v62 = vld [vmem:[#allocation10 + $0x140] sm:$0xff] }
 0x30a   :  { %4982 = vmatprep.subr.bf16.mxu0 %v13743_v2  ;;  %v5120_v7 = vld [vmem:[#allocation10 + $0x160] sm:$0xff] }
 0x30b   :  { %v13801_v2 = vld [vmem:[#allocation7 + $0x6e8] ss:$16 sps:$4 sm:$0xff]  }
 0x30c   :  { %4938 = vmatpush1.bf16.msra.mxu1 %v13738_v3  ;;  %v13806_v3 = vld [vmem:[#allocation7 + $0x6cc] ss:$16 sps:$4 sm:$0xff]  }
 0x30d   :  { %4983 = vmatpush1.bf16.msra.mxu0 %v13741_v53  ;;  %4939 = vmatprep.subr.bf16.mxu1 %v13746_v4  ;;  %v12572_v53 = vcombine.low %v5124_v54, %v5128_v55  ;;  %v12565_v4 = vcombine.high %v5116_v62, %v5120_v7  ;;  %v13827_v54 = vld [vmem:[#allocation7 + $0x7ec] ss:$16 sps:$4 sm:$0xff]  }
 0x30e   :  { %4984 = vmatprep.subr.bf16.mxu0 %v13749_v5  ;;  %v5108_v5 = vld [vmem:[#allocation10 + $0x100] sm:$0xff] }
 0x310   :  { %4940 = vmatpush1.bf16.msra.mxu1 %v13744_v6  ;;  %v5112_v6 = vld [vmem:[#allocation10 + $0x120] sm:$0xff] }
 0x311   :  { %4985 = vmatpush1.bf16.msra.mxu0 %v13747_v42  ;;  %4941 = vmatprep.subr.bf16.mxu1 %v13752_v8  ;;  %v13804_v42 = vld [vmem:[#allocation7 + $0x6c8] ss:$16 sps:$4 sm:$0xff]   ;;  %v13809_v8 = vld [vmem:[#allocation7 + $0x6ac] ss:$16 sps:$4 sm:$0xff]  }
 0x312   :  { %4986 = vmatprep.subr.bf16.mxu0 %v13755_v32  ;;  %v12564_v32 = vcombine.low %v5116_v62, %v5120_v7  ;;  %v13830_v62 = vld [vmem:[#allocation7 + $0x7cc] ss:$16 sps:$4 sm:$0xff]  }
 0x314   :  { %4942 = vmatpush1.bf16.msra.mxu1 %v13750_v13  ;;  %v5100_v13 = vld [vmem:[#allocation10 + $0xc0] sm:$0xff] }
 0x315   :  { %4987 = vmatpush2.bf16.msra.mxu0 %v13753_v9  ;;  %4943 = vmatprep.subr.bf16.mxu1 %v13758_v10  ;;  %v5104_v9 = vld [vmem:[#allocation10 + $0xe0] sm:$0xff] }
 0x316   :  { %4988 = vmatprep.subr.bf16.mxu0 %v13761_v18  ;;  %v13807_v10 = vld [vmem:[#allocation7 + $0x6a8] ss:$16 sps:$4 sm:$0xff]   ;;  %v13812_v18 = vld [vmem:[#allocation7 + $0x68c] ss:$16 sps:$4 sm:$0xff]  }
 0x318   :  { %4944 = vmatpush2.bf16.msra.mxu1 %v13756_v1  ;;  %v12549_v1 = vcombine.high %v5100_v13, %v5104_v9 }
 0x319   :  { %4989 = vmatpush2.bf16.msra.mxu0 %v13759_v11  ;;  %4945 = vmatprep.subr.bf16.mxu1 %v13764_v14  ;;  %v5092_v11 = vld [vmem:[#allocation10 + $0x80] sm:$0xff] }
 0x31a   :  { %4990 = vmatprep.subr.bf16.mxu0 %v13767_v17  ;;  %v5096_v14 = vld [vmem:[#allocation10 + $0xa0] sm:$0xff]  ;;  %v13815_v17 = vld [vmem:[#allocation7 + $0x66c] ss:$16 sps:$4 sm:$0xff]  }
 0x31c   :  { %4946 = vmatpush2.bf16.msra.mxu1 %v13762_v19  ;;  %v12548_v19 = vcombine.low %v5100_v13, %v5104_v9  ;;  %v13836_v13 = vld [vmem:[#allocation7 + $0x78c] ss:$16 sps:$4 sm:$0xff]  }
 0x31d   :  { %4991 = vmatpush2.bf16.msra.mxu0 %v13765_v20  ;;  %4947 = vmatprep.subr.bf16.mxu1 %v13770_v63  ;;  %v12541_v20 = vcombine.high %v5092_v11, %v5096_v14  ;;  %v5084_v63 = vld [vmem:[#allocation10 + $0x40] sm:$0xff] }
 0x31e   :  { %4992 = vmatprep.subr.bf16.mxu0 %v13773_v49  ;;  %v5088_v49 = vld [vmem:[#allocation10 + $0x60] sm:$0xff] }
 0x320   :  { %4948 = vmatpush2.bf16.msra.mxu1 %v13768_v48  ;;  %v13813_v48 = vld [vmem:[#allocation7 + $0x668] ss:$16 sps:$4 sm:$0xff]  }
 0x321   :  { %4993 = vmatpush2.bf16.msra.mxu0 %v13771_v43  ;;  %4949 = vmatprep.subr.bf16.mxu1 %v13776_v23  ;;  %v15402_v43 = vld [vmem:[#allocation10 + $0x1c8] sm:$0xff] }
 0x322   :  { %4994 = vmatprep.subr.bf16.mxu0 %v13779_v26  ;;  %v15404_v23 = vld [vmem:[#allocation10 + $0x1e8] sm:$0xff] }
 0x323   :  { %v13818_v26 = vld [vmem:[#allocation7 + $0x64c] ss:$16 sps:$4 sm:$0xff]  }
 0x324   :  { %4950 = vmatpush2.bf16.msra.mxu1 %v13774_v28  ;;  %v12540_v28 = vcombine.low %v5092_v11, %v5096_v14  ;;  %v13839_v11 = vld [vmem:[#allocation7 + $0x76c] ss:$16 sps:$4 sm:$0xff]  }
 0x325   :  { %4995 = vmatpush2.bf16.msra.mxu0 %v13777_v56  ;;  %4951 = vmatprep.subr.bf16.mxu1 %v13782_v30  ;;  %v12533_v56 = vcombine.high %v5084_v63, %v5088_v49  ;;  %v12582_v30 = vcombine.low %v15402_v43, %v15404_v23 }
 0x326   :  { %4996 = vmatprep.subr.bf16.mxu0 %v13785_v50  ;;  %v5076_v50 = vld [vmem:[#allocation10] sm:$0xff] }
 0x328   :  { %4952 = vmatpush2.bf16.msra.mxu1 %v13780_v31  ;;  %v5080_v31 = vld [vmem:[#allocation10 + $0x20] sm:$0xff] }
 0x329   :  { %4997 = vmatpush2.bf16.msra.mxu0 %v13783_v33  ;;  %4953 = vmatprep.subr.bf16.mxu1 %v13788_v35  ;;  %v13816_v33 = vld [vmem:[#allocation7 + $0x648] ss:$16 sps:$4 sm:$0xff]   ;;  %v13821_v35 = vld [vmem:[#allocation7 + $0x62c] ss:$16 sps:$4 sm:$0xff]   ;;  %v12524_v47 = vcombine.low %v5076_v50, %v5080_v31 }
 0x32a   :  { %4998 = vmatprep.subr.bf16.mxu0 %v13791_v34  ;;  %v12532_v34 = vcombine.low %v5084_v63, %v5088_v49  ;;  %v13842_v63 = vld [vmem:[#allocation7 + $0x74c] ss:$16 sps:$4 sm:$0xff]  }
 0x32c   :  { %4954 = vmatpush2.bf16.msra.mxu1 %v13786_v37  ;;  %v12525_v37 = vcombine.high %v5076_v50, %v5080_v31  ;;  %v13845_v50 = vld [vmem:[#allocation7 + $0x72c] ss:$16 sps:$4 sm:$0xff]  }
 0x32d   :  { %4999 = vmatpush2.bf16.msra.mxu0 %v13789_v38  ;;  %4955 = vmatprep.subr.bf16.mxu1 %v13794_v40  ;;  %v5196_v38 = vld [vmem:[#allocation10 + $0x3c0] sm:$0xff] }
 0x32e   :  { %5000 = vmatprep.subr.bf16.mxu0 %v13797_v46  ;;  %v5200_v40 = vld [vmem:[#allocation10 + $0x3e0] sm:$0xff] }
 0x32f   :  { %v13819_v46 = vld [vmem:[#allocation7 + $0x628] ss:$16 sps:$4 sm:$0xff]   ;;  %v12644_v55 = vcombine.low %v5196_v38, %v5200_v40 }
 0x330   :  { %4956 = vmatpush2.bf16.msra.mxu1 %v13792_v22  ;;  %v12645_v22 = vcombine.high %v5196_v38, %v5200_v40  ;;  %v12583_v38 = vcombine.high %v15402_v43, %v15404_v23  ;;  %v13846_v40 = vld [vmem:[#allocation7 + $0x708] ss:$16 sps:$4 sm:$0xff]   ;;  %v5097_v43 = vld [vmem:[#allocation10 + $0xa8] sm:$0xff] }
 0x331   :  { %5001 = vmatpush2.bf16.msra.mxu0 %v13795_v57  ;;  %4957 = vmatprep.subr.bf16.mxu1 %v13800_v51  ;;  %v5188_v57 = vld [vmem:[#allocation10 + $0x380] sm:$0xff] }
 0x332   :  { %6654 = vmatprep.subr.bf16.mxu0 %v12581_v52  ;;  %v5192_v51 = vld [vmem:[#allocation10 + $0x3a0] sm:$0xff] }
 0x333   :  { %v13822_v52 = vld [vmem:[#allocation7 + $0x608] ss:$16 sps:$4 sm:$0xff]   ;;  %v12636_v7 = vcombine.low %v5188_v57, %v5192_v51 }
 0x334   :  { %4958 = vmatpush2.bf16.msra.mxu1 %v13798_v59  ;;  %5003 = vmatmul.mubr.bf16.vlgmr.msra.gmra.mxu0 %v15375_v41  ;;  %v12557_v41 = vcombine.high %v5108_v5, %v5112_v6  ;;  %v12637_v59 = vcombine.high %v5188_v57, %v5192_v51  ;;  %v5252_v57 = vld [vmem:[#allocation10 + $0x580] sm:$0xff] }
 0x335   :  { %5013 = vmatprep.subr.bf16.mxu1 %v13803_v58  ;;  %6655 = vmatpush1.bf16.msra.mxu0 %v12580_v60  ;;  %v5180_v58 = vld [vmem:[#allocation10 + $0x340] sm:$0xff] }
 0x336   :  { %6656 = vmatprep.subr.bf16.mxu0 %v12573_v61  ;;  %v5184_v60 = vld [vmem:[#allocation10 + $0x360] sm:$0xff] }
 0x337   :  { %4960 = vmatmul.mubr.bf16.vlgmr.msra.gmra.mxu1 %v15357_v24  ;;  %v12556_v24 = vcombine.low %v5108_v5, %v5112_v6  ;;  %v13825_v61 = vld [vmem:[#allocation7 + $0x7e8] ss:$16 sps:$4 sm:$0xff]   ;;  %v13833_v5 = vld [vmem:[#allocation7 + $0x7ac] ss:$16 sps:$4 sm:$0xff]   ;;  %v12628_v6 = vcombine.low %v5180_v58, %v5184_v60 }
 0x338   :  { %5014 = vmatpush1.bf16.msra.mxu1 %v13801_v2  ;;  %5045 = vmatprep.mubr.bf16.mxu1 %v15390_v36  ;;  %v13810_v36 = vld [vmem:[#allocation7 + $0x688] ss:$16 sps:$4 sm:$0xff]   ;;  %v12629_v2 = vcombine.high %v5180_v58, %v5184_v60 }
 0x339   :  { %5015 = vmatprep.subr.bf16.mxu1 %v13806_v3  ;;  %6657 = vmatpush1.bf16.msra.mxu0 %v12572_v53  ;;  %v5172_v3 = vld [vmem:[#allocation10 + $0x300] sm:$0xff] }
 0x33a   :  { %6658 = vmatprep.subr.bf16.mxu0 %v12565_v4  ;;  %v5176_v53 = vld [vmem:[#allocation10 + $0x320] sm:$0xff] }
 0x33b   :  { %v13828_v4 = vld [vmem:[#allocation7 + $0x7c8] ss:$16 sps:$4 sm:$0xff]   ;;  %v12620_v9 = vcombine.low %v5172_v3, %v5176_v53 }
 0x33c   :  { %5016 = vmatpush1.bf16.msra.mxu1 %v13804_v42  ;;  %v12621_v42 = vcombine.high %v5172_v3, %v5176_v53  ;;  %v5256_v51 = vld [vmem:[#allocation10 + $0x5a0] sm:$0xff] }
 0x33d   :  { %5017 = vmatprep.subr.bf16.mxu1 %v13809_v8  ;;  %6659 = vmatpush1.bf16.msra.mxu0 %v12564_v32  ;;  %v5164_v8 = vld [vmem:[#allocation10 + $0x2c0] sm:$0xff] }
 0x33e   :  { %6660 = vmatprep.subr.bf16.mxu0 %v12557_v41  ;;  %v5168_v32 = vld [vmem:[#allocation10 + $0x2e0] sm:$0xff] }
 0x33f   :  { %v13831_v41 = vld [vmem:[#allocation7 + $0x7a8] ss:$16 sps:$4 sm:$0xff]   ;;  %v12612_v14 = vcombine.low %v5164_v8, %v5168_v32 }
 0x340   :  { %5018 = vmatpush1.bf16.msra.mxu1 %v13807_v10  ;;  %v12613_v10 = vcombine.high %v5164_v8, %v5168_v32  ;;  %v5232_v3 = vld [vmem:[#allocation10 + $0x4e0] sm:$0xff] }
 0x341   :  { %5019 = vmatprep.subr.bf16.mxu1 %v13812_v18  ;;  %6661 = vmatpush1.bf16.msra.mxu0 %v12556_v24  ;;  %v5156_v18 = vld [vmem:[#allocation10 + $0x280] sm:$0xff] }
 0x342   :  { %6662 = vmatprep.subr.bf16.mxu0 %v12549_v1  ;;  %v5160_v24 = vld [vmem:[#allocation10 + $0x2a0] sm:$0xff] }
 0x343   :  { %v13834_v1 = vld [vmem:[#allocation7 + $0x788] ss:$16 sps:$4 sm:$0xff]   ;;  %v12604_v49 = vcombine.low %v5156_v18, %v5160_v24 }
 0x344   :  { %5020 = vmatpush1.bf16.msra.mxu1 %v13810_v36  ;;  %v12605_v36 = vcombine.high %v5156_v18, %v5160_v24  ;;  %v5212_v32 = vld [vmem:[#allocation10 + $0x440] sm:$0xff] }
 0x345   :  { %5021 = vmatprep.subr.bf16.mxu1 %v13815_v17  ;;  %6663 = vmatpush1.bf16.msra.mxu0 %v12548_v19  ;;  %v5148_v17 = vld [vmem:[#allocation10 + $0x240] sm:$0xff] }
 0x346   :  { %6664 = vmatprep.subr.bf16.mxu0 %v12541_v20  ;;  %v5152_v19 = vld [vmem:[#allocation10 + $0x260] sm:$0xff] }
 0x347   :  { %v13837_v20 = vld [vmem:[#allocation7 + $0x768] ss:$16 sps:$4 sm:$0xff]   ;;  %v12596_v31 = vcombine.low %v5148_v17, %v5152_v19 }
 0x348   :  { %5022 = vmatpush1.bf16.msra.mxu1 %v13813_v48  ;;  %v12597_v48 = vcombine.high %v5148_v17, %v5152_v19  ;;  %v5204_v18 = vld [vmem:[#allocation10 + $0x400] sm:$0xff] }
 0x349   :  { %5023 = vmatprep.subr.bf16.mxu1 %v13818_v26  ;;  %6665 = vmatpush1.bf16.msra.mxu0 %v12540_v28  ;;  %v5140_v26 = vld [vmem:[#allocation10 + $0x200] sm:$0xff] }
 0x34a   :  { %6666 = vmatprep.subr.bf16.mxu0 %v12533_v56  ;;  %v5144_v28 = vld [vmem:[#allocation10 + $0x220] sm:$0xff] }
 0x34b   :  { %v13840_v56 = vld [vmem:[#allocation7 + $0x748] ss:$16 sps:$4 sm:$0xff]  }
 0x34c   :  { %5024 = vmatpush1.bf16.msra.mxu1 %v13816_v33  ;;  %v12589_v33 = vcombine.high %v5140_v26, %v5144_v28  ;;  %v5208_v24 = vld [vmem:[#allocation10 + $0x420] sm:$0xff] }
 0x34d   :  { %5025 = vmatprep.subr.bf16.mxu1 %v13821_v35  ;;  %6667 = vmatpush1.bf16.msra.mxu0 %v12532_v34  ;;  %v13843_v35 = vld [vmem:[#allocation7 + $0x728] ss:$16 sps:$4 sm:$0xff]   ;;  %v13848_v34 = vld [vmem:[#allocation7 + $0x70c] ss:$16 sps:$4 sm:$0xff]  }
 0x34e   :  { %6668 = vmatprep.subr.bf16.mxu0 %v12525_v37  ;;  %v12588_v37 = vcombine.low %v5140_v26, %v5144_v28  ;;  %v5328_v17 = vld [vmem:[#allocation10 + $0x7e0] sm:$0xff] }
 0x350   :  { %5026 = vmatpush1.bf16.msra.mxu1 %v13819_v46  ;;  %v5260_v46 = vld [vmem:[#allocation10 + $0x5c0] sm:$0xff] }
 0x351   :  { %5027 = vmatprep.subr.bf16.mxu1 %v13824_v39  ;;  %6669 = vmatpush1.bf16.msra.mxu0 %v12524_v47  ;;  %v5264_v39 = vld [vmem:[#allocation10 + $0x5e0] sm:$0xff] }
 0x352   :  { %6670 = vmatprep.subr.bf16.mxu0 %v12645_v22  ;;  %v12708_v47 = vcombine.low %v5260_v46, %v5264_v39  ;;  %v12709_v22 = vcombine.high %v5260_v46, %v5264_v39 }
 0x354   :  { %5028 = vmatpush1.bf16.msra.mxu1 %v13822_v52  ;;  %v12700_v52 = vcombine.low %v5252_v57, %v5256_v51 }
 0x355   :  { %5029 = vmatprep.subr.bf16.mxu1 %v13827_v54  ;;  %6671 = vmatpush2.bf16.msra.mxu0 %v12644_v55  ;;  %v12701_v54 = vcombine.high %v5252_v57, %v5256_v51  ;;  %v5244_v55 = vld [vmem:[#allocation10 + $0x540] sm:$0xff] }
 0x356   :  { %6672 = vmatprep.subr.bf16.mxu0 %v12637_v59  ;;  %v5248_v59 = vld [vmem:[#allocation10 + $0x560] sm:$0xff] }
 0x357   :  { %v12692_v58 = vcombine.low %v5244_v55, %v5248_v59  ;;  %v12693_v60 = vcombine.high %v5244_v55, %v5248_v59 }
 0x358   :  { %5030 = vmatpush2.bf16.msra.mxu1 %v13825_v61  ;;  %v5236_v61 = vld [vmem:[#allocation10 + $0x500] sm:$0xff] }
 0x359   :  { %5031 = vmatprep.subr.bf16.mxu1 %v13830_v62  ;;  %6673 = vmatpush2.bf16.msra.mxu0 %v12636_v7 }
 0x35a   :  { %6674 = vmatprep.subr.bf16.mxu0 %v12629_v2  ;;  %v5228_v2 = vld [vmem:[#allocation10 + $0x4c0] sm:$0xff] }
 0x35b   :  { %v12676_v53 = vcombine.low %v5228_v2, %v5232_v3 }
 0x35c   :  { %5032 = vmatpush2.bf16.msra.mxu1 %v13828_v4  ;;  %v12677_v4 = vcombine.high %v5228_v2, %v5232_v3 }
 0x35d   :  { %5033 = vmatprep.subr.bf16.mxu1 %v13833_v5  ;;  %6675 = vmatpush2.bf16.msra.mxu0 %v12628_v6  ;;  %v5220_v5 = vld [vmem:[#allocation10 + $0x480] sm:$0xff] }
 0x35e   :  { %6676 = vmatprep.subr.bf16.mxu0 %v12621_v42  ;;  %v5224_v6 = vld [vmem:[#allocation10 + $0x4a0] sm:$0xff] }
 0x35f   :  { %v12668_v42 = vcombine.low %v5220_v5, %v5224_v6  ;;  %v12669_v8 = vcombine.high %v5220_v5, %v5224_v6  ;;  %v5284_v6 = vld [vmem:[#allocation10 + $0x680] sm:$0xff] }
 0x360   :  { %5034 = vmatpush2.bf16.msra.mxu1 %v13831_v41  ;;  %v5216_v41 = vld [vmem:[#allocation10 + $0x460] sm:$0xff] }
 0x361   :  { %5035 = vmatprep.subr.bf16.mxu1 %v13836_v13  ;;  %6677 = vmatpush2.bf16.msra.mxu0 %v12620_v9  ;;  %v12660_v13 = vcombine.low %v5212_v32, %v5216_v41  ;;  %v12661_v9 = vcombine.high %v5212_v32, %v5216_v41 }
 0x362   :  { %6678 = vmatprep.subr.bf16.mxu0 %v12613_v10  ;;  %v4746_v10 = vpop.f32.mrf.mxu0 }
 0x364   :  { %5036 = vmatpush2.bf16.msra.mxu1 %v13834_v1  ;;  %v12652_v1 = vcombine.low %v5204_v18, %v5208_v24 }
 0x365   :  { %5037 = vmatprep.subr.bf16.mxu1 %v13839_v11  ;;  %6679 = vmatpush2.bf16.msra.mxu0 %v12612_v14  ;;  %v12653_v11 = vcombine.high %v5204_v18, %v5208_v24  ;;  %v4748_v14 = vpop.f32.mrf.mxu0 }
 0x366   :  { %6680 = vmatprep.subr.bf16.mxu0 %v12605_v36  ;;  %v5324_v36 = vld [vmem:[#allocation10 + $0x7c0] sm:$0xff] }
 0x367   :  { %v12772_v19 = vcombine.low %v5324_v36, %v5328_v17 }
 0x368   :  { %5038 = vmatpush2.bf16.msra.mxu1 %v13837_v20  ;;  %v12773_v20 = vcombine.high %v5324_v36, %v5328_v17  ;;  %v5276_v17 = vld [vmem:[#allocation10 + $0x640] sm:$0xff] }
 0x369   :  { %5039 = vmatprep.subr.bf16.mxu1 %v13842_v63  ;;  %6681 = vmatpush2.bf16.msra.mxu0 %v12604_v49  ;;  %v4750_v63 = vpop.f32.mrf.mxu0  ;;  %v5316_v49 = vld [vmem:[#allocation10 + $0x780] sm:$0xff] }
 0x36a   :  { %6682 = vmatprep.subr.bf16.mxu0 %v12597_v48  ;;  %v5320_v48 = vld [vmem:[#allocation10 + $0x7a0] sm:$0xff] }
 0x36b   :  { %v12764_v26 = vcombine.low %v5316_v49, %v5320_v48  ;;  %v12765_v28 = vcombine.high %v5316_v49, %v5320_v48 }
 0x36c   :  { %5040 = vmatpush2.bf16.msra.mxu1 %v13840_v56  ;;  %v4789_v56 = vpop.f32.mrf.mxu1 }
 0x36d   :  { %5041 = vmatprep.subr.bf16.mxu1 %v13845_v50  ;;  %6683 = vmatpush2.bf16.msra.mxu0 %v12596_v31  ;;  %v4752_v50 = vpop.f32.mrf.mxu0  ;;  %v5308_v31 = vld [vmem:[#allocation10 + $0x740] sm:$0xff] }
 0x36e   :  { %6684 = vmatprep.subr.bf16.mxu0 %v12589_v33  ;;  %v5312_v33 = vld [vmem:[#allocation10 + $0x760] sm:$0xff] }
 0x370   :  { %5042 = vmatpush2.bf16.msra.mxu1 %v13843_v35  ;;  %v15411_v35 = vld [vmem:[#allocation8] sm:$0xf] }
 0x371   :  { %5043 = vmatprep.subr.bf16.mxu1 %v13848_v34  ;;  %6685 = vmatpush2.bf16.msra.mxu0 %v12588_v37  ;;  %v12756_v34 = vcombine.low %v5308_v31, %v5312_v33  ;;  %v12757_v37 = vcombine.high %v5308_v31, %v5312_v33  ;;  %v3419_v46 = vrot.slane %v15411_v35, %v15309_v44  ;;  %v5268_v33 = vld [vmem:[#allocation10 + $0x600] sm:$0xff] }
 0x372   :  { %6740 = vmatprep.subr.bf16.mxu0 %v12583_v38  ;;  %v4791_v38 = vpop.f32.mrf.mxu1  ;;  %v3415_v39 = vrot.slane %v15411_v35, %v15264_v27 }
 0x373   :  { %v4749_v55 = vadd.f32 %v4748_v14, %v3419_v46 }
 0x374   :  { %5044 = vmatpush2.bf16.msra.mxu1 %v13846_v40  ;;  %v4832_v40 = vpop.f32.mrf.mxu0  ;;  %v4747_v59 = vadd.f32 %v4746_v10, %v3415_v39 }
 0x375   :  { %6697 = vmatprep.subr.bf16.mxu1 %v12709_v22  ;;  %v5304_v22 = vld [vmem:[#allocation10 + $0x720] sm:$0xff]  ;;  %v4792_v3 = vadd.f32 %v4791_v38, %v4749_v55 }
 0x377   :  { %5046 = vmatmul.mubr.bf16.vlgmr.msra.gmra.mxu1 %v15393_v0  ;;  %v5240_v0 = vld [vmem:[#allocation10 + $0x520] sm:$0xff] }
 0x378   :  { %6698 = vmatpush1.bf16.msra.mxu1 %v12708_v47  ;;  %v12684_v62 = vcombine.low %v5236_v61, %v5240_v0  ;;  %v12685_v7 = vcombine.high %v5236_v61, %v5240_v0  ;;  %v5300_v47 = vld [vmem:[#allocation10 + $0x700] sm:$0xff]  ;;  %v4751_v61 = vadd.f32 %v4750_v63, %v3415_v39 }
 0x379   :  { %6699 = vmatprep.subr.bf16.mxu1 %v12701_v54  ;;  %v12748_v57 = vcombine.low %v5300_v47, %v5304_v22  ;;  %v12749_v51 = vcombine.high %v5300_v47, %v5304_v22  ;;  %v4834_v54 = vpop.f32.mrf.mxu0  ;;  %v5125_v22 = vld [vmem:[#allocation10 + $0x188] sm:$0xff] }
 0x37a   :  { %v4835_v32 = vadd.f32 %v4834_v54, %v4792_v3  ;;  %v15419_v54 = vld [vmem:[#allocation10 + $0x5e8] sm:$0xff] }
 0x37b   :  { %v4836_v2 = vpop.f32.mrf.mxu0  ;;  %v5109_v3 = vld [vmem:[#allocation10 + $0x108] sm:$0xff] }
 0x37c   :  { %6700 = vmatpush1.bf16.msra.mxu1 %v12700_v52  ;;  %v4793_v52 = vpop.f32.mrf.mxu1 }
 0x37d   :  { %6701 = vmatprep.subr.bf16.mxu1 %v12693_v60  ;;  %v5296_v60 = vld [vmem:[#allocation10 + $0x6e0] sm:$0xff] }
 0x380   :  { %6702 = vmatpush1.bf16.msra.mxu1 %v12692_v58  ;;  %v5292_v58 = vld [vmem:[#allocation10 + $0x6c0] sm:$0xff] }
 0x381   :  { %6703 = vmatprep.subr.bf16.mxu1 %v12685_v7  ;;  %v12740_v0 = vcombine.low %v5292_v58, %v5296_v60  ;;  %v4795_v7 = vpop.f32.mrf.mxu1 }
 0x384   :  { %6704 = vmatpush1.bf16.msra.mxu1 %v12684_v62  ;;  %v12741_v62 = vcombine.high %v5292_v58, %v5296_v60 }
 0x385   :  { %6705 = vmatprep.subr.bf16.mxu1 %v12677_v4  ;;  %v4790_v4 = vadd.f32 %v4789_v56, %v4747_v59 }
 0x388   :  { %6706 = vmatpush1.bf16.msra.mxu1 %v12676_v53  ;;  %v4753_v53 = vadd.f32 %v4752_v50, %v3419_v46 }
 0x389   :  { %6707 = vmatprep.subr.bf16.mxu1 %v12669_v8  ;;  %v4794_v8 = vadd.f32 %v4793_v52, %v4751_v61  ;;  %v15417_v52 = vld [vmem:[#allocation10 + $0x5c8] sm:$0xff] }
 0x38a   :  { %v4796_v24 = vadd.f32 %v4795_v7, %v4753_v53  ;;  %v12711_v59 = vcombine.high %v15417_v52, %v15419_v54  ;;  %v12710_v61 = vcombine.low %v15417_v52, %v15419_v54  ;;  %v5113_v53 = vld [vmem:[#allocation10 + $0x128] sm:$0xff] }
 0x38c   :  { %6708 = vmatpush1.bf16.msra.mxu1 %v12668_v42  ;;  %v5288_v42 = vld [vmem:[#allocation10 + $0x6a0] sm:$0xff] }
 0x38d   :  { %6709 = vmatprep.subr.bf16.mxu1 %v12661_v9  ;;  %v12733_v41 = vcombine.high %v5284_v6, %v5288_v42  ;;  %v4838_v9 = vpop.f32.mrf.mxu0  ;;  %v12732_v18 = vcombine.low %v5284_v6, %v5288_v42  ;;  %v5101_v6 = vld [vmem:[#allocation10 + $0xc8] sm:$0xff] }
 0x38e   :  { %v5105_v42 = vld [vmem:[#allocation10 + $0xe8] sm:$0xff] }
 0x38f   :  { %v12550_v23 = vcombine.low %v5101_v6, %v5105_v42 }
 0x390   :  { %6710 = vmatpush1.bf16.msra.mxu1 %v12660_v13  ;;  %v4833_v13 = vadd.f32 %v4832_v40, %v4790_v4 }
 0x391   :  { %6711 = vmatprep.subr.bf16.mxu1 %v12653_v11 }
 0x394   :  { %6712 = vmatpush1.bf16.msra.mxu1 %v12652_v1  ;;  %v4837_v1 = vadd.f32 %v4836_v2, %v4794_v8  ;;  %v12558_v8 = vcombine.low %v5109_v3, %v5113_v53 }
 0x395   :  { %6713 = vmatprep.subr.bf16.mxu1 %v12773_v20  ;;  %v4839_v20 = vadd.f32 %v4838_v9, %v4796_v24  ;;  %v5089_v9 = vld [vmem:[#allocation10 + $0x68] sm:$0xff] }
 0x396   :  { %v5077_v24 = vld [vmem:[#allocation10 + $0x8] sm:$0xff] }
 0x398   :  { %6714 = vmatpush2.bf16.msra.mxu1 %v12772_v19  ;;  %v5280_v19 = vld [vmem:[#allocation10 + $0x660] sm:$0xff] }
 0x399   :  { %6715 = vmatprep.subr.bf16.mxu1 %v12765_v28  ;;  %v12725_v49 = vcombine.high %v5276_v17, %v5280_v19 }
 0x39c   :  { %6716 = vmatpush2.bf16.msra.mxu1 %v12764_v26  ;;  %v12724_v26 = vcombine.low %v5276_v17, %v5280_v19  ;;  %v5201_v17 = vld [vmem:[#allocation10 + $0x3e8] sm:$0xff] }
 0x39d   :  { %6717 = vmatprep.subr.bf16.mxu1 %v12757_v37 }
 0x3a0   :  { %6718 = vmatpush2.bf16.msra.mxu1 %v12756_v34  ;;  %v5272_v34 = vld [vmem:[#allocation10 + $0x620] sm:$0xff] }
 0x3a1   :  { %6719 = vmatprep.subr.bf16.mxu1 %v12749_v51  ;;  %v12717_v38 = vcombine.high %v5268_v33, %v5272_v34  ;;  %v12716_v46 = vcombine.low %v5268_v33, %v5272_v34  ;;  %v5173_v33 = vld [vmem:[#allocation10 + $0x308] sm:$0xff] }
 0x3a2   :  { %v5177_v34 = vld [vmem:[#allocation10 + $0x328] sm:$0xff] }
 0x3a4   :  { %6720 = vmatpush2.bf16.msra.mxu1 %v12748_v57  ;;  %v5129_v57 = vld [vmem:[#allocation10 + $0x1a8] sm:$0xff] }
 0x3a5   :  { %6721 = vmatprep.subr.bf16.mxu1 %v12741_v62  ;;  %v12575_v60 = vcombine.high %v5125_v22, %v5129_v57  ;;  %v5121_v62 = vld [vmem:[#allocation10 + $0x168] sm:$0xff]  ;;  %v12574_v7 = vcombine.low %v5125_v22, %v5129_v57 }
 0x3a6   :  { %v5157_v22 = vld [vmem:[#allocation10 + $0x288] sm:$0xff] }
 0x3a7   :  { %v5161_v57 = vld [vmem:[#allocation10 + $0x2a8] sm:$0xff] }
 0x3a8   :  { %6722 = vmatpush2.bf16.msra.mxu1 %v12740_v0  ;;  %v5117_v0 = vld [vmem:[#allocation10 + $0x148] sm:$0xff] }
 0x3a9   :  { %6723 = vmatprep.subr.bf16.mxu1 %v12733_v41  ;;  %v12567_v2 = vcombine.high %v5117_v0, %v5121_v62  ;;  %v12566_v4 = vcombine.low %v5117_v0, %v5121_v62  ;;  %v5093_v41 = vld [vmem:[#allocation10 + $0x88] sm:$0xff]  ;;  %v12606_v62 = vcombine.low %v5157_v22, %v5161_v57 }
 0x3aa   :  { %v5153_v0 = vld [vmem:[#allocation10 + $0x268] sm:$0xff] }
 0x3ac   :  { %6724 = vmatpush2.bf16.msra.mxu1 %v12732_v18 }
 0x3ad   :  { %6725 = vmatprep.subr.bf16.mxu1 %v12725_v49  ;;  %v5193_v49 = vld [vmem:[#allocation10 + $0x3a8] sm:$0xff] }
 0x3b0   :  { %6726 = vmatpush2.bf16.msra.mxu1 %v12724_v26 }
 0x3b1   :  { %6727 = vmatprep.subr.bf16.mxu1 %v12717_v38  ;;  %v12623_v38 = vcombine.high %v5173_v33, %v5177_v34 }
 0x3b4   :  { %6728 = vmatpush2.bf16.msra.mxu1 %v12716_v46  ;;  %v5169_v46 = vld [vmem:[#allocation10 + $0x2e8] sm:$0xff] }
 0x3b5   :  { %6783 = vmatprep.subr.bf16.mxu1 %v12711_v59  ;;  %v12607_v59 = vcombine.high %v5157_v22, %v5161_v57  ;;  %v5190_v22 = vld [vmem:[#allocation10 + $0x390] sm:$0xff] }
 0x3b6   :  { %v5194_v57 = vld [vmem:[#allocation10 + $0x3b0] sm:$0xff] }
 0x3b7   :  { %v4875_v5 = vpop.f32.mrf.mxu1 }
 0x3b8   :  { %v4876_v14 = vadd.f32 %v4875_v5, %v4833_v13  ;;  %v12559_v5 = vcombine.high %v5109_v3, %v5113_v53  ;;  %v5085_v13 = vld [vmem:[#allocation10 + $0x48] sm:$0xff] }
 0x3b9   :  { %v4877_v10 = vpop.f32.mrf.mxu1  ;;  %v12535_v18 = vcombine.high %v5085_v13, %v5089_v9  ;;  %v5145_v3 = vld [vmem:[#allocation10 + $0x228] sm:$0xff] }
 0x3ba   :  { %v4878_v11 = vadd.f32 %v4877_v10, %v4835_v32  ;;  %v5056_v31 = vmul.f32 0.2, %v4876_v14  ;;  %v12551_v32 = vcombine.high %v5101_v6, %v5105_v42  ;;  %v12542_v10 = vcombine.low %v5093_v41, %v5097_v43  ;;  %v5138_v6 = vld [vmem:[#allocation10 + $0x1f0] sm:$0xff] }
 0x3bb   :  { %v4879_v36 = vpop.f32.mrf.mxu1 }
 0x3bc   :  { %v4880_v63 = vadd.f32 %v4879_v36, %v4837_v1  ;;  %v5057_v28 = vmul.f32 0.2, %v4878_v11  ;;  %v5064_v51 = vmax.f32 %v4876_v14, %v5056_v31  ;;  %v5081_v1 = vld [vmem:[#allocation10 + $0x28] sm:$0xff] }
 0x3bd   :  { %v4881_v48 = vpop.f32.mrf.mxu1  ;;  %v12527_v14 = vcombine.high %v5077_v24, %v5081_v1  ;;  %v5197_v36 = vld [vmem:[#allocation10 + $0x3c8] sm:$0xff]  ;;  %v12526_v19 = vcombine.low %v5077_v24, %v5081_v1  ;;  %v5114_v24 = vld [vmem:[#allocation10 + $0x130] sm:$0xff] }
 0x3be   :  { %v5060_v56 = vmul.f32 0.2, %v4880_v63  ;;  %v4882_v50 = vadd.f32 %v4881_v48, %v4839_v20  ;;  %v5065_v39 = vmax.f32 %v4878_v11, %v5057_v28  ;;  %v12534_v11 = vcombine.low %v5085_v13, %v5089_v9  ;;  %v5181_v28 = vld [vmem:[#allocation10 + $0x348] sm:$0xff]  ;;  %v5122_v13 = vld [vmem:[#allocation10 + $0x170] sm:$0xff] }
 0x3bf   :  { %v12647_v20 = vcombine.high %v5197_v36, %v5201_v17  ;;  %v12646_v48 = vcombine.low %v5197_v36, %v5201_v17  ;;  %v5106_v36 = vld [vmem:[#allocation10 + $0xf0] sm:$0xff] }
 0x3c0   :  { %v5061_v37 = vmul.f32 0.2, %v4882_v50  ;;  %v5068_v40 = vmax.f32 %v4880_v63, %v5060_v56  ;;  %v5189_v63 = vld [vmem:[#allocation10 + $0x388] sm:$0xff] }
 0x3c1   :  { %v12639_v26 = vcombine.high %v5189_v63, %v5193_v49  ;;  %v5185_v56 = vld [vmem:[#allocation10 + $0x368] sm:$0xff] }
 0x3c2   :  { %v5069_v47 = vmax.f32 %v4882_v50, %v5061_v37  ;;  %v15425_v58 = vpack.c.bf16 %v5068_v40, %v5064_v51  ;;  %v12638_v50 = vcombine.low %v5189_v63, %v5193_v49  ;;  %v12631_v31 = vcombine.high %v5181_v28, %v5185_v56  ;;  %v5165_v40 = vld [vmem:[#allocation10 + $0x2c8] sm:$0xff]  ;;  %v5098_v63 = vld [vmem:[#allocation10 + $0xb0] sm:$0xff] }
 0x3c3   :  { %v12630_v37 = vcombine.low %v5181_v28, %v5185_v56  ;;  %v12614_v51 = vcombine.low %v5165_v40, %v5169_v46  ;;  %v5090_v28 = vld [vmem:[#allocation10 + $0x70] sm:$0xff] }
 0x3c4   :  { %v15421_v55 = vpack.c.bf16 %v5069_v47, %v5065_v39  ;;  %v12622_v39 = vcombine.low %v5173_v33, %v5177_v34  ;;  %v12615_v47 = vcombine.high %v5165_v40, %v5169_v46  ;;  %v5082_v33 = vld [vmem:[#allocation10 + $0x30] sm:$0xff] }
 0x3c5   :  { %v5202_v40 = vld [vmem:[#allocation10 + $0x3f0] sm:$0xff] }
 0x3c6   :  { %6686 = vmatprep.mubr.bf16.mxu0 %v15421_v55 }
 0x3c7   :  { %6687 = vmatmul.mubr.bf16.vlgmr.msra.gmra.mxu0 %v15425_v58 }
 0x3c8   :  { %6741 = vmatpush1.bf16.msra.mxu0 %v12582_v30  ;;  %6772 = vmatprep.mubr.bf16.mxu0 %v15421_v55  ;;  %v12543_v30 = vcombine.high %v5093_v41, %v5097_v43  ;;  %v5130_v41 = vld [vmem:[#allocation10 + $0x1b0] sm:$0xff] }
 0x3c9   :  { %6742 = vmatprep.subr.bf16.mxu0 %v12575_v60  ;;  %v5149_v60 = vld [vmem:[#allocation10 + $0x248] sm:$0xff] }
 0x3ca   :  { %v12598_v53 = vcombine.low %v5149_v60, %v5153_v0 }
 0x3cc   :  { %6743 = vmatpush1.bf16.msra.mxu0 %v12574_v7  ;;  %v12599_v7 = vcombine.high %v5149_v60, %v5153_v0  ;;  %v12641_v60 = vcombine.high %v5190_v22, %v5194_v57  ;;  %v5182_v0 = vld [vmem:[#allocation10 + $0x350] sm:$0xff] }
 0x3cd   :  { %6744 = vmatprep.subr.bf16.mxu0 %v12567_v2  ;;  %v5141_v2 = vld [vmem:[#allocation10 + $0x208] sm:$0xff] }
 0x3ce   :  { %v12590_v42 = vcombine.low %v5141_v2, %v5145_v3 }
 0x3d0   :  { %6745 = vmatpush1.bf16.msra.mxu0 %v12566_v4  ;;  %v12591_v4 = vcombine.high %v5141_v2, %v5145_v3 }
 0x3d1   :  { %6746 = vmatprep.subr.bf16.mxu0 %v12559_v5  ;;  %v5134_v5 = vld [vmem:[#allocation10 + $0x1d0] sm:$0xff] }
 0x3d2   :  { %v12584_v43 = vcombine.low %v5134_v5, %v5138_v6 }
 0x3d4   :  { %6747 = vmatpush1.bf16.msra.mxu0 %v12558_v8  ;;  %v12585_v8 = vcombine.high %v5134_v5, %v5138_v6  ;;  %v5178_v5 = vld [vmem:[#allocation10 + $0x330] sm:$0xff] }
 0x3d5   :  { %6748 = vmatprep.subr.bf16.mxu0 %v12551_v32  ;;  %v5126_v32 = vld [vmem:[#allocation10 + $0x190] sm:$0xff] }
 0x3d6   :  { %v12576_v9 = vcombine.low %v5126_v32, %v5130_v41 }
 0x3d8   :  { %6749 = vmatpush1.bf16.msra.mxu0 %v12550_v23  ;;  %v12577_v23 = vcombine.high %v5126_v32, %v5130_v41  ;;  %v3427_v41 = vrot.slane %v15411_v35, %v15322_v29 }
 0x3d9   :  { %6750 = vmatprep.subr.bf16.mxu0 %v12543_v30  ;;  %v5118_v30 = vld [vmem:[#allocation10 + $0x150] sm:$0xff] }
 0x3da   :  { %v12568_v1 = vcombine.low %v5118_v30, %v5122_v13 }
 0x3dc   :  { %6751 = vmatpush1.bf16.msra.mxu0 %v12542_v10  ;;  %v12569_v10 = vcombine.high %v5118_v30, %v5122_v13  ;;  %v3423_v30 = vrot.slane %v15411_v35, %v15347_v16 }
 0x3dd   :  { %6752 = vmatprep.subr.bf16.mxu0 %v12535_v18  ;;  %v5110_v18 = vld [vmem:[#allocation10 + $0x110] sm:$0xff] }
 0x3de   :  { %v12560_v17 = vcombine.low %v5110_v18, %v5114_v24 }
 0x3e0   :  { %6753 = vmatpush1.bf16.msra.mxu0 %v12534_v11  ;;  %v12561_v11 = vcombine.high %v5110_v18, %v5114_v24 }
 0x3e1   :  { %6754 = vmatprep.subr.bf16.mxu0 %v12527_v14  ;;  %v5102_v14 = vld [vmem:[#allocation10 + $0xd0] sm:$0xff] }
 0x3e2   :  { %v12552_v49 = vcombine.low %v5102_v14, %v5106_v36 }
 0x3e4   :  { %6755 = vmatpush1.bf16.msra.mxu0 %v12526_v19  ;;  %v12553_v19 = vcombine.high %v5102_v14, %v5106_v36 }
 0x3e5   :  { %6756 = vmatprep.subr.bf16.mxu0 %v12647_v20  ;;  %v5094_v20 = vld [vmem:[#allocation10 + $0x90] sm:$0xff] }
 0x3e6   :  { %v12544_v56 = vcombine.low %v5094_v20, %v5098_v63 }
 0x3e8   :  { %6757 = vmatpush2.bf16.msra.mxu0 %v12646_v48  ;;  %v12545_v48 = vcombine.high %v5094_v20, %v5098_v63 }
 0x3e9   :  { %6758 = vmatprep.subr.bf16.mxu0 %v12639_v26  ;;  %v5086_v26 = vld [vmem:[#allocation10 + $0x50] sm:$0xff] }
 0x3ea   :  { %v12536_v34 = vcombine.low %v5086_v26, %v5090_v28 }
 0x3ec   :  { %6759 = vmatpush2.bf16.msra.mxu0 %v12638_v50  ;;  %v12537_v50 = vcombine.high %v5086_v26, %v5090_v28  ;;  %v5150_v28 = vld [vmem:[#allocation10 + $0x250] sm:$0xff] }
 0x3ed   :  { %6760 = vmatprep.subr.bf16.mxu0 %v12631_v31  ;;  %v5078_v31 = vld [vmem:[#allocation10 + $0x10] sm:$0xff] }
 0x3ee   :  { %v12528_v46 = vcombine.low %v5078_v31, %v5082_v33 }
 0x3f0   :  { %6761 = vmatpush2.bf16.msra.mxu0 %v12630_v37  ;;  %v12529_v37 = vcombine.high %v5078_v31, %v5082_v33 }
 0x3f1   :  { %6762 = vmatprep.subr.bf16.mxu0 %v12623_v38  ;;  %v5198_v38 = vld [vmem:[#allocation10 + $0x3d0] sm:$0xff] }
 0x3f4   :  { %6763 = vmatpush2.bf16.msra.mxu0 %v12622_v39  ;;  %v4918_v39 = vpop.f32.mrf.mxu0 }
 0x3f5   :  { %6764 = vmatprep.subr.bf16.mxu0 %v12615_v47  ;;  %v12649_v47 = vcombine.high %v5198_v38, %v5202_v40  ;;  %v4919_v14 = vadd.f32 %v4918_v39, %v3423_v30 }
 0x3f7   :  { %v4961_v3 = vpop.f32.mrf.mxu1 }
 0x3f8   :  { %6765 = vmatpush2.bf16.msra.mxu0 %v12614_v51  ;;  %v12648_v51 = vcombine.low %v5198_v38, %v5202_v40  ;;  %v4962_v63 = vadd.f32 %v4961_v3, %v4919_v14 }
 0x3f9   :  { %6766 = vmatprep.subr.bf16.mxu0 %v12607_v59  ;;  %v4920_v59 = vpop.f32.mrf.mxu0 }
 0x3fa   :  { %v4921_v24 = vadd.f32 %v4920_v59, %v3427_v41 }
 0x3fb   :  { %v4922_v2 = vpop.f32.mrf.mxu0 }
 0x3fc   :  { %6767 = vmatpush2.bf16.msra.mxu0 %v12606_v62  ;;  %v5186_v62 = vld [vmem:[#allocation10 + $0x370] sm:$0xff] }
 0x3fd   :  { %6768 = vmatprep.subr.bf16.mxu0 %v12599_v7  ;;  %v12640_v7 = vcombine.low %v5190_v22, %v5194_v57  ;;  %v12632_v6 = vcombine.low %v5182_v0, %v5186_v62  ;;  %v5142_v22 = vld [vmem:[#allocation10 + $0x210] sm:$0xff] }
 0x3fe   :  { %v5146_v57 = vld [vmem:[#allocation10 + $0x230] sm:$0xff] }
 0x3ff   :  { %v12593_v3 = vcombine.high %v5142_v22, %v5146_v57 }
 0x400   :  { %6769 = vmatpush2.bf16.msra.mxu0 %v12598_v53  ;;  %v12633_v53 = vcombine.high %v5182_v0, %v5186_v62 }
 0x401   :  { %6770 = vmatprep.subr.bf16.mxu0 %v12591_v4  ;;  %v5174_v4 = vld [vmem:[#allocation10 + $0x310] sm:$0xff] }
 0x402   :  { %v12625_v32 = vcombine.high %v5174_v4, %v5178_v5 }
 0x404   :  { %6771 = vmatpush2.bf16.msra.mxu0 %v12590_v42  ;;  %v4924_v42 = vpop.f32.mrf.mxu0 }
 0x405   :  { %6826 = vmatprep.subr.bf16.mxu0 %v12585_v8  ;;  %v4963_v8 = vpop.f32.mrf.mxu1  ;;  %v4925_v35 = vadd.f32 %v4924_v42, %v3427_v41  ;;  %v5139_v42 = vld [vmem:[#allocation10 + $0x1f8] sm:$0xff]  ;;  %v12592_v41 = vcombine.low %v5142_v22, %v5146_v57 }
 0x406   :  { %v5004_v13 = vpop.f32.mrf.mxu0 }
 0x407   :  { %6773 = vmatmul.mubr.bf16.vlgmr.msra.gmra.mxu0 %v15425_v58  ;;  %v5005_v38 = vadd.f32 %v5004_v13, %v4962_v63  ;;  %v5249_v63 = vld [vmem:[#allocation10 + $0x568] sm:$0xff] }
 0x408   :  { %6827 = vmatpush1.bf16.msra.mxu0 %v12584_v43  ;;  %6858 = vmatprep.mubr.bf16.mxu0 %v15421_v55  ;;  %v5166_v43 = vld [vmem:[#allocation10 + $0x2d0] sm:$0xff]  ;;  %v5006_v36 = vpop.f32.mrf.mxu0 }
 0x409   :  { %6828 = vmatprep.subr.bf16.mxu0 %v12577_v23  ;;  %v5170_v23 = vld [vmem:[#allocation10 + $0x2f0] sm:$0xff] }
 0x40a   :  { %v12617_v18 = vcombine.high %v5166_v43, %v5170_v23  ;;  %v12616_v20 = vcombine.low %v5166_v43, %v5170_v23 }
 0x40c   :  { %6829 = vmatpush1.bf16.msra.mxu0 %v12576_v9  ;;  %v12624_v9 = vcombine.low %v5174_v4, %v5178_v5 }
 0x40d   :  { %6830 = vmatprep.subr.bf16.mxu0 %v12569_v10  ;;  %v4965_v10 = vpop.f32.mrf.mxu1 }
 0x410   :  { %6831 = vmatpush1.bf16.msra.mxu0 %v12568_v1  ;;  %v5158_v1 = vld [vmem:[#allocation10 + $0x290] sm:$0xff] }
 0x411   :  { %6832 = vmatprep.subr.bf16.mxu0 %v12561_v11  ;;  %v5162_v11 = vld [vmem:[#allocation10 + $0x2b0] sm:$0xff] }
 0x414   :  { %6833 = vmatpush1.bf16.msra.mxu0 %v12560_v17  ;;  %v4923_v17 = vadd.f32 %v4922_v2, %v3423_v30 }
 0x415   :  { %6834 = vmatprep.subr.bf16.mxu0 %v12553_v19  ;;  %v4964_v19 = vadd.f32 %v4963_v8, %v4921_v24  ;;  %v5127_v24 = vld [vmem:[#allocation10 + $0x198] sm:$0xff] }
 0x416   :  { %v4966_v26 = vadd.f32 %v4965_v10, %v4923_v17 }
 0x418   :  { %6835 = vmatpush1.bf16.msra.mxu0 %v12552_v49  ;;  %v4967_v49 = vpop.f32.mrf.mxu1 }
 0x419   :  { %6836 = vmatprep.subr.bf16.mxu0 %v12545_v48  ;;  %v12609_v48 = vcombine.high %v5158_v1, %v5162_v11  ;;  %v4968_v33 = vadd.f32 %v4967_v49, %v4925_v35  ;;  %v5119_v49 = vld [vmem:[#allocation10 + $0x158] sm:$0xff] }
 0x41c   :  { %6837 = vmatpush1.bf16.msra.mxu0 %v12544_v56  ;;  %v5154_v56 = vld [vmem:[#allocation10 + $0x270] sm:$0xff] }
 0x41d   :  { %6838 = vmatprep.subr.bf16.mxu0 %v12537_v50  ;;  %v5008_v50 = vpop.f32.mrf.mxu0 }
 0x420   :  { %6839 = vmatpush1.bf16.msra.mxu0 %v12536_v34  ;;  %v5007_v34 = vadd.f32 %v5006_v36, %v4964_v19 }
 0x421   :  { %6840 = vmatprep.subr.bf16.mxu0 %v12529_v37  ;;  %v12608_v37 = vcombine.low %v5158_v1, %v5162_v11  ;;  %v5131_v1 = vld [vmem:[#allocation10 + $0x1b8] sm:$0xff] }
 0x422   :  { %v12579_v19 = vcombine.high %v5127_v24, %v5131_v1 }
 0x424   :  { %6841 = vmatpush1.bf16.msra.mxu0 %v12528_v46  ;;  %v12601_v46 = vcombine.high %v5150_v28, %v5154_v56 }
 0x425   :  { %6842 = vmatprep.subr.bf16.mxu0 %v12649_v47  ;;  %v5009_v47 = vadd.f32 %v5008_v50, %v4966_v26  ;;  %v12578_v26 = vcombine.low %v5127_v24, %v5131_v1  ;;  %v5237_v50 = vld [vmem:[#allocation10 + $0x508] sm:$0xff] }
 0x426   :  { %v5325_v1 = vld [vmem:[#allocation10 + $0x7c8] sm:$0xff] }
 0x428   :  { %6843 = vmatpush2.bf16.msra.mxu0 %v12648_v51  ;;  %v5010_v51 = vpop.f32.mrf.mxu0 }
 0x429   :  { %6844 = vmatprep.subr.bf16.mxu0 %v12641_v60  ;;  %v5011_v62 = vadd.f32 %v5010_v51, %v4968_v33  ;;  %v5111_v33 = vld [vmem:[#allocation10 + $0x118] sm:$0xff]  ;;  %v5221_v51 = vld [vmem:[#allocation10 + $0x488] sm:$0xff] }
 0x42c   :  { %6845 = vmatpush2.bf16.msra.mxu0 %v12640_v7  ;;  %v12600_v7 = vcombine.low %v5150_v28, %v5154_v56 }
 0x42d   :  { %6846 = vmatprep.subr.bf16.mxu0 %v12633_v53 }
 0x430   :  { %6847 = vmatpush2.bf16.msra.mxu0 %v12632_v6  ;;  %v5135_v6 = vld [vmem:[#allocation10 + $0x1d8] sm:$0xff] }
 0x431   :  { %6848 = vmatprep.subr.bf16.mxu0 %v12625_v32  ;;  %v12587_v23 = vcombine.high %v5135_v6, %v5139_v42  ;;  %v12586_v36 = vcombine.low %v5135_v6, %v5139_v42  ;;  %v5091_v6 = vld [vmem:[#allocation10 + $0x78] sm:$0xff] }
 0x434   :  { %6849 = vmatpush2.bf16.msra.mxu0 %v12624_v9  ;;  %v5253_v9 = vld [vmem:[#allocation10 + $0x588] sm:$0xff] }
 0x435   :  { %6850 = vmatprep.subr.bf16.mxu0 %v12617_v18  ;;  %v5257_v18 = vld [vmem:[#allocation10 + $0x5a8] sm:$0xff] }
 0x436   :  { %v12703_v17 = vcombine.high %v5253_v9, %v5257_v18  ;;  %v12702_v35 = vcombine.low %v5253_v9, %v5257_v18 }
 0x437   :  { %v5047_v31 = vpop.f32.mrf.mxu1 }
 0x438   :  { %6851 = vmatpush2.bf16.msra.mxu0 %v12616_v20  ;;  %v5048_v59 = vadd.f32 %v5047_v31, %v5005_v38  ;;  %v5245_v20 = vld [vmem:[#allocation10 + $0x548] sm:$0xff] }
 0x439   :  { %v5049_v40 = vpop.f32.mrf.mxu1  ;;  %6852 = vmatprep.subr.bf16.mxu0 %v12609_v48  ;;  %v5123_v48 = vld [vmem:[#allocation10 + $0x178] sm:$0xff]  ;;  %v12695_v28 = vcombine.high %v5245_v20, %v5249_v63  ;;  %v5241_v31 = vld [vmem:[#allocation10 + $0x528] sm:$0xff] }
 0x43a   :  { %v5050_v39 = vadd.f32 %v5049_v40, %v5007_v34  ;;  %v5058_v8 = vmul.f32 0.2, %v5048_v59  ;;  %v12571_v56 = vcombine.high %v5119_v49, %v5123_v48  ;;  %v5115_v34 = vld [vmem:[#allocation10 + $0x138] sm:$0xff]  ;;  %v12570_v52 = vcombine.low %v5119_v49, %v5123_v48  ;;  %v5229_v38 = vld [vmem:[#allocation10 + $0x4c8] sm:$0xff] }
 0x43b   :  { %v5051_v60 = vpop.f32.mrf.mxu1  ;;  %v12687_v54 = vcombine.high %v5237_v50, %v5241_v31  ;;  %v5233_v40 = vld [vmem:[#allocation10 + $0x4e8] sm:$0xff] }
 0x43c   :  { %v5052_v0 = vadd.f32 %v5051_v60, %v5009_v47  ;;  %6853 = vmatpush2.bf16.msra.mxu0 %v12608_v37  ;;  %v5059_v53 = vmul.f32 0.2, %v5050_v39  ;;  %v5066_v10 = vmax.f32 %v5048_v59, %v5058_v8  ;;  %v12694_v37 = vcombine.low %v5245_v20, %v5249_v63  ;;  %v5225_v59 = vld [vmem:[#allocation10 + $0x4a8] sm:$0xff]  ;;  %v5095_v60 = vld [vmem:[#allocation10 + $0x98] sm:$0xff] }
 0x43d   :  { %v5053_v2 = vpop.f32.mrf.mxu1  ;;  %6854 = vmatprep.subr.bf16.mxu0 %v12601_v46  ;;  %v5107_v46 = vld [vmem:[#allocation10 + $0xf8] sm:$0xff]  ;;  %v12562_v47 = vcombine.low %v5111_v33, %v5115_v34  ;;  %v12679_v22 = vcombine.high %v5229_v38, %v5233_v40  ;;  %v12670_v42 = vcombine.low %v5221_v51, %v5225_v59 }
 0x43e   :  { %v5062_v4 = vmul.f32 0.2, %v5052_v0  ;;  %v5054_v5 = vadd.f32 %v5053_v2, %v5011_v62  ;;  %v5067_v30 = vmax.f32 %v5050_v39, %v5059_v53  ;;  %v12686_v39 = vcombine.low %v5237_v50, %v5241_v31  ;;  %v5213_v53 = vld [vmem:[#allocation10 + $0x448] sm:$0xff] }
 0x43f   :  { %v12678_v62 = vcombine.low %v5229_v38, %v5233_v40  ;;  %v12671_v2 = vcombine.high %v5221_v51, %v5225_v59 }
 0x440   :  { %v5063_v32 = vmul.f32 0.2, %v5054_v5  ;;  %6855 = vmatpush2.bf16.msra.mxu0 %v12600_v7  ;;  %v5070_v43 = vmax.f32 %v5052_v0, %v5062_v4  ;;  %v5099_v0 = vld [vmem:[#allocation10 + $0xb8] sm:$0xff]  ;;  %v5217_v4 = vld [vmem:[#allocation10 + $0x468] sm:$0xff] }
 0x441   :  { %6856 = vmatprep.subr.bf16.mxu0 %v12593_v3  ;;  %v12547_v3 = vcombine.high %v5095_v60, %v5099_v0  ;;  %v12546_v8 = vcombine.low %v5095_v60, %v5099_v0  ;;  %v12662_v9 = vcombine.low %v5213_v53, %v5217_v4 }
 0x442   :  { %v5071_v13 = vmax.f32 %v5054_v5, %v5063_v32  ;;  %v15443_v14 = vpack.c.bf16 %v5070_v43, %v5066_v10  ;;  %v5087_v5 = vld [vmem:[#allocation10 + $0x58] sm:$0xff]  ;;  %v12663_v32 = vcombine.high %v5213_v53, %v5217_v4  ;;  %v5205_v43 = vld [vmem:[#allocation10 + $0x408] sm:$0xff] }
 0x443   :  { %v12538_v10 = vcombine.low %v5087_v5, %v5091_v6 }
 0x444   :  { %v15441_v11 = vpack.c.bf16 %v5071_v13, %v5067_v30  ;;  %6857 = vmatpush2.bf16.msra.mxu0 %v12592_v41  ;;  %v12539_v41 = vcombine.high %v5087_v5, %v5091_v6  ;;  %v5079_v30 = vld [vmem:[#allocation10 + $0x18] sm:$0xff] }
 0x445   :  { %6912 = vmatprep.subr.bf16.mxu0 %v12587_v23  ;;  %v5209_v23 = vld [vmem:[#allocation10 + $0x428] sm:$0xff]  ;;  %v5083_v13 = vld [vmem:[#allocation10 + $0x38] sm:$0xff] }
 0x446   :  { %6729 = vmatprep.mubr.bf16.mxu1 %v15441_v11  ;;  %v12655_v18 = vcombine.high %v5205_v43, %v5209_v23  ;;  %v12531_v24 = vcombine.high %v5079_v30, %v5083_v13  ;;  %v12654_v20 = vcombine.low %v5205_v43, %v5209_v23  ;;  %v12530_v63 = vcombine.low %v5079_v30, %v5083_v13 }
 0x447   :  { %6730 = vmatmul.mubr.bf16.vlgmr.msra.gmra.mxu1 %v15443_v14  ;;  %6859 = vmatmul.mubr.bf16.vlgmr.msra.gmra.mxu0 %v15425_v58 }
 0x448   :  { %6784 = vmatpush1.bf16.msra.mxu1 %v12710_v61  ;;  %6815 = vmatprep.mubr.bf16.mxu1 %v15441_v11  ;;  %v12563_v61 = vcombine.high %v5111_v33, %v5115_v34 }
 0x449   :  { %6913 = vmatpush1.bf16.msra.mxu0 %v12586_v36  ;;  %6944 = vmatprep.mubr.bf16.mxu0 %v15421_v55  ;;  %v5103_v55 = vld [vmem:[#allocation10 + $0xd8] sm:$0xff]  ;;  %v5329_v36 = vld [vmem:[#allocation10 + $0x7e8] sm:$0xff] }
 0x44a   :  { %6785 = vmatprep.subr.bf16.mxu1 %v12703_v17  ;;  %6914 = vmatprep.subr.bf16.mxu0 %v12579_v19  ;;  %v12555_v57 = vcombine.high %v5103_v55, %v5107_v46  ;;  %v12554_v7 = vcombine.low %v5103_v55, %v5107_v46  ;;  %v5199_v17 = vld [vmem:[#allocation10 + $0x3d8] sm:$0xff]  ;;  %v12775_v49 = vcombine.high %v5325_v1, %v5329_v36 }
 0x44b   :  { %v5203_v19 = vld [vmem:[#allocation10 + $0x3f8] sm:$0xff]  ;;  %v12774_v50 = vcombine.low %v5325_v1, %v5329_v36 }
 0x44c   :  { %6786 = vmatpush1.bf16.msra.mxu1 %v12702_v35  ;;  %v12651_v48 = vcombine.high %v5199_v17, %v5203_v19  ;;  %v5317_v35 = vld [vmem:[#allocation10 + $0x788] sm:$0xff]  ;;  %v12650_v31 = vcombine.low %v5199_v17, %v5203_v19 }
 0x44d   :  { %6915 = vmatpush1.bf16.msra.mxu0 %v12578_v26  ;;  %6787 = vmatprep.subr.bf16.mxu1 %v12695_v28  ;;  %v5321_v26 = vld [vmem:[#allocation10 + $0x7a8] sm:$0xff]  ;;  %v5191_v28 = vld [vmem:[#allocation10 + $0x398] sm:$0xff] }
 0x44e   :  { %6916 = vmatprep.subr.bf16.mxu0 %v12571_v56  ;;  %v5195_v56 = vld [vmem:[#allocation10 + $0x3b8] sm:$0xff]  ;;  %v12767_v33 = vcombine.high %v5317_v35, %v5321_v26  ;;  %v12766_v38 = vcombine.low %v5317_v35, %v5321_v26 }
 0x44f   :  { %v12643_v34 = vcombine.high %v5191_v28, %v5195_v56  ;;  %v12642_v40 = vcombine.low %v5191_v28, %v5195_v56 }
 0x450   :  { %6788 = vmatpush1.bf16.msra.mxu1 %v12694_v37  ;;  %v5309_v37 = vld [vmem:[#allocation10 + $0x748] sm:$0xff] }
 0x451   :  { %6917 = vmatpush1.bf16.msra.mxu0 %v12570_v52  ;;  %6789 = vmatprep.subr.bf16.mxu1 %v12687_v54  ;;  %v5313_v52 = vld [vmem:[#allocation10 + $0x768] sm:$0xff]  ;;  %v5183_v54 = vld [vmem:[#allocation10 + $0x358] sm:$0xff] }
 0x452   :  { %6918 = vmatprep.subr.bf16.mxu0 %v12563_v61  ;;  %v5187_v61 = vld [vmem:[#allocation10 + $0x378] sm:$0xff]  ;;  %v12759_v55 = vcombine.high %v5309_v37, %v5313_v52  ;;  %v12758_v51 = vcombine.low %v5309_v37, %v5313_v52  ;;  %v5254_v52 = vld [vmem:[#allocation10 + $0x590] sm:$0xff] }
 0x453   :  { %v12635_v46 = vcombine.high %v5183_v54, %v5187_v61  ;;  %v12634_v59 = vcombine.low %v5183_v54, %v5187_v61  ;;  %v5258_v54 = vld [vmem:[#allocation10 + $0x5b0] sm:$0xff]  ;;  %v13851_v61 = vld [vmem:[#allocation14 + $0x154] ss:$24 sps:$4 sm:$0xff]  }
 0x454   :  { %6790 = vmatpush1.bf16.msra.mxu1 %v12686_v39  ;;  %v5301_v39 = vld [vmem:[#allocation10 + $0x708] sm:$0xff] }
 0x455   :  { %6919 = vmatpush1.bf16.msra.mxu0 %v12562_v47  ;;  %6791 = vmatprep.subr.bf16.mxu1 %v12679_v22  ;;  %v5305_v47 = vld [vmem:[#allocation10 + $0x728] sm:$0xff]  ;;  %v5175_v22 = vld [vmem:[#allocation10 + $0x318] sm:$0xff] }
 0x456   :  { %6920 = vmatprep.subr.bf16.mxu0 %v12555_v57  ;;  %v5179_v57 = vld [vmem:[#allocation10 + $0x338] sm:$0xff]  ;;  %v12751_v60 = vcombine.high %v5301_v39, %v5305_v47  ;;  %v12750_v53 = vcombine.low %v5301_v39, %v5305_v47  ;;  %v13854_v47 = vld [vmem:[#allocation14 + $0x124] ss:$24 sps:$4 sm:$0xff]  }
 0x457   :  { %v12627_v0 = vcombine.high %v5175_v22, %v5179_v57  ;;  %v12626_v4 = vcombine.low %v5175_v22, %v5179_v57  ;;  %v13849_v39 = vld [vmem:[#allocation14 + $0x150] ss:$24 sps:$4 sm:$0xff]   ;;  %v12704_v22 = vcombine.low %v5254_v52, %v5258_v54 }
 0x458   :  { %6792 = vmatpush1.bf16.msra.mxu1 %v12678_v62  ;;  %v5293_v62 = vld [vmem:[#allocation10 + $0x6c8] sm:$0xff] }
 0x459   :  { %6921 = vmatpush1.bf16.msra.mxu0 %v12554_v7  ;;  %6793 = vmatprep.subr.bf16.mxu1 %v12671_v2  ;;  %v5297_v7 = vld [vmem:[#allocation10 + $0x6e8] sm:$0xff]  ;;  %v5167_v2 = vld [vmem:[#allocation10 + $0x2d8] sm:$0xff] }
 0x45a   :  { %6922 = vmatprep.subr.bf16.mxu0 %v12547_v3  ;;  %v5171_v3 = vld [vmem:[#allocation10 + $0x2f8] sm:$0xff]  ;;  %v12743_v5 = vcombine.high %v5293_v62, %v5297_v7  ;;  %v12742_v43 = vcombine.low %v5293_v62, %v5297_v7 }
 0x45b   :  { %v12619_v6 = vcombine.high %v5167_v2, %v5171_v3  ;;  %v12618_v23 = vcombine.low %v5167_v2, %v5171_v3  ;;  %v5230_v2 = vld [vmem:[#allocation10 + $0x4d0] sm:$0xff] }
 0x45c   :  { %6794 = vmatpush1.bf16.msra.mxu1 %v12670_v42  ;;  %v5285_v42 = vld [vmem:[#allocation10 + $0x688] sm:$0xff]  ;;  %v5234_v3 = vld [vmem:[#allocation10 + $0x4f0] sm:$0xff] }
 0x45d   :  { %6923 = vmatpush1.bf16.msra.mxu0 %v12546_v8  ;;  %6795 = vmatprep.subr.bf16.mxu1 %v12663_v32  ;;  %v5289_v8 = vld [vmem:[#allocation10 + $0x6a8] sm:$0xff]  ;;  %v5159_v32 = vld [vmem:[#allocation10 + $0x298] sm:$0xff] }
 0x45e   :  { %6924 = vmatprep.subr.bf16.mxu0 %v12539_v41  ;;  %v5163_v41 = vld [vmem:[#allocation10 + $0x2b8] sm:$0xff]  ;;  %v12735_v30 = vcombine.high %v5285_v42, %v5289_v8  ;;  %v12734_v1 = vcombine.low %v5285_v42, %v5289_v8  ;;  %v5226_v42 = vld [vmem:[#allocation10 + $0x4b0] sm:$0xff] }
 0x45f   :  { %v12611_v13 = vcombine.high %v5159_v32, %v5163_v41  ;;  %v12610_v36 = vcombine.low %v5159_v32, %v5163_v41  ;;  %v13858_v8 = vld [vmem:[#allocation14 + $0xc0] ss:$24 sps:$4 sm:$0xff]   ;;  %v13863_v32 = vld [vmem:[#allocation14 + $0x94] ss:$24 sps:$4 sm:$0xff]   ;;  %v12680_v41 = vcombine.low %v5230_v2, %v5234_v3 }
 0x460   :  { %6796 = vmatpush1.bf16.msra.mxu1 %v12662_v9  ;;  %v5277_v9 = vld [vmem:[#allocation10 + $0x648] sm:$0xff] }
 0x461   :  { %6925 = vmatpush1.bf16.msra.mxu0 %v12538_v10  ;;  %6797 = vmatprep.subr.bf16.mxu1 %v12655_v18  ;;  %v5281_v10 = vld [vmem:[#allocation10 + $0x668] sm:$0xff]  ;;  %v5151_v18 = vld [vmem:[#allocation10 + $0x258] sm:$0xff] }
 0x462   :  { %6926 = vmatprep.subr.bf16.mxu0 %v12531_v24  ;;  %v5155_v24 = vld [vmem:[#allocation10 + $0x278] sm:$0xff]  ;;  %v12727_v17 = vcombine.high %v5277_v9, %v5281_v10  ;;  %v12726_v35 = vcombine.low %v5277_v9, %v5281_v10  ;;  %v13866_v9 = vld [vmem:[#allocation14 + $0x64] ss:$24 sps:$4 sm:$0xff]  }
 0x463   :  { %v12603_v19 = vcombine.high %v5151_v18, %v5155_v24  ;;  %v12602_v26 = vcombine.low %v5151_v18, %v5155_v24  ;;  %v5206_v24 = vld [vmem:[#allocation10 + $0x410] sm:$0xff] }
 0x464   :  { %6798 = vmatpush1.bf16.msra.mxu1 %v12654_v20  ;;  %v5269_v20 = vld [vmem:[#allocation10 + $0x608] sm:$0xff] }
 0x465   :  { %6927 = vmatpush1.bf16.msra.mxu0 %v12530_v63  ;;  %6799 = vmatprep.subr.bf16.mxu1 %v12775_v49  ;;  %v5273_v63 = vld [vmem:[#allocation10 + $0x628] sm:$0xff]  ;;  %v5143_v49 = vld [vmem:[#allocation10 + $0x218] sm:$0xff] }
 0x466   :  { %6928 = vmatprep.subr.bf16.mxu0 %v12651_v48  ;;  %v5147_v48 = vld [vmem:[#allocation10 + $0x238] sm:$0xff]  ;;  %v12719_v28 = vcombine.high %v5269_v20, %v5273_v63 }
 0x467   :  { %v12595_v56 = vcombine.high %v5143_v49, %v5147_v48 }
 0x468   :  { %6800 = vmatpush2.bf16.msra.mxu1 %v12774_v50  ;;  %v5262_v50 = vld [vmem:[#allocation10 + $0x5d0] sm:$0xff] }
 0x469   :  { %6929 = vmatpush2.bf16.msra.mxu0 %v12650_v31  ;;  %6801 = vmatprep.subr.bf16.mxu1 %v12767_v33  ;;  %v5266_v31 = vld [vmem:[#allocation10 + $0x5f0] sm:$0xff]  ;;  %v12718_v33 = vcombine.low %v5269_v20, %v5273_v63 }
 0x46a   :  { %6930 = vmatprep.subr.bf16.mxu0 %v12643_v34  ;;  %v12594_v34 = vcombine.low %v5143_v49, %v5147_v48  ;;  %v12713_v37 = vcombine.high %v5262_v50, %v5266_v31  ;;  %v5326_v63 = vld [vmem:[#allocation10 + $0x7d0] sm:$0xff]  ;;  %v13867_v48 = vld [vmem:[#allocation14 + $0x30] ss:$24 sps:$4 sm:$0xff]  }
 0x46b   :  { %v5330_v49 = vld [vmem:[#allocation10 + $0x7f0] sm:$0xff] }
 0x46c   :  { %6802 = vmatpush2.bf16.msra.mxu1 %v12766_v38  ;;  %v12712_v38 = vcombine.low %v5262_v50, %v5266_v31  ;;  %v5322_v50 = vld [vmem:[#allocation10 + $0x7b0] sm:$0xff] }
 0x46d   :  { %6931 = vmatpush2.bf16.msra.mxu0 %v12642_v40  ;;  %6803 = vmatprep.subr.bf16.mxu1 %v12759_v55  ;;  %v12705_v40 = vcombine.high %v5254_v52, %v5258_v54  ;;  %v5246_v55 = vld [vmem:[#allocation10 + $0x550] sm:$0xff] }
 0x46e   :  { %6932 = vmatprep.subr.bf16.mxu0 %v12635_v46  ;;  %v5250_v46 = vld [vmem:[#allocation10 + $0x570] sm:$0xff] }
 0x46f   :  { %v12697_v57 = vcombine.high %v5246_v55, %v5250_v46  ;;  %v12696_v62 = vcombine.low %v5246_v55, %v5250_v46  ;;  %v13870_v31 = vld [vmem:[#allocation14] ss:$24 sps:$4 sm:$0xff]  }
 0x470   :  { %6804 = vmatpush2.bf16.msra.mxu1 %v12758_v51  ;;  %v5238_v51 = vld [vmem:[#allocation10 + $0x510] sm:$0xff] }
 0x471   :  { %6933 = vmatpush2.bf16.msra.mxu0 %v12634_v59  ;;  %6805 = vmatprep.subr.bf16.mxu1 %v12751_v60  ;;  %v5242_v59 = vld [vmem:[#allocation10 + $0x530] sm:$0xff] }
 0x472   :  { %6934 = vmatprep.subr.bf16.mxu0 %v12627_v0  ;;  %v13852_v60 = vld [vmem:[#allocation14 + $0x120] ss:$24 sps:$4 sm:$0xff]   ;;  %v13857_v0 = vld [vmem:[#allocation14 + $0xf4] ss:$24 sps:$4 sm:$0xff]   ;;  %v12689_v7 = vcombine.high %v5238_v51, %v5242_v59 }
 0x473   :  { %v5310_v52 = vld [vmem:[#allocation10 + $0x750] sm:$0xff] }
 0x474   :  { %6806 = vmatpush2.bf16.msra.mxu1 %v12750_v53  ;;  %v13855_v53 = vld [vmem:[#allocation14 + $0xf0] ss:$24 sps:$4 sm:$0xff]   ;;  %v5314_v54 = vld [vmem:[#allocation10 + $0x770] sm:$0xff] }
 0x475   :  { %6935 = vmatpush2.bf16.msra.mxu0 %v12626_v4  ;;  %6807 = vmatprep.subr.bf16.mxu1 %v12743_v5  ;;  %v13860_v4 = vld [vmem:[#allocation14 + $0xc4] ss:$24 sps:$4 sm:$0xff]   ;;  %v12681_v5 = vcombine.high %v5230_v2, %v5234_v3  ;;  %v12761_v55 = vcombine.high %v5310_v52, %v5314_v54 }
 0x476   :  { %6936 = vmatprep.subr.bf16.mxu0 %v12619_v6  ;;  %v5222_v6 = vld [vmem:[#allocation10 + $0x490] sm:$0xff] }
 0x477   :  { %v12672_v10 = vcombine.low %v5222_v6, %v5226_v42  ;;  %v5302_v46 = vld [vmem:[#allocation10 + $0x710] sm:$0xff] }
 0x478   :  { %6808 = vmatpush2.bf16.msra.mxu1 %v12742_v43  ;;  %v12673_v43 = vcombine.high %v5222_v6, %v5226_v42  ;;  %v5286_v3 = vld [vmem:[#allocation10 + $0x690] sm:$0xff] }
 0x479   :  { %6937 = vmatpush2.bf16.msra.mxu0 %v12618_v23  ;;  %6809 = vmatprep.subr.bf16.mxu1 %v12735_v30  ;;  %v5214_v23 = vld [vmem:[#allocation10 + $0x450] sm:$0xff] }
 0x47a   :  { %6938 = vmatprep.subr.bf16.mxu0 %v12611_v13  ;;  %v5218_v30 = vld [vmem:[#allocation10 + $0x470] sm:$0xff]  ;;  %v13861_v13 = vld [vmem:[#allocation14 + $0x90] ss:$24 sps:$4 sm:$0xff]  }
 0x47b   :  { %v12665_v18 = vcombine.high %v5214_v23, %v5218_v30  ;;  %v5278_v42 = vld [vmem:[#allocation10 + $0x650] sm:$0xff] }
 0x47c   :  { %6810 = vmatpush2.bf16.msra.mxu1 %v12734_v1  ;;  %v5210_v1 = vld [vmem:[#allocation10 + $0x430] sm:$0xff] }
 0x47d   :  { %6939 = vmatpush2.bf16.msra.mxu0 %v12610_v36  ;;  %6811 = vmatprep.subr.bf16.mxu1 %v12727_v17  ;;  %v13864_v36 = vld [vmem:[#allocation14 + $0x60] ss:$24 sps:$4 sm:$0xff]   ;;  %v13869_v17 = vld [vmem:[#allocation14 + $0x34] ss:$24 sps:$4 sm:$0xff]   ;;  %v12657_v20 = vcombine.high %v5206_v24, %v5210_v1 }
 0x47e   :  { %6940 = vmatprep.subr.bf16.mxu0 %v12603_v19  ;;  %v12664_v19 = vcombine.low %v5214_v23, %v5218_v30  ;;  %v5270_v30 = vld [vmem:[#allocation10 + $0x610] sm:$0xff] }
 0x480   :  { %6812 = vmatpush2.bf16.msra.mxu1 %v12726_v35  ;;  %v13872_v35 = vld [vmem:[#allocation14 + $0x4] ss:$24 sps:$4 sm:$0xff]  }
 0x481   :  { %6941 = vmatpush2.bf16.msra.mxu0 %v12602_v26  ;;  %6813 = vmatprep.subr.bf16.mxu1 %v12719_v28  ;;  %v12656_v26 = vcombine.low %v5206_v24, %v5210_v1  ;;  %v12777_v28 = vcombine.high %v5326_v63, %v5330_v49  ;;  %v5263_v1 = vld [vmem:[#allocation10 + $0x5d8] sm:$0xff] }
 0x482   :  { %6942 = vmatprep.subr.bf16.mxu0 %v12595_v56  ;;  %v5318_v56 = vld [vmem:[#allocation10 + $0x790] sm:$0xff] }
 0x484   :  { %6814 = vmatpush2.bf16.msra.mxu1 %v12718_v33  ;;  %v13875_v33 = vld [vmem:[#allocation14 + $0x2d4] ss:$24 sps:$4 sm:$0xff]  }
 0x485   :  { %6943 = vmatpush2.bf16.msra.mxu0 %v12594_v34  ;;  %6869 = vmatprep.subr.bf16.mxu1 %v12713_v37  ;;  %v12776_v34 = vcombine.low %v5326_v63, %v5330_v49  ;;  %v12769_v37 = vcombine.high %v5318_v56, %v5322_v50  ;;  %v5255_v49 = vld [vmem:[#allocation10 + $0x598] sm:$0xff] }
 0x486   :  { %9419 = vmatprep.subr.bf16.mxu0 %v13851_v61  ;;  %v13873_v61 = vld [vmem:[#allocation14 + $0x2d0] ss:$24 sps:$4 sm:$0xff]  }
 0x487   :  { %6816 = vmatmul.mubr.bf16.vlgmr.msra.gmra.mxu1 %v15443_v14 }
 0x488   :  { %6870 = vmatpush1.bf16.msra.mxu1 %v12712_v38  ;;  %6901 = vmatprep.mubr.bf16.mxu1 %v15441_v11  ;;  %v13878_v38 = vld [vmem:[#allocation14 + $0x2a4] ss:$24 sps:$4 sm:$0xff]  }
 0x489   :  { %6945 = vmatmul.mubr.bf16.vlgmr.msra.gmra.mxu0 %v15425_v58  ;;  %6871 = vmatprep.subr.bf16.mxu1 %v12705_v40  ;;  %v12688_v58 = vcombine.low %v5238_v51, %v5242_v59  ;;  %v12768_v40 = vcombine.low %v5318_v56, %v5322_v50  ;;  %v5294_v59 = vld [vmem:[#allocation10 + $0x6d0] sm:$0xff]  ;;  %v5247_v56 = vld [vmem:[#allocation10 + $0x558] sm:$0xff] }
 0x48a   :  { %9420 = vmatpush1.bf16.msra.mxu0 %v13849_v39  ;;  %v5306_v39 = vld [vmem:[#allocation10 + $0x730] sm:$0xff]  ;;  %v5251_v50 = vld [vmem:[#allocation10 + $0x578] sm:$0xff] }
 0x48b   :  { %9421 = vmatprep.subr.bf16.mxu0 %v13854_v47  ;;  %v13876_v47 = vld [vmem:[#allocation14 + $0x2a0] ss:$24 sps:$4 sm:$0xff]   ;;  %v12753_v51 = vcombine.high %v5302_v46, %v5306_v39 }
 0x48c   :  { %6872 = vmatpush1.bf16.msra.mxu1 %v12704_v22  ;;  %v13881_v22 = vld [vmem:[#allocation14 + $0x274] ss:$24 sps:$4 sm:$0xff]  }
 0x48d   :  { %6873 = vmatprep.subr.bf16.mxu1 %v12697_v57  ;;  %v12760_v57 = vcombine.low %v5310_v52, %v5314_v54  ;;  %v12698_v52 = vcombine.low %v5247_v56, %v5251_v50 }
 0x48e   :  { %9422 = vmatpush1.bf16.msra.mxu0 %v13852_v60  ;;  %v5298_v60 = vld [vmem:[#allocation10 + $0x6f0] sm:$0xff] }
 0x48f   :  { %9423 = vmatprep.subr.bf16.mxu0 %v13857_v0  ;;  %v13879_v0 = vld [vmem:[#allocation14 + $0x270] ss:$24 sps:$4 sm:$0xff]   ;;  %v12745_v2 = vcombine.high %v5294_v59, %v5298_v60 }
 0x490   :  { %6874 = vmatpush1.bf16.msra.mxu1 %v12696_v62  ;;  %v13884_v62 = vld [vmem:[#allocation14 + $0x244] ss:$24 sps:$4 sm:$0xff]  }
 0x491   :  { %6875 = vmatprep.subr.bf16.mxu1 %v12689_v7  ;;  %v12752_v7 = vcombine.low %v5302_v46, %v5306_v39  ;;  %v5223_v46 = vld [vmem:[#allocation10 + $0x498] sm:$0xff] }
 0x492   :  { %9424 = vmatpush1.bf16.msra.mxu0 %v13855_v53  ;;  %v5290_v53 = vld [vmem:[#allocation10 + $0x6b0] sm:$0xff]  ;;  %v5227_v39 = vld [vmem:[#allocation10 + $0x4b8] sm:$0xff] }
 0x493   :  { %9425 = vmatprep.subr.bf16.mxu0 %v13860_v4  ;;  %v13882_v4 = vld [vmem:[#allocation14 + $0x240] ss:$24 sps:$4 sm:$0xff]   ;;  %v12737_v6 = vcombine.high %v5286_v3, %v5290_v53 }
 0x494   :  { %6876 = vmatpush1.bf16.msra.mxu1 %v12688_v58  ;;  %v13887_v58 = vld [vmem:[#allocation14 + $0x214] ss:$24 sps:$4 sm:$0xff]  }
 0x495   :  { %6877 = vmatprep.subr.bf16.mxu1 %v12681_v5  ;;  %v12744_v5 = vcombine.low %v5294_v59, %v5298_v60  ;;  %v12674_v59 = vcombine.low %v5223_v46, %v5227_v39 }
 0x496   :  { %9426 = vmatpush1.bf16.msra.mxu0 %v13858_v8  ;;  %v5282_v8 = vld [vmem:[#allocation10 + $0x670] sm:$0xff] }
 0x497   :  { %9427 = vmatprep.subr.bf16.mxu0 %v13863_v32  ;;  %v13885_v32 = vld [vmem:[#allocation14 + $0x210] ss:$24 sps:$4 sm:$0xff]   ;;  %v12729_v23 = vcombine.high %v5278_v42, %v5282_v8 }
 0x498   :  { %6878 = vmatpush1.bf16.msra.mxu1 %v12680_v41  ;;  %v13890_v41 = vld [vmem:[#allocation14 + $0x1e4] ss:$24 sps:$4 sm:$0xff]  }
 0x499   :  { %6879 = vmatprep.subr.bf16.mxu1 %v12673_v43  ;;  %v12736_v43 = vcombine.low %v5286_v3, %v5290_v53  ;;  %v5327_v3 = vld [vmem:[#allocation10 + $0x7d8] sm:$0xff] }
 0x49a   :  { %9428 = vmatpush1.bf16.msra.mxu0 %v13861_v13  ;;  %v5274_v13 = vld [vmem:[#allocation10 + $0x630] sm:$0xff]  ;;  %v5331_v53 = vld [vmem:[#allocation10 + $0x7f8] sm:$0xff] }
 0x49b   :  { %9429 = vmatprep.subr.bf16.mxu0 %v13866_v9  ;;  %v13888_v9 = vld [vmem:[#allocation14 + $0x1e0] ss:$24 sps:$4 sm:$0xff]   ;;  %v12721_v24 = vcombine.high %v5270_v30, %v5274_v13 }
 0x49c   :  { %6880 = vmatpush1.bf16.msra.mxu1 %v12672_v10  ;;  %v13893_v10 = vld [vmem:[#allocation14 + $0x1b4] ss:$24 sps:$4 sm:$0xff]  }
 0x49d   :  { %6881 = vmatprep.subr.bf16.mxu1 %v12665_v18  ;;  %v12728_v18 = vcombine.low %v5278_v42, %v5282_v8  ;;  %v12778_v42 = vcombine.low %v5327_v3, %v5331_v53 }
 0x49e   :  { %9430 = vmatpush1.bf16.msra.mxu0 %v13864_v36  ;;  %v5267_v36 = vld [vmem:[#allocation10 + $0x5f8] sm:$0xff] }
 0x49f   :  { %9431 = vmatprep.subr.bf16.mxu0 %v13869_v17  ;;  %v13891_v17 = vld [vmem:[#allocation14 + $0x1b0] ss:$24 sps:$4 sm:$0xff]   ;;  %v12715_v63 = vcombine.high %v5263_v1, %v5267_v36 }
 0x4a0   :  { %6882 = vmatpush1.bf16.msra.mxu1 %v12664_v19  ;;  %v13896_v19 = vld [vmem:[#allocation14 + $0x184] ss:$24 sps:$4 sm:$0xff]  }
 0x4a1   :  { %6883 = vmatprep.subr.bf16.mxu1 %v12657_v20  ;;  %v12720_v20 = vcombine.low %v5270_v30, %v5274_v13  ;;  %v5303_v30 = vld [vmem:[#allocation10 + $0x718] sm:$0xff] }
 0x4a2   :  { %9432 = vmatpush1.bf16.msra.mxu0 %v13867_v48  ;;  %v5259_v48 = vld [vmem:[#allocation10 + $0x5b8] sm:$0xff] }
 0x4a3   :  { %9433 = vmatprep.subr.bf16.mxu0 %v13872_v35  ;;  %v13894_v35 = vld [vmem:[#allocation14 + $0x180] ss:$24 sps:$4 sm:$0xff]   ;;  %v5307_v13 = vld [vmem:[#allocation10 + $0x738] sm:$0xff] }
 0x4a4   :  { %6884 = vmatpush1.bf16.msra.mxu1 %v12656_v26  ;;  %v12714_v26 = vcombine.low %v5263_v1, %v5267_v36  ;;  %v12754_v1 = vcombine.low %v5303_v30, %v5307_v13 }
 0x4a5   :  { %6885 = vmatprep.subr.bf16.mxu1 %v12777_v28  ;;  %v12707_v28 = vcombine.high %v5255_v49, %v5259_v48 }
 0x4a6   :  { %9434 = vmatpush1.bf16.msra.mxu0 %v13870_v31  ;;  %v12706_v31 = vcombine.low %v5255_v49, %v5259_v48  ;;  %v5279_v49 = vld [vmem:[#allocation10 + $0x658] sm:$0xff] }
 0x4a7   :  { %9435 = vmatprep.subr.bf16.mxu0 %v13875_v33  ;;  %v12699_v33 = vcombine.high %v5247_v56, %v5251_v50  ;;  %v5283_v48 = vld [vmem:[#allocation10 + $0x678] sm:$0xff] }
 0x4a8   :  { %6886 = vmatpush2.bf16.msra.mxu1 %v12776_v34  ;;  %v5239_v34 = vld [vmem:[#allocation10 + $0x518] sm:$0xff]  ;;  %v12730_v50 = vcombine.low %v5279_v49, %v5283_v48 }
 0x4a9   :  { %6887 = vmatprep.subr.bf16.mxu1 %v12769_v37  ;;  %v5243_v37 = vld [vmem:[#allocation10 + $0x538] sm:$0xff] }
 0x4aa   :  { %9436 = vmatpush2.bf16.msra.mxu0 %v13873_v61  ;;  %v12691_v54 = vcombine.high %v5239_v34, %v5243_v37  ;;  %v5231_v61 = vld [vmem:[#allocation10 + $0x4d8] sm:$0xff] }
 0x4ab   :  { %9437 = vmatprep.subr.bf16.mxu0 %v13878_v38  ;;  %v5235_v38 = vld [vmem:[#allocation10 + $0x4f8] sm:$0xff] }
 0x4ac   :  { %6888 = vmatpush2.bf16.msra.mxu1 %v12768_v40  ;;  %v12690_v40 = vcombine.low %v5239_v34, %v5243_v37  ;;  %v5275_v56 = vld [vmem:[#allocation10 + $0x638] sm:$0xff] }
 0x4ad   :  { %6889 = vmatprep.subr.bf16.mxu1 %v12761_v55  ;;  %v12683_v55 = vcombine.high %v5231_v61, %v5235_v38 }
 0x4ae   :  { %9438 = vmatpush2.bf16.msra.mxu0 %v13876_v47  ;;  %v12682_v47 = vcombine.low %v5231_v61, %v5235_v38  ;;  %v6999_v38 = vld [vmem:[#allocation11] sm:$0xff] }
 0x4af   :  { %9439 = vmatprep.subr.bf16.mxu0 %v13881_v22  ;;  %v13947_v22 = vld [vmem:[#allocation14 + $0x754] ss:$24 sps:$4 sm:$0xff]  }
 0x4b0   :  { %6890 = vmatpush2.bf16.msra.mxu1 %v12760_v57  ;;  %v5215_v57 = vld [vmem:[#allocation10 + $0x458] sm:$0xff] }
 0x4b1   :  { %6891 = vmatprep.subr.bf16.mxu1 %v12753_v51  ;;  %v5219_v51 = vld [vmem:[#allocation10 + $0x478] sm:$0xff] }
 0x4b2   :  { %9440 = vmatpush2.bf16.msra.mxu0 %v13879_v0  ;;  %v12667_v60 = vcombine.high %v5215_v57, %v5219_v51  ;;  %v5207_v0 = vld [vmem:[#allocation10 + $0x418] sm:$0xff] }
 0x4b3   :  { %9441 = vmatprep.subr.bf16.mxu0 %v13884_v62  ;;  %v5211_v62 = vld [vmem:[#allocation10 + $0x438] sm:$0xff] }
 0x4b4   :  { %6892 = vmatpush2.bf16.msra.mxu1 %v12752_v7  ;;  %v12666_v7 = vcombine.low %v5215_v57, %v5219_v51  ;;  %v13900_v51 = vld [vmem:[#allocation14 + $0x420] ss:$24 sps:$4 sm:$0xff]  }
 0x4b5   :  { %6893 = vmatprep.subr.bf16.mxu1 %v12745_v2  ;;  %v12659_v2 = vcombine.high %v5207_v0, %v5211_v62 }
 0x4b6   :  { %9442 = vmatpush2.bf16.msra.mxu0 %v13882_v4  ;;  %v12658_v4 = vcombine.low %v5207_v0, %v5211_v62  ;;  %v13905_v62 = vld [vmem:[#allocation14 + $0x3f4] ss:$24 sps:$4 sm:$0xff]  }
 0x4b7   :  { %9443 = vmatprep.subr.bf16.mxu0 %v13887_v58  ;;  %v12779_v58 = vcombine.high %v5327_v3, %v5331_v53 }
 0x4b8   :  { %6894 = vmatpush2.bf16.msra.mxu1 %v12744_v5  ;;  %v5319_v5 = vld [vmem:[#allocation10 + $0x798] sm:$0xff] }
 0x4b9   :  { %6895 = vmatprep.subr.bf16.mxu1 %v12737_v6  ;;  %v5323_v6 = vld [vmem:[#allocation10 + $0x7b8] sm:$0xff] }
 0x4ba   :  { %9444 = vmatpush2.bf16.msra.mxu0 %v13885_v32  ;;  %v12771_v8 = vcombine.high %v5319_v5, %v5323_v6  ;;  %v5311_v32 = vld [vmem:[#allocation10 + $0x758] sm:$0xff] }
 0x4bb   :  { %9445 = vmatprep.subr.bf16.mxu0 %v13890_v41  ;;  %v5315_v41 = vld [vmem:[#allocation10 + $0x778] sm:$0xff] }
 0x4bc   :  { %6896 = vmatpush2.bf16.msra.mxu1 %v12736_v43  ;;  %v12770_v43 = vcombine.low %v5319_v5, %v5323_v6  ;;  %v13903_v6 = vld [vmem:[#allocation14 + $0x3f0] ss:$24 sps:$4 sm:$0xff]  }
 0x4bd   :  { %6897 = vmatprep.subr.bf16.mxu1 %v12729_v23  ;;  %v12763_v23 = vcombine.high %v5311_v32, %v5315_v41 }
 0x4be   :  { %9446 = vmatpush2.bf16.msra.mxu0 %v13888_v9  ;;  %v12762_v9 = vcombine.low %v5311_v32, %v5315_v41 }
 0x4bf   :  { %9447 = vmatprep.subr.bf16.mxu0 %v13893_v10  ;;  %v12755_v10 = vcombine.high %v5303_v30, %v5307_v13  ;;  %v13906_v13 = vld [vmem:[#allocation14 + $0x3c0] ss:$24 sps:$4 sm:$0xff]  }
 0x4c0   :  { %6898 = vmatpush2.bf16.msra.mxu1 %v12728_v18  ;;  %v5295_v18 = vld [vmem:[#allocation10 + $0x6d8] sm:$0xff] }
 0x4c1   :  { %6899 = vmatprep.subr.bf16.mxu1 %v12721_v24  ;;  %v5299_v24 = vld [vmem:[#allocation10 + $0x6f8] sm:$0xff] }
 0x4c2   :  { %9448 = vmatpush2.bf16.msra.mxu0 %v13891_v17  ;;  %v12747_v36 = vcombine.high %v5295_v18, %v5299_v24  ;;  %v5287_v17 = vld [vmem:[#allocation10 + $0x698] sm:$0xff] }
 0x4c3   :  { %9449 = vmatprep.subr.bf16.mxu0 %v13896_v19  ;;  %v5291_v19 = vld [vmem:[#allocation10 + $0x6b8] sm:$0xff] }
 0x4c4   :  { %6900 = vmatpush2.bf16.msra.mxu1 %v12720_v20  ;;  %v12746_v20 = vcombine.low %v5295_v18, %v5299_v24 }
 0x4c5   :  { %6955 = vmatprep.subr.bf16.mxu1 %v12715_v63  ;;  %v12739_v63 = vcombine.high %v5287_v17, %v5291_v19 }
 0x4c6   :  { %9450 = vmatpush2.bf16.msra.mxu0 %v13894_v35  ;;  %v12738_v35 = vcombine.low %v5287_v17, %v5291_v19  ;;  %v13909_v17 = vld [vmem:[#allocation14 + $0x390] ss:$24 sps:$4 sm:$0xff]  }
 0x4c7   :  { %6902 = vmatmul.mubr.bf16.vlgmr.msra.gmra.mxu1 %v15443_v14  ;;  %9505 = vmatprep.subr.bf16.mxu0 %v13947_v22  ;;  %v13945_v19 = vld [vmem:[#allocation14 + $0x750] ss:$24 sps:$4 sm:$0xff]  }
 0x4c8   :  { %6956 = vmatpush1.bf16.msra.mxu1 %v12714_v26  ;;  %6987 = vmatprep.mubr.bf16.mxu1 %v15441_v11  ;;  %v12675_v11 = vcombine.high %v5223_v46, %v5227_v39  ;;  %v12731_v26 = vcombine.high %v5279_v49, %v5283_v48  ;;  %v13950_v49 = vld [vmem:[#allocation14 + $0x724] ss:$24 sps:$4 sm:$0xff]   ;;  %v13912_v48 = vld [vmem:[#allocation14 + $0x360] ss:$24 sps:$4 sm:$0xff]  }
 0x4c9   :  { %6957 = vmatprep.subr.bf16.mxu1 %v12707_v28  ;;  %v5271_v28 = vld [vmem:[#allocation10 + $0x618] sm:$0xff] }
 0x4ca   :  { %v12722_v34 = vcombine.low %v5271_v28, %v5275_v56 }
 0x4cc   :  { %6958 = vmatpush1.bf16.msra.mxu1 %v12706_v31  ;;  %v6688_v31 = vpop.f32.mrf.mxu0 }
 0x4cd   :  { %6959 = vmatprep.subr.bf16.mxu1 %v12699_v33  ;;  %v12723_v33 = vcombine.high %v5271_v28, %v5275_v56  ;;  %v13953_v28 = vld [vmem:[#allocation14 + $0x6f4] ss:$24 sps:$4 sm:$0xff]   ;;  %v13915_v56 = vld [vmem:[#allocation14 + $0x330] ss:$24 sps:$4 sm:$0xff]  }
 0x4ce   :  { %v6690_v37 = vpop.f32.mrf.mxu0 }
 0x4d0   :  { %6960 = vmatpush1.bf16.msra.mxu1 %v12698_v52  ;;  %v13899_v52 = vld [vmem:[#allocation14 + $0x454] ss:$24 sps:$4 sm:$0xff]   ;;  %v6692_v39 = vpop.f32.mrf.mxu0 }
 0x4d1   :  { %6961 = vmatprep.subr.bf16.mxu1 %v12691_v54  ;;  %v15458_v54 = vld [vmem:[#allocation13] sm:$0xff] }
 0x4d2   :  { %v5341_v61 = vrot.slane %v15458_v54, %v15309_v44  ;;  %v5337_v46 = vrot.slane %v15458_v54, %v15264_v27 }
 0x4d4   :  { %6962 = vmatpush1.bf16.msra.mxu1 %v12690_v40  ;;  %v7000_v40 = vstv %s15796_s1  ;;  %v6691_v57 = vadd.f32 %v6690_v37, %v5341_v61  ;;  %v13954_v37 = vld [vmem:[#allocation14 + $0x6c0] ss:$24 sps:$4 sm:$0xff]  }
 0x4d5   :  { %6963 = vmatprep.subr.bf16.mxu1 %v12683_v55  ;;  %v13897_v55 = vld [vmem:[#allocation14 + $0x450] ss:$24 sps:$4 sm:$0xff]   ;;  %v15468_v22 = vmul.f32 %v7000_v40, %v6999_v38 }
 0x4d6   :  { %v13921_v38 = vld [vmem:[#allocation14 + $0x5d0] ss:$24 sps:$4 sm:$0xff]  }
 0x4d7   :  { %v7010_v3 = vrot.slane %v15468_v22, %v15309_v44  ;;  %v13957_v40 = vld [vmem:[#allocation14 + $0x690] ss:$24 sps:$4 sm:$0xff]  }
 0x4d8   :  { %6964 = vmatpush1.bf16.msra.mxu1 %v12682_v47  ;;  %v13902_v47 = vld [vmem:[#allocation14 + $0x424] ss:$24 sps:$4 sm:$0xff]  }
 0x4d9   :  { %6965 = vmatprep.subr.bf16.mxu1 %v12675_v11 }
 0x4dc   :  { %6966 = vmatpush1.bf16.msra.mxu1 %v12674_v59  ;;  %v6689_v59 = vadd.f32 %v6688_v31, %v5337_v46  ;;  %v13920_v31 = vld [vmem:[#allocation14 + $0x304] ss:$24 sps:$4 sm:$0xff]  }
 0x4dd   :  { %6967 = vmatprep.subr.bf16.mxu1 %v12667_v60  ;;  %v6694_v60 = vpop.f32.mrf.mxu0 }
 0x4e0   :  { %6968 = vmatpush1.bf16.msra.mxu1 %v12666_v7  ;;  %v6693_v7 = vadd.f32 %v6692_v39, %v5337_v46  ;;  %v13962_v46 = vld [vmem:[#allocation14 + $0x664] ss:$24 sps:$4 sm:$0xff]   ;;  %v13924_v39 = vld [vmem:[#allocation14 + $0x5a0] ss:$24 sps:$4 sm:$0xff]  }
 0x4e1   :  { %6969 = vmatprep.subr.bf16.mxu1 %v12659_v2 }
 0x4e4   :  { %6970 = vmatpush1.bf16.msra.mxu1 %v12658_v4 }
 0x4e5   :  { %6971 = vmatprep.subr.bf16.mxu1 %v12779_v58  ;;  %v6695_v58 = vadd.f32 %v6694_v60, %v5341_v61  ;;  %v13959_v61 = vld [vmem:[#allocation14 + $0x694] ss:$24 sps:$4 sm:$0xff]   ;;  %v13932_v60 = vld [vmem:[#allocation14 + $0x544] ss:$24 sps:$4 sm:$0xff]  }
 0x4e8   :  { %6972 = vmatpush2.bf16.msra.mxu1 %v12778_v42 }
 0x4e9   :  { %6973 = vmatprep.subr.bf16.mxu1 %v12771_v8  ;;  %v13908_v8 = vld [vmem:[#allocation14 + $0x3c4] ss:$24 sps:$4 sm:$0xff]  }
 0x4ec   :  { %6974 = vmatpush2.bf16.msra.mxu1 %v12770_v43 }
 0x4ed   :  { %6975 = vmatprep.subr.bf16.mxu1 %v12763_v23 }
 0x4f0   :  { %6976 = vmatpush2.bf16.msra.mxu1 %v12762_v9 }
 0x4f1   :  { %6977 = vmatprep.subr.bf16.mxu1 %v12755_v10  ;;  %v13911_v10 = vld [vmem:[#allocation14 + $0x394] ss:$24 sps:$4 sm:$0xff]  }
 0x4f4   :  { %6978 = vmatpush2.bf16.msra.mxu1 %v12754_v1 }
 0x4f5   :  { %6979 = vmatprep.subr.bf16.mxu1 %v12747_v36 }
 0x4f8   :  { %6980 = vmatpush2.bf16.msra.mxu1 %v12746_v20 }
 0x4f9   :  { %6981 = vmatprep.subr.bf16.mxu1 %v12739_v63  ;;  %v13914_v63 = vld [vmem:[#allocation14 + $0x364] ss:$24 sps:$4 sm:$0xff]  }
 0x4fc   :  { %6982 = vmatpush2.bf16.msra.mxu1 %v12738_v35  ;;  %v13948_v35 = vld [vmem:[#allocation14 + $0x720] ss:$24 sps:$4 sm:$0xff]  }
 0x4fd   :  { %6983 = vmatprep.subr.bf16.mxu1 %v12731_v26  ;;  %v13917_v26 = vld [vmem:[#allocation14 + $0x334] ss:$24 sps:$4 sm:$0xff]  }
 0x500   :  { %6984 = vmatpush2.bf16.msra.mxu1 %v12730_v50  ;;  %v13951_v50 = vld [vmem:[#allocation14 + $0x6f0] ss:$24 sps:$4 sm:$0xff]  }
 0x501   :  { %6985 = vmatprep.subr.bf16.mxu1 %v12723_v33  ;;  %v13956_v33 = vld [vmem:[#allocation14 + $0x6c4] ss:$24 sps:$4 sm:$0xff]  }
 0x504   :  { %6986 = vmatpush2.bf16.msra.mxu1 %v12722_v34  ;;  %v13918_v34 = vld [vmem:[#allocation14 + $0x300] ss:$24 sps:$4 sm:$0xff]  }
 0x505   :  { %9462 = vmatprep.subr.bf16.mxu1 %v13899_v52  ;;  %v13923_v52 = vld [vmem:[#allocation14 + $0x5d4] ss:$24 sps:$4 sm:$0xff]  }
 0x507   :  { %6988 = vmatmul.mubr.bf16.vlgmr.msra.gmra.mxu1 %v15443_v14  ;;  %v6731_v11 = vpop.f32.mrf.mxu1  ;;  %v7006_v14 = vrot.slane %v15468_v22, %v15264_v27 }
 0x508   :  { %9463 = vmatpush1.bf16.msra.mxu1 %v13897_v55  ;;  %v6732_v53 = vadd.f32 %v6731_v11, %v6689_v59  ;;  %v13926_v55 = vld [vmem:[#allocation14 + $0x5a4] ss:$24 sps:$4 sm:$0xff]   ;;  %v13929_v11 = vld [vmem:[#allocation14 + $0x574] ss:$24 sps:$4 sm:$0xff]   ;;  %v13963_v59 = vld [vmem:[#allocation14 + $0x630] ss:$24 sps:$4 sm:$0xff]  }
 0x509   :  { %v6733_v0 = vpop.f32.mrf.mxu1  ;;  %9464 = vmatprep.subr.bf16.mxu1 %v13902_v47  ;;  %v13960_v47 = vld [vmem:[#allocation14 + $0x660] ss:$24 sps:$4 sm:$0xff]  }
 0x50a   :  { %v6734_v2 = vadd.f32 %v6733_v0, %v6691_v57  ;;  %v7043_v23 = vadd.f32 %v7006_v14, %v6732_v53  ;;  %v13965_v57 = vld [vmem:[#allocation14 + $0x634] ss:$24 sps:$4 sm:$0xff]   ;;  %v13968_v0 = vld [vmem:[#allocation14 + $0x604] ss:$24 sps:$4 sm:$0xff]   ;;  %v13933_v53 = vld [vmem:[#allocation14 + $0x510] ss:$24 sps:$4 sm:$0xff]  }
 0x50b   :  { %v6735_v4 = vpop.f32.mrf.mxu1 }
 0x50c   :  { %v6736_v5 = vadd.f32 %v6735_v4, %v6693_v7  ;;  %9465 = vmatpush1.bf16.msra.mxu1 %v13900_v51  ;;  %v7044_v32 = vadd.f32 %v7010_v3, %v6734_v2  ;;  %v7059_v1 = vmax.f32 %v7043_v23, 0.0  ;;  %v13927_v51 = vld [vmem:[#allocation14 + $0x570] ss:$24 sps:$4 sm:$0xff]   ;;  %v13966_v7 = vld [vmem:[#allocation14 + $0x600] ss:$24 sps:$4 sm:$0xff]  }
 0x50d   :  { %v6737_v42 = vpop.f32.mrf.mxu1  ;;  %9466 = vmatprep.subr.bf16.mxu1 %v13905_v62  ;;  %v13930_v62 = vld [vmem:[#allocation14 + $0x540] ss:$24 sps:$4 sm:$0xff]   ;;  %v13935_v2 = vld [vmem:[#allocation14 + $0x514] ss:$24 sps:$4 sm:$0xff]   ;;  %v13938_v4 = vld [vmem:[#allocation14 + $0x4e4] ss:$24 sps:$4 sm:$0xff]  }
 0x50e   :  { %v7051_v41 = vadd.f32 %v7006_v14, %v6736_v5  ;;  %v6738_v43 = vadd.f32 %v6737_v42, %v6695_v58  ;;  %v7060_v18 = vmax.f32 %v7044_v32, 0.0  ;;  %v13969_v14 = vld [vmem:[#allocation14 + $0x8d0] ss:$24 sps:$4 sm:$0xff]   ;;  %v13974_v58 = vld [vmem:[#allocation14 + $0x8a4] ss:$24 sps:$4 sm:$0xff]  }
 0x50f   :  { %v13936_v5 = vld [vmem:[#allocation14 + $0x4e0] ss:$24 sps:$4 sm:$0xff]   ;;  %v13941_v42 = vld [vmem:[#allocation14 + $0x4b4] ss:$24 sps:$4 sm:$0xff]   ;;  %v13939_v32 = vld [vmem:[#allocation14 + $0x4b0] ss:$24 sps:$4 sm:$0xff]  }
 0x510   :  { %v7052_v30 = vadd.f32 %v7010_v3, %v6738_v43  ;;  %9467 = vmatpush1.bf16.msra.mxu1 %v13903_v6  ;;  %v7067_v9 = vmax.f32 %v7051_v41, 0.0  ;;  %v13971_v3 = vld [vmem:[#allocation14 + $0x8d4] ss:$24 sps:$4 sm:$0xff]   ;;  %v13972_v6 = vld [vmem:[#allocation14 + $0x8a0] ss:$24 sps:$4 sm:$0xff]   ;;  %v6774_v43 = vpop.f32.mrf.mxu0 }
 0x511   :  { %9468 = vmatprep.subr.bf16.mxu1 %v13908_v8  ;;  %v13977_v8 = vld [vmem:[#allocation14 + $0x874] ss:$24 sps:$4 sm:$0xff]   ;;  %v13975_v41 = vld [vmem:[#allocation14 + $0x870] ss:$24 sps:$4 sm:$0xff]   ;;  %v13944_v23 = vld [vmem:[#allocation14 + $0x484] ss:$24 sps:$4 sm:$0xff]  }
 0x512   :  { %v7068_v24 = vmax.f32 %v7052_v30, 0.0  ;;  %v15476_v20 = vpack.c.bf16 %v7067_v9, %v7059_v1  ;;  %v13980_v30 = vld [vmem:[#allocation14 + $0x844] ss:$24 sps:$4 sm:$0xff]   ;;  %v13978_v9 = vld [vmem:[#allocation14 + $0x840] ss:$24 sps:$4 sm:$0xff]   ;;  %v5349_v1 = vrot.slane %v15458_v54, %v15322_v29 }
 0x514   :  { %v15474_v36 = vpack.c.bf16 %v7068_v24, %v7060_v18  ;;  %9469 = vmatpush1.bf16.msra.mxu1 %v13906_v13  ;;  %v13942_v13 = vld [vmem:[#allocation14 + $0x480] ss:$24 sps:$4 sm:$0xff]   ;;  %v13983_v18 = vld [vmem:[#allocation14 + $0x814] ss:$24 sps:$4 sm:$0xff]  }
 0x515   :  { %9470 = vmatprep.subr.bf16.mxu1 %v13911_v10  ;;  %v6776_v10 = vpop.f32.mrf.mxu0  ;;  %v13995_v24 = vld [vmem:[#allocation14 + $0xa54] ss:$24 sps:$4 sm:$0xff]  }
 0x516   :  { %9451 = vmatprep.mubr.bf16.mxu0 %v15474_v36 }
 0x517   :  { %9452 = vmatmul.mubr.bf16.vlgmr.msra.gmra.mxu0 %v15476_v20 }
 0x518   :  { %9471 = vmatpush1.bf16.msra.mxu1 %v13909_v17  ;;  %9506 = vmatpush1.bf16.msra.mxu0 %v13945_v19  ;;  %v13981_v17 = vld [vmem:[#allocation14 + $0x810] ss:$24 sps:$4 sm:$0xff]   ;;  %v5345_v19 = vrot.slane %v15458_v54, %v15347_v16 }
 0x519   :  { %9472 = vmatprep.subr.bf16.mxu1 %v13914_v63  ;;  %9507 = vmatprep.subr.bf16.mxu0 %v13950_v49  ;;  %v6778_v63 = vpop.f32.mrf.mxu0  ;;  %v13986_v49 = vld [vmem:[#allocation14 + $0x7e4] ss:$24 sps:$4 sm:$0xff]  }
 0x51c   :  { %9473 = vmatpush1.bf16.msra.mxu1 %v13912_v48  ;;  %9508 = vmatpush1.bf16.msra.mxu0 %v13948_v35  ;;  %v6777_v35 = vadd.f32 %v6776_v10, %v5349_v1  ;;  %v14029_v10 = vld [vmem:[#allocation14 + $0x930] ss:$24 sps:$4 sm:$0xff]  }
 0x51d   :  { %9474 = vmatprep.subr.bf16.mxu1 %v13917_v26  ;;  %9509 = vmatprep.subr.bf16.mxu0 %v13953_v28  ;;  %v13984_v26 = vld [vmem:[#allocation14 + $0x7e0] ss:$24 sps:$4 sm:$0xff]   ;;  %v6775_v28 = vadd.f32 %v6774_v43, %v5345_v19  ;;  %v14019_v43 = vld [vmem:[#allocation14 + $0x994] ss:$24 sps:$4 sm:$0xff]  }
 0x520   :  { %9475 = vmatpush1.bf16.msra.mxu1 %v13915_v56  ;;  %9510 = vmatpush1.bf16.msra.mxu0 %v13951_v50  ;;  %v6780_v56 = vpop.f32.mrf.mxu0 }
 0x521   :  { %9476 = vmatprep.subr.bf16.mxu1 %v13920_v31  ;;  %9511 = vmatprep.subr.bf16.mxu0 %v13956_v33  ;;  %v13989_v31 = vld [vmem:[#allocation14 + $0x7b4] ss:$24 sps:$4 sm:$0xff]   ;;  %v6779_v33 = vadd.f32 %v6778_v63, %v5345_v19  ;;  %v14049_v19 = vld [vmem:[#allocation14 + $0xba4] ss:$24 sps:$4 sm:$0xff]   ;;  %v14047_v63 = vld [vmem:[#allocation14 + $0xba0] ss:$24 sps:$4 sm:$0xff]  }
 0x524   :  { %9477 = vmatpush1.bf16.msra.mxu1 %v13918_v34  ;;  %9512 = vmatpush1.bf16.msra.mxu0 %v13954_v37  ;;  %v7018_v37 = vrot.slane %v15468_v22, %v15322_v29 }
 0x525   :  { %9478 = vmatprep.subr.bf16.mxu1 %v13923_v52  ;;  %9513 = vmatprep.subr.bf16.mxu0 %v13959_v61  ;;  %v7014_v61 = vrot.slane %v15468_v22, %v15347_v16 }
 0x528   :  { %9479 = vmatpush2.bf16.msra.mxu1 %v13921_v38  ;;  %9514 = vmatpush1.bf16.msra.mxu0 %v13957_v40  ;;  %v6781_v40 = vadd.f32 %v6780_v56, %v5349_v1  ;;  %v14043_v1 = vld [vmem:[#allocation14 + $0xbd4] ss:$24 sps:$4 sm:$0xff]  }
 0x529   :  { %9480 = vmatprep.subr.bf16.mxu1 %v13926_v55  ;;  %9515 = vmatprep.subr.bf16.mxu0 %v13962_v46  ;;  %v13987_v46 = vld [vmem:[#allocation14 + $0x7b0] ss:$24 sps:$4 sm:$0xff]  }
 0x52c   :  { %9481 = vmatpush2.bf16.msra.mxu1 %v13924_v39  ;;  %9516 = vmatpush1.bf16.msra.mxu0 %v13960_v47  ;;  %v13992_v47 = vld [vmem:[#allocation14 + $0x784] ss:$24 sps:$4 sm:$0xff]  }
 0x52d   :  { %9482 = vmatprep.subr.bf16.mxu1 %v13929_v11  ;;  %9517 = vmatprep.subr.bf16.mxu0 %v13965_v57 }
 0x530   :  { %9483 = vmatpush2.bf16.msra.mxu1 %v13927_v51  ;;  %9518 = vmatpush1.bf16.msra.mxu0 %v13963_v59 }
 0x531   :  { %9484 = vmatprep.subr.bf16.mxu1 %v13932_v60  ;;  %9519 = vmatprep.subr.bf16.mxu0 %v13968_v0  ;;  %v13990_v0 = vld [vmem:[#allocation14 + $0x780] ss:$24 sps:$4 sm:$0xff]  }
 0x534   :  { %9485 = vmatpush2.bf16.msra.mxu1 %v13930_v62  ;;  %9520 = vmatpush1.bf16.msra.mxu0 %v13966_v7  ;;  %v13998_v7 = vld [vmem:[#allocation14 + $0x15c] ss:$24 sps:$4 sm:$0xff]  }
 0x535   :  { %9486 = vmatprep.subr.bf16.mxu1 %v13935_v2  ;;  %9521 = vmatprep.subr.bf16.mxu0 %v13971_v3 }
 0x538   :  { %9487 = vmatpush2.bf16.msra.mxu1 %v13933_v53  ;;  %9522 = vmatpush2.bf16.msra.mxu0 %v13969_v14 }
 0x539   :  { %9488 = vmatprep.subr.bf16.mxu1 %v13938_v4  ;;  %9523 = vmatprep.subr.bf16.mxu0 %v13974_v58  ;;  %v13993_v4 = vld [vmem:[#allocation14 + $0xa50] ss:$24 sps:$4 sm:$0xff]  }
 0x53c   :  { %9489 = vmatpush2.bf16.msra.mxu1 %v13936_v5  ;;  %9524 = vmatpush2.bf16.msra.mxu0 %v13972_v6  ;;  %v14001_v5 = vld [vmem:[#allocation14 + $0xa24] ss:$24 sps:$4 sm:$0xff]   ;;  %v13999_v6 = vld [vmem:[#allocation14 + $0xa20] ss:$24 sps:$4 sm:$0xff]  }
 0x53d   :  { %9490 = vmatprep.subr.bf16.mxu1 %v13941_v42  ;;  %9525 = vmatprep.subr.bf16.mxu0 %v13977_v8  ;;  %v14007_v42 = vld [vmem:[#allocation14 + $0x9f4] ss:$24 sps:$4 sm:$0xff]   ;;  %v14005_v8 = vld [vmem:[#allocation14 + $0x9f0] ss:$24 sps:$4 sm:$0xff]  }
 0x540   :  { %9491 = vmatpush2.bf16.msra.mxu1 %v13939_v32  ;;  %9526 = vmatpush2.bf16.msra.mxu0 %v13975_v41  ;;  %v14013_v32 = vld [vmem:[#allocation14 + $0x9c4] ss:$24 sps:$4 sm:$0xff]   ;;  %v14011_v41 = vld [vmem:[#allocation14 + $0x9c0] ss:$24 sps:$4 sm:$0xff]  }
 0x541   :  { %9492 = vmatprep.subr.bf16.mxu1 %v13944_v23  ;;  %9527 = vmatprep.subr.bf16.mxu0 %v13980_v30  ;;  %v14017_v23 = vld [vmem:[#allocation14 + $0x990] ss:$24 sps:$4 sm:$0xff]   ;;  %v14025_v30 = vld [vmem:[#allocation14 + $0x964] ss:$24 sps:$4 sm:$0xff]  }
 0x544   :  { %9493 = vmatpush2.bf16.msra.mxu1 %v13942_v13  ;;  %9528 = vmatpush2.bf16.msra.mxu0 %v13978_v9  ;;  %v14023_v13 = vld [vmem:[#allocation14 + $0x960] ss:$24 sps:$4 sm:$0xff]   ;;  %v14031_v9 = vld [vmem:[#allocation14 + $0x934] ss:$24 sps:$4 sm:$0xff]  }
 0x545   :  { %9529 = vmatprep.subr.bf16.mxu0 %v13983_v18  ;;  %9548 = vmatprep.subr.bf16.mxu1 %v13995_v24  ;;  %v14037_v18 = vld [vmem:[#allocation14 + $0x904] ss:$24 sps:$4 sm:$0xff]   ;;  %v14035_v24 = vld [vmem:[#allocation14 + $0x900] ss:$24 sps:$4 sm:$0xff]  }
 0x547   :  { %v6817_v48 = vpop.f32.mrf.mxu1 }
 0x548   :  { %9530 = vmatpush2.bf16.msra.mxu0 %v13981_v17  ;;  %v6818_v52 = vadd.f32 %v6817_v48, %v6775_v28  ;;  %v14041_v17 = vld [vmem:[#allocation14 + $0xbd0] ss:$24 sps:$4 sm:$0xff]   ;;  %v14059_v28 = vld [vmem:[#allocation14 + $0xb40] ss:$24 sps:$4 sm:$0xff]  }
 0x549   :  { %v6819_v50 = vpop.f32.mrf.mxu1  ;;  %9531 = vmatprep.subr.bf16.mxu0 %v13986_v49  ;;  %v14055_v49 = vld [vmem:[#allocation14 + $0xb74] ss:$24 sps:$4 sm:$0xff]   ;;  %v14053_v48 = vld [vmem:[#allocation14 + $0xb70] ss:$24 sps:$4 sm:$0xff]  }
 0x54a   :  { %v6820_v34 = vadd.f32 %v6819_v50, %v6777_v35  ;;  %v7045_v59 = vadd.f32 %v7014_v61, %v6818_v52  ;;  %v6860_v35 = vpop.f32.mrf.mxu0  ;;  %v14067_v50 = vld [vmem:[#allocation14 + $0xb14] ss:$24 sps:$4 sm:$0xff]   ;;  %v14073_v52 = vld [vmem:[#allocation14 + $0xae4] ss:$24 sps:$4 sm:$0xff]  }
 0x54b   :  { %v6821_v38 = vpop.f32.mrf.mxu1 }
 0x54c   :  { %v6822_v55 = vadd.f32 %v6821_v38, %v6779_v33  ;;  %9532 = vmatpush2.bf16.msra.mxu0 %v13984_v26  ;;  %v7046_v11 = vadd.f32 %v7018_v37, %v6820_v34  ;;  %v7061_v53 = vmax.f32 %v7045_v59, 0.0  ;;  %v14061_v26 = vld [vmem:[#allocation14 + $0xb44] ss:$24 sps:$4 sm:$0xff]   ;;  %v6862_v56 = vpop.f32.mrf.mxu0  ;;  %v14065_v33 = vld [vmem:[#allocation14 + $0xb10] ss:$24 sps:$4 sm:$0xff]   ;;  %v5353_v34 = vrot.slane %v15458_v54, %v15365_v25 }
 0x54d   :  { %v6823_v39 = vpop.f32.mrf.mxu1  ;;  %9533 = vmatprep.subr.bf16.mxu0 %v13989_v31  ;;  %v5357_v31 = vrot.slane %v15458_v54, %v15362_v21 }
 0x54e   :  { %v7053_v57 = vadd.f32 %v7014_v61, %v6822_v55  ;;  %v6824_v51 = vadd.f32 %v6823_v39, %v6781_v40  ;;  %v7062_v2 = vmax.f32 %v7046_v11, 0.0  ;;  %v14071_v40 = vld [vmem:[#allocation14 + $0xae0] ss:$24 sps:$4 sm:$0xff]   ;;  %v6861_v55 = vadd.f32 %v6860_v35, %v5353_v34 }
 0x54f   :  { %v6863_v38 = vadd.f32 %v6862_v56, %v5357_v31  ;;  %v14020_v35 = vld [vmem:[#allocation14 + $0x98] ss:$24 sps:$4 sm:$0xff]   ;;  %v14034_v56 = vld [vmem:[#allocation14 + $0x3c] ss:$24 sps:$4 sm:$0xff]  }
 0x550   :  { %v7054_v60 = vadd.f32 %v7018_v37, %v6824_v51  ;;  %9534 = vmatpush2.bf16.msra.mxu0 %v13987_v46  ;;  %v7069_v62 = vmax.f32 %v7053_v57, 0.0  ;;  %v6864_v37 = vpop.f32.mrf.mxu0  ;;  %v7026_v51 = vrot.slane %v15468_v22, %v15362_v21 }
 0x551   :  { %9535 = vmatprep.subr.bf16.mxu0 %v13992_v47  ;;  %v14079_v47 = vld [vmem:[#allocation14 + $0xab4] ss:$24 sps:$4 sm:$0xff]   ;;  %v6865_v11 = vadd.f32 %v6864_v37, %v5353_v34  ;;  %v14044_v37 = vld [vmem:[#allocation14 + $0x2d8] ss:$24 sps:$4 sm:$0xff]  }
 0x552   :  { %v7070_v3 = vmax.f32 %v7054_v60, 0.0  ;;  %v15490_v58 = vpack.c.bf16 %v7069_v62, %v7061_v53  ;;  %v6866_v46 = vpop.f32.mrf.mxu0  ;;  %v7022_v60 = vrot.slane %v15468_v22, %v15365_v25  ;;  %v14085_v53 = vld [vmem:[#allocation14 + $0xa84] ss:$24 sps:$4 sm:$0xff]  }
 0x553   :  { %v6867_v62 = vadd.f32 %v6866_v46, %v5357_v31  ;;  %v14040_v31 = vld [vmem:[#allocation14 + $0xc] ss:$24 sps:$4 sm:$0xff]   ;;  %v14046_v34 = vld [vmem:[#allocation14 + $0x2dc] ss:$24 sps:$4 sm:$0xff]  }
 0x554   :  { %v15488_v14 = vpack.c.bf16 %v7070_v3, %v7062_v2  ;;  %9536 = vmatpush2.bf16.msra.mxu0 %v13990_v0  ;;  %v14077_v2 = vld [vmem:[#allocation14 + $0xab0] ss:$24 sps:$4 sm:$0xff]   ;;  %v14064_v46 = vld [vmem:[#allocation14 + $0x24c] ss:$24 sps:$4 sm:$0xff]  }
 0x555   :  { %9591 = vmatprep.subr.bf16.mxu0 %v13998_v7 }
 0x556   :  { %9494 = vmatprep.mubr.bf16.mxu1 %v15488_v14 }
 0x557   :  { %9495 = vmatmul.mubr.bf16.vlgmr.msra.gmra.mxu1 %v15490_v58 }
 0x558   :  { %9549 = vmatpush1.bf16.msra.mxu1 %v13993_v4 }
 0x559   :  { %9550 = vmatprep.subr.bf16.mxu1 %v14001_v5 }
 0x55c   :  { %9551 = vmatpush1.bf16.msra.mxu1 %v13999_v6 }
 0x55d   :  { %9552 = vmatprep.subr.bf16.mxu1 %v14007_v42 }
 0x560   :  { %9553 = vmatpush1.bf16.msra.mxu1 %v14005_v8 }
 0x561   :  { %9554 = vmatprep.subr.bf16.mxu1 %v14013_v32  ;;  %v14083_v32 = vld [vmem:[#allocation14 + $0xa80] ss:$24 sps:$4 sm:$0xff]  }
 0x564   :  { %9555 = vmatpush1.bf16.msra.mxu1 %v14011_v41 }
 0x565   :  { %9556 = vmatprep.subr.bf16.mxu1 %v14019_v43  ;;  %v14091_v43 = vld [vmem:[#allocation14 + $0x45c] ss:$24 sps:$4 sm:$0xff]  }
 0x568   :  { %9557 = vmatpush1.bf16.msra.mxu1 %v14017_v23 }
 0x569   :  { %9558 = vmatprep.subr.bf16.mxu1 %v14025_v30 }
 0x56c   :  { %9559 = vmatpush1.bf16.msra.mxu1 %v14023_v13 }
 0x56d   :  { %9560 = vmatprep.subr.bf16.mxu1 %v14031_v9 }
 0x570   :  { %9561 = vmatpush1.bf16.msra.mxu1 %v14029_v10  ;;  %v13996_v10 = vld [vmem:[#allocation14 + $0x158] ss:$24 sps:$4 sm:$0xff]  }
 0x571   :  { %9562 = vmatprep.subr.bf16.mxu1 %v14037_v18 }
 0x574   :  { %9563 = vmatpush1.bf16.msra.mxu1 %v14035_v24  ;;  %v14004_v24 = vld [vmem:[#allocation14 + $0x12c] ss:$24 sps:$4 sm:$0xff]  }
 0x575   :  { %9564 = vmatprep.subr.bf16.mxu1 %v14043_v1  ;;  %v14002_v1 = vld [vmem:[#allocation14 + $0x128] ss:$24 sps:$4 sm:$0xff]  }
 0x578   :  { %9565 = vmatpush2.bf16.msra.mxu1 %v14041_v17  ;;  %v14010_v17 = vld [vmem:[#allocation14 + $0xfc] ss:$24 sps:$4 sm:$0xff]  }
 0x579   :  { %9566 = vmatprep.subr.bf16.mxu1 %v14049_v19  ;;  %v14008_v19 = vld [vmem:[#allocation14 + $0xf8] ss:$24 sps:$4 sm:$0xff]  }
 0x57c   :  { %9567 = vmatpush2.bf16.msra.mxu1 %v14047_v63  ;;  %v14016_v63 = vld [vmem:[#allocation14 + $0xcc] ss:$24 sps:$4 sm:$0xff]  }
 0x57d   :  { %9568 = vmatprep.subr.bf16.mxu1 %v14055_v49  ;;  %v14014_v49 = vld [vmem:[#allocation14 + $0xc8] ss:$24 sps:$4 sm:$0xff]  }
 0x580   :  { %9569 = vmatpush2.bf16.msra.mxu1 %v14053_v48  ;;  %v14022_v48 = vld [vmem:[#allocation14 + $0x9c] ss:$24 sps:$4 sm:$0xff]  }
 0x581   :  { %9570 = vmatprep.subr.bf16.mxu1 %v14061_v26  ;;  %v14028_v26 = vld [vmem:[#allocation14 + $0x6c] ss:$24 sps:$4 sm:$0xff]  }
 0x584   :  { %9571 = vmatpush2.bf16.msra.mxu1 %v14059_v28  ;;  %v14026_v28 = vld [vmem:[#allocation14 + $0x68] ss:$24 sps:$4 sm:$0xff]  }
 0x585   :  { %9572 = vmatprep.subr.bf16.mxu1 %v14067_v50  ;;  %v14032_v50 = vld [vmem:[#allocation14 + $0x38] ss:$24 sps:$4 sm:$0xff]  }
 0x587   :  { %v6903_v61 = vpop.f32.mrf.mxu1 }
 0x588   :  { %9573 = vmatpush2.bf16.msra.mxu1 %v14065_v33  ;;  %v6904_v59 = vadd.f32 %v6903_v61, %v6861_v55  ;;  %v14038_v33 = vld [vmem:[#allocation14 + $0x8] ss:$24 sps:$4 sm:$0xff]   ;;  %v6946_v55 = vpop.f32.mrf.mxu0 }
 0x589   :  { %v6905_v39 = vpop.f32.mrf.mxu1  ;;  %9574 = vmatprep.subr.bf16.mxu1 %v14073_v52  ;;  %v14052_v52 = vld [vmem:[#allocation14 + $0x2ac] ss:$24 sps:$4 sm:$0xff]   ;;  %v14050_v61 = vld [vmem:[#allocation14 + $0x2a8] ss:$24 sps:$4 sm:$0xff]  }
 0x58a   :  { %v6906_v57 = vadd.f32 %v6905_v39, %v6863_v38  ;;  %v7047_v42 = vadd.f32 %v7022_v60, %v6904_v59  ;;  %v14058_v38 = vld [vmem:[#allocation14 + $0x27c] ss:$24 sps:$4 sm:$0xff]   ;;  %v14062_v39 = vld [vmem:[#allocation14 + $0x248] ss:$24 sps:$4 sm:$0xff]   ;;  %v5361_v59 = vrot.slane %v15458_v54, %v15381_v12 }
 0x58b   :  { %v6907_v0 = vpop.f32.mrf.mxu1 }
 0x58c   :  { %v6908_v7 = vadd.f32 %v6907_v0, %v6865_v11  ;;  %9575 = vmatpush2.bf16.msra.mxu1 %v14071_v40  ;;  %v7048_v4 = vadd.f32 %v7026_v51, %v6906_v57  ;;  %v7063_v13 = vmax.f32 %v7047_v42, 0.0  ;;  %v14056_v40 = vld [vmem:[#allocation14 + $0x278] ss:$24 sps:$4 sm:$0xff]   ;;  %v14070_v11 = vld [vmem:[#allocation14 + $0x21c] ss:$24 sps:$4 sm:$0xff]   ;;  %v5365_v57 = vrot.slane %v15458_v54, %v15384_v45 }
 0x58d   :  { %v6909_v3 = vpop.f32.mrf.mxu1  ;;  %9576 = vmatprep.subr.bf16.mxu1 %v14079_v47  ;;  %v6948_v47 = vpop.f32.mrf.mxu0  ;;  %v14076_v0 = vld [vmem:[#allocation14 + $0x1ec] ss:$24 sps:$4 sm:$0xff]   ;;  %v7030_v54 = vrot.slane %v15468_v22, %v15381_v12 }
 0x58e   :  { %v7055_v5 = vadd.f32 %v7022_v60, %v6908_v7  ;;  %v6910_v6 = vadd.f32 %v6909_v3, %v6867_v62  ;;  %v7064_v23 = vmax.f32 %v7048_v4, 0.0  ;;  %v6949_v7 = vadd.f32 %v6948_v47, %v5365_v57 }
 0x58f   :  { %v6950_v60 = vpop.f32.mrf.mxu0  ;;  %v6947_v3 = vadd.f32 %v6946_v55, %v5361_v59  ;;  %v14106_v55 = vld [vmem:[#allocation14 + $0x6fc] ss:$24 sps:$4 sm:$0xff]  }
 0x590   :  { %v7056_v8 = vadd.f32 %v7026_v51, %v6910_v6  ;;  %9577 = vmatpush2.bf16.msra.mxu1 %v14077_v2  ;;  %v7071_v41 = vmax.f32 %v7055_v5, 0.0  ;;  %v14068_v51 = vld [vmem:[#allocation14 + $0x218] ss:$24 sps:$4 sm:$0xff]   ;;  %v14074_v2 = vld [vmem:[#allocation14 + $0x1e8] ss:$24 sps:$4 sm:$0xff]   ;;  %v6951_v6 = vadd.f32 %v6950_v60, %v5361_v59 }
 0x591   :  { %9578 = vmatprep.subr.bf16.mxu1 %v14085_v53  ;;  %v6952_v53 = vpop.f32.mrf.mxu0  ;;  %v14082_v5 = vld [vmem:[#allocation14 + $0x1bc] ss:$24 sps:$4 sm:$0xff]   ;;  %v14112_v59 = vld [vmem:[#allocation14 + $0x6cc] ss:$24 sps:$4 sm:$0xff]   ;;  %v14107_v60 = vld [vmem:[#allocation14 + $0x3c8] ss:$24 sps:$4 sm:$0xff]  }
 0x592   :  { %v7072_v30 = vmax.f32 %v7056_v8, 0.0  ;;  %v15504_v18 = vpack.c.bf16 %v7071_v41, %v7063_v13  ;;  %v7034_v8 = vrot.slane %v15468_v22, %v15384_v45 }
 0x594   :  { %v15502_v9 = vpack.c.bf16 %v7072_v30, %v7064_v23  ;;  %9579 = vmatpush2.bf16.msra.mxu1 %v14083_v32  ;;  %v14080_v30 = vld [vmem:[#allocation14 + $0x1b8] ss:$24 sps:$4 sm:$0xff]  }
 0x595   :  { %9634 = vmatprep.subr.bf16.mxu1 %v14091_v43  ;;  %v6953_v43 = vadd.f32 %v6952_v53, %v5365_v57  ;;  %v14104_v57 = vld [vmem:[#allocation14 + $0x6f8] ss:$24 sps:$4 sm:$0xff]   ;;  %v14121_v53 = vld [vmem:[#allocation14 + $0x36c] ss:$24 sps:$4 sm:$0xff]  }
 0x596   :  { %9537 = vmatprep.mubr.bf16.mxu0 %v15502_v9 }
 0x597   :  { %9538 = vmatmul.mubr.bf16.vlgmr.msra.gmra.mxu0 %v15504_v18 }
 0x598   :  { %9592 = vmatpush1.bf16.msra.mxu0 %v13996_v10  ;;  %9623 = vmatprep.mubr.bf16.mxu0 %v15474_v36  ;;  %v14088_v10 = vld [vmem:[#allocation14 + $0x18c] ss:$24 sps:$4 sm:$0xff]  }
 0x599   :  { %9593 = vmatprep.subr.bf16.mxu0 %v14004_v24 }
 0x59c   :  { %9594 = vmatpush1.bf16.msra.mxu0 %v14002_v1 }
 0x59d   :  { %9595 = vmatprep.subr.bf16.mxu0 %v14010_v17 }
 0x5a0   :  { %9596 = vmatpush1.bf16.msra.mxu0 %v14008_v19 }
 0x5a1   :  { %9597 = vmatprep.subr.bf16.mxu0 %v14016_v63 }
 0x5a4   :  { %9598 = vmatpush1.bf16.msra.mxu0 %v14014_v49  ;;  %v14086_v49 = vld [vmem:[#allocation14 + $0x188] ss:$24 sps:$4 sm:$0xff]  }
 0x5a5   :  { %9599 = vmatprep.subr.bf16.mxu0 %v14022_v48  ;;  %v14094_v48 = vld [vmem:[#allocation14 + $0x75c] ss:$24 sps:$4 sm:$0xff]  }
 0x5a8   :  { %9600 = vmatpush1.bf16.msra.mxu0 %v14020_v35 }
 0x5a9   :  { %9601 = vmatprep.subr.bf16.mxu0 %v14028_v26 }
 0x5ac   :  { %9602 = vmatpush1.bf16.msra.mxu0 %v14026_v28  ;;  %v14089_v28 = vld [vmem:[#allocation14 + $0x458] ss:$24 sps:$4 sm:$0xff]  }
 0x5ad   :  { %9603 = vmatprep.subr.bf16.mxu0 %v14034_v56  ;;  %v14092_v56 = vld [vmem:[#allocation14 + $0x758] ss:$24 sps:$4 sm:$0xff]  }
 0x5b0   :  { %9604 = vmatpush1.bf16.msra.mxu0 %v14032_v50 }
 0x5b1   :  { %9605 = vmatprep.subr.bf16.mxu0 %v14040_v31  ;;  %v14097_v31 = vld [vmem:[#allocation14 + $0x42c] ss:$24 sps:$4 sm:$0xff]  }
 0x5b4   :  { %9606 = vmatpush1.bf16.msra.mxu0 %v14038_v33  ;;  %v14100_v33 = vld [vmem:[#allocation14 + $0x72c] ss:$24 sps:$4 sm:$0xff]  }
 0x5b5   :  { %9607 = vmatprep.subr.bf16.mxu0 %v14046_v34  ;;  %v15524_v34 = vld [vmem:[#allocation16] sm:$0x3f] }
 0x5b8   :  { %9608 = vmatpush2.bf16.msra.mxu0 %v14044_v37 }
 0x5b9   :  { %9609 = vmatprep.subr.bf16.mxu0 %v14052_v52  ;;  %v14095_v52 = vld [vmem:[#allocation14 + $0x428] ss:$24 sps:$4 sm:$0xff]  }
 0x5bc   :  { %9610 = vmatpush2.bf16.msra.mxu0 %v14050_v61  ;;  %v14098_v61 = vld [vmem:[#allocation14 + $0x728] ss:$24 sps:$4 sm:$0xff]  }
 0x5bd   :  { %9611 = vmatprep.subr.bf16.mxu0 %v14058_v38 }
 0x5c0   :  { %9612 = vmatpush2.bf16.msra.mxu0 %v14056_v40  ;;  %v14103_v40 = vld [vmem:[#allocation14 + $0x3fc] ss:$24 sps:$4 sm:$0xff]  }
 0x5c1   :  { %9613 = vmatprep.subr.bf16.mxu0 %v14064_v46  ;;  %v15534_v46 = vrot.slane %v15524_v34, %v15264_v27 }
 0x5c4   :  { %9614 = vmatpush2.bf16.msra.mxu0 %v14062_v39 }
 0x5c5   :  { %9615 = vmatprep.subr.bf16.mxu0 %v14070_v11  ;;  %v14101_v11 = vld [vmem:[#allocation14 + $0x3f8] ss:$24 sps:$4 sm:$0xff]  }
 0x5c7   :  { %v6989_v62 = vpop.f32.mrf.mxu1 }
 0x5c8   :  { %9616 = vmatpush2.bf16.msra.mxu0 %v14068_v51  ;;  %v6990_v32 = vadd.f32 %v6989_v62, %v6947_v3  ;;  %v14109_v51 = vld [vmem:[#allocation14 + $0x3cc] ss:$24 sps:$4 sm:$0xff]   ;;  %v14115_v62 = vld [vmem:[#allocation14 + $0x39c] ss:$24 sps:$4 sm:$0xff]   ;;  %v14116_v3 = vld [vmem:[#allocation14 + $0x698] ss:$24 sps:$4 sm:$0xff]  }
 0x5c9   :  { %v6991_v4 = vpop.f32.mrf.mxu1  ;;  %9617 = vmatprep.subr.bf16.mxu0 %v14076_v0  ;;  %v14110_v0 = vld [vmem:[#allocation14 + $0x6c8] ss:$24 sps:$4 sm:$0xff]  }
 0x5ca   :  { %v6992_v42 = vadd.f32 %v6991_v4, %v6949_v7  ;;  %v7049_v19 = vadd.f32 %v7030_v54, %v6990_v32  ;;  %v14118_v7 = vld [vmem:[#allocation14 + $0x69c] ss:$24 sps:$4 sm:$0xff]   ;;  %v14124_v4 = vld [vmem:[#allocation14 + $0x66c] ss:$24 sps:$4 sm:$0xff]   ;;  %v14125_v32 = vld [vmem:[#allocation14 + $0x338] ss:$24 sps:$4 sm:$0xff]  }
 0x5cb   :  { %v6993_v41 = vpop.f32.mrf.mxu1 }
 0x5cc   :  { %v6994_v23 = vadd.f32 %v6993_v41, %v6951_v6  ;;  %9618 = vmatpush2.bf16.msra.mxu0 %v14074_v2  ;;  %v7050_v24 = vadd.f32 %v7034_v8, %v6992_v42  ;;  %v7065_v22 = vmax.f32 %v7049_v19, 0.0  ;;  %v14113_v2 = vld [vmem:[#allocation14 + $0x398] ss:$24 sps:$4 sm:$0xff]   ;;  %v14122_v6 = vld [vmem:[#allocation14 + $0x668] ss:$24 sps:$4 sm:$0xff]  }
 0x5cd   :  { %v6995_v13 = vpop.f32.mrf.mxu1  ;;  %9619 = vmatprep.subr.bf16.mxu0 %v14082_v5  ;;  %v14119_v5 = vld [vmem:[#allocation14 + $0x368] ss:$24 sps:$4 sm:$0xff]   ;;  %v14127_v42 = vld [vmem:[#allocation14 + $0x33c] ss:$24 sps:$4 sm:$0xff]   ;;  %v14133_v41 = vld [vmem:[#allocation14 + $0x30c] ss:$24 sps:$4 sm:$0xff]  }
 0x5ce   :  { %v7057_v1 = vadd.f32 %v7030_v54, %v6994_v23  ;;  %v6996_v17 = vadd.f32 %v6995_v13, %v6953_v43  ;;  %v7066_v35 = vmax.f32 %v7050_v24, 0.0  ;;  %v14128_v54 = vld [vmem:[#allocation14 + $0x638] ss:$24 sps:$4 sm:$0xff]   ;;  %v14136_v43 = vld [vmem:[#allocation14 + $0x60c] ss:$24 sps:$4 sm:$0xff]  }
 0x5cf   :  { %v14131_v23 = vld [vmem:[#allocation14 + $0x308] ss:$24 sps:$4 sm:$0xff]   ;;  %v14139_v13 = vld [vmem:[#allocation14 + $0x5dc] ss:$24 sps:$4 sm:$0xff]   ;;  %v14137_v24 = vld [vmem:[#allocation14 + $0x5d8] ss:$24 sps:$4 sm:$0xff]  }
 0x5d0   :  { %v7058_v63 = vadd.f32 %v7034_v8, %v6996_v17  ;;  %9620 = vmatpush2.bf16.msra.mxu0 %v14080_v30  ;;  %v7073_v45 = vmax.f32 %v7057_v1, 0.0  ;;  %v14130_v8 = vld [vmem:[#allocation14 + $0x63c] ss:$24 sps:$4 sm:$0xff]   ;;  %v14134_v30 = vld [vmem:[#allocation14 + $0x608] ss:$24 sps:$4 sm:$0xff]  }
 0x5d1   :  { %9621 = vmatprep.subr.bf16.mxu0 %v14088_v10  ;;  %v14142_v10 = vld [vmem:[#allocation14 + $0x8dc] ss:$24 sps:$4 sm:$0xff]   ;;  %v14140_v1 = vld [vmem:[#allocation14 + $0x8d8] ss:$24 sps:$4 sm:$0xff]   ;;  %v14145_v17 = vld [vmem:[#allocation14 + $0x5ac] ss:$24 sps:$4 sm:$0xff]  }
 0x5d2   :  { %v7074_v12 = vmax.f32 %v7058_v63, 0.0  ;;  %v15519_v50 = vpack.c.bf16 %v7073_v45, %v7065_v22  ;;  %v14148_v19 = vld [vmem:[#allocation14 + $0x8ac] ss:$24 sps:$4 sm:$0xff]   ;;  %v14143_v63 = vld [vmem:[#allocation14 + $0x5a8] ss:$24 sps:$4 sm:$0xff]  }
 0x5d3   :  { %v14151_v45 = vld [vmem:[#allocation14 + $0x57c] ss:$24 sps:$4 sm:$0xff]   ;;  %v14157_v22 = vld [vmem:[#allocation14 + $0x54c] ss:$24 sps:$4 sm:$0xff]  }
 0x5d4   :  { %9622 = vmatpush2.bf16.msra.mxu0 %v14086_v49  ;;  %v15517_v26 = vpack.c.bf16 %v7074_v12, %v7066_v35  ;;  %v14146_v49 = vld [vmem:[#allocation14 + $0x8a8] ss:$24 sps:$4 sm:$0xff]   ;;  %v14149_v35 = vld [vmem:[#allocation14 + $0x578] ss:$24 sps:$4 sm:$0xff]  }
 0x5d5   :  { %9677 = vmatprep.subr.bf16.mxu0 %v14094_v48  ;;  %v14154_v48 = vld [vmem:[#allocation14 + $0x87c] ss:$24 sps:$4 sm:$0xff]   ;;  %v14152_v12 = vld [vmem:[#allocation14 + $0x878] ss:$24 sps:$4 sm:$0xff]  }
 0x5d6   :  { %9580 = vmatprep.mubr.bf16.mxu1 %v15517_v26 }
 0x5d7   :  { %9624 = vmatmul.mubr.bf16.vlgmr.msra.gmra.mxu0 %v15476_v20  ;;  %9581 = vmatmul.mubr.bf16.vlgmr.msra.gmra.mxu1 %v15519_v50  ;;  %v15526_v37 = vpop.f32.mrf.mxu0 }
 0x5d8   :  { %9635 = vmatpush1.bf16.msra.mxu1 %v14089_v28  ;;  %9678 = vmatpush1.bf16.msra.mxu0 %v14092_v56  ;;  %v14160_v28 = vld [vmem:[#allocation14 + $0x84c] ss:$24 sps:$4 sm:$0xff]   ;;  %v14155_v56 = vld [vmem:[#allocation14 + $0x548] ss:$24 sps:$4 sm:$0xff]  }
 0x5d9   :  { %9709 = vmatprep.mubr.bf16.mxu0 %v15502_v9  ;;  %9666 = vmatprep.mubr.bf16.mxu1 %v15488_v14  ;;  %v15530_v38 = vpop.f32.mrf.mxu0 }
 0x5da   :  { %9636 = vmatprep.subr.bf16.mxu1 %v14097_v31  ;;  %9679 = vmatprep.subr.bf16.mxu0 %v14100_v33  ;;  %v14158_v31 = vld [vmem:[#allocation14 + $0x848] ss:$24 sps:$4 sm:$0xff]   ;;  %v14163_v33 = vld [vmem:[#allocation14 + $0x51c] ss:$24 sps:$4 sm:$0xff]  }
 0x5db   :  { %v9457_v39 = vpop.f32.mrf.mxu0 }
 0x5dc   :  { %9637 = vmatpush1.bf16.msra.mxu1 %v14095_v52  ;;  %9680 = vmatpush1.bf16.msra.mxu0 %v14098_v61  ;;  %v15537_v47 = vadd.f32 %v9457_v39, %v15534_v46  ;;  %v14166_v52 = vld [vmem:[#allocation14 + $0x81c] ss:$24 sps:$4 sm:$0xff]   ;;  %v14161_v61 = vld [vmem:[#allocation14 + $0x518] ss:$24 sps:$4 sm:$0xff]   ;;  %v14172_v39 = vld [vmem:[#allocation14 + $0x7ec] ss:$24 sps:$4 sm:$0xff]  }
 0x5dd   :  { %9638 = vmatprep.subr.bf16.mxu1 %v14103_v40  ;;  %9681 = vmatprep.subr.bf16.mxu0 %v14106_v55  ;;  %v14164_v40 = vld [vmem:[#allocation14 + $0x818] ss:$24 sps:$4 sm:$0xff]   ;;  %v14169_v55 = vld [vmem:[#allocation14 + $0x4ec] ss:$24 sps:$4 sm:$0xff]  }
 0x5e0   :  { %9639 = vmatpush1.bf16.msra.mxu1 %v14101_v11  ;;  %9682 = vmatpush1.bf16.msra.mxu0 %v14104_v57  ;;  %v14167_v11 = vld [vmem:[#allocation14 + $0x4e8] ss:$24 sps:$4 sm:$0xff]  }
 0x5e1   :  { %9640 = vmatprep.subr.bf16.mxu1 %v14109_v51  ;;  %9683 = vmatprep.subr.bf16.mxu0 %v14112_v59  ;;  %v14170_v57 = vld [vmem:[#allocation14 + $0x7e8] ss:$24 sps:$4 sm:$0xff]   ;;  %v14175_v51 = vld [vmem:[#allocation14 + $0x4bc] ss:$24 sps:$4 sm:$0xff]  }
 0x5e2   :  { %v14178_v59 = vld [vmem:[#allocation14 + $0x7bc] ss:$24 sps:$4 sm:$0xff]  }
 0x5e4   :  { %9641 = vmatpush1.bf16.msra.mxu1 %v14107_v60  ;;  %9684 = vmatpush1.bf16.msra.mxu0 %v14110_v0  ;;  %v14173_v60 = vld [vmem:[#allocation14 + $0x4b8] ss:$24 sps:$4 sm:$0xff]  }
 0x5e5   :  { %9642 = vmatprep.subr.bf16.mxu1 %v14115_v62  ;;  %9685 = vmatprep.subr.bf16.mxu0 %v14118_v7  ;;  %v14176_v0 = vld [vmem:[#allocation14 + $0x7b8] ss:$24 sps:$4 sm:$0xff]   ;;  %v14181_v62 = vld [vmem:[#allocation14 + $0x48c] ss:$24 sps:$4 sm:$0xff]  }
 0x5e6   :  { %v14184_v7 = vld [vmem:[#allocation14 + $0x78c] ss:$24 sps:$4 sm:$0xff]  }
 0x5e8   :  { %9643 = vmatpush1.bf16.msra.mxu1 %v14113_v2  ;;  %9686 = vmatpush1.bf16.msra.mxu0 %v14116_v3  ;;  %v14179_v2 = vld [vmem:[#allocation14 + $0x488] ss:$24 sps:$4 sm:$0xff]  }
 0x5e9   :  { %9644 = vmatprep.subr.bf16.mxu1 %v14121_v53  ;;  %9687 = vmatprep.subr.bf16.mxu0 %v14124_v4  ;;  %v14182_v3 = vld [vmem:[#allocation14 + $0x788] ss:$24 sps:$4 sm:$0xff]   ;;  %v14187_v53 = vld [vmem:[#allocation14 + $0xa5c] ss:$24 sps:$4 sm:$0xff]  }
 0x5ea   :  { %v14190_v4 = vld [vmem:[#allocation14 + $0x164] ss:$24 sps:$4 sm:$0xff]  }
 0x5ec   :  { %9645 = vmatpush1.bf16.msra.mxu1 %v14119_v5  ;;  %9688 = vmatpush1.bf16.msra.mxu0 %v14122_v6  ;;  %v14185_v5 = vld [vmem:[#allocation14 + $0xa58] ss:$24 sps:$4 sm:$0xff]  }
 0x5ed   :  { %9646 = vmatprep.subr.bf16.mxu1 %v14127_v42  ;;  %9689 = vmatprep.subr.bf16.mxu0 %v14130_v8  ;;  %v14188_v6 = vld [vmem:[#allocation14 + $0x160] ss:$24 sps:$4 sm:$0xff]   ;;  %v14193_v42 = vld [vmem:[#allocation14 + $0xa2c] ss:$24 sps:$4 sm:$0xff]  }
 0x5ee   :  { %v14196_v8 = vld [vmem:[#allocation14 + $0x134] ss:$24 sps:$4 sm:$0xff]  }
 0x5f0   :  { %9647 = vmatpush1.bf16.msra.mxu1 %v14125_v32  ;;  %9690 = vmatpush1.bf16.msra.mxu0 %v14128_v54  ;;  %v14191_v54 = vld [vmem:[#allocation14 + $0xa28] ss:$24 sps:$4 sm:$0xff]  }
 0x5f1   :  { %9648 = vmatprep.subr.bf16.mxu1 %v14133_v41  ;;  %9691 = vmatprep.subr.bf16.mxu0 %v14136_v43  ;;  %v14194_v43 = vld [vmem:[#allocation14 + $0x130] ss:$24 sps:$4 sm:$0xff]  }
 0x5f4   :  { %9649 = vmatpush1.bf16.msra.mxu1 %v14131_v23  ;;  %9692 = vmatpush1.bf16.msra.mxu0 %v14134_v30  ;;  %v14199_v23 = vld [vmem:[#allocation14 + $0x9fc] ss:$24 sps:$4 sm:$0xff]  }
 0x5f5   :  { %9650 = vmatprep.subr.bf16.mxu1 %v14139_v13  ;;  %9693 = vmatprep.subr.bf16.mxu0 %v14142_v10  ;;  %v14202_v30 = vld [vmem:[#allocation14 + $0x104] ss:$24 sps:$4 sm:$0xff]  }
 0x5f8   :  { %9651 = vmatpush2.bf16.msra.mxu1 %v14137_v24  ;;  %9694 = vmatpush2.bf16.msra.mxu0 %v14140_v1  ;;  %v14197_v24 = vld [vmem:[#allocation14 + $0x9f8] ss:$24 sps:$4 sm:$0xff]  }
 0x5f9   :  { %9652 = vmatprep.subr.bf16.mxu1 %v14145_v17  ;;  %9695 = vmatprep.subr.bf16.mxu0 %v14148_v19  ;;  %v14200_v1 = vld [vmem:[#allocation14 + $0x100] ss:$24 sps:$4 sm:$0xff]   ;;  %v14205_v17 = vld [vmem:[#allocation14 + $0x9cc] ss:$24 sps:$4 sm:$0xff]  }
 0x5fa   :  { %v14208_v19 = vld [vmem:[#allocation14 + $0xd4] ss:$24 sps:$4 sm:$0xff]  }
 0x5fc   :  { %9653 = vmatpush2.bf16.msra.mxu1 %v14143_v63  ;;  %9696 = vmatpush2.bf16.msra.mxu0 %v14146_v49  ;;  %v14206_v63 = vld [vmem:[#allocation14 + $0xd0] ss:$24 sps:$4 sm:$0xff]   ;;  %v14211_v49 = vld [vmem:[#allocation14 + $0x99c] ss:$24 sps:$4 sm:$0xff]  }
 0x5fd   :  { %9654 = vmatprep.subr.bf16.mxu1 %v14151_v45  ;;  %9697 = vmatprep.subr.bf16.mxu0 %v14154_v48  ;;  %v14214_v45 = vld [vmem:[#allocation14 + $0xa4] ss:$24 sps:$4 sm:$0xff]   ;;  %v14209_v48 = vld [vmem:[#allocation14 + $0x998] ss:$24 sps:$4 sm:$0xff]  }
 0x600   :  { %9655 = vmatpush2.bf16.msra.mxu1 %v14149_v35  ;;  %9698 = vmatpush2.bf16.msra.mxu0 %v14152_v12  ;;  %v14217_v35 = vld [vmem:[#allocation14 + $0x96c] ss:$24 sps:$4 sm:$0xff]  }
 0x601   :  { %9656 = vmatprep.subr.bf16.mxu1 %v14157_v22  ;;  %9699 = vmatprep.subr.bf16.mxu0 %v14160_v28  ;;  %v14220_v12 = vld [vmem:[#allocation14 + $0x74] ss:$24 sps:$4 sm:$0xff]   ;;  %v14215_v22 = vld [vmem:[#allocation14 + $0x968] ss:$24 sps:$4 sm:$0xff]  }
 0x602   :  { %v14218_v28 = vld [vmem:[#allocation14 + $0x70] ss:$24 sps:$4 sm:$0xff]  }
 0x604   :  { %9657 = vmatpush2.bf16.msra.mxu1 %v14155_v56  ;;  %9700 = vmatpush2.bf16.msra.mxu0 %v14158_v31  ;;  %v14223_v56 = vld [vmem:[#allocation14 + $0x93c] ss:$24 sps:$4 sm:$0xff]  }
 0x605   :  { %9658 = vmatprep.subr.bf16.mxu1 %v14163_v33  ;;  %9701 = vmatprep.subr.bf16.mxu0 %v14166_v52  ;;  %v14226_v31 = vld [vmem:[#allocation14 + $0x44] ss:$24 sps:$4 sm:$0xff]   ;;  %v14221_v33 = vld [vmem:[#allocation14 + $0x938] ss:$24 sps:$4 sm:$0xff]  }
 0x606   :  { %v14224_v52 = vld [vmem:[#allocation14 + $0x40] ss:$24 sps:$4 sm:$0xff]  }
 0x608   :  { %9659 = vmatpush2.bf16.msra.mxu1 %v14161_v61  ;;  %9702 = vmatpush2.bf16.msra.mxu0 %v14164_v40  ;;  %v14229_v61 = vld [vmem:[#allocation14 + $0x90c] ss:$24 sps:$4 sm:$0xff]  }
 0x609   :  { %9660 = vmatprep.subr.bf16.mxu1 %v14169_v55  ;;  %9703 = vmatprep.subr.bf16.mxu0 %v14172_v39  ;;  %v14232_v40 = vld [vmem:[#allocation14 + $0x14] ss:$24 sps:$4 sm:$0xff]   ;;  %v14227_v55 = vld [vmem:[#allocation14 + $0x908] ss:$24 sps:$4 sm:$0xff]  }
 0x60a   :  { %v14230_v39 = vld [vmem:[#allocation14 + $0x10] ss:$24 sps:$4 sm:$0xff]  }
 0x60c   :  { %9661 = vmatpush2.bf16.msra.mxu1 %v14167_v11  ;;  %9704 = vmatpush2.bf16.msra.mxu0 %v14170_v57  ;;  %v14235_v11 = vld [vmem:[#allocation14 + $0xbdc] ss:$24 sps:$4 sm:$0xff]  }
 0x60d   :  { %9662 = vmatprep.subr.bf16.mxu1 %v14175_v51  ;;  %9705 = vmatprep.subr.bf16.mxu0 %v14178_v59  ;;  %v14238_v57 = vld [vmem:[#allocation14 + $0x2e4] ss:$24 sps:$4 sm:$0xff]   ;;  %v14233_v51 = vld [vmem:[#allocation14 + $0xbd8] ss:$24 sps:$4 sm:$0xff]  }
 0x60e   :  { %v14236_v59 = vld [vmem:[#allocation14 + $0x2e0] ss:$24 sps:$4 sm:$0xff]  }
 0x610   :  { %9663 = vmatpush2.bf16.msra.mxu1 %v14173_v60  ;;  %9706 = vmatpush2.bf16.msra.mxu0 %v14176_v0  ;;  %v14241_v60 = vld [vmem:[#allocation14 + $0xbac] ss:$24 sps:$4 sm:$0xff]  }
 0x611   :  { %9664 = vmatprep.subr.bf16.mxu1 %v14181_v62  ;;  %9707 = vmatprep.subr.bf16.mxu0 %v14184_v7  ;;  %v14244_v0 = vld [vmem:[#allocation14 + $0x2b4] ss:$24 sps:$4 sm:$0xff]   ;;  %v14239_v62 = vld [vmem:[#allocation14 + $0xba8] ss:$24 sps:$4 sm:$0xff]  }
 0x612   :  { %v14242_v7 = vld [vmem:[#allocation14 + $0x2b0] ss:$24 sps:$4 sm:$0xff]  }
 0x614   :  { %9665 = vmatpush2.bf16.msra.mxu1 %v14179_v2  ;;  %9708 = vmatpush2.bf16.msra.mxu0 %v14182_v3  ;;  %v14247_v2 = vld [vmem:[#allocation14 + $0xb7c] ss:$24 sps:$4 sm:$0xff]  }
 0x615   :  { %9720 = vmatprep.subr.bf16.mxu1 %v14187_v53  ;;  %9763 = vmatprep.subr.bf16.mxu0 %v14190_v4  ;;  %v14250_v3 = vld [vmem:[#allocation14 + $0x284] ss:$24 sps:$4 sm:$0xff]   ;;  %v14245_v53 = vld [vmem:[#allocation14 + $0xb78] ss:$24 sps:$4 sm:$0xff]  }
 0x616   :  { %v14248_v4 = vld [vmem:[#allocation14 + $0x280] ss:$24 sps:$4 sm:$0xff]  }
 0x617   :  { %9667 = vmatmul.mubr.bf16.vlgmr.msra.gmra.mxu1 %v15490_v58  ;;  %9710 = vmatmul.mubr.bf16.vlgmr.msra.gmra.mxu0 %v15504_v18  ;;  %v15541_v32 = vpop.f32.mrf.mxu1 }
 0x618   :  { %9721 = vmatpush1.bf16.msra.mxu1 %v14185_v5  ;;  %9752 = vmatprep.mubr.bf16.mxu1 %v15517_v26  ;;  %v14253_v5 = vld [vmem:[#allocation14 + $0xb4c] ss:$24 sps:$4 sm:$0xff]  }
 0x619   :  { %9764 = vmatpush1.bf16.msra.mxu0 %v14188_v6  ;;  %9795 = vmatprep.mubr.bf16.mxu0 %v15474_v36  ;;  %v15545_v41 = vpop.f32.mrf.mxu1  ;;  %v14203_v36 = vld [vmem:[#allocation14 + $0x9c8] ss:$24 sps:$4 sm:$0xff]   ;;  %v14256_v6 = vld [vmem:[#allocation14 + $0x254] ss:$24 sps:$4 sm:$0xff]  }
 0x61a   :  { %9722 = vmatprep.subr.bf16.mxu1 %v14193_v42  ;;  %9765 = vmatprep.subr.bf16.mxu0 %v14196_v8  ;;  %v14251_v42 = vld [vmem:[#allocation14 + $0xb48] ss:$24 sps:$4 sm:$0xff]  }
 0x61b   :  { %v9500_v13 = vpop.f32.mrf.mxu1  ;;  %v14254_v8 = vld [vmem:[#allocation14 + $0x250] ss:$24 sps:$4 sm:$0xff]  }
 0x61c   :  { %v15548_v10 = vadd.f32 %v9500_v13, %v15537_v47  ;;  %9723 = vmatpush1.bf16.msra.mxu1 %v14191_v54  ;;  %v14212_v47 = vld [vmem:[#allocation14 + $0xa0] ss:$24 sps:$4 sm:$0xff]   ;;  %v14259_v54 = vld [vmem:[#allocation14 + $0xb1c] ss:$24 sps:$4 sm:$0xff]   ;;  %v14265_v13 = vld [vmem:[#allocation14 + $0xaec] ss:$24 sps:$4 sm:$0xff]  }
 0x61d   :  { %9766 = vmatpush1.bf16.msra.mxu0 %v14194_v43  ;;  %9724 = vmatprep.subr.bf16.mxu1 %v14199_v23  ;;  %v14262_v43 = vld [vmem:[#allocation14 + $0x224] ss:$24 sps:$4 sm:$0xff]   ;;  %v14257_v23 = vld [vmem:[#allocation14 + $0xb18] ss:$24 sps:$4 sm:$0xff]  }
 0x61e   :  { %9767 = vmatprep.subr.bf16.mxu0 %v14202_v30  ;;  %v14260_v30 = vld [vmem:[#allocation14 + $0x220] ss:$24 sps:$4 sm:$0xff]  }
 0x620   :  { %9725 = vmatpush1.bf16.msra.mxu1 %v14197_v24  ;;  %v14268_v24 = vld [vmem:[#allocation14 + $0x1f4] ss:$24 sps:$4 sm:$0xff]  }
 0x621   :  { %9768 = vmatpush1.bf16.msra.mxu0 %v14200_v1  ;;  %9726 = vmatprep.subr.bf16.mxu1 %v14205_v17  ;;  %v14263_v1 = vld [vmem:[#allocation14 + $0xae8] ss:$24 sps:$4 sm:$0xff]  }
 0x622   :  { %9769 = vmatprep.subr.bf16.mxu0 %v14208_v19  ;;  %v14266_v17 = vld [vmem:[#allocation14 + $0x1f0] ss:$24 sps:$4 sm:$0xff]   ;;  %v14271_v19 = vld [vmem:[#allocation14 + $0xabc] ss:$24 sps:$4 sm:$0xff]  }
 0x624   :  { %9727 = vmatpush1.bf16.msra.mxu1 %v14203_v36  ;;  %v14274_v36 = vld [vmem:[#allocation14 + $0x1c4] ss:$24 sps:$4 sm:$0xff]  }
 0x625   :  { %9770 = vmatpush1.bf16.msra.mxu0 %v14206_v63  ;;  %9728 = vmatprep.subr.bf16.mxu1 %v14211_v49  ;;  %v14269_v63 = vld [vmem:[#allocation14 + $0xab8] ss:$24 sps:$4 sm:$0xff]  }
 0x626   :  { %9771 = vmatprep.subr.bf16.mxu0 %v14214_v45  ;;  %v14272_v49 = vld [vmem:[#allocation14 + $0x1c0] ss:$24 sps:$4 sm:$0xff]   ;;  %v14277_v45 = vld [vmem:[#allocation14 + $0xa8c] ss:$24 sps:$4 sm:$0xff]  }
 0x628   :  { %9729 = vmatpush1.bf16.msra.mxu1 %v14209_v48  ;;  %v14280_v48 = vld [vmem:[#allocation14 + $0x194] ss:$24 sps:$4 sm:$0xff]  }
 0x629   :  { %9772 = vmatpush1.bf16.msra.mxu0 %v14212_v47  ;;  %9730 = vmatprep.subr.bf16.mxu1 %v14217_v35  ;;  %v14275_v47 = vld [vmem:[#allocation14 + $0xa88] ss:$24 sps:$4 sm:$0xff]  }
 0x62a   :  { %9773 = vmatprep.subr.bf16.mxu0 %v14220_v12  ;;  %v14278_v35 = vld [vmem:[#allocation14 + $0x190] ss:$24 sps:$4 sm:$0xff]   ;;  %v14283_v12 = vld [vmem:[#allocation14 + $0x464] ss:$24 sps:$4 sm:$0xff]  }
 0x62c   :  { %9731 = vmatpush1.bf16.msra.mxu1 %v14215_v22  ;;  %v14286_v22 = vld [vmem:[#allocation14 + $0x764] ss:$24 sps:$4 sm:$0xff]  }
 0x62d   :  { %9774 = vmatpush1.bf16.msra.mxu0 %v14218_v28  ;;  %9732 = vmatprep.subr.bf16.mxu1 %v14223_v56  ;;  %v14281_v28 = vld [vmem:[#allocation14 + $0x460] ss:$24 sps:$4 sm:$0xff]   ;;  %v9459_v56 = vpop.f32.mrf.mxu0 }
 0x62e   :  { %9775 = vmatprep.subr.bf16.mxu0 %v14226_v31  ;;  %v14284_v31 = vld [vmem:[#allocation14 + $0x760] ss:$24 sps:$4 sm:$0xff]  }
 0x630   :  { %9733 = vmatpush1.bf16.msra.mxu1 %v14221_v33  ;;  %v14289_v33 = vld [vmem:[#allocation14 + $0x434] ss:$24 sps:$4 sm:$0xff]  }
 0x631   :  { %9776 = vmatpush1.bf16.msra.mxu0 %v14224_v52  ;;  %9734 = vmatprep.subr.bf16.mxu1 %v14229_v61  ;;  %v14292_v61 = vld [vmem:[#allocation14 + $0x734] ss:$24 sps:$4 sm:$0xff]  }
 0x632   :  { %9777 = vmatprep.subr.bf16.mxu0 %v14232_v40  ;;  %v15555_v40 = vrot.slane %v15524_v34, %v15309_v44 }
 0x634   :  { %9735 = vmatpush1.bf16.msra.mxu1 %v14227_v55  ;;  %v14287_v55 = vld [vmem:[#allocation14 + $0x430] ss:$24 sps:$4 sm:$0xff]  }
 0x635   :  { %9778 = vmatpush1.bf16.msra.mxu0 %v14230_v39  ;;  %9736 = vmatprep.subr.bf16.mxu1 %v14235_v11  ;;  %v9502_v39 = vpop.f32.mrf.mxu1 }
 0x636   :  { %9779 = vmatprep.subr.bf16.mxu0 %v14238_v57  ;;  %v14290_v57 = vld [vmem:[#allocation14 + $0x730] ss:$24 sps:$4 sm:$0xff]  }
 0x638   :  { %9737 = vmatpush2.bf16.msra.mxu1 %v14233_v51  ;;  %v14295_v51 = vld [vmem:[#allocation14 + $0x404] ss:$24 sps:$4 sm:$0xff]  }
 0x639   :  { %9780 = vmatpush2.bf16.msra.mxu0 %v14236_v59  ;;  %9738 = vmatprep.subr.bf16.mxu1 %v14241_v60  ;;  %v9460_v59 = vadd.f32 %v9459_v56, %v15555_v40  ;;  %v14298_v60 = vld [vmem:[#allocation14 + $0x704] ss:$24 sps:$4 sm:$0xff]   ;;  %v14338_v56 = vld [vmem:[#allocation14 + $0x8b0] ss:$24 sps:$4 sm:$0xff]  }
 0x63a   :  { %9781 = vmatprep.subr.bf16.mxu0 %v14244_v0 }
 0x63c   :  { %9739 = vmatpush2.bf16.msra.mxu1 %v14239_v62  ;;  %v9503_v62 = vadd.f32 %v9502_v39, %v9460_v59  ;;  %v14349_v39 = vld [vmem:[#allocation14 + $0x554] ss:$24 sps:$4 sm:$0xff]   ;;  %v14350_v59 = vld [vmem:[#allocation14 + $0x850] ss:$24 sps:$4 sm:$0xff]  }
 0x63d   :  { %9782 = vmatpush2.bf16.msra.mxu0 %v14242_v7  ;;  %9740 = vmatprep.subr.bf16.mxu1 %v14247_v2  ;;  %v14293_v7 = vld [vmem:[#allocation14 + $0x400] ss:$24 sps:$4 sm:$0xff]  }
 0x63e   :  { %9783 = vmatprep.subr.bf16.mxu0 %v14250_v3  ;;  %v14296_v2 = vld [vmem:[#allocation14 + $0x700] ss:$24 sps:$4 sm:$0xff]   ;;  %v14301_v3 = vld [vmem:[#allocation14 + $0x3d4] ss:$24 sps:$4 sm:$0xff]  }
 0x640   :  { %9741 = vmatpush2.bf16.msra.mxu1 %v14245_v53 }
 0x641   :  { %9784 = vmatpush2.bf16.msra.mxu0 %v14248_v4  ;;  %9742 = vmatprep.subr.bf16.mxu1 %v14253_v5  ;;  %v14304_v4 = vld [vmem:[#allocation14 + $0x6d4] ss:$24 sps:$4 sm:$0xff]   ;;  %v14302_v5 = vld [vmem:[#allocation14 + $0x6d0] ss:$24 sps:$4 sm:$0xff]  }
 0x642   :  { %9785 = vmatprep.subr.bf16.mxu0 %v14256_v6  ;;  %v14307_v6 = vld [vmem:[#allocation14 + $0x3a4] ss:$24 sps:$4 sm:$0xff]  }
 0x644   :  { %9743 = vmatpush2.bf16.msra.mxu1 %v14251_v42  ;;  %v14305_v42 = vld [vmem:[#allocation14 + $0x3a0] ss:$24 sps:$4 sm:$0xff]  }
 0x645   :  { %9786 = vmatpush2.bf16.msra.mxu0 %v14254_v8  ;;  %9744 = vmatprep.subr.bf16.mxu1 %v14259_v54  ;;  %v14308_v8 = vld [vmem:[#allocation14 + $0x6a0] ss:$24 sps:$4 sm:$0xff]   ;;  %v14313_v54 = vld [vmem:[#allocation14 + $0x374] ss:$24 sps:$4 sm:$0xff]  }
 0x646   :  { %9787 = vmatprep.subr.bf16.mxu0 %v14262_v43  ;;  %v14316_v43 = vld [vmem:[#allocation14 + $0x674] ss:$24 sps:$4 sm:$0xff]  }
 0x648   :  { %9745 = vmatpush2.bf16.msra.mxu1 %v14257_v23  ;;  %v14311_v23 = vld [vmem:[#allocation14 + $0x370] ss:$24 sps:$4 sm:$0xff]  }
 0x649   :  { %9788 = vmatpush2.bf16.msra.mxu0 %v14260_v30  ;;  %9746 = vmatprep.subr.bf16.mxu1 %v14265_v13  ;;  %v14314_v30 = vld [vmem:[#allocation14 + $0x670] ss:$24 sps:$4 sm:$0xff]   ;;  %v14319_v13 = vld [vmem:[#allocation14 + $0x344] ss:$24 sps:$4 sm:$0xff]  }
 0x64a   :  { %9789 = vmatprep.subr.bf16.mxu0 %v14268_v24  ;;  %v14322_v24 = vld [vmem:[#allocation14 + $0x644] ss:$24 sps:$4 sm:$0xff]  }
 0x64c   :  { %9747 = vmatpush2.bf16.msra.mxu1 %v14263_v1  ;;  %v14317_v1 = vld [vmem:[#allocation14 + $0x340] ss:$24 sps:$4 sm:$0xff]  }
 0x64d   :  { %9790 = vmatpush2.bf16.msra.mxu0 %v14266_v17  ;;  %9748 = vmatprep.subr.bf16.mxu1 %v14271_v19  ;;  %v14320_v17 = vld [vmem:[#allocation14 + $0x640] ss:$24 sps:$4 sm:$0xff]   ;;  %v14325_v19 = vld [vmem:[#allocation14 + $0x314] ss:$24 sps:$4 sm:$0xff]  }
 0x64e   :  { %9791 = vmatprep.subr.bf16.mxu0 %v14274_v36  ;;  %v14328_v36 = vld [vmem:[#allocation14 + $0x614] ss:$24 sps:$4 sm:$0xff]  }
 0x650   :  { %9749 = vmatpush2.bf16.msra.mxu1 %v14269_v63  ;;  %v14323_v63 = vld [vmem:[#allocation14 + $0x310] ss:$24 sps:$4 sm:$0xff]  }
 0x651   :  { %9792 = vmatpush2.bf16.msra.mxu0 %v14272_v49  ;;  %9750 = vmatprep.subr.bf16.mxu1 %v14277_v45  ;;  %v14326_v49 = vld [vmem:[#allocation14 + $0x610] ss:$24 sps:$4 sm:$0xff]   ;;  %v14331_v45 = vld [vmem:[#allocation14 + $0x5e4] ss:$24 sps:$4 sm:$0xff]  }
 0x652   :  { %9793 = vmatprep.subr.bf16.mxu0 %v14280_v48  ;;  %v14334_v48 = vld [vmem:[#allocation14 + $0x8e4] ss:$24 sps:$4 sm:$0xff]  }
 0x654   :  { %9751 = vmatpush2.bf16.msra.mxu1 %v14275_v47  ;;  %v14329_v47 = vld [vmem:[#allocation14 + $0x5e0] ss:$24 sps:$4 sm:$0xff]  }
 0x655   :  { %9794 = vmatpush2.bf16.msra.mxu0 %v14278_v35  ;;  %9806 = vmatprep.subr.bf16.mxu1 %v14283_v12  ;;  %v14332_v35 = vld [vmem:[#allocation14 + $0x8e0] ss:$24 sps:$4 sm:$0xff]   ;;  %v14337_v12 = vld [vmem:[#allocation14 + $0x5b4] ss:$24 sps:$4 sm:$0xff]  }
 0x656   :  { %9849 = vmatprep.subr.bf16.mxu0 %v14286_v22  ;;  %v14340_v22 = vld [vmem:[#allocation14 + $0x8b4] ss:$24 sps:$4 sm:$0xff]  }
 0x657   :  { %9753 = vmatmul.mubr.bf16.vlgmr.msra.gmra.mxu1 %v15519_v50  ;;  %v15551_v52 = vpop.f32.mrf.mxu0 }
 0x658   :  { %9796 = vmatmul.mubr.bf16.vlgmr.msra.gmra.mxu0 %v15476_v20  ;;  %9807 = vmatpush1.bf16.msra.mxu1 %v14281_v28  ;;  %v14335_v28 = vld [vmem:[#allocation14 + $0x5b0] ss:$24 sps:$4 sm:$0xff]  }
 0x659   :  { %9838 = vmatprep.mubr.bf16.mxu1 %v15488_v14  ;;  %9850 = vmatpush1.bf16.msra.mxu0 %v14284_v31  ;;  %v15559_v11 = vpop.f32.mrf.mxu0  ;;  %v14343_v31 = vld [vmem:[#allocation14 + $0x584] ss:$24 sps:$4 sm:$0xff]  }
 0x65a   :  { %9881 = vmatprep.mubr.bf16.mxu0 %v15502_v9  ;;  %9808 = vmatprep.subr.bf16.mxu1 %v14289_v33  ;;  %v14299_v9 = vld [vmem:[#allocation14 + $0x3d0] ss:$24 sps:$4 sm:$0xff]   ;;  %v14346_v33 = vld [vmem:[#allocation14 + $0x884] ss:$24 sps:$4 sm:$0xff]  }
 0x65b   :  { %9851 = vmatprep.subr.bf16.mxu0 %v14292_v61  ;;  %v9543_v0 = vpop.f32.mrf.mxu0  ;;  %v14341_v61 = vld [vmem:[#allocation14 + $0x580] ss:$24 sps:$4 sm:$0xff]  }
 0x65c   :  { %v15564_v20 = vadd.f32 %v9543_v0, %v15548_v10  ;;  %9809 = vmatpush1.bf16.msra.mxu1 %v14287_v55  ;;  %v14310_v10 = vld [vmem:[#allocation14 + $0x6a4] ss:$24 sps:$4 sm:$0xff]   ;;  %v14344_v55 = vld [vmem:[#allocation14 + $0x880] ss:$24 sps:$4 sm:$0xff]  }
 0x65d   :  { %9852 = vmatpush1.bf16.msra.mxu0 %v14290_v57  ;;  %v9545_v14 = vpop.f32.mrf.mxu0  ;;  %9810 = vmatprep.subr.bf16.mxu1 %v14295_v51  ;;  %v14352_v57 = vld [vmem:[#allocation14 + $0x854] ss:$24 sps:$4 sm:$0xff]   ;;  %v14347_v51 = vld [vmem:[#allocation14 + $0x550] ss:$24 sps:$4 sm:$0xff]   ;;  %v14358_v0 = vld [vmem:[#allocation14 + $0x824] ss:$24 sps:$4 sm:$0xff]  }
 0x65e   :  { %v15566_v53 = vadd.f32 %v9545_v14, %v9503_v62  ;;  %9853 = vmatprep.subr.bf16.mxu0 %v14298_v60  ;;  %v14355_v60 = vld [vmem:[#allocation14 + $0x524] ss:$24 sps:$4 sm:$0xff]   ;;  %v14353_v62 = vld [vmem:[#allocation14 + $0x520] ss:$24 sps:$4 sm:$0xff]   ;;  %v14361_v14 = vld [vmem:[#allocation14 + $0x4f4] ss:$24 sps:$4 sm:$0xff]  }
 0x660   :  { %9811 = vmatpush1.bf16.msra.mxu1 %v14293_v7  ;;  %v14356_v7 = vld [vmem:[#allocation14 + $0x820] ss:$24 sps:$4 sm:$0xff]  }
 0x661   :  { %9854 = vmatpush1.bf16.msra.mxu0 %v14296_v2  ;;  %9812 = vmatprep.subr.bf16.mxu1 %v14301_v3  ;;  %v14364_v2 = vld [vmem:[#allocation14 + $0x7f4] ss:$24 sps:$4 sm:$0xff]   ;;  %v14359_v3 = vld [vmem:[#allocation14 + $0x4f0] ss:$24 sps:$4 sm:$0xff]  }
 0x662   :  { %9855 = vmatprep.subr.bf16.mxu0 %v14304_v4  ;;  %v14362_v4 = vld [vmem:[#allocation14 + $0x7f0] ss:$24 sps:$4 sm:$0xff]  }
 0x664   :  { %9813 = vmatpush1.bf16.msra.mxu1 %v14299_v9  ;;  %v14367_v9 = vld [vmem:[#allocation14 + $0x4c4] ss:$24 sps:$4 sm:$0xff]  }
 0x665   :  { %9856 = vmatpush1.bf16.msra.mxu0 %v14302_v5  ;;  %9814 = vmatprep.subr.bf16.mxu1 %v14307_v6  ;;  %v14370_v5 = vld [vmem:[#allocation14 + $0x7c4] ss:$24 sps:$4 sm:$0xff]   ;;  %v14365_v6 = vld [vmem:[#allocation14 + $0x4c0] ss:$24 sps:$4 sm:$0xff]  }
 0x666   :  { %9857 = vmatprep.subr.bf16.mxu0 %v14310_v10  ;;  %v14368_v10 = vld [vmem:[#allocation14 + $0x7c0] ss:$24 sps:$4 sm:$0xff]  }
 0x668   :  { %9815 = vmatpush1.bf16.msra.mxu1 %v14305_v42  ;;  %v14373_v42 = vld [vmem:[#allocation14 + $0x494] ss:$24 sps:$4 sm:$0xff]  }
 0x669   :  { %9858 = vmatpush1.bf16.msra.mxu0 %v14308_v8  ;;  %9816 = vmatprep.subr.bf16.mxu1 %v14313_v54  ;;  %v14376_v8 = vld [vmem:[#allocation14 + $0x794] ss:$24 sps:$4 sm:$0xff]   ;;  %v14371_v54 = vld [vmem:[#allocation14 + $0x490] ss:$24 sps:$4 sm:$0xff]  }
 0x66a   :  { %9859 = vmatprep.subr.bf16.mxu0 %v14316_v43  ;;  %v14374_v43 = vld [vmem:[#allocation14 + $0x790] ss:$24 sps:$4 sm:$0xff]  }
 0x66c   :  { %9817 = vmatpush1.bf16.msra.mxu1 %v14311_v23  ;;  %v14379_v23 = vld [vmem:[#allocation14 + $0xa64] ss:$24 sps:$4 sm:$0xff]  }
 0x66d   :  { %9860 = vmatpush1.bf16.msra.mxu0 %v14314_v30  ;;  %9818 = vmatprep.subr.bf16.mxu1 %v14319_v13  ;;  %v14377_v30 = vld [vmem:[#allocation14 + $0xa60] ss:$24 sps:$4 sm:$0xff]   ;;  %v14382_v13 = vld [vmem:[#allocation14 + $0xa34] ss:$24 sps:$4 sm:$0xff]  }
 0x66e   :  { %9861 = vmatprep.subr.bf16.mxu0 %v14322_v24 }
 0x670   :  { %9819 = vmatpush1.bf16.msra.mxu1 %v14317_v1 }
 0x671   :  { %9862 = vmatpush1.bf16.msra.mxu0 %v14320_v17  ;;  %9820 = vmatprep.subr.bf16.mxu1 %v14325_v19  ;;  %v14380_v17 = vld [vmem:[#allocation14 + $0xa30] ss:$24 sps:$4 sm:$0xff]  }
 0x672   :  { %9863 = vmatprep.subr.bf16.mxu0 %v14328_v36 }
 0x674   :  { %9821 = vmatpush1.bf16.msra.mxu1 %v14323_v63  ;;  %v14385_v63 = vld [vmem:[#allocation14 + $0xa04] ss:$24 sps:$4 sm:$0xff]  }
 0x675   :  { %9864 = vmatpush1.bf16.msra.mxu0 %v14326_v49  ;;  %9822 = vmatprep.subr.bf16.mxu1 %v14331_v45  ;;  %v15581_v49 = vrot.slane %v15524_v34, %v15347_v16 }
 0x676   :  { %9865 = vmatprep.subr.bf16.mxu0 %v14334_v48  ;;  %v15585_v48 = vrot.slane %v15524_v34, %v15322_v29 }
 0x678   :  { %9823 = vmatpush2.bf16.msra.mxu1 %v14329_v47  ;;  %v14383_v47 = vld [vmem:[#allocation14 + $0xa00] ss:$24 sps:$4 sm:$0xff]  }
 0x679   :  { %9866 = vmatpush2.bf16.msra.mxu0 %v14332_v35  ;;  %9824 = vmatprep.subr.bf16.mxu1 %v14337_v12 }
 0x67a   :  { %9867 = vmatprep.subr.bf16.mxu0 %v14340_v22  ;;  %v14388_v22 = vld [vmem:[#allocation14 + $0x9d4] ss:$24 sps:$4 sm:$0xff]  }
 0x67c   :  { %9825 = vmatpush2.bf16.msra.mxu1 %v14335_v28 }
 0x67d   :  { %9868 = vmatpush2.bf16.msra.mxu0 %v14338_v56  ;;  %9826 = vmatprep.subr.bf16.mxu1 %v14343_v31  ;;  %v14386_v31 = vld [vmem:[#allocation14 + $0x9d0] ss:$24 sps:$4 sm:$0xff]  }
 0x67e   :  { %9869 = vmatprep.subr.bf16.mxu0 %v14346_v33  ;;  %v14391_v33 = vld [vmem:[#allocation14 + $0x9a4] ss:$24 sps:$4 sm:$0xff]  }
 0x680   :  { %9827 = vmatpush2.bf16.msra.mxu1 %v14341_v61  ;;  %v14389_v61 = vld [vmem:[#allocation14 + $0x9a0] ss:$24 sps:$4 sm:$0xff]  }
 0x681   :  { %9870 = vmatpush2.bf16.msra.mxu0 %v14344_v55  ;;  %9828 = vmatprep.subr.bf16.mxu1 %v14349_v39  ;;  %v14392_v55 = vld [vmem:[#allocation14 + $0x970] ss:$24 sps:$4 sm:$0xff]   ;;  %v14397_v39 = vld [vmem:[#allocation14 + $0x944] ss:$24 sps:$4 sm:$0xff]  }
 0x682   :  { %9871 = vmatprep.subr.bf16.mxu0 %v14352_v57  ;;  %v14395_v57 = vld [vmem:[#allocation14 + $0x940] ss:$24 sps:$4 sm:$0xff]  }
 0x684   :  { %9829 = vmatpush2.bf16.msra.mxu1 %v14347_v51  ;;  %v14400_v51 = vld [vmem:[#allocation14 + $0x914] ss:$24 sps:$4 sm:$0xff]  }
 0x685   :  { %9872 = vmatpush2.bf16.msra.mxu0 %v14350_v59  ;;  %9830 = vmatprep.subr.bf16.mxu1 %v14355_v60  ;;  %v14398_v59 = vld [vmem:[#allocation14 + $0x910] ss:$24 sps:$4 sm:$0xff]   ;;  %v14401_v60 = vld [vmem:[#allocation14 + $0xbe0] ss:$24 sps:$4 sm:$0xff]  }
 0x686   :  { %9873 = vmatprep.subr.bf16.mxu0 %v14358_v0  ;;  %v14406_v0 = vld [vmem:[#allocation14 + $0xbb4] ss:$24 sps:$4 sm:$0xff]  }
 0x688   :  { %9831 = vmatpush2.bf16.msra.mxu1 %v14353_v62  ;;  %v14404_v62 = vld [vmem:[#allocation14 + $0xbb0] ss:$24 sps:$4 sm:$0xff]  }
 0x689   :  { %9874 = vmatpush2.bf16.msra.mxu0 %v14356_v7  ;;  %9832 = vmatprep.subr.bf16.mxu1 %v14361_v14  ;;  %v14409_v7 = vld [vmem:[#allocation14 + $0xb84] ss:$24 sps:$4 sm:$0xff]   ;;  %v14407_v14 = vld [vmem:[#allocation14 + $0xb80] ss:$24 sps:$4 sm:$0xff]  }
 0x68a   :  { %9875 = vmatprep.subr.bf16.mxu0 %v14364_v2  ;;  %v14412_v2 = vld [vmem:[#allocation14 + $0xb54] ss:$24 sps:$4 sm:$0xff]  }
 0x68c   :  { %9833 = vmatpush2.bf16.msra.mxu1 %v14359_v3  ;;  %v14410_v3 = vld [vmem:[#allocation14 + $0xb50] ss:$24 sps:$4 sm:$0xff]  }
 0x68d   :  { %9876 = vmatpush2.bf16.msra.mxu0 %v14362_v4  ;;  %9834 = vmatprep.subr.bf16.mxu1 %v14367_v9  ;;  %v14415_v4 = vld [vmem:[#allocation14 + $0xb24] ss:$24 sps:$4 sm:$0xff]   ;;  %v14413_v9 = vld [vmem:[#allocation14 + $0xb20] ss:$24 sps:$4 sm:$0xff]  }
 0x68e   :  { %9877 = vmatprep.subr.bf16.mxu0 %v14370_v5  ;;  %v14418_v5 = vld [vmem:[#allocation14 + $0xaf4] ss:$24 sps:$4 sm:$0xff]  }
 0x690   :  { %9835 = vmatpush2.bf16.msra.mxu1 %v14365_v6  ;;  %v14416_v6 = vld [vmem:[#allocation14 + $0xaf0] ss:$24 sps:$4 sm:$0xff]  }
 0x691   :  { %9878 = vmatpush2.bf16.msra.mxu0 %v14368_v10  ;;  %9836 = vmatprep.subr.bf16.mxu1 %v14373_v42  ;;  %v14421_v10 = vld [vmem:[#allocation14 + $0xac4] ss:$24 sps:$4 sm:$0xff]   ;;  %v14419_v42 = vld [vmem:[#allocation14 + $0xac0] ss:$24 sps:$4 sm:$0xff]  }
 0x692   :  { %9879 = vmatprep.subr.bf16.mxu0 %v14376_v8  ;;  %v14424_v8 = vld [vmem:[#allocation14 + $0xa94] ss:$24 sps:$4 sm:$0xff]  }
 0x694   :  { %9837 = vmatpush2.bf16.msra.mxu1 %v14371_v54  ;;  %v14422_v54 = vld [vmem:[#allocation14 + $0xa90] ss:$24 sps:$4 sm:$0xff]  }
 0x695   :  { %9880 = vmatpush2.bf16.msra.mxu0 %v14374_v43  ;;  %9892 = vmatprep.subr.bf16.mxu1 %v14379_v23 }
 0x697   :  { %v15568_v24 = vpop.f32.mrf.mxu0  ;;  %9839 = vmatmul.mubr.bf16.vlgmr.msra.gmra.mxu1 %v15490_v58  ;;  %v15571_v1 = vpop.f32.mrf.mxu1 }
 0x698   :  { %9882 = vmatmul.mubr.bf16.vlgmr.msra.gmra.mxu0 %v15504_v18  ;;  %9893 = vmatpush1.bf16.msra.mxu1 %v14377_v30 }
 0x699   :  { %9924 = vmatprep.mubr.bf16.mxu1 %v15517_v26  ;;  %v15575_v19 = vpop.f32.mrf.mxu0  ;;  %v15577_v36 = vpop.f32.mrf.mxu1  ;;  %9894 = vmatprep.subr.bf16.mxu1 %v14382_v13 }
 0x69b   :  { %v9629_v45 = vpop.f32.mrf.mxu0  ;;  %v9586_v58 = vpop.f32.mrf.mxu1 }
 0x69c   :  { %v15588_v18 = vadd.f32 %v9629_v45, %v15581_v49  ;;  %v15591_v26 = vadd.f32 %v9586_v58, %v15564_v20  ;;  %9895 = vmatpush1.bf16.msra.mxu1 %v14380_v17  ;;  %v14394_v20 = vld [vmem:[#allocation14 + $0x974] ss:$24 sps:$4 sm:$0xff]  }
 0x69d   :  { %v9631_v35 = vpop.f32.mrf.mxu0  ;;  %v9588_v12 = vpop.f32.mrf.mxu1  ;;  %9896 = vmatprep.subr.bf16.mxu1 %v14385_v63 }
 0x69e   :  { %v15594_v28 = vadd.f32 %v9631_v35, %v15585_v48  ;;  %v15597_v56 = vadd.f32 %v9588_v12, %v15566_v53  ;;  %v14403_v53 = vld [vmem:[#allocation14 + $0xbe4] ss:$24 sps:$4 sm:$0xff]  }
 0x6a0   :  { %9897 = vmatpush1.bf16.msra.mxu1 %v14383_v47 }
 0x6a1   :  { %9898 = vmatprep.subr.bf16.mxu1 %v14388_v22 }
 0x6a4   :  { %9899 = vmatpush1.bf16.msra.mxu1 %v14386_v31 }
 0x6a5   :  { %9900 = vmatprep.subr.bf16.mxu1 %v14391_v33 }
 0x6a8   :  { %9901 = vmatpush1.bf16.msra.mxu1 %v14389_v61 }
 0x6a9   :  { %9902 = vmatprep.subr.bf16.mxu1 %v14394_v20  ;;  %v15620_v20 = vrot.slane %v15524_v34, %v15365_v25  ;;  %v14428_v25 = vld [vmem:[#allocation17 + $0x2e0] ss:$16 sps:$4 sm:$0xff]  }
 0x6ac   :  { %9903 = vmatpush1.bf16.msra.mxu1 %v14392_v55 }
 0x6ad   :  { %9904 = vmatprep.subr.bf16.mxu1 %v14397_v39 }
 0x6b0   :  { %9905 = vmatpush1.bf16.msra.mxu1 %v14395_v57 }
 0x6b1   :  { %9906 = vmatprep.subr.bf16.mxu1 %v14400_v51 }
 0x6b4   :  { %9907 = vmatpush1.bf16.msra.mxu1 %v14398_v59 }
 0x6b5   :  { %9908 = vmatprep.subr.bf16.mxu1 %v14403_v53 }
 0x6b8   :  { %9909 = vmatpush2.bf16.msra.mxu1 %v14401_v60 }
 0x6b9   :  { %9910 = vmatprep.subr.bf16.mxu1 %v14406_v0  ;;  %v14425_v0 = vld [vmem:[#allocation17 + $0xe0] ss:$16 sps:$4 sm:$0xff]  }
 0x6bc   :  { %9911 = vmatpush2.bf16.msra.mxu1 %v14404_v62  ;;  %v14427_v62 = vld [vmem:[#allocation17 + $0xe4] ss:$16 sps:$4 sm:$0xff]  }
 0x6bd   :  { %9912 = vmatprep.subr.bf16.mxu1 %v14409_v7  ;;  %v14430_v7 = vld [vmem:[#allocation17 + $0x2e4] ss:$16 sps:$4 sm:$0xff]   ;;  %11238 = vmatprep.subr.bf16.mxu0 %v14427_v62  ;;  %v9626_v62 = vadd.f32 %v15568_v24, %v15581_v49 }
 0x6be   :  { %11239 = vmatpush1.bf16.msra.mxu0 %v14425_v0 }
 0x6c0   :  { %9913 = vmatpush2.bf16.msra.mxu1 %v14407_v14  ;;  %v14433_v14 = vld [vmem:[#allocation17 + $0xc4] ss:$16 sps:$4 sm:$0xff]  }
 0x6c1   :  { %9914 = vmatprep.subr.bf16.mxu1 %v14412_v2  ;;  %v14436_v2 = vld [vmem:[#allocation17 + $0x2c4] ss:$16 sps:$4 sm:$0xff]   ;;  %11240 = vmatprep.subr.bf16.mxu0 %v14433_v14 }
 0x6c4   :  { %9915 = vmatpush2.bf16.msra.mxu1 %v14410_v3  ;;  %v14431_v3 = vld [vmem:[#allocation17 + $0xc0] ss:$16 sps:$4 sm:$0xff]  }
 0x6c5   :  { %9916 = vmatprep.subr.bf16.mxu1 %v14415_v4  ;;  %v14442_v4 = vld [vmem:[#allocation17 + $0x2a4] ss:$16 sps:$4 sm:$0xff]   ;;  %11241 = vmatpush1.bf16.msra.mxu0 %v14431_v3 }
 0x6c8   :  { %9917 = vmatpush2.bf16.msra.mxu1 %v14413_v9  ;;  %v14437_v9 = vld [vmem:[#allocation17 + $0xa0] ss:$16 sps:$4 sm:$0xff]  }
 0x6c9   :  { %9918 = vmatprep.subr.bf16.mxu1 %v14418_v5  ;;  %v14440_v5 = vld [vmem:[#allocation17 + $0x2a0] ss:$16 sps:$4 sm:$0xff]  }
 0x6cc   :  { %9919 = vmatpush2.bf16.msra.mxu1 %v14416_v6  ;;  %v14445_v6 = vld [vmem:[#allocation17 + $0x84] ss:$16 sps:$4 sm:$0xff]  }
 0x6cd   :  { %9920 = vmatprep.subr.bf16.mxu1 %v14421_v10  ;;  %v14448_v10 = vld [vmem:[#allocation17 + $0x284] ss:$16 sps:$4 sm:$0xff]  }
 0x6d0   :  { %9921 = vmatpush2.bf16.msra.mxu1 %v14419_v42  ;;  %v14443_v42 = vld [vmem:[#allocation17 + $0x80] ss:$16 sps:$4 sm:$0xff]  }
 0x6d1   :  { %9922 = vmatprep.subr.bf16.mxu1 %v14424_v8  ;;  %v14446_v8 = vld [vmem:[#allocation17 + $0x280] ss:$16 sps:$4 sm:$0xff]  }
 0x6d4   :  { %9923 = vmatpush2.bf16.msra.mxu1 %v14422_v54  ;;  %v14451_v54 = vld [vmem:[#allocation17 + $0x64] ss:$16 sps:$4 sm:$0xff]  }
 0x6d5   :  { %11281 = vmatprep.subr.bf16.mxu1 %v14430_v7 }
 0x6d7   :  { %v15599_v43 = vpop.f32.mrf.mxu1  ;;  %v15601_v23 = vpop.f32.mrf.mxu0  ;;  %9925 = vmatmul.mubr.bf16.vlgmr.msra.gmra.mxu1 %v15519_v50 }
 0x6d8   :  { %11282 = vmatpush1.bf16.msra.mxu1 %v14428_v25  ;;  %v9628_v25 = vadd.f32 %v15575_v19, %v15585_v48  ;;  %v9669_v7 = vadd.f32 %v15599_v43, %v9626_v62 }
 0x6d9   :  { %v15604_v30 = vpop.f32.mrf.mxu1  ;;  %v15606_v13 = vpop.f32.mrf.mxu0  ;;  %11283 = vmatprep.subr.bf16.mxu1 %v14436_v2  ;;  %v9454_v2 = vadd.f32 %v15526_v37, %v15534_v46 }
 0x6da   :  { %v9671_v14 = vadd.f32 %v15604_v30, %v9628_v25 }
 0x6db   :  { %v9672_v17 = vpop.f32.mrf.mxu1  ;;  %v9715_v63 = vpop.f32.mrf.mxu0  ;;  %v9497_v3 = vadd.f32 %v15541_v32, %v9454_v2  ;;  %v15077_v2 = vmov inf  }
 0x6dc   :  { %v9673_v45 = vadd.f32 %v9672_v17, %v15588_v18  ;;  %v14454_v17 = vld [vmem:[#allocation17 + $0x264] ss:$16 sps:$4 sm:$0xff]   ;;  %v9714_v24 = vadd.f32 %v15606_v13, %v9671_v14  ;;  %v15076_v14 = vmov -inf  }
 0x6dd   :  { %v9674_v58 = vpop.f32.mrf.mxu1  ;;  %v9717_v12 = vpop.f32.mrf.mxu0  ;;  %v9540_v49 = vadd.f32 %v15551_v52, %v9497_v3  ;;  %v14463_v3 = vld [vmem:[#allocation17 + $0x24] ss:$16 sps:$4 sm:$0xff]  }
 0x6de   :  { %v9716_v47 = vadd.f32 %v9715_v63, %v9673_v45  ;;  %v9675_v35 = vadd.f32 %v9674_v58, %v15594_v28  ;;  %v15626_v28 = vrot.slane %v15524_v34, %v15362_v21  ;;  %v14434_v21 = vld [vmem:[#allocation17 + $0x2c0] ss:$16 sps:$4 sm:$0xff]   ;;  %v14439_v34 = vld [vmem:[#allocation17 + $0xa4] ss:$16 sps:$4 sm:$0xff]  }
 0x6df   :  { %11284 = vmatpush1.bf16.msra.mxu1 %v14434_v21  ;;  %11242 = vmatprep.subr.bf16.mxu0 %v14439_v34  ;;  %v14449_v63 = vld [vmem:[#allocation17 + $0x60] ss:$16 sps:$4 sm:$0xff]   ;;  %v14457_v58 = vld [vmem:[#allocation17 + $0x44] ss:$16 sps:$4 sm:$0xff]  }
 0x6e0   :  { %v9718_v22 = vadd.f32 %v9717_v12, %v9675_v35  ;;  %11285 = vmatprep.subr.bf16.mxu1 %v14442_v4  ;;  %11243 = vmatpush1.bf16.msra.mxu0 %v14437_v9  ;;  %v14452_v45 = vld [vmem:[#allocation17 + $0x260] ss:$16 sps:$4 sm:$0xff]  }
 0x6e1   :  { %11244 = vmatprep.subr.bf16.mxu0 %v14445_v6  ;;  %v14455_v35 = vld [vmem:[#allocation17 + $0x40] ss:$16 sps:$4 sm:$0xff]  }
 0x6e2   :  { %v14458_v12 = vld [vmem:[#allocation17 + $0x240] ss:$16 sps:$4 sm:$0xff]  }
 0x6e3   :  { %11286 = vmatpush1.bf16.msra.mxu1 %v14440_v5 }
 0x6e4   :  { %11287 = vmatprep.subr.bf16.mxu1 %v14448_v10  ;;  %11245 = vmatpush1.bf16.msra.mxu0 %v14443_v42 }
 0x6e5   :  { %11246 = vmatprep.subr.bf16.mxu0 %v14451_v54 }
 0x6e7   :  { %11288 = vmatpush1.bf16.msra.mxu1 %v14446_v8 }
 0x6e8   :  { %11289 = vmatprep.subr.bf16.mxu1 %v14454_v17  ;;  %11247 = vmatpush1.bf16.msra.mxu0 %v14449_v63 }
 0x6e9   :  { %11248 = vmatprep.subr.bf16.mxu0 %v14457_v58 }
 0x6eb   :  { %11290 = vmatpush1.bf16.msra.mxu1 %v14452_v45 }
 0x6ec   :  { %11249 = vmatpush1.bf16.msra.mxu0 %v14455_v35 }
 0x6ed   :  { %11250 = vmatprep.subr.bf16.mxu0 %v14463_v3 }
 0x717   :  { %v15610_v31 = vpop.f32.mrf.mxu1 }
 0x718   :  { %v15612_v33 = vpop.f32.mrf.mxu0 }
 0x719   :  { %v15614_v61 = vpop.f32.mrf.mxu1  ;;  %v9798_v19 = vadd.f32 %v15612_v33, %v15620_v20 }
 0x71a   :  { %v15616_v50 = vpop.f32.mrf.mxu0  ;;  %v9757_v46 = vadd.f32 %v15614_v61, %v9714_v24  ;;  %v14472_v24 = vld [vmem:[#allocation17 + $0x204] ss:$16 sps:$4 sm:$0xff]  }
 0x71b   :  { %v9758_v55 = vpop.f32.mrf.mxu1 }
 0x71c   :  { %v15622_v18 = vadd.f32 %v9758_v55, %v9716_v47  ;;  %v9801_v39 = vpop.f32.mrf.mxu0  ;;  %v14460_v47 = vld [vmem:[#allocation17 + $0x244] ss:$16 sps:$4 sm:$0xff]  }
 0x71d   :  { %v9802_v57 = vadd.f32 %v9801_v39, %v15620_v20  ;;  %v9760_v51 = vpop.f32.mrf.mxu1  ;;  %11291 = vmatprep.subr.bf16.mxu1 %v14460_v47 }
 0x71e   :  { %v15629_v59 = vadd.f32 %v9760_v51, %v9718_v22  ;;  %v9803_v53 = vpop.f32.mrf.mxu0  ;;  %11292 = vmatpush1.bf16.msra.mxu1 %v14458_v12 }
 0x71f   :  { %v9804_v60 = vadd.f32 %v9803_v53, %v15626_v28 }
 0x757   :  { %v9840_v22 = vpop.f32.mrf.mxu1 }
 0x758   :  { %v9841_v32 = vadd.f32 %v9840_v22, %v9798_v19  ;;  %v14467_v19 = vld [vmem:[#allocation17] ss:$16 sps:$4 sm:$0xff]  }
 0x759   :  { %v9842_v55 = vpop.f32.mrf.mxu1 }
 0x75b   :  { %v9844_v39 = vpop.f32.mrf.mxu1 }
 0x75c   :  { %v15632_v51 = vadd.f32 %v9844_v39, %v9802_v57  ;;  %v9456_v57 = vadd.f32 %v15530_v38, %v15555_v40  ;;  %v9800_v38 = vadd.f32 %v15616_v50, %v15626_v28  ;;  %v9583_v40 = vadd.f32 %v15571_v1, %v9540_v49  ;;  %v14470_v49 = vld [vmem:[#allocation17 + $0x200] ss:$16 sps:$4 sm:$0xff]  }
 0x75d   :  { %v9846_v53 = vpop.f32.mrf.mxu1 }
 0x75e   :  { %v15634_v0 = vadd.f32 %v9846_v53, %v9804_v60  ;;  %v9712_v60 = vadd.f32 %v15601_v23, %v9669_v7  ;;  %v9499_v21 = vadd.f32 %v15545_v41, %v9456_v57  ;;  %v9883_v41 = vpop.f32.mrf.mxu0  ;;  %v9843_v23 = vadd.f32 %v9842_v55, %v9800_v38  ;;  %v14461_v57 = vld [vmem:[#allocation17 + $0x20] ss:$16 sps:$4 sm:$0xff]  }
 0x75f   :  { %v9884_v30 = vadd.f32 %v9883_v41, %v9841_v32  ;;  %11251 = vmatpush1.bf16.msra.mxu0 %v14461_v57  ;;  %v14476_v38 = vld [vmem:[#allocation17 + $0x3e0] ss:$16 sps:$4 sm:$0xff]   ;;  %v14481_v32 = vld [vmem:[#allocation17 + $0x1c4] ss:$16 sps:$4 sm:$0xff]  }
 0x760   :  { %v9755_v48 = vadd.f32 %v15610_v31, %v9712_v60  ;;  %v9542_v37 = vadd.f32 %v15559_v11, %v9499_v21  ;;  %v9885_v52 = vpop.f32.mrf.mxu0  ;;  %v14464_v60 = vld [vmem:[#allocation17 + $0x220] ss:$16 sps:$4 sm:$0xff]   ;;  %v14466_v21 = vld [vmem:[#allocation17 + $0x224] ss:$16 sps:$4 sm:$0xff]   ;;  %11252 = vmatprep.subr.bf16.mxu0 %v14469_v15 }
 0x761   :  { %v9886_v11 = vadd.f32 %v9885_v52, %v9843_v23  ;;  %11293 = vmatprep.subr.bf16.mxu1 %v14466_v21  ;;  %v14479_v41 = vld [vmem:[#allocation17 + $0x1c0] ss:$16 sps:$4 sm:$0xff]   ;;  %v14487_v23 = vld [vmem:[#allocation17 + $0x1a4] ss:$16 sps:$4 sm:$0xff]  }
 0x762   :  { %v9585_v43 = vadd.f32 %v15577_v36, %v9542_v37  ;;  %14745 = vtanh.f32 %v9755_v48  ;;  %11294 = vmatpush1.bf16.msra.mxu1 %v14464_v60  ;;  %v14475_v48 = vld [vmem:[#allocation17 + $0x1e4] ss:$16 sps:$4 sm:$0xff]   ;;  %v14485_v52 = vld [vmem:[#allocation17 + $0x1a0] ss:$16 sps:$4 sm:$0xff]   ;;  %v9887_v15 = vpop.f32.mrf.mxu0 }
 0x763   :  { %14747 = vtanh.f32 %v9757_v46  ;;  %11295 = vmatprep.subr.bf16.mxu1 %v14472_v24  ;;  %11253 = vmatpush1.bf16.msra.mxu0 %v14467_v19  ;;  %v14478_v37 = vld [vmem:[#allocation17 + $0x3e4] ss:$16 sps:$4 sm:$0xff]   ;;  %v14473_v46 = vld [vmem:[#allocation17 + $0x1e0] ss:$16 sps:$4 sm:$0xff]  }
 0x764   :  { %14749 = vtanh.f32 %v9583_v40  ;;  %11254 = vmatprep.subr.bf16.mxu0 %v14475_v48  ;;  %v14484_v40 = vld [vmem:[#allocation17 + $0x3c4] ss:$16 sps:$4 sm:$0xff]  }
 0x765   :  { %14751 = vtanh.f32 %v9585_v43  ;;  %v14482_v43 = vld [vmem:[#allocation17 + $0x3c0] ss:$16 sps:$4 sm:$0xff]  }
 0x766   :  { %11296 = vmatpush1.bf16.msra.mxu1 %v14470_v49 }
 0x767   :  { %11297 = vmatprep.subr.bf16.mxu1 %v14478_v37  ;;  %11255 = vmatpush2.bf16.msra.mxu0 %v14473_v46  ;;  %v9888_v46 = vadd.f32 %v9887_v15, %v15632_v51  ;;  %v14535_v15 = vld [vmem:[#allocation17 + $0x4a4] ss:$16 sps:$4 sm:$0xff]  }
 0x768   :  { %11256 = vmatprep.subr.bf16.mxu0 %v14481_v32 }
 0x76a   :  { %11298 = vmatpush2.bf16.msra.mxu1 %v14476_v38  ;;  %v9889_v38 = vpop.f32.mrf.mxu0 }
 0x76b   :  { %11299 = vmatprep.subr.bf16.mxu1 %v14484_v40  ;;  %11257 = vmatpush2.bf16.msra.mxu0 %v14479_v41 }
 0x76c   :  { %11258 = vmatprep.subr.bf16.mxu0 %v14487_v23 }
 0x76e   :  { %11300 = vmatpush2.bf16.msra.mxu1 %v14482_v43  ;;  %v9890_v43 = vadd.f32 %v9889_v38, %v15634_v0  ;;  %v14542_v38 = vld [vmem:[#allocation17 + $0x88] ss:$16 sps:$4 sm:$0xff]  }
 0x76f   :  { %v15660_v50 = vpop.eup %14745  ;;  %11259 = vmatpush2.bf16.msra.mxu0 %v14485_v52 }
 0x770   :  { %v15662_v1 = vpop.eup %14747  ;;  %v9987_v28 = vsel %vm9950_vm0, %v15660_v50, -inf  ;;  %v9954_v4 = vsel %vm9950_vm0, %v15660_v50, inf }
 0x771   :  { %v15664_v20 = vpop.eup %14749  ;;  %v9988_v34 = vsel %vm9950_vm0, %v15662_v1, -inf  ;;  %v9955_v9 = vsel %vm9950_vm0, %v15662_v1, inf }
 0x772   :  { %v15667_v36 = vpop.eup %14751  ;;  %v9985_v6 = vsel %vm9950_vm0, %v15664_v20, -inf  ;;  %v9952_v10 = vsel %vm9950_vm0, %v15664_v20, inf }
 0x773   :  { %v9986_v42 = vsel %vm9950_vm0, %v15667_v36, -inf  ;;  %v9953_v54 = vsel %vm9950_vm0, %v15667_v36, inf  ;;  %v9997_v45 = vmax.f32 %v9985_v6, %v9987_v28  ;;  %v9964_v47 = vmin.f32 %v9952_v10, %v9954_v4  ;;  %v14499_v28 = vld [vmem:[#allocation17 + $0x164] ss:$16 sps:$4 sm:$0xff]   ;;  %v14500_v4 = vld [vmem:[#allocation17 + $0x360] ss:$16 sps:$4 sm:$0xff]  }
 0x774   :  { %v9998_v58 = vmax.f32 %v9986_v42, %v9988_v34  ;;  %v9965_v35 = vmin.f32 %v9953_v54, %v9955_v9  ;;  %v14497_v34 = vld [vmem:[#allocation17 + $0x160] ss:$16 sps:$4 sm:$0xff]   ;;  %v14502_v9 = vld [vmem:[#allocation17 + $0x364] ss:$16 sps:$4 sm:$0xff]  }
 0x775   :  { %v14505_v6 = vld [vmem:[#allocation17 + $0x144] ss:$16 sps:$4 sm:$0xff]   ;;  %v14503_v42 = vld [vmem:[#allocation17 + $0x140] ss:$16 sps:$4 sm:$0xff]  }
 0x776   :  { %v14508_v10 = vld [vmem:[#allocation17 + $0x344] ss:$16 sps:$4 sm:$0xff]  }
 0x777   :  { %v14511_v54 = vld [vmem:[#allocation17 + $0x124] ss:$16 sps:$4 sm:$0xff]  }
 0x797   :  { %v9926_v13 = vpop.f32.mrf.mxu1 }
 0x798   :  { %v9927_v31 = vadd.f32 %v9926_v13, %v9884_v30  ;;  %v14490_v30 = vld [vmem:[#allocation17 + $0x3a4] ss:$16 sps:$4 sm:$0xff]   ;;  %v14488_v13 = vld [vmem:[#allocation17 + $0x3a0] ss:$16 sps:$4 sm:$0xff]  }
 0x799   :  { %v9928_v33 = vpop.f32.mrf.mxu1  ;;  %11301 = vmatprep.subr.bf16.mxu1 %v14490_v30 }
 0x79a   :  { %14753 = vtanh.f32 %v9927_v31  ;;  %v9929_v61 = vadd.f32 %v9928_v33, %v9886_v11  ;;  %11302 = vmatpush2.bf16.msra.mxu1 %v14488_v13  ;;  %v14493_v11 = vld [vmem:[#allocation17 + $0x184] ss:$16 sps:$4 sm:$0xff]   ;;  %v14491_v33 = vld [vmem:[#allocation17 + $0x180] ss:$16 sps:$4 sm:$0xff]  }
 0x79b   :  { %v14496_v31 = vld [vmem:[#allocation17 + $0x384] ss:$16 sps:$4 sm:$0xff]   ;;  %11260 = vmatprep.subr.bf16.mxu0 %v14493_v11  ;;  %v9930_v24 = vpop.f32.mrf.mxu1 }
 0x79c   :  { %14755 = vtanh.f32 %v9929_v61  ;;  %v14494_v61 = vld [vmem:[#allocation17 + $0x380] ss:$16 sps:$4 sm:$0xff]   ;;  %11303 = vmatprep.subr.bf16.mxu1 %v14496_v31  ;;  %11261 = vmatpush2.bf16.msra.mxu0 %v14491_v33  ;;  %v9931_v23 = vadd.f32 %v9930_v24, %v9888_v46  ;;  %v14538_v24 = vld [vmem:[#allocation17 + $0xac] ss:$16 sps:$4 sm:$0xff]  }
 0x79d   :  { %11262 = vmatprep.subr.bf16.mxu0 %v14499_v28  ;;  %v9932_v32 = vpop.f32.mrf.mxu1  ;;  %14757 = vtanh.f32 %v15591_v26  ;;  %v14539_v46 = vld [vmem:[#allocation17 + $0x480] ss:$16 sps:$4 sm:$0xff]  }
 0x79e   :  { %11304 = vmatpush2.bf16.msra.mxu1 %v14494_v61  ;;  %14759 = vtanh.f32 %v15597_v56  ;;  %v9933_v13 = vadd.f32 %v9932_v32, %v9890_v43  ;;  %v14547_v32 = vld [vmem:[#allocation17 + $0x464] ss:$16 sps:$4 sm:$0xff]   ;;  %v14548_v43 = vld [vmem:[#allocation17 + $0x68] ss:$16 sps:$4 sm:$0xff]  }
 0x79f   :  { %11305 = vmatprep.subr.bf16.mxu1 %v14502_v9  ;;  %14761 = vtanh.f32 %v15622_v18 }
 0x7a0   :  { %11263 = vmatpush2.bf16.msra.mxu0 %v14497_v34  ;;  %14763 = vtanh.f32 %v15629_v59 }
 0x7a1   :  { %11264 = vmatprep.subr.bf16.mxu0 %v14505_v6  ;;  %14765 = vtanh.f32 %v9931_v23  ;;  %v14553_v23 = vld [vmem:[#allocation17 + $0x444] ss:$16 sps:$4 sm:$0xff]  }
 0x7a2   :  { %11306 = vmatpush2.bf16.msra.mxu1 %v14500_v4  ;;  %14767 = vtanh.f32 %v9933_v13  ;;  %v14554_v13 = vld [vmem:[#allocation17 + $0x48] ss:$16 sps:$4 sm:$0xff]  }
 0x7a3   :  { %11307 = vmatprep.subr.bf16.mxu1 %v14508_v10 }
 0x7a4   :  { %11265 = vmatpush2.bf16.msra.mxu0 %v14503_v42 }
 0x7a5   :  { %11266 = vmatprep.subr.bf16.mxu0 %v14511_v54 }
 0x7a7   :  { %v15681_v5 = vpop.eup %14753 }
 0x7a8   :  { %v9989_v8 = vsel %vm9950_vm0, %v15681_v5, -inf  ;;  %v9956_v17 = vsel %vm9950_vm0, %v15681_v5, inf }
 0x7a9   :  { %v15701_v63 = vpop.eup %14755  ;;  %v9999_v55 = vmax.f32 %v9997_v45, %v9989_v8  ;;  %v9966_v53 = vmin.f32 %v9964_v47, %v9956_v17  ;;  %v14506_v8 = vld [vmem:[#allocation17 + $0x340] ss:$16 sps:$4 sm:$0xff]   ;;  %v14514_v17 = vld [vmem:[#allocation17 + $0x324] ss:$16 sps:$4 sm:$0xff]  }
 0x7aa   :  { %v9990_v12 = vsel %vm9950_vm0, %v15701_v63, -inf  ;;  %v9957_v22 = vsel %vm9950_vm0, %v15701_v63, inf  ;;  %11308 = vmatpush2.bf16.msra.mxu1 %v14506_v8  ;;  %v14509_v45 = vld [vmem:[#allocation17 + $0x120] ss:$16 sps:$4 sm:$0xff]   ;;  %v14517_v47 = vld [vmem:[#allocation17 + $0x104] ss:$16 sps:$4 sm:$0xff]   ;;  %v14758_v31 = vpop.eup %14757 }
 0x7ab   :  { %v10000_v39 = vmax.f32 %v9998_v58, %v9990_v12  ;;  %v9967_v62 = vmin.f32 %v9965_v35, %v9957_v22  ;;  %v14512_v58 = vld [vmem:[#allocation17 + $0x320] ss:$16 sps:$4 sm:$0xff]   ;;  %11309 = vmatprep.subr.bf16.mxu1 %v14514_v17  ;;  %v14520_v35 = vld [vmem:[#allocation17 + $0x304] ss:$16 sps:$4 sm:$0xff]   ;;  %11267 = vmatpush2.bf16.msra.mxu0 %v14509_v45  ;;  %v14760_v0 = vpop.eup %14759 }
 0x7ac   :  { %v14515_v12 = vld [vmem:[#allocation17 + $0x100] ss:$16 sps:$4 sm:$0xff]   ;;  %11268 = vmatprep.subr.bf16.mxu0 %v14517_v47  ;;  %v14762_v33 = vpop.eup %14761 }
 0x7ad   :  { %v10001_v25 = vmax.f32 %v9999_v55, %v10000_v39  ;;  %v9968_v7 = vmin.f32 %v9966_v53, %v9967_v62  ;;  %v14518_v22 = vld [vmem:[#allocation17 + $0x300] ss:$16 sps:$4 sm:$0xff]   ;;  %v14523_v55 = vld [vmem:[#allocation17 + $0x4e4] ss:$16 sps:$4 sm:$0xff]   ;;  %v14526_v39 = vld [vmem:[#allocation17 + $0xec] ss:$16 sps:$4 sm:$0xff]   ;;  %v14764_v26 = vpop.eup %14763 }
 0x7ae   :  { %11310 = vmatpush2.bf16.msra.mxu1 %v14512_v58  ;;  %v14766_v61 = vpop.eup %14765 }
 0x7af   :  { %10002 = vmax.xlane.f32.xlu1 %v10001_v25  ;;  %9969 = vmin.xlane.f32.xlu0 %v9968_v7  ;;  %v14768_v18 = vpop.eup %14767 }
 0x7b0   :  { %11311 = vmatprep.subr.bf16.mxu1 %v14520_v35  ;;  %11269 = vmatpush2.bf16.msra.mxu0 %v14515_v12 }
 0x7b1   :  { %11324 = vmatprep.subr.bf16.mxu0 %v14523_v55 }
 0x7b2   :  { %11312 = vmatpush2.bf16.msra.mxu1 %v14518_v22 }
 0x7b3   :  { %10009 = vmax.xlane.f32.xlu1 %v15076_v14  ;;  %9976 = vmin.xlane.f32.xlu0 %v15077_v2 }
 0x7b4   :  { %11367 = vmatprep.subr.bf16.mxu1 %v14526_v39 }
 0x838   :  { %v10003_v53 = vpop.xlane.xlu1 %10002  ;;  %v9970_v62 = vpop.xlane.xlu0 %9969 }
 0x83c   :  { %v10010_v25 = vpop.xlane.xlu1 %10009  ;;  %v9977_v7 = vpop.xlane.xlu0 %9976 }
 0x83d   :  { %v10011_v14 = vmax.f32 %v10003_v53, %v10010_v25  ;;  %v9978_v2 = vmin.f32 %v9970_v62, %v9977_v7 }
 0x83f   :  { %v10012_v57 = vrot.slane %v10011_v14, 4  ;;  %v9979_v3 = vrot.slane %v9978_v2, 4 }
 0x841   :  { %v10013_v60 = vmax.f32 %v10011_v14, %v10012_v57  ;;  %v9980_v21 = vmin.f32 %v9978_v2, %v9979_v3  ;;  %v14529_v2 = vld [vmem:[#allocation17 + $0x4c4] ss:$16 sps:$4 sm:$0xff]   ;;  %v14532_v57 = vld [vmem:[#allocation17 + $0xcc] ss:$16 sps:$4 sm:$0xff]  }
 0x843   :  { %v10014_v19 = vrot.slane %v10013_v60, 2  ;;  %v9981_v49 = vrot.slane %v9980_v21, 2 }
 0x845   :  { %v10015_v48 = vmax.f32 %v10013_v60, %v10014_v19  ;;  %v9982_v37 = vmin.f32 %v9980_v21, %v9981_v49  ;;  %v14527_v60 = vld [vmem:[#allocation17 + $0x4c0] ss:$16 sps:$4 sm:$0xff]   ;;  %v14530_v21 = vld [vmem:[#allocation17 + $0xc8] ss:$16 sps:$4 sm:$0xff]  }
 0x846   :  { %v14533_v19 = vld [vmem:[#allocation17 + $0x4a0] ss:$16 sps:$4 sm:$0xff]   ;;  %v14536_v49 = vld [vmem:[#allocation17 + $0xa8] ss:$16 sps:$4 sm:$0xff]  }
 0x847   :  { %v10016_v40 = vrot.slane %v10015_v48, 1  ;;  %v9983_v41 = vrot.slane %v9982_v37, 1 }
 0x849   :  { %v10017_v30 = vmax.f32 %v10015_v48, %v10016_v40  ;;  %v9984_v52 = vmin.f32 %v9982_v37, %v9983_v41  ;;  %v14541_v48 = vld [vmem:[#allocation17 + $0x484] ss:$16 sps:$4 sm:$0xff]   ;;  %v14544_v37 = vld [vmem:[#allocation17 + $0x8c] ss:$16 sps:$4 sm:$0xff]   ;;  %v14545_v41 = vld [vmem:[#allocation17 + $0x460] ss:$16 sps:$4 sm:$0xff]  }
 0x84a   :  { %v14550_v40 = vld [vmem:[#allocation17 + $0x6c] ss:$16 sps:$4 sm:$0xff]  }
 0x84b   :  { %v10018_v11 = vsub.f32 %v10017_v30, %v9984_v52  ;;  %v10022_v28 = vsub.f32 %v15667_v36, %v9984_v52  ;;  %v10028_v34 = vsub.f32 %v14760_v0, %v9984_v52  ;;  %v10024_v56 = vsub.f32 %v15662_v1, %v9984_v52  ;;  %v14556_v30 = vld [vmem:[#allocation17 + $0x4c] ss:$16 sps:$4 sm:$0xff]   ;;  %v14560_v0 = vld [vmem:[#allocation17 + $0x28] ss:$16 sps:$4 sm:$0xff]  }
 0x84c   :  { %v10030_v4 = vsub.f32 %v14764_v26, %v9984_v52  ;;  %v10021_v9 = vsub.f32 %v15664_v20, %v9984_v52  ;;  %v10027_v59 = vsub.f32 %v14758_v31, %v9984_v52  ;;  %v10023_v6 = vsub.f32 %v15660_v50, %v9984_v52  ;;  %v14557_v31 = vld [vmem:[#allocation17 + $0x420] ss:$16 sps:$4 sm:$0xff]   ;;  %v14568_v26 = vld [vmem:[#allocation17 + $0xc] ss:$16 sps:$4 sm:$0xff]  }
 0x84d   :  { %vm10019_vm1 = vcmp.gt.f32.partialorder %v10018_v11, 0.0  ;;  %v10029_v10 = vsub.f32 %v14762_v33, %v9984_v52  ;;  %v10026_v8 = vsub.f32 %v15701_v63, %v9984_v52  ;;  %v10032_v54 = vsub.f32 %v14768_v18, %v9984_v52  ;;  %v14524_v63 = vld [vmem:[#allocation17 + $0xe8] ss:$16 sps:$4 sm:$0xff]   ;;  %v14565_v33 = vld [vmem:[#allocation17 + $0x404] ss:$16 sps:$4 sm:$0xff]  }
 0x84e   :  { %v10020_v51 = vsel %vm10019_vm1, %v10018_v11, 1.0  ;;  %v10025_v17 = vsub.f32 %v15681_v5, %v9984_v52  ;;  %v10031_v45 = vsub.f32 %v14766_v61, %v9984_v52  ;;  %v14521_v5 = vld [vmem:[#allocation17 + $0x4e0] ss:$16 sps:$4 sm:$0xff]   ;;  %v14559_v11 = vld [vmem:[#allocation17 + $0x424] ss:$16 sps:$4 sm:$0xff]  }
 0x84f   :  { %14769 = vrcp.f32 %v10020_v51  ;;  %v14551_v52 = vld [vmem:[#allocation17 + $0x440] ss:$16 sps:$4 sm:$0xff]   ;;  %v14562_v51 = vld [vmem:[#allocation17 + $0x2c] ss:$16 sps:$4 sm:$0xff]   ;;  %v14572_v18 = vld [vmem:[#allocation17 + $0x1e8] ss:$16 sps:$4 sm:$0xff]  }
 0x850   :  { %v14563_v61 = vld [vmem:[#allocation17 + $0x400] ss:$16 sps:$4 sm:$0xff]  }
 0x85c   :  { %v14770_v42 = vpop.eup %14769 }
 0x85d   :  { %v10035_v58 = vmul.f32 %v14770_v42, %v10022_v28  ;;  %v10041_v36 = vmul.f32 %v14770_v42, %v10028_v34  ;;  %v10037_v47 = vmul.f32 %v14770_v42, %v10024_v56  ;;  %v10043_v35 = vmul.f32 %v14770_v42, %v10030_v4  ;;  %v14566_v28 = vld [vmem:[#allocation17 + $0x8] ss:$16 sps:$4 sm:$0xff]   ;;  %v14571_v34 = vld [vmem:[#allocation17 + $0x5e4] ss:$16 sps:$4 sm:$0xff]   ;;  %v14574_v56 = vld [vmem:[#allocation17 + $0x1ec] ss:$16 sps:$4 sm:$0xff]  }
 0x85e   :  { %v10034_v1 = vmul.f32 %v14770_v42, %v10021_v9  ;;  %v10040_v12 = vmul.f32 %v14770_v42, %v10027_v59  ;;  %v10036_v22 = vmul.f32 %v14770_v42, %v10023_v6  ;;  %v10042_v55 = vmul.f32 %v14770_v42, %v10029_v10  ;;  %v14569_v4 = vld [vmem:[#allocation17 + $0x5e0] ss:$16 sps:$4 sm:$0xff]   ;;  %v14577_v9 = vld [vmem:[#allocation17 + $0x5c4] ss:$16 sps:$4 sm:$0xff]   ;;  %v14580_v59 = vld [vmem:[#allocation17 + $0x1cc] ss:$16 sps:$4 sm:$0xff]  }
 0x85f   :  { %10047 = vst [vmem:[%s15810_s15 + $0x8] sm:$0xff] %v10035_v58  ;;  %10053 = vst [vmem:[%s15810_s15 + $0x38] sm:$0xff] %v10041_v36  ;;  %v10059_v50 = vpack.c.bf16 %v10041_v36, %v10035_v58  ;;  %v15733_v20 = vpack.c.bf16 %v10043_v35, %v10037_v47  ;;  %v10039_v39 = vmul.f32 %v14770_v42, %v10026_v8  ;;  %v14575_v6 = vld [vmem:[#allocation17 + $0x5c0] ss:$16 sps:$4 sm:$0xff]   ;;  %v14578_v10 = vld [vmem:[#allocation17 + $0x1c8] ss:$16 sps:$4 sm:$0xff]  }
 0x860   :  { %10049 = vst [vmem:[%s15810_s15 + $0x18] sm:$0xff] %v10037_v47  ;;  %10055 = vst [vmem:[%s15810_s15 + $0x48] sm:$0xff] %v10043_v35  ;;  %v10045_v53 = vmul.f32 %v14770_v42, %v10032_v54  ;;  %v15741_v62 = vpack.c.bf16 %v10040_v12, %v10034_v1  ;;  %v15749_v25 = vpack.c.bf16 %v10042_v55, %v10036_v22  ;;  %v14586_v8 = vld [vmem:[#allocation17 + $0x1ac] ss:$16 sps:$4 sm:$0xff]   ;;  %v14581_v54 = vld [vmem:[#allocation17 + $0x5a0] ss:$16 sps:$4 sm:$0xff]  }
 0x861   :  { %10046 = vst [vmem:[%s15810_s15] sm:$0xff] %v10034_v1  ;;  %10052 = vst [vmem:[%s15810_s15 + $0x30] sm:$0xff] %v10040_v12  ;;  %v15751_v7 = vmul.f32 %v14770_v42, %v10025_v17  ;;  %v15753_v14 = vmul.f32 %v14770_v42, %v10031_v45  ;;  %11270 = vmatprep.mubr.bf16.mxu0 %v10059_v50  ;;  %11313 = vmatprep.mubr.bf16.mxu1 %v15733_v20  ;;  %v14583_v42 = vld [vmem:[#allocation17 + $0x5a4] ss:$16 sps:$4 sm:$0xff]   ;;  %v14584_v17 = vld [vmem:[#allocation17 + $0x1a8] ss:$16 sps:$4 sm:$0xff]  }
 0x862   :  { %10048 = vst [vmem:[%s15810_s15 + $0x10] sm:$0xff] %v10036_v22  ;;  %10054 = vst [vmem:[%s15810_s15 + $0x40] sm:$0xff] %v10042_v55  ;;  %11271 = vmatmul.mubr.bf16.vlgmr.msra.gmra.mxu0 %v15741_v62  ;;  %11314 = vmatmul.mubr.bf16.vlgmr.msra.gmra.mxu1 %v15749_v25  ;;  %v15764_v3 = vpack.c.bf16 %v10045_v53, %v10039_v39  ;;  %v14589_v45 = vld [vmem:[#allocation17 + $0x584] ss:$16 sps:$4 sm:$0xff]   ;;  %v14592_v58 = vld [vmem:[#allocation17 + $0x18c] ss:$16 sps:$4 sm:$0xff]  }
 0x863   :  { %10051 = vst [vmem:[%s15810_s15 + $0x28] sm:$0xff] %v10039_v39  ;;  %10057 = vst [vmem:[%s15810_s15 + $0x58] sm:$0xff] %v10045_v53  ;;  %11325 = vmatpush1.bf16.msra.mxu0 %v14521_v5  ;;  %11368 = vmatpush1.bf16.msra.mxu1 %v14524_v63  ;;  %v14587_v36 = vld [vmem:[#allocation17 + $0x580] ss:$16 sps:$4 sm:$0xff]   ;;  %v14590_v47 = vld [vmem:[#allocation17 + $0x188] ss:$16 sps:$4 sm:$0xff]  }
 0x864   :  { %10050 = vst [vmem:[%s15810_s15 + $0x20] sm:$0xff] %v15751_v7  ;;  %10056 = vst [vmem:[%s15810_s15 + $0x50] sm:$0xff] %v15753_v14  ;;  %11356 = vmatprep.mubr.bf16.mxu0 %v15764_v3  ;;  %11399 = vmatprep.mubr.bf16.mxu1 %v10059_v50  ;;  %v14595_v35 = vld [vmem:[#allocation17 + $0x564] ss:$16 sps:$4 sm:$0xff]   ;;  %v14598_v1 = vld [vmem:[#allocation17 + $0x16c] ss:$16 sps:$4 sm:$0xff]  }
 0x865   :  { %11326 = vmatprep.subr.bf16.mxu0 %v14529_v2  ;;  %11369 = vmatprep.subr.bf16.mxu1 %v14532_v57  ;;  %v14593_v12 = vld [vmem:[#allocation17 + $0x560] ss:$16 sps:$4 sm:$0xff]   ;;  %v14596_v22 = vld [vmem:[#allocation17 + $0x168] ss:$16 sps:$4 sm:$0xff]   ;;  %v14601_v55 = vld [vmem:[#allocation17 + $0x544] ss:$16 sps:$4 sm:$0xff]  }
 0x866   :  { %v14604_v50 = vld [vmem:[#allocation17 + $0x14c] ss:$16 sps:$4 sm:$0xff]   ;;  %v14599_v5 = vld [vmem:[#allocation17 + $0x540] ss:$16 sps:$4 sm:$0xff]   ;;  %v14602_v63 = vld [vmem:[#allocation17 + $0x148] ss:$16 sps:$4 sm:$0xff]  }
 0x867   :  { %11327 = vmatpush1.bf16.msra.mxu0 %v14527_v60  ;;  %11370 = vmatpush1.bf16.msra.mxu1 %v14530_v21  ;;  %v14607_v39 = vld [vmem:[#allocation17 + $0x524] ss:$16 sps:$4 sm:$0xff]   ;;  %v14610_v53 = vld [vmem:[#allocation17 + $0x12c] ss:$16 sps:$4 sm:$0xff]   ;;  %v14605_v2 = vld [vmem:[#allocation17 + $0x520] ss:$16 sps:$4 sm:$0xff]  }
 0x868   :  { %11328 = vmatprep.subr.bf16.mxu0 %v14535_v15  ;;  %11371 = vmatprep.subr.bf16.mxu1 %v14538_v24  ;;  %v14608_v57 = vld [vmem:[#allocation17 + $0x128] ss:$16 sps:$4 sm:$0xff]   ;;  %v14613_v60 = vld [vmem:[#allocation17 + $0x504] ss:$16 sps:$4 sm:$0xff]   ;;  %v14616_v21 = vld [vmem:[#allocation17 + $0x10c] ss:$16 sps:$4 sm:$0xff]  }
 0x869   :  { %v14611_v15 = vld [vmem:[#allocation17 + $0x500] ss:$16 sps:$4 sm:$0xff]   ;;  %v14614_v24 = vld [vmem:[#allocation17 + $0x108] ss:$16 sps:$4 sm:$0xff]  }
 0x86b   :  { %11329 = vmatpush1.bf16.msra.mxu0 %v14533_v19  ;;  %11372 = vmatpush1.bf16.msra.mxu1 %v14536_v49  ;;  %v14619_v19 = vld [vmem:[#allocation17 + $0x2ec] ss:$16 sps:$4 sm:$0xff]  }
 0x86c   :  { %11330 = vmatprep.subr.bf16.mxu0 %v14541_v48  ;;  %11373 = vmatprep.subr.bf16.mxu1 %v14544_v37  ;;  %v14622_v49 = vld [vmem:[#allocation17 + $0x4ec] ss:$16 sps:$4 sm:$0xff]   ;;  %v14617_v48 = vld [vmem:[#allocation17 + $0x2e8] ss:$16 sps:$4 sm:$0xff]   ;;  %v15777_v37 = vpack.c.bf16 %v15753_v14, %v15751_v7 }
 0x86d   :  { %v14634_v7 = vld [vmem:[#allocation17 + $0x4ac] ss:$16 sps:$4 sm:$0xff]   ;;  %v14629_v14 = vld [vmem:[#allocation17 + $0x2a8] ss:$16 sps:$4 sm:$0xff]  }
 0x86f   :  { %11331 = vmatpush1.bf16.msra.mxu0 %v14539_v46  ;;  %11374 = vmatpush1.bf16.msra.mxu1 %v14542_v38  ;;  %v14620_v46 = vld [vmem:[#allocation17 + $0x4e8] ss:$16 sps:$4 sm:$0xff]   ;;  %v14625_v38 = vld [vmem:[#allocation17 + $0x2cc] ss:$16 sps:$4 sm:$0xff]  }
 0x870   :  { %11332 = vmatprep.subr.bf16.mxu0 %v14547_v32  ;;  %11375 = vmatprep.subr.bf16.mxu1 %v14550_v40  ;;  %v14628_v32 = vld [vmem:[#allocation17 + $0x4cc] ss:$16 sps:$4 sm:$0xff]   ;;  %v14623_v40 = vld [vmem:[#allocation17 + $0x2c8] ss:$16 sps:$4 sm:$0xff]  }
 0x873   :  { %11333 = vmatpush1.bf16.msra.mxu0 %v14545_v41  ;;  %11376 = vmatpush1.bf16.msra.mxu1 %v14548_v43  ;;  %v14626_v41 = vld [vmem:[#allocation17 + $0x4c8] ss:$16 sps:$4 sm:$0xff]   ;;  %v14631_v43 = vld [vmem:[#allocation17 + $0x2ac] ss:$16 sps:$4 sm:$0xff]  }
 0x874   :  { %11334 = vmatprep.subr.bf16.mxu0 %v14553_v23  ;;  %11377 = vmatprep.subr.bf16.mxu1 %v14556_v30  ;;  %v14632_v23 = vld [vmem:[#allocation17 + $0x4a8] ss:$16 sps:$4 sm:$0xff]   ;;  %v14637_v30 = vld [vmem:[#allocation17 + $0x28c] ss:$16 sps:$4 sm:$0xff]  }
 0x877   :  { %11335 = vmatpush1.bf16.msra.mxu0 %v14551_v52  ;;  %11378 = vmatpush1.bf16.msra.mxu1 %v14554_v13  ;;  %v14635_v52 = vld [vmem:[#allocation17 + $0x288] ss:$16 sps:$4 sm:$0xff]   ;;  %v14643_v13 = vld [vmem:[#allocation17 + $0x26c] ss:$16 sps:$4 sm:$0xff]  }
 0x878   :  { %11336 = vmatprep.subr.bf16.mxu0 %v14559_v11  ;;  %11379 = vmatprep.subr.bf16.mxu1 %v14562_v51  ;;  %v14641_v11 = vld [vmem:[#allocation17 + $0x268] ss:$16 sps:$4 sm:$0xff]  }
 0x879   :  { %v14644_v51 = vld [vmem:[#allocation17 + $0x468] ss:$16 sps:$4 sm:$0xff]  }
 0x87b   :  { %11337 = vmatpush1.bf16.msra.mxu0 %v14557_v31  ;;  %11380 = vmatpush1.bf16.msra.mxu1 %v14560_v0  ;;  %v14649_v31 = vld [vmem:[#allocation17 + $0x24c] ss:$16 sps:$4 sm:$0xff]  }
 0x87c   :  { %11338 = vmatprep.subr.bf16.mxu0 %v14565_v33  ;;  %11381 = vmatprep.subr.bf16.mxu1 %v14568_v26  ;;  %v14652_v0 = vld [vmem:[#allocation17 + $0x44c] ss:$16 sps:$4 sm:$0xff]   ;;  %v14647_v33 = vld [vmem:[#allocation17 + $0x248] ss:$16 sps:$4 sm:$0xff]  }
 0x87d   :  { %v14650_v26 = vld [vmem:[#allocation17 + $0x448] ss:$16 sps:$4 sm:$0xff]  }
 0x87f   :  { %11339 = vmatpush1.bf16.msra.mxu0 %v14563_v61  ;;  %11382 = vmatpush1.bf16.msra.mxu1 %v14566_v28  ;;  %v14655_v61 = vld [vmem:[#allocation17 + $0x22c] ss:$16 sps:$4 sm:$0xff]  }
 0x880   :  { %11340 = vmatprep.subr.bf16.mxu0 %v14571_v34  ;;  %11383 = vmatprep.subr.bf16.mxu1 %v14574_v56  ;;  %v14658_v28 = vld [vmem:[#allocation17 + $0x42c] ss:$16 sps:$4 sm:$0xff]   ;;  %v14653_v34 = vld [vmem:[#allocation17 + $0x228] ss:$16 sps:$4 sm:$0xff]  }
 0x881   :  { %v14656_v56 = vld [vmem:[#allocation17 + $0x428] ss:$16 sps:$4 sm:$0xff]  }
 0x883   :  { %11341 = vmatpush2.bf16.msra.mxu0 %v14569_v4  ;;  %11384 = vmatpush2.bf16.msra.mxu1 %v14572_v18  ;;  %v14661_v4 = vld [vmem:[#allocation17 + $0x20c] ss:$16 sps:$4 sm:$0xff]  }
 0x884   :  { %11342 = vmatprep.subr.bf16.mxu0 %v14577_v9  ;;  %11385 = vmatprep.subr.bf16.mxu1 %v14580_v59  ;;  %v14664_v18 = vld [vmem:[#allocation17 + $0x40c] ss:$16 sps:$4 sm:$0xff]   ;;  %v14659_v9 = vld [vmem:[#allocation17 + $0x208] ss:$16 sps:$4 sm:$0xff]  }
 0x885   :  { %v14662_v59 = vld [vmem:[#allocation17 + $0x408] ss:$16 sps:$4 sm:$0xff]  }
 0x887   :  { %11343 = vmatpush2.bf16.msra.mxu0 %v14575_v6  ;;  %11386 = vmatpush2.bf16.msra.mxu1 %v14578_v10  ;;  %v14667_v6 = vld [vmem:[#allocation17 + $0x3ec] ss:$16 sps:$4 sm:$0xff]  }
 0x888   :  { %11344 = vmatprep.subr.bf16.mxu0 %v14583_v42  ;;  %11387 = vmatprep.subr.bf16.mxu1 %v14586_v8  ;;  %v14670_v10 = vld [vmem:[#allocation17 + $0x5ec] ss:$16 sps:$4 sm:$0xff]   ;;  %v14665_v42 = vld [vmem:[#allocation17 + $0x3e8] ss:$16 sps:$4 sm:$0xff]  }
 0x889   :  { %v14668_v8 = vld [vmem:[#allocation17 + $0x5e8] ss:$16 sps:$4 sm:$0xff]  }
 0x88b   :  { %11345 = vmatpush2.bf16.msra.mxu0 %v14581_v54  ;;  %11388 = vmatpush2.bf16.msra.mxu1 %v14584_v17  ;;  %v14673_v54 = vld [vmem:[#allocation17 + $0x3cc] ss:$16 sps:$4 sm:$0xff]  }
 0x88c   :  { %11346 = vmatprep.subr.bf16.mxu0 %v14589_v45  ;;  %11389 = vmatprep.subr.bf16.mxu1 %v14592_v58  ;;  %v14676_v17 = vld [vmem:[#allocation17 + $0x5cc] ss:$16 sps:$4 sm:$0xff]   ;;  %v14671_v45 = vld [vmem:[#allocation17 + $0x3c8] ss:$16 sps:$4 sm:$0xff]  }
 0x88d   :  { %v14674_v58 = vld [vmem:[#allocation17 + $0x5c8] ss:$16 sps:$4 sm:$0xff]  }
 0x88f   :  { %11347 = vmatpush2.bf16.msra.mxu0 %v14587_v36  ;;  %11390 = vmatpush2.bf16.msra.mxu1 %v14590_v47  ;;  %v14679_v36 = vld [vmem:[#allocation17 + $0x3ac] ss:$16 sps:$4 sm:$0xff]  }
 0x890   :  { %11348 = vmatprep.subr.bf16.mxu0 %v14595_v35  ;;  %11391 = vmatprep.subr.bf16.mxu1 %v14598_v1  ;;  %v14682_v47 = vld [vmem:[#allocation17 + $0x5ac] ss:$16 sps:$4 sm:$0xff]   ;;  %v14677_v35 = vld [vmem:[#allocation17 + $0x3a8] ss:$16 sps:$4 sm:$0xff]  }
 0x891   :  { %v14680_v1 = vld [vmem:[#allocation17 + $0x5a8] ss:$16 sps:$4 sm:$0xff]  }
 0x893   :  { %11349 = vmatpush2.bf16.msra.mxu0 %v14593_v12  ;;  %11392 = vmatpush2.bf16.msra.mxu1 %v14596_v22  ;;  %v14685_v12 = vld [vmem:[#allocation17 + $0x38c] ss:$16 sps:$4 sm:$0xff]  }
 0x894   :  { %11350 = vmatprep.subr.bf16.mxu0 %v14601_v55  ;;  %11393 = vmatprep.subr.bf16.mxu1 %v14604_v50  ;;  %v14688_v22 = vld [vmem:[#allocation17 + $0x58c] ss:$16 sps:$4 sm:$0xff]   ;;  %v14683_v55 = vld [vmem:[#allocation17 + $0x388] ss:$16 sps:$4 sm:$0xff]  }
 0x895   :  { %v14686_v50 = vld [vmem:[#allocation17 + $0x588] ss:$16 sps:$4 sm:$0xff]  }
 0x897   :  { %11351 = vmatpush2.bf16.msra.mxu0 %v14599_v5  ;;  %11394 = vmatpush2.bf16.msra.mxu1 %v14602_v63  ;;  %v14691_v5 = vld [vmem:[#allocation17 + $0x36c] ss:$16 sps:$4 sm:$0xff]  }
 0x898   :  { %11352 = vmatprep.subr.bf16.mxu0 %v14607_v39  ;;  %11395 = vmatprep.subr.bf16.mxu1 %v14610_v53  ;;  %v14694_v63 = vld [vmem:[#allocation17 + $0x56c] ss:$16 sps:$4 sm:$0xff]   ;;  %v14689_v39 = vld [vmem:[#allocation17 + $0x368] ss:$16 sps:$4 sm:$0xff]  }
 0x899   :  { %v14692_v53 = vld [vmem:[#allocation17 + $0x568] ss:$16 sps:$4 sm:$0xff]  }
 0x89b   :  { %11353 = vmatpush2.bf16.msra.mxu0 %v14605_v2  ;;  %11396 = vmatpush2.bf16.msra.mxu1 %v14608_v57  ;;  %v14697_v2 = vld [vmem:[#allocation17 + $0x34c] ss:$16 sps:$4 sm:$0xff]  }
 0x89c   :  { %11354 = vmatprep.subr.bf16.mxu0 %v14613_v60  ;;  %11397 = vmatprep.subr.bf16.mxu1 %v14616_v21  ;;  %v14700_v57 = vld [vmem:[#allocation17 + $0x54c] ss:$16 sps:$4 sm:$0xff]   ;;  %v14695_v60 = vld [vmem:[#allocation17 + $0x348] ss:$16 sps:$4 sm:$0xff]  }
 0x89d   :  { %v14698_v21 = vld [vmem:[#allocation17 + $0x548] ss:$16 sps:$4 sm:$0xff]  }
 0x89f   :  { %11355 = vmatpush2.bf16.msra.mxu0 %v14611_v15  ;;  %11398 = vmatpush2.bf16.msra.mxu1 %v14614_v24  ;;  %v14703_v15 = vld [vmem:[#allocation17 + $0x32c] ss:$16 sps:$4 sm:$0xff]  }
 0x8a0   :  { %11410 = vmatprep.subr.bf16.mxu0 %v14619_v19  ;;  %11453 = vmatprep.subr.bf16.mxu1 %v14622_v49  ;;  %v14706_v24 = vld [vmem:[#allocation17 + $0x52c] ss:$16 sps:$4 sm:$0xff]   ;;  %v14701_v19 = vld [vmem:[#allocation17 + $0x328] ss:$16 sps:$4 sm:$0xff]  }
 0x8a1   :  { %v14704_v49 = vld [vmem:[#allocation17 + $0x528] ss:$16 sps:$4 sm:$0xff]  }
 0x8a2   :  { %11357 = vmatmul.mubr.bf16.vlgmr.msra.gmra.mxu0 %v15777_v37  ;;  %11400 = vmatmul.mubr.bf16.vlgmr.msra.gmra.mxu1 %v15741_v62  ;;  %v14640_v62 = vld [vmem:[#allocation17 + $0x48c] ss:$16 sps:$4 sm:$0xff]  }
 0x8a3   :  { %11411 = vmatpush1.bf16.msra.mxu0 %v14617_v48  ;;  %11442 = vmatprep.mubr.bf16.mxu0 %v15733_v20  ;;  %v14638_v20 = vld [vmem:[#allocation17 + $0x488] ss:$16 sps:$4 sm:$0xff]   ;;  %v14709_v48 = vld [vmem:[#allocation17 + $0x30c] ss:$16 sps:$4 sm:$0xff]  }
 0x8a4   :  { %11454 = vmatpush1.bf16.msra.mxu1 %v14620_v46  ;;  %11485 = vmatprep.mubr.bf16.mxu1 %v15764_v3  ;;  %v14646_v3 = vld [vmem:[#allocation17 + $0x46c] ss:$16 sps:$4 sm:$0xff]  }
 0x8a5   :  { %11412 = vmatprep.subr.bf16.mxu0 %v14625_v38  ;;  %11455 = vmatprep.subr.bf16.mxu1 %v14628_v32  ;;  %v14712_v46 = vld [vmem:[#allocation17 + $0x50c] ss:$16 sps:$4 sm:$0xff]   ;;  %v14707_v38 = vld [vmem:[#allocation17 + $0x308] ss:$16 sps:$4 sm:$0xff]  }
 0x8a6   :  { %v14710_v32 = vld [vmem:[#allocation17 + $0x508] ss:$16 sps:$4 sm:$0xff]  }
 0x8a7   :  { %11413 = vmatpush1.bf16.msra.mxu0 %v14623_v40  ;;  %v14713_v40 = vld [vmem:[#allocation20 + $0x78] sm:$0xff]  }
 0x8a8   :  { %11456 = vmatpush1.bf16.msra.mxu1 %v14626_v41  ;;  %11414 = vmatprep.subr.bf16.mxu0 %v14631_v43  ;;  %v14714_v41 = vld [vmem:[#allocation20 + $0x38] sm:$0xff]   ;;  %v14715_v43 = vld [vmem:[#allocation20 + $0x70] sm:$0xff]  }
 0x8a9   :  { %11457 = vmatprep.subr.bf16.mxu1 %v14634_v7  ;;  %v14716_v7 = vld [vmem:[#allocation20 + $0x30] sm:$0xff]  }
 0x8ab   :  { %11415 = vmatpush1.bf16.msra.mxu0 %v14629_v14  ;;  %v14717_v14 = vld [vmem:[#allocation20 + $0x68] sm:$0xff]  }
 0x8ac   :  { %11458 = vmatpush1.bf16.msra.mxu1 %v14632_v23  ;;  %11416 = vmatprep.subr.bf16.mxu0 %v14637_v30  ;;  %v14718_v23 = vld [vmem:[#allocation20 + $0x28] sm:$0xff]   ;;  %v14719_v30 = vld [vmem:[#allocation20 + $0x60] sm:$0xff]  }
 0x8ad   :  { %11459 = vmatprep.subr.bf16.mxu1 %v14640_v62  ;;  %v14720_v62 = vld [vmem:[#allocation20 + $0x20] sm:$0xff]  }
 0x8af   :  { %11417 = vmatpush1.bf16.msra.mxu0 %v14635_v52  ;;  %v14721_v52 = vld [vmem:[#allocation20 + $0x58] sm:$0xff]  }
 0x8b0   :  { %11460 = vmatpush1.bf16.msra.mxu1 %v14638_v20  ;;  %11418 = vmatprep.subr.bf16.mxu0 %v14643_v13  ;;  %v14722_v20 = vld [vmem:[#allocation20 + $0x18] sm:$0xff]   ;;  %v14723_v13 = vld [vmem:[#allocation20 + $0x50] sm:$0xff]  }
 0x8b1   :  { %11461 = vmatprep.subr.bf16.mxu1 %v14646_v3  ;;  %v14729_v3 = vld [vmem:[#allocation20 + $0xf8] sm:$0xff]  }
 0x8b3   :  { %11419 = vmatpush1.bf16.msra.mxu0 %v14641_v11  ;;  %v14731_v11 = vld [vmem:[#allocation20 + $0xf0] sm:$0xff]  }
 0x8b4   :  { %11462 = vmatpush1.bf16.msra.mxu1 %v14644_v51  ;;  %11420 = vmatprep.subr.bf16.mxu0 %v14649_v31  ;;  %v14725_v51 = vld [vmem:[#allocation20 + $0x48] sm:$0xff]   ;;  %v14732_v31 = vld [vmem:[#allocation20 + $0xb0] sm:$0xff]  }
 0x8b5   :  { %11463 = vmatprep.subr.bf16.mxu1 %v14652_v0  ;;  %v14733_v0 = vld [vmem:[#allocation20 + $0xe8] sm:$0xff]  }
 0x8b7   :  { %11421 = vmatpush1.bf16.msra.mxu0 %v14647_v33  ;;  %v14726_v33 = vld [vmem:[#allocation20 + $0x8] sm:$0xff]  }
 0x8b8   :  { %11464 = vmatpush1.bf16.msra.mxu1 %v14650_v26  ;;  %11422 = vmatprep.subr.bf16.mxu0 %v14655_v61  ;;  %v14727_v26 = vld [vmem:[#allocation20 + $0x40] sm:$0xff]   ;;  %v14734_v61 = vld [vmem:[#allocation20 + $0xa8] sm:$0xff]  }
 0x8b9   :  { %11465 = vmatprep.subr.bf16.mxu1 %v14658_v28  ;;  %v14735_v28 = vld [vmem:[#allocation20 + $0xe0] sm:$0xff]  }
 0x8bb   :  { %11423 = vmatpush1.bf16.msra.mxu0 %v14653_v34  ;;  %v14728_v34 = vld [vmem:[#allocation20] sm:$0xff]  }
 0x8bc   :  { %11466 = vmatpush1.bf16.msra.mxu1 %v14656_v56  ;;  %11424 = vmatprep.subr.bf16.mxu0 %v14661_v4  ;;  %v14736_v56 = vld [vmem:[#allocation20 + $0xa0] sm:$0xff]   ;;  %v14737_v4 = vld [vmem:[#allocation20 + $0xd8] sm:$0xff]  }
 0x8bd   :  { %11467 = vmatprep.subr.bf16.mxu1 %v14664_v18  ;;  %v14738_v18 = vld [vmem:[#allocation20 + $0x98] sm:$0xff]  }
 0x8bf   :  { %11425 = vmatpush1.bf16.msra.mxu0 %v14659_v9  ;;  %v14739_v9 = vld [vmem:[#allocation20 + $0xd0] sm:$0xff]  }
 0x8c0   :  { %11468 = vmatpush1.bf16.msra.mxu1 %v14662_v59  ;;  %11426 = vmatprep.subr.bf16.mxu0 %v14667_v6  ;;  %v14740_v59 = vld [vmem:[#allocation20 + $0x90] sm:$0xff]   ;;  %v14741_v6 = vld [vmem:[#allocation20 + $0xc8] sm:$0xff]  }
 0x8c1   :  { %11469 = vmatprep.subr.bf16.mxu1 %v14670_v10  ;;  %v14742_v10 = vld [vmem:[#allocation20 + $0x88] sm:$0xff]  }
 0x8c3   :  { %11427 = vmatpush2.bf16.msra.mxu0 %v14665_v42  ;;  %v14743_v42 = vld [vmem:[#allocation20 + $0xc0] sm:$0xff]  }
 0x8c4   :  { %11470 = vmatpush2.bf16.msra.mxu1 %v14668_v8  ;;  %11428 = vmatprep.subr.bf16.mxu0 %v14673_v54  ;;  %v14744_v8 = vld [vmem:[#allocation20 + $0x80] sm:$0xff]  }
 0x8c5   :  { %11471 = vmatprep.subr.bf16.mxu1 %v14676_v17 }
 0x8c7   :  { %11429 = vmatpush2.bf16.msra.mxu0 %v14671_v45  ;;  %v10256_v45 = vld [vmem:[#allocation19] sm:$0xf] }
 0x8c8   :  { %11472 = vmatpush2.bf16.msra.mxu1 %v14674_v58  ;;  %11430 = vmatprep.subr.bf16.mxu0 %v14679_v36  ;;  %v10265_v36 = vrot.slane %v10256_v45, %v15309_v44 }
 0x8c9   :  { %11473 = vmatprep.subr.bf16.mxu1 %v14682_v47  ;;  %v10261_v47 = vrot.slane %v10256_v45, %v15264_v27 }
 0x8cb   :  { %11431 = vmatpush2.bf16.msra.mxu0 %v14677_v35 }
 0x8cc   :  { %11474 = vmatpush2.bf16.msra.mxu1 %v14680_v1  ;;  %11432 = vmatprep.subr.bf16.mxu0 %v14685_v12 }
 0x8cd   :  { %11475 = vmatprep.subr.bf16.mxu1 %v14688_v22 }
 0x8cf   :  { %11433 = vmatpush2.bf16.msra.mxu0 %v14683_v55 }
 0x8d0   :  { %11476 = vmatpush2.bf16.msra.mxu1 %v14686_v50  ;;  %11434 = vmatprep.subr.bf16.mxu0 %v14691_v5 }
 0x8d1   :  { %11477 = vmatprep.subr.bf16.mxu1 %v14694_v63 }
 0x8d3   :  { %11435 = vmatpush2.bf16.msra.mxu0 %v14689_v39 }
 0x8d4   :  { %11478 = vmatpush2.bf16.msra.mxu1 %v14692_v53  ;;  %11436 = vmatprep.subr.bf16.mxu0 %v14697_v2 }
 0x8d5   :  { %11479 = vmatprep.subr.bf16.mxu1 %v14700_v57 }
 0x8d7   :  { %11437 = vmatpush2.bf16.msra.mxu0 %v14695_v60 }
 0x8d8   :  { %11480 = vmatpush2.bf16.msra.mxu1 %v14698_v21  ;;  %11438 = vmatprep.subr.bf16.mxu0 %v14703_v15 }
 0x8d9   :  { %11481 = vmatprep.subr.bf16.mxu1 %v14706_v24 }
 0x8db   :  { %11439 = vmatpush2.bf16.msra.mxu0 %v14701_v19 }
 0x8dc   :  { %11482 = vmatpush2.bf16.msra.mxu1 %v14704_v49  ;;  %11440 = vmatprep.subr.bf16.mxu0 %v14709_v48 }
 0x8dd   :  { %11483 = vmatprep.subr.bf16.mxu1 %v14712_v46 }
 0x8df   :  { %11441 = vmatpush2.bf16.msra.mxu0 %v14707_v38 }
 0x8e0   :  { %11484 = vmatpush2.bf16.msra.mxu1 %v14710_v32  ;;  %13389 = vmatprep.subr.bf16.mxu0 %v14713_v40 }
 0x8e1   :  { %13411 = vmatprep.subr.bf16.mxu1 %v14729_v3  ;;  %v10273_v3 = vrot.slane %v10256_v45, %v15322_v29 }
 0x8e2   :  { %11443 = vmatmul.mubr.bf16.vlgmr.msra.gmra.mxu0 %v15749_v25  ;;  %v14730_v25 = vld [vmem:[#allocation20 + $0xb8] sm:$0xff]  }
 0x8e3   :  { %11486 = vmatmul.mubr.bf16.vlgmr.msra.gmra.mxu1 %v15777_v37  ;;  %13390 = vmatpush3.bf16.msra.mxu0 %v14714_v41  ;;  %v14724_v37 = vld [vmem:[#allocation20 + $0x10] sm:$0xff]  }
 0x8e4   :  { %13391 = vmatprep.subr.bf16.mxu0 %v14715_v43  ;;  %13412 = vmatpush3.bf16.msra.mxu1 %v14730_v25 }
 0x8e5   :  { %13413 = vmatprep.subr.bf16.mxu1 %v14731_v11 }
 0x8e7   :  { %13392 = vmatpush3.bf16.msra.mxu0 %v14716_v7 }
 0x8e8   :  { %13393 = vmatprep.subr.bf16.mxu0 %v14717_v14  ;;  %13414 = vmatpush3.bf16.msra.mxu1 %v14732_v31 }
 0x8e9   :  { %13415 = vmatprep.subr.bf16.mxu1 %v14733_v0 }
 0x8eb   :  { %13394 = vmatpush3.bf16.msra.mxu0 %v14718_v23 }
 0x8ec   :  { %13395 = vmatprep.subr.bf16.mxu0 %v14719_v30  ;;  %13416 = vmatpush3.bf16.msra.mxu1 %v14734_v61 }
 0x8ed   :  { %13417 = vmatprep.subr.bf16.mxu1 %v14735_v28 }
 0x8ef   :  { %13396 = vmatpush3.bf16.msra.mxu0 %v14720_v62 }
 0x8f0   :  { %13397 = vmatprep.subr.bf16.mxu0 %v14721_v52  ;;  %13418 = vmatpush3.bf16.msra.mxu1 %v14736_v56 }
 0x8f1   :  { %13419 = vmatprep.subr.bf16.mxu1 %v14737_v4 }
 0x8f3   :  { %13398 = vmatpush3.bf16.msra.mxu0 %v14722_v20 }
 0x8f4   :  { %13399 = vmatprep.subr.bf16.mxu0 %v14723_v13  ;;  %13420 = vmatpush3.bf16.msra.mxu1 %v14738_v18  ;;  %v10269_v13 = vrot.slane %v10256_v45, %v15347_v16 }
 0x8f5   :  { %13421 = vmatprep.subr.bf16.mxu1 %v14739_v9 }
 0x8f7   :  { %13400 = vmatpush3.bf16.msra.mxu0 %v14724_v37 }
 0x8f8   :  { %13401 = vmatprep.subr.bf16.mxu0 %v14725_v51  ;;  %13422 = vmatpush3.bf16.msra.mxu1 %v14740_v59 }
 0x8f9   :  { %13423 = vmatprep.subr.bf16.mxu1 %v14741_v6 }
 0x8fb   :  { %13402 = vmatpush3.bf16.msra.mxu0 %v14726_v33 }
 0x8fc   :  { %13403 = vmatprep.subr.bf16.mxu0 %v14727_v26  ;;  %13424 = vmatpush3.bf16.msra.mxu1 %v14742_v10 }
 0x8fd   :  { %13425 = vmatprep.subr.bf16.mxu1 %v14743_v42 }
 0x8ff   :  { %13404 = vmatpush3.bf16.msra.mxu0 %v14728_v34 }
 0x900   :  { %13426 = vmatpush3.bf16.msra.mxu1 %v14744_v8 }
 0x922   :  { %v11272_v54 = vpop.f32.mrf.mxu0  ;;  %v11315_v58 = vpop.f32.mrf.mxu1 }
 0x923   :  { %v11273_v22 = vadd.f32 %v11272_v54, %v10261_v47 }
 0x924   :  { %v11274_v17 = vpop.f32.mrf.mxu0  ;;  %v11317_v1 = vpop.f32.mrf.mxu1 }
 0x925   :  { %v11275_v12 = vadd.f32 %v11274_v17, %v10265_v36  ;;  %v11316_v2 = vadd.f32 %v11315_v58, %v11273_v22 }
 0x926   :  { %v11276_v35 = vpop.f32.mrf.mxu0  ;;  %v11319_v5 = vpop.f32.mrf.mxu1 }
 0x927   :  { %v11277_v50 = vadd.f32 %v11276_v35, %v10261_v47  ;;  %v11318_v39 = vadd.f32 %v11317_v1, %v11275_v12 }
 0x928   :  { %v11278_v55 = vpop.f32.mrf.mxu0  ;;  %v11321_v15 = vpop.f32.mrf.mxu1 }
 0x929   :  { %v11279_v53 = vadd.f32 %v11278_v55, %v10265_v36  ;;  %v11320_v60 = vadd.f32 %v11319_v5, %v11277_v50 }
 0x92b   :  { %v11322_v44 = vadd.f32 %v11321_v15, %v11279_v53 }
 0x962   :  { %v11358_v63 = vpop.f32.mrf.mxu0  ;;  %v11401_v62 = vpop.f32.mrf.mxu1 }
 0x963   :  { %v11359_v24 = vadd.f32 %v11358_v63, %v11316_v2  ;;  %v11402_v11 = vadd.f32 %v11401_v62, %v10269_v13  ;;  %v13356_v63 = vld [vmem:[#allocation22] ss:$0 sm:$0xff] }
 0x964   :  { %v11360_v57 = vpop.f32.mrf.mxu0  ;;  %v11403_v52 = vpop.f32.mrf.mxu1 }
 0x965   :  { %v11361_v21 = vadd.f32 %v11360_v57, %v11318_v39  ;;  %v11496_v32 = vmul.f32 0.2, %v11359_v24  ;;  %v11404_v51 = vadd.f32 %v11403_v52, %v10273_v3 }
 0x966   :  { %v11362_v19 = vpop.f32.mrf.mxu0  ;;  %v11405_v20 = vpop.f32.mrf.mxu1 }
 0x967   :  { %v11363_v49 = vadd.f32 %v11362_v19, %v11320_v60  ;;  %v11497_v48 = vmul.f32 0.2, %v11361_v21  ;;  %v11504_v14 = vmax.f32 %v11359_v24, %v11496_v32  ;;  %v11406_v26 = vadd.f32 %v11405_v20, %v10269_v13 }
 0x968   :  { %v11364_v27 = vpop.f32.mrf.mxu0  ;;  %v11407_v25 = vpop.f32.mrf.mxu1 }
 0x969   :  { %v11500_v46 = vmul.f32 0.2, %v11363_v49  ;;  %v11365_v38 = vadd.f32 %v11364_v27, %v11322_v44  ;;  %v11505_v43 = vmax.f32 %v11361_v21, %v11497_v48  ;;  %v11408_v56 = vadd.f32 %v11407_v25, %v10273_v3 }
 0x96b   :  { %v11501_v40 = vmul.f32 0.2, %v11365_v38  ;;  %v11508_v41 = vmax.f32 %v11363_v49, %v11500_v46 }
 0x96d   :  { %v11509_v7 = vmax.f32 %v11365_v38, %v11501_v40  ;;  %v11512_v30 = vpack.c.bf16 %v11508_v41, %v11504_v14 }
 0x96f   :  { %v11513_v23 = vpack.c.bf16 %v11509_v7, %v11505_v43 }
 0x971   :  { %11811 = vmatprep.mubr.bf16.mxu0 %v11513_v23 }
 0x972   :  { %11812 = vmatmul.mubr.bf16.vlgmr.msra.gmra.mxu0 %v11512_v30 }
 0x9a2   :  { %v11444_v37 = vpop.f32.mrf.mxu0 }
 0x9a3   :  { %v11487_v31 = vpop.f32.mrf.mxu1  ;;  %v11445_v0 = vadd.f32 %v11444_v37, %v11402_v11 }
 0x9a4   :  { %v11446_v33 = vpop.f32.mrf.mxu0 }
 0x9a5   :  { %v11447_v61 = vadd.f32 %v11446_v33, %v11404_v51  ;;  %v11489_v28 = vpop.f32.mrf.mxu1  ;;  %v11488_v59 = vadd.f32 %v11487_v31, %v11445_v0 }
 0x9a6   :  { %v11448_v34 = vpop.f32.mrf.mxu0 }
 0x9a7   :  { %v11490_v4 = vadd.f32 %v11489_v28, %v11447_v61  ;;  %v11449_v18 = vadd.f32 %v11448_v34, %v11406_v26  ;;  %v11491_v9 = vpop.f32.mrf.mxu1  ;;  %v11498_v17 = vmul.f32 0.2, %v11488_v59 }
 0x9a8   :  { %v11450_v6 = vpop.f32.mrf.mxu0 }
 0x9a9   :  { %v11492_v16 = vadd.f32 %v11491_v9, %v11449_v18  ;;  %v11451_v10 = vadd.f32 %v11450_v6, %v11408_v56  ;;  %v11493_v29 = vpop.f32.mrf.mxu1  ;;  %v11499_v42 = vmul.f32 0.2, %v11490_v4  ;;  %v11506_v35 = vmax.f32 %v11488_v59, %v11498_v17 }
 0x9ab   :  { %v11502_v8 = vmul.f32 0.2, %v11492_v16  ;;  %v11494_v54 = vadd.f32 %v11493_v29, %v11451_v10  ;;  %v11507_v36 = vmax.f32 %v11490_v4, %v11499_v42 }
 0x9ad   :  { %v11503_v45 = vmul.f32 0.2, %v11494_v54  ;;  %v11510_v58 = vmax.f32 %v11492_v16, %v11502_v8 }
 0x9af   :  { %v11511_v47 = vmax.f32 %v11494_v54, %v11503_v45  ;;  %v11514_v12 = vpack.c.bf16 %v11510_v58, %v11506_v35 }
 0x9b1   :  { %v11515_v1 = vpack.c.bf16 %v11511_v47, %v11507_v36 }
 0x9b3   :  { %11852 = vmatprep.mubr.bf16.mxu1 %v11515_v1 }
 0x9b4   :  { %11853 = vmatmul.mubr.bf16.vlgmr.msra.gmra.mxu1 %v11514_v12 }
 0xa32   :  { %v13405_v22 = vpop.f32.mrf.mxu0 }
 0xa34   :  { %v13406_v55 = vpop.f32.mrf.mxu0 }
 0xa35   :  { %v13407_v5 = vadd.f32 %v13406_v55, %v13405_v22 }
 0xa36   :  { %v13408_v50 = vpop.f32.mrf.mxu0 }
 0xa37   :  { %v11814_v57 = vadd.f32 %v13407_v5, %v13356_v63 }
 0xa38   :  { %v13409_v39 = vpop.f32.mrf.mxu0 }
 0xa39   :  { %v13410_v60 = vadd.f32 %v13409_v39, %v13408_v50 }
 0xa3b   :  { %v11817_v44 = vadd.f32 %v13410_v60, %v13356_v63 }
 0xa74   :  { %v13427_v53 = vpop.f32.mrf.mxu1 }
 0xa76   :  { %v13428_v2 = vpop.f32.mrf.mxu1 }
 0xa77   :  { %v13429_v21 = vadd.f32 %v13428_v2, %v13427_v53 }
 0xa78   :  { %v13430_v15 = vpop.f32.mrf.mxu1 }
 0xa79   :  { %v11855_v24 = vadd.f32 %v13429_v21, %v11814_v57 }
 0xa7a   :  { %v13431_v19 = vpop.f32.mrf.mxu1 }
 0xa7b   :  { %11861 = vst [vmem:[%s15811_s16] sm:$0xff] %v11855_v24  ;;  %v13432_v49 = vadd.f32 %v13431_v19, %v13430_v15 }
 0xa7d   :  { %v11858_v27 = vadd.f32 %v13432_v49, %v11817_v44 }
 0xa7f   :  { %11862 = vst [vmem:[%s15811_s16 + $0x8] sm:$0xff] %v11858_v27 }
 0xa80   :  { %11871 = vsyncpa [#allocation4], 1 }
 0xa81   :  { %11872 = vsyncpa [#allocation6], 1 }
 0xa82   :  { %11873 = vsyncpa [#allocation9], 1 }
 0xa83   :  { %11874 = vsyncpa [#allocation12], 1 }
 0xa84   :  { %11875 = vsyncpa [#allocation15], 1 }
 0xa85   :  { %11876 = vsyncpa [#allocation18], 1 }
 0xa86   :  { %11877 = vsyncpa [#allocation21], 1 }

</bundles_post_ra>
